<compile_context>
chip_gen: v7x
topology: tpu7x:2x2x1
jax: 0.10.0
libtpu: 0.0.40
codegen_flags: <defaults>
</compile_context>

<pallas_src>
import functools

import jax
import jax.numpy as jnp
from jax.experimental import pallas as pl
from jax.experimental.pallas import tpu as pltpu

# ---- constants mirroring the PyTorch module ----
ENC_C, ENC_KS, ENC_STR, ENC_PAD = 64, 4, 2, 1
BN_EPS, LRELU_SLOPE = 1e-5, 0.2


def _round_up(x, m):
    return ((x + m - 1) // m) * m


# --------------------------------------------------------------------------
# Pallas kernel: tiled matmul + bias (+ fused BatchNorm + LeakyReLU) epilogue
# Grid = (N_tiles, K_tiles), K innermost ("arbitrary"); output block is
# K-invariant, so it stays resident in VMEM and doubles as the accumulator.
# --------------------------------------------------------------------------
def _matmul_fused_kernel(a_ref, b_ref, bias_ref, gamma_ref, beta_ref, o_ref,
                         *, m_valid, fuse_bn, eps, slope):
    k = pl.program_id(1)

    @pl.when(k == 0)
    def _():
        o_ref[...] = jnp.zeros_like(o_ref)

    # bf16 x bf16 -> f32 accumulate directly into the resident output block.
    o_ref[...] += jnp.dot(a_ref[...], b_ref[...],
                          preferred_element_type=jnp.float32)

    @pl.when(k == pl.num_programs(1) - 1)
    def _():
        y = o_ref[...] + bias_ref[...]
        if fuse_bn:
            # BatchNorm over the M (= batch*OH*OW) axis, per channel column.
            # Padded rows (>= m_valid) are masked out of the statistics.
            mp = y.shape[0]
            mask = (jax.lax.broadcasted_iota(jnp.int32, (mp, 1), 0)
                    < m_valid).astype(jnp.float32)
            inv_m = 1.0 / float(m_valid)
            mu = jnp.sum(y * mask, axis=0, keepdims=True) * inv_m
            diff = (y - mu) * mask
            var = jnp.sum(diff * diff, axis=0, keepdims=True) * inv_m  # biased (torch training BN)
            yn = (y - mu) * jax.lax.rsqrt(var + eps) * gamma_ref[...] + beta_ref[...]
            y = jnp.where(yn >= 0.0, yn, slope * yn)                    # LeakyReLU(0.2)
        o_ref[...] = y


def matmul_fused(a, cfg, *, fuse_bn, eps=BN_EPS, slope=LRELU_SLOPE):
    """Returns epilogue(a @ W + bias)[:M, :N].

    a:   (M, K) f32 activations (padded/cast to bf16 here).
    cfg: prepared dict with pre-padded bf16 weight (Kp, Np), f32 bias/gamma/beta
         (1, Np), tile sizes tk/tn and the valid output width n.
    """
    M, K = a.shape
    tk, tn, N = cfg["tk"], cfg["tn"], cfg["n"]
    Kp, Np = cfg["w"].shape
    Mp = _round_up(M, 16)  # bf16 sublane packing

    a_p = jnp.zeros((Mp, Kp), jnp.bfloat16).at[:M, :K].set(a.astype(jnp.bfloat16))

    # VMEM sized from the actual blocks (double-buffered), capped well below
    # the 64 MiB physical VMEM of v7x.
    vmem_need = 2 * (Mp * tk * 2 + tk * tn * 2 + Mp * tn * 4 + 3 * tn * 4) + (1 << 20)
    vmem_limit = int(min(max(vmem_need, 4 << 20), 48 << 20))

    out = pl.pallas_call(
        functools.partial(_matmul_fused_kernel, m_valid=M, fuse_bn=fuse_bn,
                          eps=eps, slope=slope),
        out_shape=jax.ShapeDtypeStruct((Mp, Np), jnp.float32),
        grid_spec=pltpu.PrefetchScalarGridSpec(
            num_scalar_prefetch=0,
            grid=(Np // tn, Kp // tk),
            in_specs=[
                pl.BlockSpec((Mp, tk), lambda j, k: (0, k)),   # A: im2col patches
                pl.BlockSpec((tk, tn), lambda j, k: (k, j)),   # B: weights
                pl.BlockSpec((1, tn), lambda j, k: (0, j)),    # bias
                pl.BlockSpec((1, tn), lambda j, k: (0, j)),    # gamma
                pl.BlockSpec((1, tn), lambda j, k: (0, j)),    # beta
            ],
            out_specs=pl.BlockSpec((Mp, tn), lambda j, k: (0, j)),
        ),
        compiler_params=pltpu.CompilerParams(
            dimension_semantics=("parallel", "arbitrary"),
            vmem_limit_bytes=vmem_limit,
        ),
    )(a_p, cfg["w"], cfg["bias"], cfg["gamma"], cfg["beta"])
    return out[:M, :N]


# --------------------------------------------------------------------------
# Plain-JAX glue: im2col patch extraction (NHWC)
# --------------------------------------------------------------------------
def im2col(x_nhwc, kh, kw, stride, pad):
    # TODO(synk): fold the kh*kw taps into the Pallas grid (per-tap strided DMA)
    # to avoid materializing the im2col matrix in HBM for very large inputs.
    x = jnp.pad(x_nhwc, ((0, 0), (pad, pad), (pad, pad), (0, 0)))
    N, H, W, C = x.shape
    OH = (H - kh) // stride + 1
    OW = (W - kw) // stride + 1
    cols = []
    for i in range(kh):
        for j in range(kw):
            cols.append(x[:, i:i + stride * OH:stride, j:j + stride * OW:stride, :])
    patches = jnp.stack(cols, axis=3)  # (N, OH, OW, kh*kw, C)
    return patches.reshape(N * OH * OW, kh * kw * C), (N, OH, OW)


# --------------------------------------------------------------------------
# Parameters: synthetic PyTorch-default init (not a checkpoint load)
# --------------------------------------------------------------------------
def make_params(key, latent_dim, img_shape, n_blocks=5):
    C, H, W = img_shape
    keys = iter(jax.random.split(key, 4 * n_blocks + 8))

    def uinit(shape, fan_in):
        s = 1.0 / float(fan_in) ** 0.5
        return jax.random.uniform(next(keys), shape, jnp.float32, -s, s)

    blocks = []
    in_c, h_sp, w_sp = C, H, W
    for i in range(n_blocks):
        out_c = ENC_C * (2 ** i)
        fan = in_c * ENC_KS * ENC_KS
        blocks.append(dict(
            w=uinit((out_c, in_c, ENC_KS, ENC_KS), fan),
            b=uinit((out_c,), fan),
            gamma=jnp.ones((out_c,), jnp.float32),
            beta=jnp.zeros((out_c,), jnp.float32),
        ))
        in_c = out_c
        h_sp = (h_sp + 2 * ENC_PAD - ENC_KS) // ENC_STR + 1
        w_sp = (w_sp + 2 * ENC_PAD - ENC_KS) // ENC_STR + 1
    fcs_in = in_c * h_sp * w_sp
    fc1 = (uinit((latent_dim, fcs_in), fcs_in), uinit((latent_dim,), fcs_in))
    fc2 = (uinit((latent_dim, fcs_in), fcs_in), uinit((latent_dim,), fcs_in))
    return dict(blocks=blocks, fc1=fc1, fc2=fc2, fcs_in=fcs_in,
                last_out_shape=(in_c, h_sp, w_sp), latent_dim=latent_dim)


def _prep_matmul_side(w_kn, bias_n, gamma_n=None, beta_n=None,
                      tk_max=512, tn_max=256):
    """One-time: pad weight to (Kp, Np) bf16, vectors to (1, Np) f32."""
    K, N = w_kn.shape
    tk = min(tk_max, _round_up(K, 128))
    tn = min(tn_max, _round_up(N, 128))
    Kp, Np = _round_up(K, tk), _round_up(N, tn)
    w_p = jnp.zeros((Kp, Np), jnp.bfloat16).at[:K, :N].set(w_kn.astype(jnp.bfloat16))

    def padv(v):
        return jnp.zeros((1, Np), jnp.float32).at[0, :N].set(v.astype(jnp.float32))

    gamma_n = gamma_n if gamma_n is not None else jnp.ones((N,), jnp.float32)
    beta_n = beta_n if beta_n is not None else jnp.zeros((N,), jnp.float32)
    return dict(w=w_p, bias=padv(bias_n), gamma=padv(gamma_n), beta=padv(beta_n),
                tk=tk, tn=tn, n=N)


def prepare_params(params):
    """Hoisted once per parameter set: weight reshapes, padding, bf16 casts."""
    prepared = dict(blocks=[], latent_dim=params["latent_dim"])
    for blk in params["blocks"]:
        w = blk["w"]  # (O, I, kh, kw)
        wmat = jnp.transpose(w, (2, 3, 1, 0)).reshape(-1, w.shape[0])  # (kh*kw*I, O)
        prepared["blocks"].append(
            _prep_matmul_side(wmat, blk["b"], blk["gamma"], blk["beta"]))
    (w1, b1), (w2, b2) = params["fc1"], params["fc2"]
    w_cat = jnp.concatenate([w1.T, w2.T], axis=1)     # (fcs_in, 2*latent_dim)
    b_cat = jnp.concatenate([b1, b2], axis=0)
    prepared["fc"] = _prep_matmul_side(w_cat, b_cat)
    return prepared


# --------------------------------------------------------------------------
# EncoderConvOrig forward: returns (mu, logvar)
# --------------------------------------------------------------------------
def encoder_conv_orig_forward(prepared, x_nchw):
    h = jnp.transpose(x_nchw, (0, 2, 3, 1)).astype(jnp.float32)  # NCHW -> NHWC
    for cfg in prepared["blocks"]:
        cols, (n, oh, ow) = im2col(h, ENC_KS, ENC_KS, ENC_STR, ENC_PAD)
        y = matmul_fused(cols, cfg, fuse_bn=True)    # conv + bias + BN + LeakyReLU
        h = y.reshape(n, oh, ow, cfg["n"])
    n, oh, ow, c = h.shape
    h_flat = jnp.transpose(h, (0, 3, 1, 2)).reshape(n, -1)  # flatten in (C,H,W) order
    out = matmul_fused(h_flat, prepared["fc"], fuse_bn=False)  # fused fc1 | fc2
    ld = prepared["latent_dim"]
    mu, logvar = out[:, :ld], out[:, ld:2 * ld]
    return mu, logvar


if __name__ == "__main__":
    latent_dim = 8
    img_shape = (4, 32, 32)   # (C, H, W): 32 so five stride-2 k=4 p=1 blocks reach 1x1
    batch = 2

    key = jax.random.PRNGKey(0)
    kx, kp = jax.random.split(key)
    x = jax.random.normal(kx, (batch,) + img_shape, dtype=jnp.float32)

    params = make_params(kp, latent_dim, img_shape, n_blocks=5)
    prepared = prepare_params(params)   # one-time weight prep, hoisted out of forward

    fwd = jax.jit(functools.partial(encoder_conv_orig_forward, prepared))
    mu, logvar = fwd(x)
    jax.block_until_ready((mu, logvar))

    assert mu.shape == (batch, latent_dim)
    assert logvar.shape == (batch, latent_dim)
    assert bool(jnp.all(jnp.isfinite(mu))) and bool(jnp.all(jnp.isfinite(logvar)))
    print("KERNEL_OK")
</pallas_src>

<mosaic_0001>
module attributes {stable_mosaic.version = 11 : i64} {
  func.func @_matmul_fused_kernel(%arg0: i32, %arg1: i32, %arg2: memref<512x128xbf16, #tpu.memory_space<vmem>>, %arg3: memref<128x128xbf16, #tpu.memory_space<vmem>>, %arg4: memref<1x128xf32, #tpu.memory_space<vmem>>, %arg5: memref<1x128xf32, #tpu.memory_space<vmem>>, %arg6: memref<1x128xf32, #tpu.memory_space<vmem>>, %arg7: memref<512x128xf32, #tpu.memory_space<vmem>>) attributes {dimension_semantics = [#tpu.dimension_semantics<parallel>, #tpu.dimension_semantics<arbitrary>], iteration_bounds = array<i64: 1, 1>, scalar_prefetch = 0 : i64, scratch_operands = 0 : i64, tpu.core_type = #tpu.core_type<tc>, window_params = [{transform_indices = @transform_0, window_bounds = array<i64: 512, 128>}, {transform_indices = @transform_1, window_bounds = array<i64: 128, 128>}, {transform_indices = @transform_2, window_bounds = array<i64: 1, 128>}, {transform_indices = @transform_3, window_bounds = array<i64: 1, 128>}, {transform_indices = @transform_4, window_bounds = array<i64: 1, 128>}, {transform_indices = @transform_5, window_bounds = array<i64: 512, 128>}]} {
    %c0_i32 = arith.constant 0 : i32
    %0 = arith.cmpi eq, %arg1, %c0_i32 : i32
    %1 = arith.extui %0 : i1 to i32
    %c0_i32_0 = arith.constant 0 : i32
    %2 = arith.cmpi ne, %1, %c0_i32_0 : i32
    scf.if %2 {
      %cst_10 = arith.constant 0.000000e+00 : f32
      %12 = vector.broadcast %cst_10 : f32 to vector<512x128xf32>
      %c0_11 = arith.constant 0 : index
      %c0_12 = arith.constant 0 : index
      %13 = vector.load %arg7[%c0_11, %c0_12] : memref<512x128xf32, #tpu.memory_space<vmem>>, vector<512x128xf32>
      tpu.vector_store %arg7[%c0_11, %c0_12], %12 {strides = array<i32>} : memref<512x128xf32, #tpu.memory_space<vmem>>, vector<512x128xf32>,
    } else {
    }
    %c0 = arith.constant 0 : index
    %c0_1 = arith.constant 0 : index
    %3 = vector.load %arg7[%c0, %c0_1] : memref<512x128xf32, #tpu.memory_space<vmem>>, vector<512x128xf32>
    %c0_2 = arith.constant 0 : index
    %c0_3 = arith.constant 0 : index
    %4 = vector.load %arg2[%c0_2, %c0_3] : memref<512x128xbf16, #tpu.memory_space<vmem>>, vector<512x128xbf16>
    %c0_4 = arith.constant 0 : index
    %c0_5 = arith.constant 0 : index
    %5 = vector.load %arg3[%c0_4, %c0_5] : memref<128x128xbf16, #tpu.memory_space<vmem>>, vector<128x128xbf16>
    %cst = arith.constant dense<0.000000e+00> : vector<512x128xf32>
    %6 = tpu.matmul %4, %5, %cst {dimension_numbers = #tpu.dot_dimension_numbers<[1], [0], [0], [1], [0, 0, 1, 1], [], []>} : vector<512x128xbf16>, vector<128x128xbf16>, vector<512x128xf32> -> vector<512x128xf32>
    %7 = arith.addf %3, %6 : vector<512x128xf32>
    %c0_6 = arith.constant 0 : index
    %c0_7 = arith.constant 0 : index
    %8 = vector.load %arg7[%c0_6, %c0_7] : memref<512x128xf32, #tpu.memory_space<vmem>>, vector<512x128xf32>
    tpu.vector_store %arg7[%c0_6, %c0_7], %7 {strides = array<i32>} : memref<512x128xf32, #tpu.memory_space<vmem>>, vector<512x128xf32>,
    %c0_i32_8 = arith.constant 0 : i32
    %9 = arith.cmpi eq, %arg1, %c0_i32_8 : i32
    %10 = arith.extui %9 : i1 to i32
    %c0_i32_9 = arith.constant 0 : i32
    %11 = arith.cmpi ne, %10, %c0_i32_9 : i32
    scf.if %11 {
      %c0_10 = arith.constant 0 : index
      %c0_11 = arith.constant 0 : index
      %12 = vector.load %arg7[%c0_10, %c0_11] : memref<512x128xf32, #tpu.memory_space<vmem>>, vector<512x128xf32>
      %c0_12 = arith.constant 0 : index
      %c0_13 = arith.constant 0 : index
      %13 = vector.load %arg4[%c0_12, %c0_13] : memref<1x128xf32, #tpu.memory_space<vmem>>, vector<1x128xf32>
      %14 = vector.broadcast %13 : vector<1x128xf32> to vector<512x128xf32>
      %15 = arith.addf %12, %14 : vector<512x128xf32>
      %16 = tpu.iota {dimensions = array<i32: 0>} : vector<512x1xi32>
      %c512_i32 = arith.constant 512 : i32
      %17 = vector.broadcast %c512_i32 : i32 to vector<512x1xi32>
      %18 = arith.cmpi slt, %16, %17 : vector<512x1xi32>
      %19 = arith.extui %18 : vector<512x1xi1> to vector<512x1xi32>
      %20 = arith.sitofp %19 : vector<512x1xi32> to vector<512x1xf32>
      %21 = vector.broadcast %20 : vector<512x1xf32> to vector<512x128xf32>
      %22 = arith.mulf %15, %21 : vector<512x128xf32>
      %cst_14 = arith.constant dense<0.000000e+00> : vector<128xf32>
      %23 = vector.multi_reduction <add>, %22, %cst_14 [0] : vector<512x128xf32> to vector<128xf32>
      %24 = vector.shape_cast %23 : vector<128xf32> to vector<1x128xf32>
      %cst_15 = arith.constant 0.001953125 : f32
      %25 = vector.broadcast %cst_15 : f32 to vector<1x128xf32>
      %26 = arith.mulf %24, %25 : vector<1x128xf32>
      %27 = vector.broadcast %26 : vector<1x128xf32> to vector<512x128xf32>
      %28 = arith.subf %15, %27 : vector<512x128xf32>
      %29 = vector.broadcast %20 : vector<512x1xf32> to vector<512x128xf32>
      %30 = arith.mulf %28, %29 : vector<512x128xf32>
      %31 = arith.mulf %30, %30 : vector<512x128xf32>
      %cst_16 = arith.constant dense<0.000000e+00> : vector<128xf32>
      %32 = vector.multi_reduction <add>, %31, %cst_16 [0] : vector<512x128xf32> to vector<128xf32>
      %33 = vector.shape_cast %32 : vector<128xf32> to vector<1x128xf32>
      %cst_17 = arith.constant 0.001953125 : f32
      %34 = vector.broadcast %cst_17 : f32 to vector<1x128xf32>
      %35 = arith.mulf %33, %34 : vector<1x128xf32>
      %36 = vector.broadcast %26 : vector<1x128xf32> to vector<512x128xf32>
      %37 = arith.subf %15, %36 : vector<512x128xf32>
      %cst_18 = arith.constant 9.99999974E-6 : f32
      %38 = vector.broadcast %cst_18 : f32 to vector<1x128xf32>
      %39 = arith.addf %35, %38 : vector<1x128xf32>
      %40 = math.rsqrt %39 : vector<1x128xf32>
      %41 = vector.broadcast %40 : vector<1x128xf32> to vector<512x128xf32>
      %42 = arith.mulf %37, %41 : vector<512x128xf32>
      %c0_19 = arith.constant 0 : index
      %c0_20 = arith.constant 0 : index
      %43 = vector.load %arg5[%c0_19, %c0_20] : memref<1x128xf32, #tpu.memory_space<vmem>>, vector<1x128xf32>
      %44 = vector.broadcast %43 : vector<1x128xf32> to vector<512x128xf32>
      %45 = arith.mulf %42, %44 : vector<512x128xf32>
      %c0_21 = arith.constant 0 : index
      %c0_22 = arith.constant 0 : index
      %46 = vector.load %arg6[%c0_21, %c0_22] : memref<1x128xf32, #tpu.memory_space<vmem>>, vector<1x128xf32>
      %47 = vector.broadcast %46 : vector<1x128xf32> to vector<512x128xf32>
      %48 = arith.addf %45, %47 : vector<512x128xf32>
      %cst_23 = arith.constant 0.000000e+00 : f32
      %49 = vector.broadcast %cst_23 : f32 to vector<512x128xf32>
      %50 = arith.cmpf oge, %48, %49 : vector<512x128xf32>
      %cst_24 = arith.constant 2.000000e-01 : f32
      %51 = vector.broadcast %cst_24 : f32 to vector<512x128xf32>
      %52 = arith.mulf %51, %48 : vector<512x128xf32>
      %53 = arith.select %50, %48, %52 : vector<512x128xi1>, vector<512x128xf32>
      %c0_25 = arith.constant 0 : index
      %c0_26 = arith.constant 0 : index
      %54 = vector.load %arg7[%c0_25, %c0_26] : memref<512x128xf32, #tpu.memory_space<vmem>>, vector<512x128xf32>
      tpu.vector_store %arg7[%c0_25, %c0_26], %53 {strides = array<i32>} : memref<512x128xf32, #tpu.memory_space<vmem>>, vector<512x128xf32>,
    } else {
    }
    return
  }
  func.func @transform_0(%arg0: i32, %arg1: i32) -> (i32, i32) {
    %c0_i32 = arith.constant 0 : i32
    %c0_i32_0 = arith.constant 0 : i32
    return %c0_i32, %arg1 : i32, i32
  }
  func.func @transform_1(%arg0: i32, %arg1: i32) -> (i32, i32) {
    %c0_i32 = arith.constant 0 : i32
    return %arg1, %arg0 : i32, i32
  }
  func.func @transform_2(%arg0: i32, %arg1: i32) -> (i32, i32) {
    %c0_i32 = arith.constant 0 : i32
    %c0_i32_0 = arith.constant 0 : i32
    return %c0_i32, %arg0 : i32, i32
  }
  func.func @transform_3(%arg0: i32, %arg1: i32) -> (i32, i32) {
    %c0_i32 = arith.constant 0 : i32
    %c0_i32_0 = arith.constant 0 : i32
    return %c0_i32, %arg0 : i32, i32
  }
  func.func @transform_4(%arg0: i32, %arg1: i32) -> (i32, i32) {
    %c0_i32 = arith.constant 0 : i32
    %c0_i32_0 = arith.constant 0 : i32
    return %c0_i32, %arg0 : i32, i32
  }
  func.func @transform_5(%arg0: i32, %arg1: i32) -> (i32, i32) {
    %c0_i32 = arith.constant 0 : i32
    %c0_i32_0 = arith.constant 0 : i32
    return %c0_i32, %arg0 : i32, i32
  }
}

module attributes {stable_mosaic.version = 11 : i64} {
  func.func @_matmul_fused_kernel(%arg0: i32, %arg1: i32, %arg2: memref<128x512xbf16, #tpu.memory_space<vmem>>, %arg3: memref<512x128xbf16, #tpu.memory_space<vmem>>, %arg4: memref<1x128xf32, #tpu.memory_space<vmem>>, %arg5: memref<1x128xf32, #tpu.memory_space<vmem>>, %arg6: memref<1x128xf32, #tpu.memory_space<vmem>>, %arg7: memref<128x128xf32, #tpu.memory_space<vmem>>) attributes {dimension_semantics = [#tpu.dimension_semantics<parallel>, #tpu.dimension_semantics<arbitrary>], iteration_bounds = array<i64: 1, 2>, scalar_prefetch = 0 : i64, scratch_operands = 0 : i64, tpu.core_type = #tpu.core_type<tc>, window_params = [{transform_indices = @transform_0, window_bounds = array<i64: 128, 512>}, {transform_indices = @transform_1, window_bounds = array<i64: 512, 128>}, {transform_indices = @transform_2, window_bounds = array<i64: 1, 128>}, {transform_indices = @transform_3, window_bounds = array<i64: 1, 128>}, {transform_indices = @transform_4, window_bounds = array<i64: 1, 128>}, {transform_indices = @transform_5, window_bounds = array<i64: 128, 128>}]} {
    %c0_i32 = arith.constant 0 : i32
    %0 = arith.cmpi eq, %arg1, %c0_i32 : i32
    %1 = arith.extui %0 : i1 to i32
    %c0_i32_0 = arith.constant 0 : i32
    %2 = arith.cmpi ne, %1, %c0_i32_0 : i32
    scf.if %2 {
      %cst_9 = arith.constant 0.000000e+00 : f32
      %12 = vector.broadcast %cst_9 : f32 to vector<128x128xf32>
      %c0_10 = arith.constant 0 : index
      %c0_11 = arith.constant 0 : index
      %13 = vector.load %arg7[%c0_10, %c0_11] : memref<128x128xf32, #tpu.memory_space<vmem>>, vector<128x128xf32>
      tpu.vector_store %arg7[%c0_10, %c0_11], %12 {strides = array<i32>} : memref<128x128xf32, #tpu.memory_space<vmem>>, vector<128x128xf32>,
    } else {
    }
    %c0 = arith.constant 0 : index
    %c0_1 = arith.constant 0 : index
    %3 = vector.load %arg7[%c0, %c0_1] : memref<128x128xf32, #tpu.memory_space<vmem>>, vector<128x128xf32>
    %c0_2 = arith.constant 0 : index
    %c0_3 = arith.constant 0 : index
    %4 = vector.load %arg2[%c0_2, %c0_3] : memref<128x512xbf16, #tpu.memory_space<vmem>>, vector<128x512xbf16>
    %c0_4 = arith.constant 0 : index
    %c0_5 = arith.constant 0 : index
    %5 = vector.load %arg3[%c0_4, %c0_5] : memref<512x128xbf16, #tpu.memory_space<vmem>>, vector<512x128xbf16>
    %cst = arith.constant dense<0.000000e+00> : vector<128x128xf32>
    %6 = tpu.matmul %4, %5, %cst {dimension_numbers = #tpu.dot_dimension_numbers<[1], [0], [0], [1], [0, 0, 1, 1], [], []>} : vector<128x512xbf16>, vector<512x128xbf16>, vector<128x128xf32> -> vector<128x128xf32>
    %7 = arith.addf %3, %6 : vector<128x128xf32>
    %c0_6 = arith.constant 0 : index
    %c0_7 = arith.constant 0 : index
    %8 = vector.load %arg7[%c0_6, %c0_7] : memref<128x128xf32, #tpu.memory_space<vmem>>, vector<128x128xf32>
    tpu.vector_store %arg7[%c0_6, %c0_7], %7 {strides = array<i32>} : memref<128x128xf32, #tpu.memory_space<vmem>>, vector<128x128xf32>,
    %c1_i32 = arith.constant 1 : i32
    %9 = arith.cmpi eq, %arg1, %c1_i32 : i32
    %10 = arith.extui %9 : i1 to i32
    %c0_i32_8 = arith.constant 0 : i32
    %11 = arith.cmpi ne, %10, %c0_i32_8 : i32
    scf.if %11 {
      %c0_9 = arith.constant 0 : index
      %c0_10 = arith.constant 0 : index
      %12 = vector.load %arg7[%c0_9, %c0_10] : memref<128x128xf32, #tpu.memory_space<vmem>>, vector<128x128xf32>
      %c0_11 = arith.constant 0 : index
      %c0_12 = arith.constant 0 : index
      %13 = vector.load %arg4[%c0_11, %c0_12] : memref<1x128xf32, #tpu.memory_space<vmem>>, vector<1x128xf32>
      %14 = vector.broadcast %13 : vector<1x128xf32> to vector<128x128xf32>
      %15 = arith.addf %12, %14 : vector<128x128xf32>
      %16 = tpu.iota {dimensions = array<i32: 0>} : vector<128x1xi32>
      %c128_i32 = arith.constant 128 : i32
      %17 = vector.broadcast %c128_i32 : i32 to vector<128x1xi32>
      %18 = arith.cmpi slt, %16, %17 : vector<128x1xi32>
      %19 = arith.extui %18 : vector<128x1xi1> to vector<128x1xi32>
      %20 = arith.sitofp %19 : vector<128x1xi32> to vector<128x1xf32>
      %21 = vector.broadcast %20 : vector<128x1xf32> to vector<128x128xf32>
      %22 = arith.mulf %15, %21 : vector<128x128xf32>
      %cst_13 = arith.constant dense<0.000000e+00> : vector<128xf32>
      %23 = vector.multi_reduction <add>, %22, %cst_13 [0] : vector<128x128xf32> to vector<128xf32>
      %24 = vector.shape_cast %23 : vector<128xf32> to vector<1x128xf32>
      %cst_14 = arith.constant 7.812500e-03 : f32
      %25 = vector.broadcast %cst_14 : f32 to vector<1x128xf32>
      %26 = arith.mulf %24, %25 : vector<1x128xf32>
      %27 = vector.broadcast %26 : vector<1x128xf32> to vector<128x128xf32>
      %28 = arith.subf %15, %27 : vector<128x128xf32>
      %29 = vector.broadcast %20 : vector<128x1xf32> to vector<128x128xf32>
      %30 = arith.mulf %28, %29 : vector<128x128xf32>
      %31 = arith.mulf %30, %30 : vector<128x128xf32>
      %cst_15 = arith.constant dense<0.000000e+00> : vector<128xf32>
      %32 = vector.multi_reduction <add>, %31, %cst_15 [0] : vector<128x128xf32> to vector<128xf32>
      %33 = vector.shape_cast %32 : vector<128xf32> to vector<1x128xf32>
      %cst_16 = arith.constant 7.812500e-03 : f32
      %34 = vector.broadcast %cst_16 : f32 to vector<1x128xf32>
      %35 = arith.mulf %33, %34 : vector<1x128xf32>
      %36 = vector.broadcast %26 : vector<1x128xf32> to vector<128x128xf32>
      %37 = arith.subf %15, %36 : vector<128x128xf32>
      %cst_17 = arith.constant 9.99999974E-6 : f32
      %38 = vector.broadcast %cst_17 : f32 to vector<1x128xf32>
      %39 = arith.addf %35, %38 : vector<1x128xf32>
      %40 = math.rsqrt %39 : vector<1x128xf32>
      %41 = vector.broadcast %40 : vector<1x128xf32> to vector<128x128xf32>
      %42 = arith.mulf %37, %41 : vector<128x128xf32>
      %c0_18 = arith.constant 0 : index
      %c0_19 = arith.constant 0 : index
      %43 = vector.load %arg5[%c0_18, %c0_19] : memref<1x128xf32, #tpu.memory_space<vmem>>, vector<1x128xf32>
      %44 = vector.broadcast %43 : vector<1x128xf32> to vector<128x128xf32>
      %45 = arith.mulf %42, %44 : vector<128x128xf32>
      %c0_20 = arith.constant 0 : index
      %c0_21 = arith.constant 0 : index
      %46 = vector.load %arg6[%c0_20, %c0_21] : memref<1x128xf32, #tpu.memory_space<vmem>>, vector<1x128xf32>
      %47 = vector.broadcast %46 : vector<1x128xf32> to vector<128x128xf32>
      %48 = arith.addf %45, %47 : vector<128x128xf32>
      %cst_22 = arith.constant 0.000000e+00 : f32
      %49 = vector.broadcast %cst_22 : f32 to vector<128x128xf32>
      %50 = arith.cmpf oge, %48, %49 : vector<128x128xf32>
      %cst_23 = arith.constant 2.000000e-01 : f32
      %51 = vector.broadcast %cst_23 : f32 to vector<128x128xf32>
      %52 = arith.mulf %51, %48 : vector<128x128xf32>
      %53 = arith.select %50, %48, %52 : vector<128x128xi1>, vector<128x128xf32>
      %c0_24 = arith.constant 0 : index
      %c0_25 = arith.constant 0 : index
      %54 = vector.load %arg7[%c0_24, %c0_25] : memref<128x128xf32, #tpu.memory_space<vmem>>, vector<128x128xf32>
      tpu.vector_store %arg7[%c0_24, %c0_25], %53 {strides = array<i32>} : memref<128x128xf32, #tpu.memory_space<vmem>>, vector<128x128xf32>,
    } else {
    }
    return
  }
  func.func @transform_0(%arg0: i32, %arg1: i32) -> (i32, i32) {
    %c0_i32 = arith.constant 0 : i32
    %c0_i32_0 = arith.constant 0 : i32
    return %c0_i32, %arg1 : i32, i32
  }
  func.func @transform_1(%arg0: i32, %arg1: i32) -> (i32, i32) {
    %c0_i32 = arith.constant 0 : i32
    return %arg1, %arg0 : i32, i32
  }
  func.func @transform_2(%arg0: i32, %arg1: i32) -> (i32, i32) {
    %c0_i32 = arith.constant 0 : i32
    %c0_i32_0 = arith.constant 0 : i32
    return %c0_i32, %arg0 : i32, i32
  }
  func.func @transform_3(%arg0: i32, %arg1: i32) -> (i32, i32) {
    %c0_i32 = arith.constant 0 : i32
    %c0_i32_0 = arith.constant 0 : i32
    return %c0_i32, %arg0 : i32, i32
  }
  func.func @transform_4(%arg0: i32, %arg1: i32) -> (i32, i32) {
    %c0_i32 = arith.constant 0 : i32
    %c0_i32_0 = arith.constant 0 : i32
    return %c0_i32, %arg0 : i32, i32
  }
  func.func @transform_5(%arg0: i32, %arg1: i32) -> (i32, i32) {
    %c0_i32 = arith.constant 0 : i32
    %c0_i32_0 = arith.constant 0 : i32
    return %c0_i32, %arg0 : i32, i32
  }
}

module attributes {stable_mosaic.version = 11 : i64} {
  func.func @_matmul_fused_kernel(%arg0: i32, %arg1: i32, %arg2: memref<32x512xbf16, #tpu.memory_space<vmem>>, %arg3: memref<512x256xbf16, #tpu.memory_space<vmem>>, %arg4: memref<1x256xf32, #tpu.memory_space<vmem>>, %arg5: memref<1x256xf32, #tpu.memory_space<vmem>>, %arg6: memref<1x256xf32, #tpu.memory_space<vmem>>, %arg7: memref<32x256xf32, #tpu.memory_space<vmem>>) attributes {dimension_semantics = [#tpu.dimension_semantics<parallel>, #tpu.dimension_semantics<arbitrary>], iteration_bounds = array<i64: 1, 4>, scalar_prefetch = 0 : i64, scratch_operands = 0 : i64, tpu.core_type = #tpu.core_type<tc>, window_params = [{transform_indices = @transform_0, window_bounds = array<i64: 32, 512>}, {transform_indices = @transform_1, window_bounds = array<i64: 512, 256>}, {transform_indices = @transform_2, window_bounds = array<i64: 1, 256>}, {transform_indices = @transform_3, window_bounds = array<i64: 1, 256>}, {transform_indices = @transform_4, window_bounds = array<i64: 1, 256>}, {transform_indices = @transform_5, window_bounds = array<i64: 32, 256>}]} {
    %c0_i32 = arith.constant 0 : i32
    %0 = arith.cmpi eq, %arg1, %c0_i32 : i32
    %1 = arith.extui %0 : i1 to i32
    %c0_i32_0 = arith.constant 0 : i32
    %2 = arith.cmpi ne, %1, %c0_i32_0 : i32
    scf.if %2 {
      %cst_9 = arith.constant 0.000000e+00 : f32
      %12 = vector.broadcast %cst_9 : f32 to vector<32x256xf32>
      %c0_10 = arith.constant 0 : index
      %c0_11 = arith.constant 0 : index
      %13 = vector.load %arg7[%c0_10, %c0_11] : memref<32x256xf32, #tpu.memory_space<vmem>>, vector<32x256xf32>
      tpu.vector_store %arg7[%c0_10, %c0_11], %12 {strides = array<i32>} : memref<32x256xf32, #tpu.memory_space<vmem>>, vector<32x256xf32>,
    } else {
    }
    %c0 = arith.constant 0 : index
    %c0_1 = arith.constant 0 : index
    %3 = vector.load %arg7[%c0, %c0_1] : memref<32x256xf32, #tpu.memory_space<vmem>>, vector<32x256xf32>
    %c0_2 = arith.constant 0 : index
    %c0_3 = arith.constant 0 : index
    %4 = vector.load %arg2[%c0_2, %c0_3] : memref<32x512xbf16, #tpu.memory_space<vmem>>, vector<32x512xbf16>
    %c0_4 = arith.constant 0 : index
    %c0_5 = arith.constant 0 : index
    %5 = vector.load %arg3[%c0_4, %c0_5] : memref<512x256xbf16, #tpu.memory_space<vmem>>, vector<512x256xbf16>
    %cst = arith.constant dense<0.000000e+00> : vector<32x256xf32>
    %6 = tpu.matmul %4, %5, %cst {dimension_numbers = #tpu.dot_dimension_numbers<[1], [0], [0], [1], [0, 0, 1, 1], [], []>} : vector<32x512xbf16>, vector<512x256xbf16>, vector<32x256xf32> -> vector<32x256xf32>
    %7 = arith.addf %3, %6 : vector<32x256xf32>
    %c0_6 = arith.constant 0 : index
    %c0_7 = arith.constant 0 : index
    %8 = vector.load %arg7[%c0_6, %c0_7] : memref<32x256xf32, #tpu.memory_space<vmem>>, vector<32x256xf32>
    tpu.vector_store %arg7[%c0_6, %c0_7], %7 {strides = array<i32>} : memref<32x256xf32, #tpu.memory_space<vmem>>, vector<32x256xf32>,
    %c3_i32 = arith.constant 3 : i32
    %9 = arith.cmpi eq, %arg1, %c3_i32 : i32
    %10 = arith.extui %9 : i1 to i32
    %c0_i32_8 = arith.constant 0 : i32
    %11 = arith.cmpi ne, %10, %c0_i32_8 : i32
    scf.if %11 {
      %c0_9 = arith.constant 0 : index
      %c0_10 = arith.constant 0 : index
      %12 = vector.load %arg7[%c0_9, %c0_10] : memref<32x256xf32, #tpu.memory_space<vmem>>, vector<32x256xf32>
      %c0_11 = arith.constant 0 : index
      %c0_12 = arith.constant 0 : index
      %13 = vector.load %arg4[%c0_11, %c0_12] : memref<1x256xf32, #tpu.memory_space<vmem>>, vector<1x256xf32>
      %14 = vector.broadcast %13 : vector<1x256xf32> to vector<32x256xf32>
      %15 = arith.addf %12, %14 : vector<32x256xf32>
      %16 = tpu.iota {dimensions = array<i32: 0>} : vector<32x1xi32>
      %c32_i32 = arith.constant 32 : i32
      %17 = vector.broadcast %c32_i32 : i32 to vector<32x1xi32>
      %18 = arith.cmpi slt, %16, %17 : vector<32x1xi32>
      %19 = arith.extui %18 : vector<32x1xi1> to vector<32x1xi32>
      %20 = arith.sitofp %19 : vector<32x1xi32> to vector<32x1xf32>
      %21 = vector.broadcast %20 : vector<32x1xf32> to vector<32x256xf32>
      %22 = arith.mulf %15, %21 : vector<32x256xf32>
      %cst_13 = arith.constant dense<0.000000e+00> : vector<256xf32>
      %23 = vector.multi_reduction <add>, %22, %cst_13 [0] : vector<32x256xf32> to vector<256xf32>
      %24 = vector.shape_cast %23 : vector<256xf32> to vector<1x256xf32>
      %cst_14 = arith.constant 3.125000e-02 : f32
      %25 = vector.broadcast %cst_14 : f32 to vector<1x256xf32>
      %26 = arith.mulf %24, %25 : vector<1x256xf32>
      %27 = vector.broadcast %26 : vector<1x256xf32> to vector<32x256xf32>
      %28 = arith.subf %15, %27 : vector<32x256xf32>
      %29 = vector.broadcast %20 : vector<32x1xf32> to vector<32x256xf32>
      %30 = arith.mulf %28, %29 : vector<32x256xf32>
      %31 = arith.mulf %30, %30 : vector<32x256xf32>
      %cst_15 = arith.constant dense<0.000000e+00> : vector<256xf32>
      %32 = vector.multi_reduction <add>, %31, %cst_15 [0] : vector<32x256xf32> to vector<256xf32>
      %33 = vector.shape_cast %32 : vector<256xf32> to vector<1x256xf32>
      %cst_16 = arith.constant 3.125000e-02 : f32
      %34 = vector.broadcast %cst_16 : f32 to vector<1x256xf32>
      %35 = arith.mulf %33, %34 : vector<1x256xf32>
      %36 = vector.broadcast %26 : vector<1x256xf32> to vector<32x256xf32>
      %37 = arith.subf %15, %36 : vector<32x256xf32>
      %cst_17 = arith.constant 9.99999974E-6 : f32
      %38 = vector.broadcast %cst_17 : f32 to vector<1x256xf32>
      %39 = arith.addf %35, %38 : vector<1x256xf32>
      %40 = math.rsqrt %39 : vector<1x256xf32>
      %41 = vector.broadcast %40 : vector<1x256xf32> to vector<32x256xf32>
      %42 = arith.mulf %37, %41 : vector<32x256xf32>
      %c0_18 = arith.constant 0 : index
      %c0_19 = arith.constant 0 : index
      %43 = vector.load %arg5[%c0_18, %c0_19] : memref<1x256xf32, #tpu.memory_space<vmem>>, vector<1x256xf32>
      %44 = vector.broadcast %43 : vector<1x256xf32> to vector<32x256xf32>
      %45 = arith.mulf %42, %44 : vector<32x256xf32>
      %c0_20 = arith.constant 0 : index
      %c0_21 = arith.constant 0 : index
      %46 = vector.load %arg6[%c0_20, %c0_21] : memref<1x256xf32, #tpu.memory_space<vmem>>, vector<1x256xf32>
      %47 = vector.broadcast %46 : vector<1x256xf32> to vector<32x256xf32>
      %48 = arith.addf %45, %47 : vector<32x256xf32>
      %cst_22 = arith.constant 0.000000e+00 : f32
      %49 = vector.broadcast %cst_22 : f32 to vector<32x256xf32>
      %50 = arith.cmpf oge, %48, %49 : vector<32x256xf32>
      %cst_23 = arith.constant 2.000000e-01 : f32
      %51 = vector.broadcast %cst_23 : f32 to vector<32x256xf32>
      %52 = arith.mulf %51, %48 : vector<32x256xf32>
      %53 = arith.select %50, %48, %52 : vector<32x256xi1>, vector<32x256xf32>
      %c0_24 = arith.constant 0 : index
      %c0_25 = arith.constant 0 : index
      %54 = vector.load %arg7[%c0_24, %c0_25] : memref<32x256xf32, #tpu.memory_space<vmem>>, vector<32x256xf32>
      tpu.vector_store %arg7[%c0_24, %c0_25], %53 {strides = array<i32>} : memref<32x256xf32, #tpu.memory_space<vmem>>, vector<32x256xf32>,
    } else {
    }
    return
  }
  func.func @transform_0(%arg0: i32, %arg1: i32) -> (i32, i32) {
    %c0_i32 = arith.constant 0 : i32
    %c0_i32_0 = arith.constant 0 : i32
    return %c0_i32, %arg1 : i32, i32
  }
  func.func @transform_1(%arg0: i32, %arg1: i32) -> (i32, i32) {
    %c0_i32 = arith.constant 0 : i32
    return %arg1, %arg0 : i32, i32
  }
  func.func @transform_2(%arg0: i32, %arg1: i32) -> (i32, i32) {
    %c0_i32 = arith.constant 0 : i32
    %c0_i32_0 = arith.constant 0 : i32
    return %c0_i32, %arg0 : i32, i32
  }
  func.func @transform_3(%arg0: i32, %arg1: i32) -> (i32, i32) {
    %c0_i32 = arith.constant 0 : i32
    %c0_i32_0 = arith.constant 0 : i32
    return %c0_i32, %arg0 : i32, i32
  }
  func.func @transform_4(%arg0: i32, %arg1: i32) -> (i32, i32) {
    %c0_i32 = arith.constant 0 : i32
    %c0_i32_0 = arith.constant 0 : i32
    return %c0_i32, %arg0 : i32, i32
  }
  func.func @transform_5(%arg0: i32, %arg1: i32) -> (i32, i32) {
    %c0_i32 = arith.constant 0 : i32
    %c0_i32_0 = arith.constant 0 : i32
    return %c0_i32, %arg0 : i32, i32
  }
}

module attributes {stable_mosaic.version = 11 : i64} {
  func.func @_matmul_fused_kernel(%arg0: i32, %arg1: i32, %arg2: memref<16x512xbf16, #tpu.memory_space<vmem>>, %arg3: memref<512x256xbf16, #tpu.memory_space<vmem>>, %arg4: memref<1x256xf32, #tpu.memory_space<vmem>>, %arg5: memref<1x256xf32, #tpu.memory_space<vmem>>, %arg6: memref<1x256xf32, #tpu.memory_space<vmem>>, %arg7: memref<16x256xf32, #tpu.memory_space<vmem>>) attributes {dimension_semantics = [#tpu.dimension_semantics<parallel>, #tpu.dimension_semantics<arbitrary>], iteration_bounds = array<i64: 2, 8>, scalar_prefetch = 0 : i64, scratch_operands = 0 : i64, tpu.core_type = #tpu.core_type<tc>, window_params = [{transform_indices = @transform_0, window_bounds = array<i64: 16, 512>}, {transform_indices = @transform_1, window_bounds = array<i64: 512, 256>}, {transform_indices = @transform_2, window_bounds = array<i64: 1, 256>}, {transform_indices = @transform_3, window_bounds = array<i64: 1, 256>}, {transform_indices = @transform_4, window_bounds = array<i64: 1, 256>}, {transform_indices = @transform_5, window_bounds = array<i64: 16, 256>}]} {
    %c0_i32 = arith.constant 0 : i32
    %0 = arith.cmpi eq, %arg1, %c0_i32 : i32
    %1 = arith.extui %0 : i1 to i32
    %c0_i32_0 = arith.constant 0 : i32
    %2 = arith.cmpi ne, %1, %c0_i32_0 : i32
    scf.if %2 {
      %cst_9 = arith.constant 0.000000e+00 : f32
      %12 = vector.broadcast %cst_9 : f32 to vector<16x256xf32>
      %c0_10 = arith.constant 0 : index
      %c0_11 = arith.constant 0 : index
      %13 = vector.load %arg7[%c0_10, %c0_11] : memref<16x256xf32, #tpu.memory_space<vmem>>, vector<16x256xf32>
      tpu.vector_store %arg7[%c0_10, %c0_11], %12 {strides = array<i32>} : memref<16x256xf32, #tpu.memory_space<vmem>>, vector<16x256xf32>,
    } else {
    }
    %c0 = arith.constant 0 : index
    %c0_1 = arith.constant 0 : index
    %3 = vector.load %arg7[%c0, %c0_1] : memref<16x256xf32, #tpu.memory_space<vmem>>, vector<16x256xf32>
    %c0_2 = arith.constant 0 : index
    %c0_3 = arith.constant 0 : index
    %4 = vector.load %arg2[%c0_2, %c0_3] : memref<16x512xbf16, #tpu.memory_space<vmem>>, vector<16x512xbf16>
    %c0_4 = arith.constant 0 : index
    %c0_5 = arith.constant 0 : index
    %5 = vector.load %arg3[%c0_4, %c0_5] : memref<512x256xbf16, #tpu.memory_space<vmem>>, vector<512x256xbf16>
    %cst = arith.constant dense<0.000000e+00> : vector<16x256xf32>
    %6 = tpu.matmul %4, %5, %cst {dimension_numbers = #tpu.dot_dimension_numbers<[1], [0], [0], [1], [0, 0, 1, 1], [], []>} : vector<16x512xbf16>, vector<512x256xbf16>, vector<16x256xf32> -> vector<16x256xf32>
    %7 = arith.addf %3, %6 : vector<16x256xf32>
    %c0_6 = arith.constant 0 : index
    %c0_7 = arith.constant 0 : index
    %8 = vector.load %arg7[%c0_6, %c0_7] : memref<16x256xf32, #tpu.memory_space<vmem>>, vector<16x256xf32>
    tpu.vector_store %arg7[%c0_6, %c0_7], %7 {strides = array<i32>} : memref<16x256xf32, #tpu.memory_space<vmem>>, vector<16x256xf32>,
    %c7_i32 = arith.constant 7 : i32
    %9 = arith.cmpi eq, %arg1, %c7_i32 : i32
    %10 = arith.extui %9 : i1 to i32
    %c0_i32_8 = arith.constant 0 : i32
    %11 = arith.cmpi ne, %10, %c0_i32_8 : i32
    scf.if %11 {
      %c0_9 = arith.constant 0 : index
      %c0_10 = arith.constant 0 : index
      %12 = vector.load %arg7[%c0_9, %c0_10] : memref<16x256xf32, #tpu.memory_space<vmem>>, vector<16x256xf32>
      %c0_11 = arith.constant 0 : index
      %c0_12 = arith.constant 0 : index
      %13 = vector.load %arg4[%c0_11, %c0_12] : memref<1x256xf32, #tpu.memory_space<vmem>>, vector<1x256xf32>
      %14 = vector.broadcast %13 : vector<1x256xf32> to vector<16x256xf32>
      %15 = arith.addf %12, %14 : vector<16x256xf32>
      %16 = tpu.iota {dimensions = array<i32: 0>} : vector<16x1xi32>
      %c8_i32 = arith.constant 8 : i32
      %17 = vector.broadcast %c8_i32 : i32 to vector<16x1xi32>
      %18 = arith.cmpi slt, %16, %17 : vector<16x1xi32>
      %19 = arith.extui %18 : vector<16x1xi1> to vector<16x1xi32>
      %20 = arith.sitofp %19 : vector<16x1xi32> to vector<16x1xf32>
      %21 = vector.broadcast %20 : vector<16x1xf32> to vector<16x256xf32>
      %22 = arith.mulf %15, %21 : vector<16x256xf32>
      %cst_13 = arith.constant dense<0.000000e+00> : vector<256xf32>
      %23 = vector.multi_reduction <add>, %22, %cst_13 [0] : vector<16x256xf32> to vector<256xf32>
      %24 = vector.shape_cast %23 : vector<256xf32> to vector<1x256xf32>
      %cst_14 = arith.constant 1.250000e-01 : f32
      %25 = vector.broadcast %cst_14 : f32 to vector<1x256xf32>
      %26 = arith.mulf %24, %25 : vector<1x256xf32>
      %27 = vector.broadcast %26 : vector<1x256xf32> to vector<16x256xf32>
      %28 = arith.subf %15, %27 : vector<16x256xf32>
      %29 = vector.broadcast %20 : vector<16x1xf32> to vector<16x256xf32>
      %30 = arith.mulf %28, %29 : vector<16x256xf32>
      %31 = arith.mulf %30, %30 : vector<16x256xf32>
      %cst_15 = arith.constant dense<0.000000e+00> : vector<256xf32>
      %32 = vector.multi_reduction <add>, %31, %cst_15 [0] : vector<16x256xf32> to vector<256xf32>
      %33 = vector.shape_cast %32 : vector<256xf32> to vector<1x256xf32>
      %cst_16 = arith.constant 1.250000e-01 : f32
      %34 = vector.broadcast %cst_16 : f32 to vector<1x256xf32>
      %35 = arith.mulf %33, %34 : vector<1x256xf32>
      %36 = vector.broadcast %26 : vector<1x256xf32> to vector<16x256xf32>
      %37 = arith.subf %15, %36 : vector<16x256xf32>
      %cst_17 = arith.constant 9.99999974E-6 : f32
      %38 = vector.broadcast %cst_17 : f32 to vector<1x256xf32>
      %39 = arith.addf %35, %38 : vector<1x256xf32>
      %40 = math.rsqrt %39 : vector<1x256xf32>
      %41 = vector.broadcast %40 : vector<1x256xf32> to vector<16x256xf32>
      %42 = arith.mulf %37, %41 : vector<16x256xf32>
      %c0_18 = arith.constant 0 : index
      %c0_19 = arith.constant 0 : index
      %43 = vector.load %arg5[%c0_18, %c0_19] : memref<1x256xf32, #tpu.memory_space<vmem>>, vector<1x256xf32>
      %44 = vector.broadcast %43 : vector<1x256xf32> to vector<16x256xf32>
      %45 = arith.mulf %42, %44 : vector<16x256xf32>
      %c0_20 = arith.constant 0 : index
      %c0_21 = arith.constant 0 : index
      %46 = vector.load %arg6[%c0_20, %c0_21] : memref<1x256xf32, #tpu.memory_space<vmem>>, vector<1x256xf32>
      %47 = vector.broadcast %46 : vector<1x256xf32> to vector<16x256xf32>
      %48 = arith.addf %45, %47 : vector<16x256xf32>
      %cst_22 = arith.constant 0.000000e+00 : f32
      %49 = vector.broadcast %cst_22 : f32 to vector<16x256xf32>
      %50 = arith.cmpf oge, %48, %49 : vector<16x256xf32>
      %cst_23 = arith.constant 2.000000e-01 : f32
      %51 = vector.broadcast %cst_23 : f32 to vector<16x256xf32>
      %52 = arith.mulf %51, %48 : vector<16x256xf32>
      %53 = arith.select %50, %48, %52 : vector<16x256xi1>, vector<16x256xf32>
      %c0_24 = arith.constant 0 : index
      %c0_25 = arith.constant 0 : index
      %54 = vector.load %arg7[%c0_24, %c0_25] : memref<16x256xf32, #tpu.memory_space<vmem>>, vector<16x256xf32>
      tpu.vector_store %arg7[%c0_24, %c0_25], %53 {strides = array<i32>} : memref<16x256xf32, #tpu.memory_space<vmem>>, vector<16x256xf32>,
    } else {
    }
    return
  }
  func.func @transform_0(%arg0: i32, %arg1: i32) -> (i32, i32) {
    %c0_i32 = arith.constant 0 : i32
    %c0_i32_0 = arith.constant 0 : i32
    return %c0_i32, %arg1 : i32, i32
  }
  func.func @transform_1(%arg0: i32, %arg1: i32) -> (i32, i32) {
    %c0_i32 = arith.constant 0 : i32
    return %arg1, %arg0 : i32, i32
  }
  func.func @transform_2(%arg0: i32, %arg1: i32) -> (i32, i32) {
    %c0_i32 = arith.constant 0 : i32
    %c0_i32_0 = arith.constant 0 : i32
    return %c0_i32, %arg0 : i32, i32
  }
  func.func @transform_3(%arg0: i32, %arg1: i32) -> (i32, i32) {
    %c0_i32 = arith.constant 0 : i32
    %c0_i32_0 = arith.constant 0 : i32
    return %c0_i32, %arg0 : i32, i32
  }
  func.func @transform_4(%arg0: i32, %arg1: i32) -> (i32, i32) {
    %c0_i32 = arith.constant 0 : i32
    %c0_i32_0 = arith.constant 0 : i32
    return %c0_i32, %arg0 : i32, i32
  }
  func.func @transform_5(%arg0: i32, %arg1: i32) -> (i32, i32) {
    %c0_i32 = arith.constant 0 : i32
    %c0_i32_0 = arith.constant 0 : i32
    return %c0_i32, %arg0 : i32, i32
  }
}

module attributes {stable_mosaic.version = 11 : i64} {
  func.func @_matmul_fused_kernel(%arg0: i32, %arg1: i32, %arg2: memref<16x512xbf16, #tpu.memory_space<vmem>>, %arg3: memref<512x256xbf16, #tpu.memory_space<vmem>>, %arg4: memref<1x256xf32, #tpu.memory_space<vmem>>, %arg5: memref<1x256xf32, #tpu.memory_space<vmem>>, %arg6: memref<1x256xf32, #tpu.memory_space<vmem>>, %arg7: memref<16x256xf32, #tpu.memory_space<vmem>>) attributes {dimension_semantics = [#tpu.dimension_semantics<parallel>, #tpu.dimension_semantics<arbitrary>], iteration_bounds = array<i64: 4, 16>, scalar_prefetch = 0 : i64, scratch_operands = 0 : i64, tpu.core_type = #tpu.core_type<tc>, window_params = [{transform_indices = @transform_0, window_bounds = array<i64: 16, 512>}, {transform_indices = @transform_1, window_bounds = array<i64: 512, 256>}, {transform_indices = @transform_2, window_bounds = array<i64: 1, 256>}, {transform_indices = @transform_3, window_bounds = array<i64: 1, 256>}, {transform_indices = @transform_4, window_bounds = array<i64: 1, 256>}, {transform_indices = @transform_5, window_bounds = array<i64: 16, 256>}]} {
    %c0_i32 = arith.constant 0 : i32
    %0 = arith.cmpi eq, %arg1, %c0_i32 : i32
    %1 = arith.extui %0 : i1 to i32
    %c0_i32_0 = arith.constant 0 : i32
    %2 = arith.cmpi ne, %1, %c0_i32_0 : i32
    scf.if %2 {
      %cst_9 = arith.constant 0.000000e+00 : f32
      %12 = vector.broadcast %cst_9 : f32 to vector<16x256xf32>
      %c0_10 = arith.constant 0 : index
      %c0_11 = arith.constant 0 : index
      %13 = vector.load %arg7[%c0_10, %c0_11] : memref<16x256xf32, #tpu.memory_space<vmem>>, vector<16x256xf32>
      tpu.vector_store %arg7[%c0_10, %c0_11], %12 {strides = array<i32>} : memref<16x256xf32, #tpu.memory_space<vmem>>, vector<16x256xf32>,
    } else {
    }
    %c0 = arith.constant 0 : index
    %c0_1 = arith.constant 0 : index
    %3 = vector.load %arg7[%c0, %c0_1] : memref<16x256xf32, #tpu.memory_space<vmem>>, vector<16x256xf32>
    %c0_2 = arith.constant 0 : index
    %c0_3 = arith.constant 0 : index
    %4 = vector.load %arg2[%c0_2, %c0_3] : memref<16x512xbf16, #tpu.memory_space<vmem>>, vector<16x512xbf16>
    %c0_4 = arith.constant 0 : index
    %c0_5 = arith.constant 0 : index
    %5 = vector.load %arg3[%c0_4, %c0_5] : memref<512x256xbf16, #tpu.memory_space<vmem>>, vector<512x256xbf16>
    %cst = arith.constant dense<0.000000e+00> : vector<16x256xf32>
    %6 = tpu.matmul %4, %5, %cst {dimension_numbers = #tpu.dot_dimension_numbers<[1], [0], [0], [1], [0, 0, 1, 1], [], []>} : vector<16x512xbf16>, vector<512x256xbf16>, vector<16x256xf32> -> vector<16x256xf32>
    %7 = arith.addf %3, %6 : vector<16x256xf32>
    %c0_6 = arith.constant 0 : index
    %c0_7 = arith.constant 0 : index
    %8 = vector.load %arg7[%c0_6, %c0_7] : memref<16x256xf32, #tpu.memory_space<vmem>>, vector<16x256xf32>
    tpu.vector_store %arg7[%c0_6, %c0_7], %7 {strides = array<i32>} : memref<16x256xf32, #tpu.memory_space<vmem>>, vector<16x256xf32>,
    %c15_i32 = arith.constant 15 : i32
    %9 = arith.cmpi eq, %arg1, %c15_i32 : i32
    %10 = arith.extui %9 : i1 to i32
    %c0_i32_8 = arith.constant 0 : i32
    %11 = arith.cmpi ne, %10, %c0_i32_8 : i32
    scf.if %11 {
      %c0_9 = arith.constant 0 : index
      %c0_10 = arith.constant 0 : index
      %12 = vector.load %arg7[%c0_9, %c0_10] : memref<16x256xf32, #tpu.memory_space<vmem>>, vector<16x256xf32>
      %c0_11 = arith.constant 0 : index
      %c0_12 = arith.constant 0 : index
      %13 = vector.load %arg4[%c0_11, %c0_12] : memref<1x256xf32, #tpu.memory_space<vmem>>, vector<1x256xf32>
      %14 = vector.broadcast %13 : vector<1x256xf32> to vector<16x256xf32>
      %15 = arith.addf %12, %14 : vector<16x256xf32>
      %16 = tpu.iota {dimensions = array<i32: 0>} : vector<16x1xi32>
      %c2_i32 = arith.constant 2 : i32
      %17 = vector.broadcast %c2_i32 : i32 to vector<16x1xi32>
      %18 = arith.cmpi slt, %16, %17 : vector<16x1xi32>
      %19 = arith.extui %18 : vector<16x1xi1> to vector<16x1xi32>
      %20 = arith.sitofp %19 : vector<16x1xi32> to vector<16x1xf32>
      %21 = vector.broadcast %20 : vector<16x1xf32> to vector<16x256xf32>
      %22 = arith.mulf %15, %21 : vector<16x256xf32>
      %cst_13 = arith.constant dense<0.000000e+00> : vector<256xf32>
      %23 = vector.multi_reduction <add>, %22, %cst_13 [0] : vector<16x256xf32> to vector<256xf32>
      %24 = vector.shape_cast %23 : vector<256xf32> to vector<1x256xf32>
      %cst_14 = arith.constant 5.000000e-01 : f32
      %25 = vector.broadcast %cst_14 : f32 to vector<1x256xf32>
      %26 = arith.mulf %24, %25 : vector<1x256xf32>
      %27 = vector.broadcast %26 : vector<1x256xf32> to vector<16x256xf32>
      %28 = arith.subf %15, %27 : vector<16x256xf32>
      %29 = vector.broadcast %20 : vector<16x1xf32> to vector<16x256xf32>
      %30 = arith.mulf %28, %29 : vector<16x256xf32>
      %31 = arith.mulf %30, %30 : vector<16x256xf32>
      %cst_15 = arith.constant dense<0.000000e+00> : vector<256xf32>
      %32 = vector.multi_reduction <add>, %31, %cst_15 [0] : vector<16x256xf32> to vector<256xf32>
      %33 = vector.shape_cast %32 : vector<256xf32> to vector<1x256xf32>
      %cst_16 = arith.constant 5.000000e-01 : f32
      %34 = vector.broadcast %cst_16 : f32 to vector<1x256xf32>
      %35 = arith.mulf %33, %34 : vector<1x256xf32>
      %36 = vector.broadcast %26 : vector<1x256xf32> to vector<16x256xf32>
      %37 = arith.subf %15, %36 : vector<16x256xf32>
      %cst_17 = arith.constant 9.99999974E-6 : f32
      %38 = vector.broadcast %cst_17 : f32 to vector<1x256xf32>
      %39 = arith.addf %35, %38 : vector<1x256xf32>
      %40 = math.rsqrt %39 : vector<1x256xf32>
      %41 = vector.broadcast %40 : vector<1x256xf32> to vector<16x256xf32>
      %42 = arith.mulf %37, %41 : vector<16x256xf32>
      %c0_18 = arith.constant 0 : index
      %c0_19 = arith.constant 0 : index
      %43 = vector.load %arg5[%c0_18, %c0_19] : memref<1x256xf32, #tpu.memory_space<vmem>>, vector<1x256xf32>
      %44 = vector.broadcast %43 : vector<1x256xf32> to vector<16x256xf32>
      %45 = arith.mulf %42, %44 : vector<16x256xf32>
      %c0_20 = arith.constant 0 : index
      %c0_21 = arith.constant 0 : index
      %46 = vector.load %arg6[%c0_20, %c0_21] : memref<1x256xf32, #tpu.memory_space<vmem>>, vector<1x256xf32>
      %47 = vector.broadcast %46 : vector<1x256xf32> to vector<16x256xf32>
      %48 = arith.addf %45, %47 : vector<16x256xf32>
      %cst_22 = arith.constant 0.000000e+00 : f32
      %49 = vector.broadcast %cst_22 : f32 to vector<16x256xf32>
      %50 = arith.cmpf oge, %48, %49 : vector<16x256xf32>
      %cst_23 = arith.constant 2.000000e-01 : f32
      %51 = vector.broadcast %cst_23 : f32 to vector<16x256xf32>
      %52 = arith.mulf %51, %48 : vector<16x256xf32>
      %53 = arith.select %50, %48, %52 : vector<16x256xi1>, vector<16x256xf32>
      %c0_24 = arith.constant 0 : index
      %c0_25 = arith.constant 0 : index
      %54 = vector.load %arg7[%c0_24, %c0_25] : memref<16x256xf32, #tpu.memory_space<vmem>>, vector<16x256xf32>
      tpu.vector_store %arg7[%c0_24, %c0_25], %53 {strides = array<i32>} : memref<16x256xf32, #tpu.memory_space<vmem>>, vector<16x256xf32>,
    } else {
    }
    return
  }
  func.func @transform_0(%arg0: i32, %arg1: i32) -> (i32, i32) {
    %c0_i32 = arith.constant 0 : i32
    %c0_i32_0 = arith.constant 0 : i32
    return %c0_i32, %arg1 : i32, i32
  }
  func.func @transform_1(%arg0: i32, %arg1: i32) -> (i32, i32) {
    %c0_i32 = arith.constant 0 : i32
    return %arg1, %arg0 : i32, i32
  }
  func.func @transform_2(%arg0: i32, %arg1: i32) -> (i32, i32) {
    %c0_i32 = arith.constant 0 : i32
    %c0_i32_0 = arith.constant 0 : i32
    return %c0_i32, %arg0 : i32, i32
  }
  func.func @transform_3(%arg0: i32, %arg1: i32) -> (i32, i32) {
    %c0_i32 = arith.constant 0 : i32
    %c0_i32_0 = arith.constant 0 : i32
    return %c0_i32, %arg0 : i32, i32
  }
  func.func @transform_4(%arg0: i32, %arg1: i32) -> (i32, i32) {
    %c0_i32 = arith.constant 0 : i32
    %c0_i32_0 = arith.constant 0 : i32
    return %c0_i32, %arg0 : i32, i32
  }
  func.func @transform_5(%arg0: i32, %arg1: i32) -> (i32, i32) {
    %c0_i32 = arith.constant 0 : i32
    %c0_i32_0 = arith.constant 0 : i32
    return %c0_i32, %arg0 : i32, i32
  }
}

module attributes {stable_mosaic.version = 11 : i64} {
  func.func @_matmul_fused_kernel(%arg0: i32, %arg1: i32, %arg2: memref<16x512xbf16, #tpu.memory_space<vmem>>, %arg3: memref<512x128xbf16, #tpu.memory_space<vmem>>, %arg4: memref<1x128xf32, #tpu.memory_space<vmem>>, %arg5: memref<1x128xf32, #tpu.memory_space<vmem>>, %arg6: memref<1x128xf32, #tpu.memory_space<vmem>>, %arg7: memref<16x128xf32, #tpu.memory_space<vmem>>) attributes {dimension_semantics = [#tpu.dimension_semantics<parallel>, #tpu.dimension_semantics<arbitrary>], iteration_bounds = array<i64: 1, 2>, scalar_prefetch = 0 : i64, scratch_operands = 0 : i64, tpu.core_type = #tpu.core_type<tc>, window_params = [{transform_indices = @transform_0, window_bounds = array<i64: 16, 512>}, {transform_indices = @transform_1, window_bounds = array<i64: 512, 128>}, {transform_indices = @transform_2, window_bounds = array<i64: 1, 128>}, {transform_indices = @transform_3, window_bounds = array<i64: 1, 128>}, {transform_indices = @transform_4, window_bounds = array<i64: 1, 128>}, {transform_indices = @transform_5, window_bounds = array<i64: 16, 128>}]} {
    %c0_i32 = arith.constant 0 : i32
    %0 = arith.cmpi eq, %arg1, %c0_i32 : i32
    %1 = arith.extui %0 : i1 to i32
    %c0_i32_0 = arith.constant 0 : i32
    %2 = arith.cmpi ne, %1, %c0_i32_0 : i32
    scf.if %2 {
      %cst_9 = arith.constant 0.000000e+00 : f32
      %12 = vector.broadcast %cst_9 : f32 to vector<16x128xf32>
      %c0_10 = arith.constant 0 : index
      %c0_11 = arith.constant 0 : index
      %13 = vector.load %arg7[%c0_10, %c0_11] : memref<16x128xf32, #tpu.memory_space<vmem>>, vector<16x128xf32>
      tpu.vector_store %arg7[%c0_10, %c0_11], %12 {strides = array<i32>} : memref<16x128xf32, #tpu.memory_space<vmem>>, vector<16x128xf32>,
    } else {
    }
    %c0 = arith.constant 0 : index
    %c0_1 = arith.constant 0 : index
    %3 = vector.load %arg7[%c0, %c0_1] : memref<16x128xf32, #tpu.memory_space<vmem>>, vector<16x128xf32>
    %c0_2 = arith.constant 0 : index
    %c0_3 = arith.constant 0 : index
    %4 = vector.load %arg2[%c0_2, %c0_3] : memref<16x512xbf16, #tpu.memory_space<vmem>>, vector<16x512xbf16>
    %c0_4 = arith.constant 0 : index
    %c0_5 = arith.constant 0 : index
    %5 = vector.load %arg3[%c0_4, %c0_5] : memref<512x128xbf16, #tpu.memory_space<vmem>>, vector<512x128xbf16>
    %cst = arith.constant dense<0.000000e+00> : vector<16x128xf32>
    %6 = tpu.matmul %4, %5, %cst {dimension_numbers = #tpu.dot_dimension_numbers<[1], [0], [0], [1], [0, 0, 1, 1], [], []>} : vector<16x512xbf16>, vector<512x128xbf16>, vector<16x128xf32> -> vector<16x128xf32>
    %7 = arith.addf %3, %6 : vector<16x128xf32>
    %c0_6 = arith.constant 0 : index
    %c0_7 = arith.constant 0 : index
    %8 = vector.load %arg7[%c0_6, %c0_7] : memref<16x128xf32, #tpu.memory_space<vmem>>, vector<16x128xf32>
    tpu.vector_store %arg7[%c0_6, %c0_7], %7 {strides = array<i32>} : memref<16x128xf32, #tpu.memory_space<vmem>>, vector<16x128xf32>,
    %c1_i32 = arith.constant 1 : i32
    %9 = arith.cmpi eq, %arg1, %c1_i32 : i32
    %10 = arith.extui %9 : i1 to i32
    %c0_i32_8 = arith.constant 0 : i32
    %11 = arith.cmpi ne, %10, %c0_i32_8 : i32
    scf.if %11 {
      %c0_9 = arith.constant 0 : index
      %c0_10 = arith.constant 0 : index
      %12 = vector.load %arg7[%c0_9, %c0_10] : memref<16x128xf32, #tpu.memory_space<vmem>>, vector<16x128xf32>
      %c0_11 = arith.constant 0 : index
      %c0_12 = arith.constant 0 : index
      %13 = vector.load %arg4[%c0_11, %c0_12] : memref<1x128xf32, #tpu.memory_space<vmem>>, vector<1x128xf32>
      %14 = vector.broadcast %13 : vector<1x128xf32> to vector<16x128xf32>
      %15 = arith.addf %12, %14 : vector<16x128xf32>
      %c0_13 = arith.constant 0 : index
      %c0_14 = arith.constant 0 : index
      %16 = vector.load %arg7[%c0_13, %c0_14] : memref<16x128xf32, #tpu.memory_space<vmem>>, vector<16x128xf32>
      tpu.vector_store %arg7[%c0_13, %c0_14], %15 {strides = array<i32>} : memref<16x128xf32, #tpu.memory_space<vmem>>, vector<16x128xf32>,
    } else {
    }
    return
  }
  func.func @transform_0(%arg0: i32, %arg1: i32) -> (i32, i32) {
    %c0_i32 = arith.constant 0 : i32
    %c0_i32_0 = arith.constant 0 : i32
    return %c0_i32, %arg1 : i32, i32
  }
  func.func @transform_1(%arg0: i32, %arg1: i32) -> (i32, i32) {
    %c0_i32 = arith.constant 0 : i32
    return %arg1, %arg0 : i32, i32
  }
  func.func @transform_2(%arg0: i32, %arg1: i32) -> (i32, i32) {
    %c0_i32 = arith.constant 0 : i32
    %c0_i32_0 = arith.constant 0 : i32
    return %c0_i32, %arg0 : i32, i32
  }
  func.func @transform_3(%arg0: i32, %arg1: i32) -> (i32, i32) {
    %c0_i32 = arith.constant 0 : i32
    %c0_i32_0 = arith.constant 0 : i32
    return %c0_i32, %arg0 : i32, i32
  }
  func.func @transform_4(%arg0: i32, %arg1: i32) -> (i32, i32) {
    %c0_i32 = arith.constant 0 : i32
    %c0_i32_0 = arith.constant 0 : i32
    return %c0_i32, %arg0 : i32, i32
  }
  func.func @transform_5(%arg0: i32, %arg1: i32) -> (i32, i32) {
    %c0_i32 = arith.constant 0 : i32
    %c0_i32_0 = arith.constant 0 : i32
    return %c0_i32, %arg0 : i32, i32
  }
}

</mosaic_0001>

<bundles_post_ra>
// kernel: encoder_conv_orig_forward.6
= control target key start
LH: loop header
LB: loop body
LE: loop exit
PB: predicated region body
PF: predicated region fallthrough
CT: control target
= control target key end

     0   :  { %10 = vsyncpa [#allocation3], 0  ;;  %s4582_s0 = inlined_call_operand.vmem [shape: bf16[512,128], index: 0, kind: input, shape index: {}]   ;;  %s4583_s1 = inlined_call_operand.hbm [shape: bf16[128,128], index: 1, kind: input, shape index: {}]   ;;  %s4584_s2 = inlined_call_operand.hbm [shape: f32[1,128], index: 2, kind: input, shape index: {}]   ;;  %s4585_s3 = inlined_call_operand.hbm [shape: f32[1,128], index: 3, kind: input, shape index: {}]   ;;  %s4586_s4 = inlined_call_operand.vmem [shape: f32[1,128], index: 4, kind: input, shape index: {}]   ;;  %s4587_s5 = inlined_call_operand.vmem [shape: f32[512,128], index: 5, kind: output, shape index: {}]  }
   0x1   :  { %11 = vsyncpa [#allocation5], 0  ;;  %s2485_s18 = smov [#allocation4]   ;;  %s2486_s20 = smov [#allocation2]  }
   0x2   :  { %s32_s19 = sshll.u32 %s2485_s18, 4  ;;  %s19_s21 = sshll.u32 %s2486_s20, 4  ;;  %s33_s19 = int_to_ptr.vmem [resolvable:$true] %s32_s19  ;;  %s2520_s21 = int_to_ptr.vmem [resolvable:$true] %s19_s21 }
   0x3   :  { %s2415_s24 = scalar_lea.hbm %s4584_s2, 16 }
   0x4   :  { %p2416_p0 = scmp.ne.s32.totalorder %s4584_s2, %s2415_s24  ;;  %p2419_p1 = scmp.lt.u32.totalorder %s2415_s24, %s4584_s2 }
   0x6   :  { %p2421_p2 = pnand %p2419_p1, %p2416_p0 }
   0x8   :  { %2424 = shalt.err (!%p2421_p2)
}
   0x9   :  { %s2425_s29 = scalar_lea.vmem %s33_s19, 16  ;;  %s2429_s30 = scalar_lea.vmem %s33_s19, 32 }
   0xa   :  { %p2426_p3 = scmp.ne.s32.totalorder %s33_s19, %s2425_s29  ;;  %p2430_p4 = scmp.lt.s32.totalorder %s33_s19, %s33_s19 }
   0xb   :  { %p2431_p5 = scmp.lt.s32.totalorder %s2429_s30, %s2425_s29 }
   0xd   :  { %p2432_p6 = por %p2431_p5, %p2430_p4 }
   0xf   :  { %p2433_p7 = pnand %p2432_p6, %p2426_p3 }
  0x11   :  { %2436 = shalt.err (!%p2433_p7)
}
  0x12   :  { %35 = dma.hbm_to_vmem [thread:$0]  %s4584_s2, 16, %s33_s19, [#allocation5]  }
  0x13   :  { %s2437_s10 = scalar_lea.hbm %s4583_s1, 1024 }
  0x14   :  { %p2438_p8 = scmp.ne.s32.totalorder %s4583_s1, %s2437_s10  ;;  %p2441_p9 = scmp.lt.u32.totalorder %s2437_s10, %s4583_s1 }
  0x16   :  { %p2443_p10 = pnand %p2441_p9, %p2438_p8 }
  0x18   :  { %2446 = shalt.err (!%p2443_p10)
}
  0x19   :  { %s2447_s15 = scalar_lea.vmem %s2520_s21, 1024  ;;  %p2452_p12 = scmp.lt.s32.totalorder %s2520_s21, %s2520_s21 }
  0x1a   :  { %p2448_p11 = scmp.ne.s32.totalorder %s2520_s21, %s2447_s15  ;;  %p2453_p13 = scmp.lt.s32.totalorder %s2447_s15, %s2447_s15 }
  0x1c   :  { %p2454_p0 = por %p2453_p13, %p2452_p12 }
  0x1e   :  { %p2455_p1 = pnand %p2454_p0, %p2448_p11 }
  0x20   :  { %2458 = shalt.err (!%p2455_p1)
}
  0x21   :  { %s2487_s2 = smov 64   ;;  %s2488_s16 = smov 4  }
  0x22   :  { %25 = dma.hbm_to_vmem [thread:$0]  %s4583_s1, 1024, %s2520_s21, [#allocation3], %s2487_s2, %s2487_s2, %s2488_s16  }
  0x23   :  { %s2489_s19 = smov [#allocation6]   ;;  %s2459_s24 = scalar_lea.hbm %s4585_s3, 16 }
  0x24   :  { %s42_s20 = sshll.u32 %s2489_s19, 4  ;;  %p2460_p2 = scmp.ne.s32.totalorder %s4585_s3, %s2459_s24  ;;  %s43_s20 = int_to_ptr.vmem [resolvable:$true] %s42_s20 }
  0x25   :  { %p2463_p3 = scmp.lt.u32.totalorder %s2459_s24, %s4585_s3 }
  0x27   :  { %p2465_p4 = pnand %p2463_p3, %p2460_p2 }
  0x29   :  { %2468 = shalt.err (!%p2465_p4)
}
  0x2a   :  { %s2469_s29 = scalar_lea.vmem %s43_s20, 16  ;;  %s2473_s1 = scalar_lea.vmem %s43_s20, 32 }
  0x2b   :  { %p2470_p5 = scmp.ne.s32.totalorder %s43_s20, %s2469_s29  ;;  %p2474_p6 = scmp.lt.s32.totalorder %s43_s20, %s43_s20 }
  0x2c   :  { %p2475_p7 = scmp.lt.s32.totalorder %s2473_s1, %s2469_s29 }
  0x2e   :  { %p2476_p8 = por %p2475_p7, %p2474_p6 }
  0x30   :  { %p2477_p9 = pnand %p2476_p8, %p2470_p5 }
  0x32   :  { %2480 = shalt.err (!%p2477_p9)
}
  0x33   :  { %45 = dma.hbm_to_vmem [thread:$0]  %s4585_s3, 16, %s43_s20, [#allocation5]  }
  0x34   :  { %2481 = dma.done.wait [#allocation3], 1024  }
  0x35   :  { %2482 = vsyncadd [#allocation3], 4294966272 }
  0x36   :  { %2483 = dma.done.wait [#allocation5], 32  }
  0x37   :  { %2484 = vsyncadd [#allocation5], 4294967264  ;;  %v2373_v0 = vld [vmem:[#allocation2] sm:$0xff]   ;;  %v2374_v1 = vld [vmem:[#allocation2 + $0x8] sm:$0xff]  }
  0x38   :  { %2271 = vmatprep.subr.bf16.mxu0 %v2373_v0  ;;  %2351 = vmatprep.subr.bf16.mxu1 %v2373_v0  ;;  %v2375_v2 = vld [vmem:[#allocation2 + $0x10] sm:$0xff]   ;;  %v2376_v3 = vld [vmem:[#allocation2 + $0x18] sm:$0xff]   ;;  %v2381_v4 = vld [vmem:[%s4582_s0] sm:$0xff]  }
  0x39   :  { %2272 = vmatpush3.bf16.msra.mxu0 %v2373_v0  ;;  %2359 = vmatpush3.bf16.msra.mxu1 %v2373_v0  ;;  %v2377_v5 = vld [vmem:[#allocation2 + $0x20] sm:$0xff]   ;;  %v2378_v6 = vld [vmem:[#allocation2 + $0x28] sm:$0xff]   ;;  %v2379_v7 = vld [vmem:[#allocation2 + $0x30] sm:$0xff]  }
  0x3a   :  { %2273 = vmatprep.subr.bf16.mxu0 %v2374_v1  ;;  %2352 = vmatprep.subr.bf16.mxu1 %v2374_v1  ;;  %v2380_v8 = vld [vmem:[#allocation2 + $0x38] sm:$0xff]   ;;  %v2397_v9 = vld [vmem:[%s4582_s0 + $0x80] sm:$0xff]   ;;  %v2382_v10 = vld [vmem:[%s4582_s0 + $0x8] sm:$0xff]  }
  0x3b   :  { %2287 = vmatprep.mubr.bf16.mxu0 %v2381_v4  ;;  %2319 = vmatprep.mubr.bf16.mxu1 %v2397_v9  ;;  %v2383_v11 = vld [vmem:[%s4582_s0 + $0x10] sm:$0xff]   ;;  %v2398_v12 = vld [vmem:[%s4582_s0 + $0x88] sm:$0xff]   ;;  %v2384_v14 = vld [vmem:[%s4582_s0 + $0x18] sm:$0xff]  }
  0x3c   :  { %v2399_v13 = vld [vmem:[%s4582_s0 + $0x90] sm:$0xff]   ;;  %v2385_v15 = vld [vmem:[%s4582_s0 + $0x20] sm:$0xff]   ;;  %v2400_v16 = vld [vmem:[%s4582_s0 + $0x98] sm:$0xff]  }
  0x3d   :  { %2274 = vmatpush3.bf16.msra.mxu0 %v2374_v1  ;;  %2360 = vmatpush3.bf16.msra.mxu1 %v2374_v1  ;;  %v2401_v17 = vld [vmem:[%s4582_s0 + $0xa0] sm:$0xff]   ;;  %v2386_v18 = vld [vmem:[%s4582_s0 + $0x28] sm:$0xff]   ;;  %v2387_v20 = vld [vmem:[%s4582_s0 + $0x30] sm:$0xff]  }
  0x3e   :  { %2275 = vmatprep.subr.bf16.mxu0 %v2375_v2  ;;  %2353 = vmatprep.subr.bf16.mxu1 %v2375_v2  ;;  %v2402_v19 = vld [vmem:[%s4582_s0 + $0xa8] sm:$0xff]   ;;  %v2403_v21 = vld [vmem:[%s4582_s0 + $0xb0] sm:$0xff]   ;;  %v2388_v22 = vld [vmem:[%s4582_s0 + $0x38] sm:$0xff]  }
  0x3f   :  { %v2404_v23 = vld [vmem:[%s4582_s0 + $0xb8] sm:$0xff]   ;;  %v2389_v24 = vld [vmem:[%s4582_s0 + $0x40] sm:$0xff]   ;;  %v2390_v26 = vld [vmem:[%s4582_s0 + $0x48] sm:$0xff]  }
  0x40   :  { %v2405_v25 = vld [vmem:[%s4582_s0 + $0xc0] sm:$0xff]   ;;  %v2406_v27 = vld [vmem:[%s4582_s0 + $0xc8] sm:$0xff]   ;;  %v2391_v28 = vld [vmem:[%s4582_s0 + $0x50] sm:$0xff]  }
  0x41   :  { %2276 = vmatpush3.bf16.msra.mxu0 %v2375_v2  ;;  %2361 = vmatpush3.bf16.msra.mxu1 %v2375_v2  ;;  %v2407_v29 = vld [vmem:[%s4582_s0 + $0xd0] sm:$0xff]   ;;  %v2392_v30 = vld [vmem:[%s4582_s0 + $0x58] sm:$0xff]   ;;  %v2393_v32 = vld [vmem:[%s4582_s0 + $0x60] sm:$0xff]  }
  0x42   :  { %2277 = vmatprep.subr.bf16.mxu0 %v2376_v3  ;;  %2354 = vmatprep.subr.bf16.mxu1 %v2376_v3  ;;  %v2408_v31 = vld [vmem:[%s4582_s0 + $0xd8] sm:$0xff]   ;;  %v2409_v33 = vld [vmem:[%s4582_s0 + $0xe0] sm:$0xff]   ;;  %v2394_v34 = vld [vmem:[%s4582_s0 + $0x68] sm:$0xff]  }
  0x43   :  { %v2410_v35 = vld [vmem:[%s4582_s0 + $0xe8] sm:$0xff]   ;;  %v2395_v36 = vld [vmem:[%s4582_s0 + $0x70] sm:$0xff]   ;;  %v2396_v38 = vld [vmem:[%s4582_s0 + $0x78] sm:$0xff]  }
  0x44   :  { %v2411_v37 = vld [vmem:[%s4582_s0 + $0xf0] sm:$0xff]   ;;  %v2412_v39 = vld [vmem:[%s4582_s0 + $0xf8] sm:$0xff]   ;;  %v2661_v44 = vld [vmem:[#allocation4] ss:$0 sm:$0xff] }
  0x45   :  { %2278 = vmatpush3.bf16.msra.mxu0 %v2376_v3  ;;  %2362 = vmatpush3.bf16.msra.mxu1 %v2376_v3 }
  0x46   :  { %2279 = vmatprep.subr.bf16.mxu0 %v2377_v5  ;;  %2355 = vmatprep.subr.bf16.mxu1 %v2377_v5 }
  0x49   :  { %2280 = vmatpush3.bf16.msra.mxu0 %v2377_v5  ;;  %2363 = vmatpush3.bf16.msra.mxu1 %v2377_v5 }
  0x4a   :  { %2281 = vmatprep.subr.bf16.mxu0 %v2378_v6  ;;  %2356 = vmatprep.subr.bf16.mxu1 %v2378_v6 }
  0x4d   :  { %2282 = vmatpush3.bf16.msra.mxu0 %v2378_v6  ;;  %2364 = vmatpush3.bf16.msra.mxu1 %v2378_v6 }
  0x4e   :  { %2283 = vmatprep.subr.bf16.mxu0 %v2379_v7  ;;  %2357 = vmatprep.subr.bf16.mxu1 %v2379_v7 }
  0x51   :  { %2284 = vmatpush3.bf16.msra.mxu0 %v2379_v7  ;;  %2365 = vmatpush3.bf16.msra.mxu1 %v2379_v7 }
  0x52   :  { %2285 = vmatprep.subr.bf16.mxu0 %v2380_v8  ;;  %2358 = vmatprep.subr.bf16.mxu1 %v2380_v8 }
  0x55   :  { %2286 = vmatpush3.bf16.msra.mxu0 %v2380_v8  ;;  %2366 = vmatpush3.bf16.msra.mxu1 %v2380_v8 }
  0x58   :  { %2288 = vmatmul.mubr.bf16.vlgmr.msra.gmra.mrb[0].mxu0 %v2382_v10  ;;  %2320 = vmatmul.mubr.bf16.vlgmr.msra.gmra.mrb[0].mxu1 %v2398_v12 }
  0x59   :  { %2291 = vmatprep.mubr.bf16.mxu0 %v2383_v11  ;;  %2323 = vmatprep.mubr.bf16.mxu1 %v2399_v13 }
  0x60   :  { %2292 = vmatmul.mubr.bf16.gmra.mrb[4].mxu0 %v2384_v14  ;;  %2324 = vmatmul.mubr.bf16.gmra.mrb[4].mxu1 %v2400_v16 }
  0x61   :  { %2295 = vmatprep.mubr.bf16.mxu0 %v2385_v15  ;;  %2327 = vmatprep.mubr.bf16.mxu1 %v2401_v17 }
  0x68   :  { %2296 = vmatmul.mubr.bf16.gmra.mrb[8].mxu0 %v2386_v18  ;;  %2328 = vmatmul.mubr.bf16.gmra.mrb[8].mxu1 %v2402_v19 }
  0x69   :  { %2299 = vmatprep.mubr.bf16.mxu0 %v2387_v20  ;;  %2331 = vmatprep.mubr.bf16.mxu1 %v2403_v21 }
  0x70   :  { %2300 = vmatmul.mubr.bf16.gmra.mrb[12].mxu0 %v2388_v22  ;;  %2332 = vmatmul.mubr.bf16.gmra.mrb[12].mxu1 %v2404_v23 }
  0x71   :  { %2303 = vmatprep.mubr.bf16.mxu0 %v2389_v24  ;;  %2335 = vmatprep.mubr.bf16.mxu1 %v2405_v25 }
  0x78   :  { %2304 = vmatmul.mubr.bf16.gmra.mrb[16].mxu0 %v2390_v26  ;;  %2336 = vmatmul.mubr.bf16.gmra.mrb[16].mxu1 %v2406_v27 }
  0x79   :  { %2307 = vmatprep.mubr.bf16.mxu0 %v2391_v28  ;;  %2339 = vmatprep.mubr.bf16.mxu1 %v2407_v29 }
  0x80   :  { %2308 = vmatmul.mubr.bf16.gmra.mrb[20].mxu0 %v2392_v30  ;;  %2340 = vmatmul.mubr.bf16.gmra.mrb[20].mxu1 %v2408_v31 }
  0x81   :  { %2311 = vmatprep.mubr.bf16.mxu0 %v2393_v32  ;;  %2343 = vmatprep.mubr.bf16.mxu1 %v2409_v33 }
  0x88   :  { %2312 = vmatmul.mubr.bf16.gmra.mrb[24].mxu0 %v2394_v34  ;;  %2344 = vmatmul.mubr.bf16.gmra.mrb[24].mxu1 %v2410_v35 }
  0x89   :  { %2315 = vmatprep.mubr.bf16.mxu0 %v2395_v36  ;;  %2347 = vmatprep.mubr.bf16.mxu1 %v2411_v37 }
  0x90   :  { %2316 = vmatmul.mubr.bf16.gmra.mrb[28].mxu0 %v2396_v38  ;;  %2348 = vmatmul.mubr.bf16.gmra.mrb[28].mxu1 %v2412_v39 }
 0x12b   :  { %v2289_v40 = vpop.f32.mrb[0].mxu0  ;;  %v2321_v41 = vpop.f32.mrb[0].mxu1 }
 0x12c   :  { %v544_v42 = vpop.f32.mrb[1].mxu0  ;;  %v2659_v43 = vpop.f32.mrb[1].mxu1  ;;  %v2664_v48 = vadd.f32 %v2321_v41, %v2661_v44  ;;  %v2679_v54 = vadd.f32 %v2289_v40, %v2661_v44 }
 0x12d   :  { %v2290_v45 = vpop.f32.mrb[2].mxu0  ;;  %v2322_v46 = vpop.f32.mrb[2].mxu1  ;;  %v2670_v51 = vadd.f32 %v2661_v44, %v544_v42 }
 0x12e   :  { %v547_v47 = vpop.f32.mrb[3].mxu0  ;;  %v675_v49 = vpop.f32.mrb[3].mxu1  ;;  %v2667_v50 = vadd.f32 %v2322_v46, %v2661_v44  ;;  %v2684_v60 = vadd.f32 %v2290_v45, %v2661_v44 }
 0x12f   :  { %v2673_v52 = vadd.f32 %v2661_v44, %v547_v47  ;;  %v2676_v53 = vadd.f32 %v2661_v44, %v675_v49 }
 0x131   :  { %v1386_v55 = vadd.f32 %v2673_v52, %v2670_v51 }
 0x133   :  { %v2293_v56 = vpop.f32.mrb[4].mxu0  ;;  %v2325_v57 = vpop.f32.mrb[4].mxu1  ;;  %v1387_v61 = vadd.f32 %v1386_v55, %v2679_v54 }
 0x134   :  { %v560_v58 = vpop.f32.mrb[5].mxu0  ;;  %v688_v59 = vpop.f32.mrb[5].mxu1  ;;  %v2688_v1 = vadd.f32 %v2325_v57, %v2661_v44  ;;  %v2708_v10 = vadd.f32 %v2293_v56, %v2661_v44 }
 0x135   :  { %v2294_v62 = vpop.f32.mrb[6].mxu0  ;;  %v2326_v63 = vpop.f32.mrb[6].mxu1  ;;  %v2691_v3 = vadd.f32 %v2661_v44, %v560_v58  ;;  %v1388_v4 = vadd.f32 %v1387_v61, %v2684_v60  ;;  %v2695_v5 = vadd.f32 %v2661_v44, %v688_v59 }
 0x136   :  { %v563_v0 = vpop.f32.mrb[7].mxu0  ;;  %v691_v2 = vpop.f32.mrb[7].mxu1  ;;  %v2698_v6 = vadd.f32 %v2326_v63, %v2661_v44  ;;  %v2712_v16 = vadd.f32 %v2294_v62, %v2661_v44 }
 0x137   :  { %v1389_v7 = vadd.f32 %v1388_v4, %v2691_v3  ;;  %v2702_v8 = vadd.f32 %v2661_v44, %v563_v0  ;;  %v2705_v9 = vadd.f32 %v2661_v44, %v691_v2 }
 0x139   :  { %v1390_v11 = vadd.f32 %v1389_v7, %v2702_v8 }
 0x13b   :  { %v2297_v12 = vpop.f32.mrb[8].mxu0  ;;  %v2329_v13 = vpop.f32.mrb[8].mxu1  ;;  %v1391_v17 = vadd.f32 %v1390_v11, %v2708_v10 }
 0x13c   :  { %v576_v14 = vpop.f32.mrb[9].mxu0  ;;  %v704_v15 = vpop.f32.mrb[9].mxu1  ;;  %v2716_v21 = vadd.f32 %v2329_v13, %v2661_v44  ;;  %v2736_v30 = vadd.f32 %v2297_v12, %v2661_v44 }
 0x13d   :  { %v2298_v18 = vpop.f32.mrb[10].mxu0  ;;  %v2330_v19 = vpop.f32.mrb[10].mxu1  ;;  %v2719_v23 = vadd.f32 %v2661_v44, %v576_v14  ;;  %v1392_v24 = vadd.f32 %v1391_v17, %v2712_v16  ;;  %v2723_v25 = vadd.f32 %v2661_v44, %v704_v15 }
 0x13e   :  { %v579_v20 = vpop.f32.mrb[11].mxu0  ;;  %4648 = vst [vmem:[#allocation9_spill] sm:$0xff] %v2716_v21  ;;  %v707_v22 = vpop.f32.mrb[11].mxu1  ;;  %v2726_v26 = vadd.f32 %v2330_v19, %v2661_v44  ;;  %v2740_v36 = vadd.f32 %v2298_v18, %v2661_v44 }
 0x13f   :  { %v1393_v27 = vadd.f32 %v1392_v24, %v2719_v23  ;;  %v2730_v28 = vadd.f32 %v2661_v44, %v579_v20  ;;  %v2733_v29 = vadd.f32 %v2661_v44, %v707_v22 }
 0x140   :  { %4649 = vst [vmem:[#allocation10_spill] sm:$0xff] %v2726_v26 }
 0x141   :  { %v1394_v31 = vadd.f32 %v1393_v27, %v2730_v28 }
 0x143   :  { %v2301_v32 = vpop.f32.mrb[12].mxu0  ;;  %v2333_v33 = vpop.f32.mrb[12].mxu1  ;;  %v1395_v37 = vadd.f32 %v1394_v31, %v2736_v30 }
 0x144   :  { %v592_v34 = vpop.f32.mrb[13].mxu0  ;;  %v720_v35 = vpop.f32.mrb[13].mxu1  ;;  %v2744_v41 = vadd.f32 %v2333_v33, %v2661_v44  ;;  %v2764_v58 = vadd.f32 %v2301_v32, %v2661_v44 }
 0x145   :  { %v2302_v38 = vpop.f32.mrb[14].mxu0  ;;  %v2334_v39 = vpop.f32.mrb[14].mxu1  ;;  %v2747_v45 = vadd.f32 %v2661_v44, %v592_v34  ;;  %v1396_v46 = vadd.f32 %v1395_v37, %v2740_v36  ;;  %v2751_v47 = vadd.f32 %v2661_v44, %v720_v35 }
 0x146   :  { %v595_v40 = vpop.f32.mrb[15].mxu0  ;;  %v723_v42 = vpop.f32.mrb[15].mxu1  ;;  %v2754_v49 = vadd.f32 %v2334_v39, %v2661_v44  ;;  %v2768_v2 = vadd.f32 %v2302_v38, %v2661_v44 }
 0x147   :  { %4650 = vst [vmem:[#allocation11_spill] sm:$0xff] %v2751_v47  ;;  %v1397_v55 = vadd.f32 %v1396_v46, %v2747_v45  ;;  %v2758_v56 = vadd.f32 %v2661_v44, %v595_v40  ;;  %v2761_v57 = vadd.f32 %v2661_v44, %v723_v42 }
 0x149   :  { %v1398_v59 = vadd.f32 %v1397_v55, %v2758_v56 }
 0x14b   :  { %v2305_v61 = vpop.f32.mrb[16].mxu0  ;;  %v2337_v62 = vpop.f32.mrb[16].mxu1  ;;  %v1399_v4 = vadd.f32 %v1398_v59, %v2764_v58 }
 0x14c   :  { %v608_v63 = vpop.f32.mrb[17].mxu0  ;;  %v736_v0 = vpop.f32.mrb[17].mxu1  ;;  %v2772_v13 = vadd.f32 %v2337_v62, %v2661_v44  ;;  %v2792_v27 = vadd.f32 %v2305_v61, %v2661_v44 }
 0x14d   :  { %v2306_v7 = vpop.f32.mrb[18].mxu0  ;;  %v2338_v11 = vpop.f32.mrb[18].mxu1  ;;  %v2775_v15 = vadd.f32 %v2661_v44, %v608_v63  ;;  %v1400_v17 = vadd.f32 %v1399_v4, %v2768_v2  ;;  %v2779_v18 = vadd.f32 %v2661_v44, %v736_v0 }
 0x14e   :  { %v611_v12 = vpop.f32.mrb[19].mxu0  ;;  %v739_v14 = vpop.f32.mrb[19].mxu1  ;;  %v2782_v19 = vadd.f32 %v2338_v11, %v2661_v44  ;;  %4652 = vst [vmem:[#allocation13_spill] sm:$0xff] %v2792_v27  ;;  %v2796_v37 = vadd.f32 %v2306_v7, %v2661_v44 }
 0x14f   :  { %v1401_v20 = vadd.f32 %v1400_v17, %v2775_v15  ;;  %v2786_v22 = vadd.f32 %v2661_v44, %v611_v12  ;;  %v2789_v24 = vadd.f32 %v2661_v44, %v739_v14 }
 0x150   :  { %4653 = vst [vmem:[#allocation14_spill] sm:$0xff] %v2796_v37 }
 0x151   :  { %4651 = vst [vmem:[#allocation12_spill] sm:$0xff] %v2786_v22  ;;  %v1402_v31 = vadd.f32 %v1401_v20, %v2786_v22 }
 0x153   :  { %v2309_v32 = vpop.f32.mrb[20].mxu0  ;;  %v2341_v33 = vpop.f32.mrb[20].mxu1  ;;  %v1403_v38 = vadd.f32 %v1402_v31, %v2792_v27 }
 0x154   :  { %v624_v34 = vpop.f32.mrb[21].mxu0  ;;  %v752_v35 = vpop.f32.mrb[21].mxu1  ;;  %v2800_v55 = vadd.f32 %v2341_v33, %v2661_v44  ;;  %v2820_v11 = vadd.f32 %v2309_v32, %v2661_v44 }
 0x155   :  { %v2310_v39 = vpop.f32.mrb[22].mxu0  ;;  %v2342_v40 = vpop.f32.mrb[22].mxu1  ;;  %v2803_v59 = vadd.f32 %v2661_v44, %v624_v34  ;;  %v1404_v61 = vadd.f32 %v1403_v38, %v2796_v37  ;;  %v2807_v62 = vadd.f32 %v2661_v44, %v752_v35 }
 0x156   :  { %v627_v42 = vpop.f32.mrb[23].mxu0  ;;  %v755_v46 = vpop.f32.mrb[23].mxu1  ;;  %v2810_v63 = vadd.f32 %v2342_v40, %v2661_v44  ;;  %4656 = vst [vmem:[#allocation17_spill] sm:$0xff] %v2820_v11  ;;  %v2824_v33 = vadd.f32 %v2310_v39, %v2661_v44 }
 0x157   :  { %4654 = vst [vmem:[#allocation15_spill] sm:$0xff] %v2803_v59  ;;  %v1405_v0 = vadd.f32 %v1404_v61, %v2803_v59  ;;  %v2814_v4 = vadd.f32 %v2661_v44, %v627_v42  ;;  %v2817_v7 = vadd.f32 %v2661_v44, %v755_v46 }
 0x158   :  { %4657 = vst [vmem:[#allocation18_spill] sm:$0xff] %v2824_v33 }
 0x159   :  { %4655 = vst [vmem:[#allocation16_spill] sm:$0xff] %v2814_v4  ;;  %v1406_v12 = vadd.f32 %v1405_v0, %v2814_v4 }
 0x15b   :  { %v2313_v14 = vpop.f32.mrb[24].mxu0  ;;  %v2345_v17 = vpop.f32.mrb[24].mxu1  ;;  %v1407_v34 = vadd.f32 %v1406_v12, %v2820_v11 }
 0x15c   :  { %v640_v20 = vpop.f32.mrb[25].mxu0  ;;  %v768_v31 = vpop.f32.mrb[25].mxu1  ;;  %v2828_v46 = vadd.f32 %v2345_v17, %v2661_v44  ;;  %v2848_v17 = vadd.f32 %v2313_v14, %v2661_v44 }
 0x15d   :  { %v2314_v35 = vpop.f32.mrb[26].mxu0  ;;  %v2346_v38 = vpop.f32.mrb[26].mxu1  ;;  %v2831_v32 = vadd.f32 %v2661_v44, %v640_v20  ;;  %v1408_v61 = vadd.f32 %v1407_v34, %v2824_v33  ;;  %v2835_v0 = vadd.f32 %v2661_v44, %v768_v31 }
 0x15e   :  { %v643_v40 = vpop.f32.mrb[27].mxu0  ;;  %v771_v42 = vpop.f32.mrb[27].mxu1  ;;  %v2838_v39 = vadd.f32 %v2346_v38, %v2661_v44  ;;  %4660 = vst [vmem:[#allocation21_spill] sm:$0xff] %v2848_v17  ;;  %v2852_v38 = vadd.f32 %v2314_v35, %v2661_v44 }
 0x15f   :  { %4658 = vst [vmem:[#allocation19_spill] sm:$0xff] %v2831_v32  ;;  %v1409_v12 = vadd.f32 %v1408_v61, %v2831_v32  ;;  %v2842_v11 = vadd.f32 %v2661_v44, %v643_v40  ;;  %v2845_v4 = vadd.f32 %v2661_v44, %v771_v42 }
 0x161   :  { %4659 = vst [vmem:[#allocation20_spill] sm:$0xff] %v2842_v11  ;;  %v1410_v20 = vadd.f32 %v1409_v12, %v2842_v11 }
 0x163   :  { %v2317_v34 = vpop.f32.mrb[28].mxu0  ;;  %v2349_v33 = vpop.f32.mrb[28].mxu1  ;;  %v1411_v61 = vadd.f32 %v1410_v20, %v2848_v17 }
 0x164   :  { %v656_v31 = vpop.f32.mrb[29].mxu0  ;;  %v784_v59 = vpop.f32.mrb[29].mxu1  ;;  %v2856_v42 = vadd.f32 %v2349_v33, %v2661_v44  ;;  %v2874_v33 = vadd.f32 %v2317_v34, %v2661_v44 }
 0x165   :  { %v2318_v32 = vpop.f32.mrb[30].mxu0  ;;  %v2350_v40 = vpop.f32.mrb[30].mxu1  ;;  %v2859_v14 = vadd.f32 %v2661_v44, %v656_v31  ;;  %v1412_v12 = vadd.f32 %v1411_v61, %v2852_v38  ;;  %v2863_v11 = vadd.f32 %v2661_v44, %v784_v59 }
 0x166   :  { %v659_v37 = vpop.f32.mrb[31].mxu0  ;;  %v787_v27 = vpop.f32.mrb[31].mxu1  ;;  %v2866_v35 = vadd.f32 %v2350_v40, %v2661_v44  ;;  %4662 = vst [vmem:[#allocation23_spill] sm:$0xff] %v2874_v33  ;;  %v2878_v61 = vadd.f32 %v2318_v32, %v2661_v44  ;;  %v2883_v40 = vadd.f32 %v2661_v44, %v2659_v43 }
 0x167   :  { %4661 = vst [vmem:[#allocation22_spill] sm:$0xff] %v2859_v14  ;;  %v1413_v20 = vadd.f32 %v1412_v12, %v2859_v14  ;;  %v2870_v17 = vadd.f32 %v2661_v44, %v659_v37  ;;  %v1062_v22 = vadd.f32 %v2661_v44, %v787_v27 }
 0x169   :  { %v1414_v31 = vadd.f32 %v1413_v20, %v2870_v17 }
 0x16b   :  { %v1415_v59 = vadd.f32 %v1414_v31, %v2874_v33 }
 0x16d   :  { %v1416_v12 = vadd.f32 %v1415_v59, %v2878_v61 }
 0x16f   :  { %v1417_v37 = vadd.f32 %v1416_v12, %v2883_v40 }
 0x171   :  { %v1418_v27 = vadd.f32 %v1417_v37, %v2676_v53 }
 0x173   :  { %v1419_v34 = vadd.f32 %v1418_v27, %v2664_v48 }
 0x175   :  { %v1420_v14 = vadd.f32 %v1419_v34, %v2667_v50 }
 0x177   :  { %v1421_v20 = vadd.f32 %v1420_v14, %v2695_v5 }
 0x179   :  { %v1422_v32 = vadd.f32 %v1421_v20, %v2705_v9 }
 0x17b   :  { %v1423_v31 = vadd.f32 %v1422_v32, %v2688_v1 }
 0x17d   :  { %v1424_v33 = vadd.f32 %v1423_v31, %v2698_v6 }
 0x17f   :  { %v1425_v43 = vadd.f32 %v1424_v33, %v2723_v25 }
 0x181   :  { %v1426_v44 = vadd.f32 %v1425_v43, %v2733_v29 }
 0x183   :  { %v1427_v59 = vadd.f32 %v1426_v44, %v2716_v21 }
 0x185   :  { %v1428_v12 = vadd.f32 %v1427_v59, %v2726_v26 }
 0x187   :  { %v1429_v37 = vadd.f32 %v1428_v12, %v2751_v47 }
 0x189   :  { %v1430_v27 = vadd.f32 %v1429_v37, %v2761_v57 }
 0x18b   :  { %v1431_v14 = vadd.f32 %v1430_v27, %v2744_v41 }
 0x18d   :  { %v1432_v34 = vadd.f32 %v1431_v14, %v2754_v49 }
 0x18f   :  { %v1433_v20 = vadd.f32 %v1432_v34, %v2779_v18 }
 0x191   :  { %v1434_v32 = vadd.f32 %v1433_v20, %v2789_v24 }
 0x193   :  { %v1435_v33 = vadd.f32 %v1434_v32, %v2772_v13 }
 0x195   :  { %v1436_v31 = vadd.f32 %v1435_v33, %v2782_v19 }
 0x197   :  { %v1437_v43 = vadd.f32 %v1436_v31, %v2807_v62 }
 0x199   :  { %v1438_v44 = vadd.f32 %v1437_v43, %v2817_v7 }
 0x19b   :  { %v1439_v59 = vadd.f32 %v1438_v44, %v2800_v55 }
 0x19d   :  { %v1440_v12 = vadd.f32 %v1439_v59, %v2810_v63 }
 0x19f   :  { %v1441_v37 = vadd.f32 %v1440_v12, %v2835_v0 }
 0x1a1   :  { %v1442_v27 = vadd.f32 %v1441_v37, %v2845_v4 }
 0x1a3   :  { %v1443_v14 = vadd.f32 %v1442_v27, %v2828_v46 }
 0x1a5   :  { %v1444_v34 = vadd.f32 %v1443_v14, %v2838_v39 }
 0x1a7   :  { %v1445_v20 = vadd.f32 %v1444_v34, %v2863_v11 }
 0x1a9   :  { %v1446_v32 = vadd.f32 %v1445_v20, %v1062_v22 }
 0x1ab   :  { %v1447_v33 = vadd.f32 %v1446_v32, %v2856_v42 }
 0x1ad   :  { %v1448_v31 = vadd.f32 %v1447_v33, %v2866_v35 }
 0x1af   :  { %v1449_v43 = vrot.slane %v1448_v31, 4 }
 0x1b1   :  { %v1450_v47 = vadd.f32 %v1449_v43, %v1448_v31 }
 0x1b3   :  { %v1451_v44 = vrot.slane %v1450_v47, 2 }
 0x1b5   :  { %v1452_v26 = vadd.f32 %v1451_v44, %v1450_v47 }
 0x1b7   :  { %v1453_v59 = vrot.slane %v1452_v26, 1 }
 0x1b9   :  { %v1454_v21 = vadd.f32 %v1453_v59, %v1452_v26 }
 0x1bb   :  { %v2917_v12 = vmul.f32 0.001953125, %v1454_v21 }
 0x1bd   :  { %v2921_v37 = vsub.f32 %v2761_v57, %v2917_v12  ;;  %v2925_v27 = vsub.f32 %v2744_v41, %v2917_v12  ;;  %v2929_v14 = vsub.f32 %v2754_v49, %v2917_v12  ;;  %v2933_v34 = vsub.f32 %v2779_v18, %v2917_v12 }
 0x1be   :  { %v2937_v21 = vsub.f32 %v2789_v24, %v2917_v12  ;;  %v2941_v26 = vsub.f32 %v2772_v13, %v2917_v12  ;;  %v2945_v41 = vsub.f32 %v2782_v19, %v2917_v12  ;;  %v2949_v47 = vsub.f32 %v2807_v62, %v2917_v12 }
 0x1bf   :  { %v2953_v49 = vsub.f32 %v2817_v7, %v2917_v12  ;;  %v2957_v57 = vsub.f32 %v2800_v55, %v2917_v12  ;;  %v2961_v13 = vsub.f32 %v2810_v63, %v2917_v12  ;;  %v2965_v18 = vsub.f32 %v2835_v0, %v2917_v12 }
 0x1c0   :  { %v2969_v19 = vsub.f32 %v2845_v4, %v2917_v12  ;;  %v2973_v24 = vsub.f32 %v2828_v46, %v2917_v12  ;;  %v2977_v55 = vsub.f32 %v2838_v39, %v2917_v12  ;;  %v2981_v62 = vsub.f32 %v2863_v11, %v2917_v12 }
 0x1c1   :  { %4663 = vst [vmem:[#allocation24_spill] sm:$0xff] %v2965_v18  ;;  %v2984_v63 = vsub.f32 %v1062_v22, %v2917_v12  ;;  %v2988_v7 = vsub.f32 %v2856_v42, %v2917_v12  ;;  %v2992_v4 = vsub.f32 %v2866_v35, %v2917_v12  ;;  %v2996_v46 = vsub.f32 %v2670_v51, %v2917_v12 }
 0x1c2   :  { %4664 = vst [vmem:[#allocation25_spill] sm:$0xff] %v2969_v19  ;;  %4665 = vst [vmem:[#allocation26_spill] sm:$0xff] %v2973_v24  ;;  %v3000_v0 = vsub.f32 %v2673_v52, %v2917_v12  ;;  %v3004_v22 = vsub.f32 %v2679_v54, %v2917_v12  ;;  %v3012_v42 = vsub.f32 %v2684_v60, %v2917_v12 }
 0x1c3   :  { %4666 = vst [vmem:[#allocation27_spill] sm:$0xff] %v2977_v55  ;;  %4667 = vst [vmem:[#allocation28_spill] sm:$0xff] %v2981_v62  ;;  %v1584_v11 = vmul.f32 %v2996_v46, %v2996_v46  ;;  %v3016_v51 = vsub.f32 %v2691_v3, %v2917_v12  ;;  %v3022_v54 = vsub.f32 %v2702_v8, %v2917_v12 }
 0x1c4   :  { %v1585_v39 = vmul.f32 %v3000_v0, %v3000_v0  ;;  %v1586_v52 = vmul.f32 %v3004_v22, %v3004_v22  ;;  %v1587_v20 = vmul.f32 %v3012_v42, %v3012_v42  ;;  %v3028_v60 = vsub.f32 %v2708_v10, %v2917_v12 }
 0x1c5   :  { %v1588_v3 = vmul.f32 %v3016_v51, %v3016_v51  ;;  %v3034_v31 = vsub.f32 %v2712_v16, %v2917_v12  ;;  %v1589_v8 = vmul.f32 %v3022_v54, %v3022_v54  ;;  %v3040_v44 = vsub.f32 %v2719_v23, %v2917_v12 }
 0x1c6   :  { %v1648_v35 = vadd.f32 %v1585_v39, %v1584_v11  ;;  %v1590_v10 = vmul.f32 %v3028_v60, %v3028_v60  ;;  %v3046_v11 = vsub.f32 %v2730_v28, %v2917_v12 }
 0x1c7   :  { %v1591_v16 = vmul.f32 %v3034_v31, %v3034_v31  ;;  %v1592_v23 = vmul.f32 %v3040_v44, %v3040_v44 }
 0x1c8   :  { %v1649_v32 = vadd.f32 %v1648_v35, %v1586_v52  ;;  %v3052_v52 = vsub.f32 %v2736_v30, %v2917_v12  ;;  %v1593_v28 = vmul.f32 %v3046_v11, %v3046_v11 }
 0x1ca   :  { %v1650_v33 = vadd.f32 %v1649_v32, %v1587_v20  ;;  %v3058_v20 = vsub.f32 %v2740_v36, %v2917_v12  ;;  %v1594_v30 = vmul.f32 %v3052_v52, %v3052_v52 }
 0x1cc   :  { %v1651_v43 = vadd.f32 %v1650_v33, %v1588_v3  ;;  %v3064_v3 = vsub.f32 %v2747_v45, %v2917_v12  ;;  %v1595_v36 = vmul.f32 %v3058_v20, %v3058_v20 }
 0x1ce   :  { %v1652_v59 = vadd.f32 %v1651_v43, %v1589_v8  ;;  %v3070_v8 = vsub.f32 %v2758_v56, %v2917_v12  ;;  %v1596_v45 = vmul.f32 %v3064_v3, %v3064_v3 }
 0x1d0   :  { %v1653_v39 = vadd.f32 %v1652_v59, %v1590_v10  ;;  %v3076_v10 = vsub.f32 %v2764_v58, %v2917_v12  ;;  %v1597_v56 = vmul.f32 %v3070_v8, %v3070_v8 }
 0x1d2   :  { %v1654_v35 = vadd.f32 %v1653_v39, %v1591_v16  ;;  %v3082_v16 = vsub.f32 %v2768_v2, %v2917_v12  ;;  %v1598_v58 = vmul.f32 %v3076_v10, %v3076_v10 }
 0x1d4   :  { %v1655_v32 = vadd.f32 %v1654_v35, %v1592_v23  ;;  %4668 = vst [vmem:[#allocation29_spill] sm:$0xff] %v3082_v16  ;;  %v3088_v23 = vsub.f32 %v2775_v15, %v2917_v12  ;;  %v1599_v2 = vmul.f32 %v3082_v16, %v3082_v16 }
 0x1d6   :  { %v1656_v33 = vadd.f32 %v1655_v32, %v1593_v28  ;;  %4669 = vst [vmem:[#allocation30_spill] sm:$0xff] %v3088_v23  ;;  %v4670_v28 = vld [vmem:[#allocation12_spill] sm:$0xff]  ;;  %v1600_v15 = vmul.f32 %v3088_v23, %v3088_v23 }
 0x1d7   :  { %v3094_v32 = vsub.f32 %v4670_v28, %v2917_v12  ;;  %v4676_v28 = vld [vmem:[#allocation15_spill] sm:$0xff] }
 0x1d8   :  { %v1657_v43 = vadd.f32 %v1656_v33, %v1594_v30  ;;  %v4672_v33 = vld [vmem:[#allocation13_spill] sm:$0xff]  ;;  %v3112_v16 = vsub.f32 %v4676_v28, %v2917_v12  ;;  %v4681_v28 = vld [vmem:[#allocation18_spill] sm:$0xff] }
 0x1d9   :  { %4671 = vst [vmem:[#allocation12_spill] sm:$0xff] %v3094_v32 }
 0x1da   :  { %v1658_v59 = vadd.f32 %v1657_v43, %v1595_v36  ;;  %v3100_v36 = vsub.f32 %v4672_v33, %v2917_v12  ;;  %4677 = vst [vmem:[#allocation15_spill] sm:$0xff] %v3112_v16  ;;  %v4678_v33 = vld [vmem:[#allocation16_spill] sm:$0xff] }
 0x1db   :  { %v3118_v23 = vsub.f32 %v4678_v33, %v2917_v12  ;;  %v4683_v33 = vld [vmem:[#allocation19_spill] sm:$0xff] }
 0x1dc   :  { %v1659_v39 = vadd.f32 %v1658_v59, %v1596_v45  ;;  %4673 = vst [vmem:[#allocation13_spill] sm:$0xff] %v3100_v36  ;;  %v4674_v45 = vld [vmem:[#allocation14_spill] sm:$0xff] }
 0x1dd   :  { %v3106_v59 = vsub.f32 %v4674_v45, %v2917_v12  ;;  %4679 = vst [vmem:[#allocation16_spill] sm:$0xff] %v3118_v23  ;;  %v4680_v45 = vld [vmem:[#allocation17_spill] sm:$0xff] }
 0x1de   :  { %v1660_v35 = vadd.f32 %v1659_v39, %v1597_v56  ;;  %v1601_v56 = vmul.f32 %v3094_v32, %v3094_v32  ;;  %v3124_v32 = vsub.f32 %v4680_v45, %v2917_v12  ;;  %v4684_v45 = vld [vmem:[#allocation20_spill] sm:$0xff] }
 0x1df   :  { %4675 = vst [vmem:[#allocation14_spill] sm:$0xff] %v3106_v59 }
 0x1e0   :  { %v1661_v30 = vadd.f32 %v1660_v35, %v1598_v58  ;;  %v1602_v58 = vmul.f32 %v3100_v36, %v3100_v36  ;;  %v3130_v36 = vsub.f32 %v4681_v28, %v2917_v12  ;;  %v4686_v28 = vld [vmem:[#allocation21_spill] sm:$0xff] }
 0x1e2   :  { %v1662_v43 = vadd.f32 %v1661_v30, %v1599_v2  ;;  %v1603_v2 = vmul.f32 %v3106_v59, %v3106_v59  ;;  %4682 = vst [vmem:[#allocation17_spill] sm:$0xff] %v3130_v36  ;;  %v3136_v59 = vsub.f32 %v4683_v33, %v2917_v12  ;;  %v3154_v33 = vsub.f32 %v2852_v38, %v2917_v12 }
 0x1e4   :  { %v1663_v39 = vadd.f32 %v1662_v43, %v1600_v15  ;;  %v1604_v15 = vmul.f32 %v3112_v16, %v3112_v16  ;;  %v3142_v16 = vsub.f32 %v4684_v45, %v2917_v12  ;;  %v4687_v45 = vld [vmem:[#allocation22_spill] sm:$0xff]  ;;  %v1611_v38 = vmul.f32 %v3154_v33, %v3154_v33 }
 0x1e6   :  { %v1664_v35 = vadd.f32 %v1663_v39, %v1601_v56  ;;  %v1605_v56 = vmul.f32 %v3118_v23, %v3118_v23  ;;  %4685 = vst [vmem:[#allocation18_spill] sm:$0xff] %v3142_v16  ;;  %v3148_v23 = vsub.f32 %v4686_v28, %v2917_v12  ;;  %v3166_v28 = vsub.f32 %v2870_v17, %v2917_v12 }
 0x1e8   :  { %v1665_v30 = vadd.f32 %v1664_v35, %v1602_v58  ;;  %v1606_v58 = vmul.f32 %v3124_v32, %v3124_v32  ;;  %v1613_v17 = vmul.f32 %v3166_v28, %v3166_v28 }
 0x1ea   :  { %v1666_v43 = vadd.f32 %v1665_v30, %v1603_v2  ;;  %v1607_v2 = vmul.f32 %v3130_v36, %v3130_v36  ;;  %v3160_v36 = vsub.f32 %v4687_v45, %v2917_v12  ;;  %v3178_v45 = vsub.f32 %v2878_v61, %v2917_v12 }
 0x1ec   :  { %v1667_v39 = vadd.f32 %v1666_v43, %v1604_v15  ;;  %v1608_v15 = vmul.f32 %v3136_v59, %v3136_v59  ;;  %v1615_v61 = vmul.f32 %v3178_v45, %v3178_v45 }
 0x1ee   :  { %v1668_v35 = vadd.f32 %v1667_v39, %v1605_v56  ;;  %v1609_v56 = vmul.f32 %v3142_v16, %v3142_v16 }
 0x1f0   :  { %v1669_v30 = vadd.f32 %v1668_v35, %v1606_v58  ;;  %v1610_v58 = vmul.f32 %v3148_v23, %v3148_v23 }
 0x1f2   :  { %v1670_v43 = vadd.f32 %v1669_v30, %v1607_v2  ;;  %v4688_v30 = vld [vmem:[#allocation23_spill] sm:$0xff] }
 0x1f3   :  { %v3172_v16 = vsub.f32 %v4688_v30, %v2917_v12  ;;  %v3190_v30 = vsub.f32 %v2676_v53, %v2917_v12 }
 0x1f4   :  { %v1671_v39 = vadd.f32 %v1670_v43, %v1608_v15  ;;  %v1612_v15 = vmul.f32 %v3160_v36, %v3160_v36 }
 0x1f5   :  { %v1617_v53 = vmul.f32 %v3190_v30, %v3190_v30 }
 0x1f6   :  { %v1672_v35 = vadd.f32 %v1671_v39, %v1609_v56  ;;  %v3184_v39 = vsub.f32 %v2883_v40, %v2917_v12 }
 0x1f8   :  { %v1673_v2 = vadd.f32 %v1672_v35, %v1610_v58  ;;  %v1614_v58 = vmul.f32 %v3172_v16, %v3172_v16  ;;  %v1616_v40 = vmul.f32 %v3184_v39, %v3184_v39 }
 0x1fa   :  { %v1674_v43 = vadd.f32 %v1673_v2, %v1611_v38  ;;  %v3196_v2 = vsub.f32 %v2664_v48, %v2917_v12 }
 0x1fc   :  { %v1675_v56 = vadd.f32 %v1674_v43, %v1612_v15  ;;  %v3202_v43 = vsub.f32 %v2667_v50, %v2917_v12  ;;  %v1618_v48 = vmul.f32 %v3196_v2, %v3196_v2 }
 0x1fe   :  { %v1676_v35 = vadd.f32 %v1675_v56, %v1613_v17  ;;  %v3208_v56 = vsub.f32 %v2695_v5, %v2917_v12  ;;  %v1619_v50 = vmul.f32 %v3202_v43, %v3202_v43 }
 0x200   :  { %v1677_v38 = vadd.f32 %v1676_v35, %v1614_v58  ;;  %v3214_v35 = vsub.f32 %v2705_v9, %v2917_v12  ;;  %v1620_v5 = vmul.f32 %v3208_v56, %v3208_v56 }
 0x202   :  { %v1678_v15 = vadd.f32 %v1677_v38, %v1615_v61  ;;  %4689 = vst [vmem:[#allocation19_spill] sm:$0xff] %v3214_v35  ;;  %v3220_v38 = vsub.f32 %v2688_v1, %v2917_v12  ;;  %v1621_v9 = vmul.f32 %v3214_v35, %v3214_v35 }
 0x204   :  { %v1679_v17 = vadd.f32 %v1678_v15, %v1616_v40  ;;  %4690 = vst [vmem:[#allocation20_spill] sm:$0xff] %v3220_v38  ;;  %v3226_v15 = vsub.f32 %v2698_v6, %v2917_v12  ;;  %v1622_v1 = vmul.f32 %v3220_v38, %v3220_v38 }
 0x206   :  { %v1680_v58 = vadd.f32 %v1679_v17, %v1617_v53  ;;  %4691 = vst [vmem:[#allocation21_spill] sm:$0xff] %v3226_v15  ;;  %v3232_v17 = vsub.f32 %v2723_v25, %v2917_v12  ;;  %v1623_v6 = vmul.f32 %v3226_v15, %v3226_v15 }
 0x208   :  { %v1681_v61 = vadd.f32 %v1680_v58, %v1618_v48  ;;  %v3238_v58 = vsub.f32 %v2733_v29, %v2917_v12  ;;  %v1624_v25 = vmul.f32 %v3232_v17, %v3232_v17 }
 0x20a   :  { %v1682_v40 = vadd.f32 %v1681_v61, %v1619_v50  ;;  %4692 = vst [vmem:[#allocation22_spill] sm:$0xff] %v3238_v58  ;;  %v4693_v61 = vld [vmem:[#allocation9_spill] sm:$0xff]  ;;  %v1625_v29 = vmul.f32 %v3238_v58, %v3238_v58  ;;  %v1629_v58 = vmul.f32 %v2921_v37, %v2921_v37 }
 0x20b   :  { %v3244_v35 = vsub.f32 %v4693_v61, %v2917_v12 }
 0x20c   :  { %v1683_v53 = vadd.f32 %v1682_v40, %v1620_v5  ;;  %v4694_v40 = vld [vmem:[#allocation10_spill] sm:$0xff] }
 0x20d   :  { %v3250_v38 = vsub.f32 %v4694_v40, %v2917_v12 }
 0x20e   :  { %v1684_v48 = vadd.f32 %v1683_v53, %v1621_v9  ;;  %v4695_v53 = vld [vmem:[#allocation11_spill] sm:$0xff] }
 0x20f   :  { %v3256_v15 = vsub.f32 %v4695_v53, %v2917_v12  ;;  %v1627_v61 = vmul.f32 %v3250_v38, %v3250_v38  ;;  %v1630_v12 = vmul.f32 %v2925_v27, %v2925_v27  ;;  %v1631_v53 = vmul.f32 %v2929_v14, %v2929_v14 }
 0x210   :  { %v1685_v50 = vadd.f32 %v1684_v48, %v1622_v1  ;;  %v1626_v1 = vmul.f32 %v3244_v35, %v3244_v35 }
 0x212   :  { %v1686_v5 = vadd.f32 %v1685_v50, %v1623_v6  ;;  %v1628_v50 = vmul.f32 %v3256_v15, %v3256_v15 }
 0x214   :  { %v1687_v9 = vadd.f32 %v1686_v5, %v1624_v25 }
 0x216   :  { %v1688_v48 = vadd.f32 %v1687_v9, %v1625_v29  ;;  %v1632_v9 = vmul.f32 %v2933_v34, %v2933_v34 }
 0x218   :  { %v1689_v6 = vadd.f32 %v1688_v48, %v1626_v1  ;;  %v1633_v48 = vmul.f32 %v2937_v21, %v2937_v21 }
 0x21a   :  { %v1690_v40 = vadd.f32 %v1689_v6, %v1627_v61  ;;  %v1634_v6 = vmul.f32 %v2941_v26, %v2941_v26 }
 0x21c   :  { %v1691_v25 = vadd.f32 %v1690_v40, %v1628_v50  ;;  %v1635_v40 = vmul.f32 %v2945_v41, %v2945_v41 }
 0x21e   :  { %v1692_v5 = vadd.f32 %v1691_v25, %v1629_v58  ;;  %v1636_v25 = vmul.f32 %v2949_v47, %v2949_v47 }
 0x220   :  { %v1693_v29 = vadd.f32 %v1692_v5, %v1630_v12  ;;  %v1637_v5 = vmul.f32 %v2953_v49, %v2953_v49 }
 0x222   :  { %v1694_v1 = vadd.f32 %v1693_v29, %v1631_v53  ;;  %v1638_v29 = vmul.f32 %v2957_v57, %v2957_v57 }
 0x224   :  { %v1695_v61 = vadd.f32 %v1694_v1, %v1632_v9  ;;  %v1639_v1 = vmul.f32 %v2961_v13, %v2961_v13 }
 0x226   :  { %v1696_v50 = vadd.f32 %v1695_v61, %v1633_v48  ;;  %v1640_v61 = vmul.f32 %v2965_v18, %v2965_v18 }
 0x228   :  { %v1697_v58 = vadd.f32 %v1696_v50, %v1634_v6  ;;  %v1641_v50 = vmul.f32 %v2969_v19, %v2969_v19 }
 0x22a   :  { %v1698_v12 = vadd.f32 %v1697_v58, %v1635_v40  ;;  %v1642_v58 = vmul.f32 %v2973_v24, %v2973_v24 }
 0x22c   :  { %v1699_v53 = vadd.f32 %v1698_v12, %v1636_v25  ;;  %v1643_v12 = vmul.f32 %v2977_v55, %v2977_v55 }
 0x22e   :  { %v1700_v9 = vadd.f32 %v1699_v53, %v1637_v5  ;;  %v1644_v53 = vmul.f32 %v2981_v62, %v2981_v62 }
 0x230   :  { %v1701_v48 = vadd.f32 %v1700_v9, %v1638_v29  ;;  %v1645_v9 = vmul.f32 %v2984_v63, %v2984_v63 }
 0x232   :  { %v1702_v6 = vadd.f32 %v1701_v48, %v1639_v1  ;;  %v1646_v48 = vmul.f32 %v2988_v7, %v2988_v7 }
 0x234   :  { %v1703_v40 = vadd.f32 %v1702_v6, %v1640_v61  ;;  %v1647_v6 = vmul.f32 %v2992_v4, %v2992_v4 }
 0x236   :  { %v1704_v25 = vadd.f32 %v1703_v40, %v1641_v50 }
 0x238   :  { %v1705_v5 = vadd.f32 %v1704_v25, %v1642_v58 }
 0x23a   :  { %v1706_v29 = vadd.f32 %v1705_v5, %v1643_v12 }
 0x23c   :  { %v1707_v1 = vadd.f32 %v1706_v29, %v1644_v53 }
 0x23e   :  { %v1708_v61 = vadd.f32 %v1707_v1, %v1645_v9  ;;  %v4703_v1 = vld [vmem:[#allocation29_spill] sm:$0xff] }
 0x240   :  { %v1709_v50 = vadd.f32 %v1708_v61, %v1646_v48  ;;  %v4704_v48 = vld [vmem:[#allocation30_spill] sm:$0xff]  ;;  %v4705_v61 = vld [vmem:[#allocation12_spill] sm:$0xff] }
 0x242   :  { %v1710_v40 = vadd.f32 %v1709_v50, %v1647_v6  ;;  %v4706_v6 = vld [vmem:[#allocation13_spill] sm:$0xff]  ;;  %v4707_v50 = vld [vmem:[#allocation14_spill] sm:$0xff] }
 0x244   :  { %v1711_v24 = vrot.slane %v1710_v40, 4 }
 0x246   :  { %v1712_v55 = vadd.f32 %v1711_v24, %v1710_v40  ;;  %v4708_v40 = vld [vmem:[#allocation15_spill] sm:$0xff] }
 0x248   :  { %v1713_v58 = vrot.slane %v1712_v55, 2 }
 0x24a   :  { %v1714_v25 = vadd.f32 %v1713_v58, %v1712_v55  ;;  %v4709_v58 = vld [vmem:[#allocation16_spill] sm:$0xff] }
 0x24c   :  { %v1715_v19 = vrot.slane %v1714_v25, 1 }
 0x24e   :  { %v1716_v62 = vadd.f32 %v1715_v19, %v1714_v25 }
 0x250   :  { %v1717_v12 = vmul.f32 0.001953125, %v1716_v62 }
 0x252   :  { %v1718_v5 = vadd.f32 1e-05, %v1717_v12  ;;  %v4710_v12 = vld [vmem:[#allocation17_spill] sm:$0xff] }
 0x254   :  { %2413 = vrsqrt.f32 %v1718_v5 }
 0x25e   :  { %v3302_v18 = vpop.eup %2413 }
 0x25f   :  { %v3306_v53 = vmul.f32 %v3302_v18, %v2996_v46  ;;  %v3310_v29 = vmul.f32 %v3302_v18, %v3000_v0  ;;  %v3314_v24 = vmul.f32 %v3302_v18, %v3004_v22  ;;  %v3318_v19 = vmul.f32 %v3302_v18, %v3012_v42 }
 0x260   :  { %v3322_v55 = vmul.f32 %v3302_v18, %v2984_v63  ;;  %v3326_v62 = vmul.f32 %v3302_v18, %v2988_v7  ;;  %v3330_v46 = vmul.f32 %v3302_v18, %v2992_v4  ;;  %v1724_v0 = vmul.f32 %v3302_v18, %v3016_v51 }
 0x261   :  { %4696 = vst [vmem:[#allocation23_spill] sm:$0xff] %v3306_v53  ;;  %4697 = vst [vmem:[#allocation9_spill] sm:$0xff] %v3310_v29  ;;  %v1725_v22 = vmul.f32 %v3302_v18, %v3022_v54  ;;  %v1726_v42 = vmul.f32 %v3302_v18, %v3028_v60  ;;  %v1727_v63 = vmul.f32 %v3302_v18, %v3034_v31  ;;  %v4719_v29 = vld [vmem:[#allocation26_spill] sm:$0xff]  ;;  %v4720_v53 = vld [vmem:[#allocation27_spill] sm:$0xff] }
 0x262   :  { %4698 = vst [vmem:[#allocation10_spill] sm:$0xff] %v3314_v24  ;;  %4699 = vst [vmem:[#allocation11_spill] sm:$0xff] %v3318_v19  ;;  %v1728_v7 = vmul.f32 %v3302_v18, %v3040_v44  ;;  %v1729_v9 = vmul.f32 %v3302_v18, %v3046_v11  ;;  %v1730_v4 = vmul.f32 %v3302_v18, %v3052_v52  ;;  %v3428_v19 = vld [vmem:[#allocation6] ss:$0 sm:$0xff]  ;;  %v4718_v24 = vld [vmem:[#allocation25_spill] sm:$0xff] }
 0x263   :  { %4700 = vst [vmem:[#allocation31_spill] sm:$0xff] %v3322_v55  ;;  %4701 = vst [vmem:[#allocation32_spill] sm:$0xff] %v3326_v62  ;;  %v1731_v51 = vmul.f32 %v3302_v18, %v3058_v20  ;;  %v1732_v54 = vmul.f32 %v3302_v18, %v3064_v3  ;;  %v1733_v60 = vmul.f32 %v3302_v18, %v3070_v8  ;;  %v4714_v62 = vld [vmem:[#allocation21_spill] sm:$0xff]  ;;  %v4715_v55 = vld [vmem:[#allocation22_spill] sm:$0xff] }
 0x264   :  { %4702 = vst [vmem:[#allocation33_spill] sm:$0xff] %v3330_v46  ;;  %v1734_v31 = vmul.f32 %v3302_v18, %v3076_v10  ;;  %v1735_v44 = vmul.f32 %v3302_v18, %v4703_v1  ;;  %v1736_v11 = vmul.f32 %v3302_v18, %v4704_v48  ;;  %v1737_v52 = vmul.f32 %v3302_v18, %v4705_v61  ;;  %v4711_v48 = vld [vmem:[#allocation18_spill] sm:$0xff]  ;;  %v4713_v46 = vld [vmem:[#allocation20_spill] sm:$0xff] }
 0x265   :  { %v1738_v20 = vmul.f32 %v3302_v18, %v4706_v6  ;;  %v1739_v3 = vmul.f32 %v3302_v18, %v4707_v50  ;;  %v1740_v8 = vmul.f32 %v3302_v18, %v4708_v40  ;;  %v1741_v10 = vmul.f32 %v3302_v18, %v4709_v58  ;;  %4716 = vst [vmem:[#allocation29_spill] sm:$0xff] %v3428_v19 }
 0x266   :  { %v1742_v25 = vmul.f32 %v3302_v18, %v3124_v32  ;;  %v1743_v5 = vmul.f32 %v3302_v18, %v4710_v12  ;;  %v1744_v1 = vmul.f32 %v3302_v18, %v3136_v59  ;;  %v1745_v61 = vmul.f32 %v3302_v18, %v4711_v48  ;;  %v4712_v48 = vld [vmem:[#allocation19_spill] sm:$0xff] }
 0x267   :  { %v1746_v6 = vmul.f32 %v3302_v18, %v3148_v23  ;;  %v1747_v50 = vmul.f32 %v3302_v18, %v3154_v33  ;;  %v1748_v40 = vmul.f32 %v3302_v18, %v3160_v36  ;;  %v1749_v32 = vmul.f32 %v3302_v18, %v3166_v28 }
 0x268   :  { %v1750_v58 = vmul.f32 %v3302_v18, %v3172_v16  ;;  %v1751_v59 = vmul.f32 %v3302_v18, %v3178_v45  ;;  %v1752_v12 = vmul.f32 %v3302_v18, %v3184_v39  ;;  %v1753_v23 = vmul.f32 %v3302_v18, %v3190_v30 }
 0x269   :  { %v1754_v33 = vmul.f32 %v3302_v18, %v3196_v2  ;;  %v1755_v36 = vmul.f32 %v3302_v18, %v3202_v43  ;;  %v1756_v28 = vmul.f32 %v3302_v18, %v3208_v56  ;;  %v1757_v16 = vmul.f32 %v3302_v18, %v4712_v48 }
 0x26a   :  { %v1758_v45 = vmul.f32 %v3302_v18, %v4713_v46  ;;  %v1759_v39 = vmul.f32 %v3302_v18, %v4714_v62  ;;  %v1760_v30 = vmul.f32 %v3302_v18, %v3232_v17  ;;  %v1761_v2 = vmul.f32 %v3302_v18, %v4715_v55 }
 0x26b   :  { %v1762_v43 = vmul.f32 %v3302_v18, %v3244_v35  ;;  %v1763_v56 = vmul.f32 %v3302_v18, %v3250_v38  ;;  %v1764_v48 = vmul.f32 %v3302_v18, %v3256_v15  ;;  %v1765_v46 = vmul.f32 %v3302_v18, %v2921_v37 }
 0x26c   :  { %v1766_v62 = vmul.f32 %v3302_v18, %v2925_v27  ;;  %v1767_v17 = vmul.f32 %v3302_v18, %v2929_v14  ;;  %v1768_v55 = vmul.f32 %v3302_v18, %v2933_v34  ;;  %v1769_v35 = vmul.f32 %v3302_v18, %v2937_v21  ;;  %v4717_v21 = vld [vmem:[#allocation24_spill] sm:$0xff] }
 0x26d   :  { %v1770_v38 = vmul.f32 %v3302_v18, %v2941_v26  ;;  %v1771_v15 = vmul.f32 %v3302_v18, %v2945_v41  ;;  %v1772_v37 = vmul.f32 %v3302_v18, %v2949_v47  ;;  %v1773_v27 = vmul.f32 %v3302_v18, %v2953_v49  ;;  %v4721_v49 = vld [vmem:[#allocation28_spill] sm:$0xff] }
 0x26e   :  { %v1774_v14 = vmul.f32 %v3302_v18, %v2957_v57  ;;  %v1775_v34 = vmul.f32 %v3302_v18, %v2961_v13  ;;  %v1776_v26 = vmul.f32 %v3302_v18, %v4717_v21  ;;  %v1777_v41 = vmul.f32 %v3302_v18, %v4718_v24  ;;  %v4722_v13 = vld [vmem:[#allocation23_spill] sm:$0xff]  ;;  %v4723_v21 = vld [vmem:[#allocation29_spill] sm:$0xff] }
 0x26f   :  { %v1778_v19 = vmul.f32 %v3302_v18, %v4719_v29  ;;  %v1779_v47 = vmul.f32 %v3302_v18, %v4720_v53  ;;  %v1780_v57 = vmul.f32 %v3302_v18, %v4721_v49  ;;  %v3450_v24 = vmul.f32 %v4723_v21, %v4722_v13  ;;  %v4725_v29 = vld [vmem:[#allocation9_spill] sm:$0xff]  ;;  %v4727_v18 = vld [vmem:[#allocation10_spill] sm:$0xff]  ;;  %v4729_v13 = vld [vmem:[#allocation11_spill] sm:$0xff] }
 0x270   :  { %v3454_v53 = vmul.f32 %v4723_v21, %v4725_v29  ;;  %v3458_v49 = vmul.f32 %v4723_v21, %v4727_v18  ;;  %v3465_v29 = vmul.f32 %v4723_v21, %v1724_v0  ;;  %v3471_v18 = vmul.f32 %v4723_v21, %v1726_v42 }
 0x271   :  { %4724 = vst [vmem:[#allocation30_spill] sm:$0xff] %v3450_v24  ;;  %v3462_v24 = vmul.f32 %v4723_v21, %v4729_v13  ;;  %v3477_v13 = vmul.f32 %v4723_v21, %v1728_v7  ;;  %v3483_v0 = vmul.f32 %v4723_v21, %v1730_v4  ;;  %v3492_v42 = vmul.f32 %v4723_v21, %v1733_v60 }
 0x272   :  { %4726 = vst [vmem:[#allocation12_spill] sm:$0xff] %v3454_v53  ;;  %4728 = vst [vmem:[#allocation13_spill] sm:$0xff] %v3458_v49  ;;  %v3468_v53 = vmul.f32 %v4723_v21, %v1725_v22  ;;  %v3474_v49 = vmul.f32 %v4723_v21, %v1727_v63  ;;  %v3489_v22 = vmul.f32 %v4723_v21, %v1732_v54 }
 0x273   :  { %4730 = vst [vmem:[#allocation14_spill] sm:$0xff] %v3462_v24  ;;  %4731 = vst [vmem:[#allocation15_spill] sm:$0xff] %v3465_v29  ;;  %v3480_v24 = vmul.f32 %v4723_v21, %v1729_v9  ;;  %v3486_v29 = vmul.f32 %v4723_v21, %v1731_v51  ;;  %v3495_v63 = vmul.f32 %v4723_v21, %v1734_v31 }
 0x274   :  { %v3498_v7 = vmul.f32 %v4723_v21, %v1735_v44  ;;  %v3501_v9 = vmul.f32 %v4723_v21, %v1736_v11  ;;  %v3504_v4 = vmul.f32 %v4723_v21, %v1737_v52  ;;  %v3507_v51 = vmul.f32 %v4723_v21, %v1738_v20 }
 0x275   :  { %v3510_v54 = vmul.f32 %v4723_v21, %v1739_v3  ;;  %v3513_v60 = vmul.f32 %v4723_v21, %v1740_v8  ;;  %v3516_v31 = vmul.f32 %v4723_v21, %v1741_v10  ;;  %v3519_v44 = vmul.f32 %v4723_v21, %v1742_v25 }
 0x276   :  { %v3522_v11 = vmul.f32 %v4723_v21, %v1743_v5  ;;  %v3525_v52 = vmul.f32 %v4723_v21, %v1744_v1  ;;  %v3528_v20 = vmul.f32 %v4723_v21, %v1745_v61  ;;  %v3531_v3 = vmul.f32 %v4723_v21, %v1746_v6 }
 0x277   :  { %v3534_v8 = vmul.f32 %v4723_v21, %v1747_v50  ;;  %v3537_v10 = vmul.f32 %v4723_v21, %v1748_v40  ;;  %v3540_v25 = vmul.f32 %v4723_v21, %v1749_v32  ;;  %v3543_v5 = vmul.f32 %v4723_v21, %v1750_v58 }
 0x278   :  { %v3546_v1 = vmul.f32 %v4723_v21, %v1751_v59  ;;  %v3549_v61 = vmul.f32 %v4723_v21, %v1752_v12  ;;  %v3552_v6 = vmul.f32 %v4723_v21, %v1753_v23  ;;  %v3555_v50 = vmul.f32 %v4723_v21, %v1754_v33 }
 0x279   :  { %v3558_v40 = vmul.f32 %v4723_v21, %v1755_v36  ;;  %v3561_v32 = vmul.f32 %v4723_v21, %v1756_v28  ;;  %v3564_v58 = vmul.f32 %v4723_v21, %v1757_v16  ;;  %v3567_v59 = vmul.f32 %v4723_v21, %v1758_v45 }
 0x27a   :  { %v3570_v12 = vmul.f32 %v4723_v21, %v1759_v39  ;;  %v3573_v23 = vmul.f32 %v4723_v21, %v1760_v30  ;;  %v3576_v33 = vmul.f32 %v4723_v21, %v1761_v2  ;;  %v3579_v36 = vmul.f32 %v4723_v21, %v1762_v43 }
 0x27b   :  { %v3582_v28 = vmul.f32 %v4723_v21, %v1763_v56  ;;  %v3585_v16 = vmul.f32 %v4723_v21, %v1764_v48  ;;  %v3588_v45 = vmul.f32 %v4723_v21, %v1765_v46  ;;  %v3591_v39 = vmul.f32 %v4723_v21, %v1766_v62 }
 0x27c   :  { %v3594_v30 = vmul.f32 %v4723_v21, %v1767_v17  ;;  %v3597_v2 = vmul.f32 %v4723_v21, %v1768_v55  ;;  %v3600_v43 = vmul.f32 %v4723_v21, %v1769_v35  ;;  %v3603_v56 = vmul.f32 %v4723_v21, %v1770_v38  ;;  %v3620_v55 = vld [vmem:[%s4586_s4] ss:$0 sm:$0xff] }
 0x27d   :  { %v3606_v48 = vmul.f32 %v4723_v21, %v1771_v15  ;;  %v3609_v46 = vmul.f32 %v4723_v21, %v1772_v37  ;;  %v3612_v62 = vmul.f32 %v4723_v21, %v1773_v27  ;;  %v3615_v17 = vmul.f32 %v4723_v21, %v1774_v14 }
 0x27e   :  { %v3623_v35 = vmul.f32 %v4723_v21, %v1775_v34  ;;  %v3626_v38 = vmul.f32 %v4723_v21, %v1776_v26  ;;  %v3629_v15 = vmul.f32 %v4723_v21, %v1777_v41  ;;  %v3632_v37 = vmul.f32 %v4723_v21, %v1778_v19  ;;  %v4739_v34 = vld [vmem:[#allocation32_spill] sm:$0xff]  ;;  %v4742_v19 = vld [vmem:[#allocation30_spill] sm:$0xff] }
 0x27f   :  { %4732 = vst [vmem:[#allocation16_spill] sm:$0xff] %v3612_v62  ;;  %4733 = vst [vmem:[#allocation17_spill] sm:$0xff] %v3615_v17  ;;  %v3635_v27 = vmul.f32 %v4723_v21, %v1779_v47  ;;  %v3638_v14 = vmul.f32 %v4723_v21, %v1780_v57  ;;  %v4737_v17 = vld [vmem:[#allocation31_spill] sm:$0xff]  ;;  %v3646_v26 = vmul.f32 %v4723_v21, %v4739_v34  ;;  %v4743_v47 = vld [vmem:[#allocation12_spill] sm:$0xff] }
 0x280   :  { %4734 = vst [vmem:[#allocation18_spill] sm:$0xff] %v3626_v38  ;;  %4735 = vst [vmem:[#allocation19_spill] sm:$0xff] %v3632_v37  ;;  %v3642_v62 = vmul.f32 %v4723_v21, %v4737_v17  ;;  %v4741_v38 = vld [vmem:[#allocation33_spill] sm:$0xff]  ;;  %v3654_v37 = vadd.f32 %v3620_v55, %v4742_v19  ;;  %v3658_v57 = vadd.f32 %v3620_v55, %v4743_v47 }
 0x281   :  { %4736 = vst [vmem:[#allocation20_spill] sm:$0xff] %v3638_v14  ;;  %4740 = vst [vmem:[#allocation22_spill] sm:$0xff] %v3646_v26  ;;  %v3650_v41 = vmul.f32 %v4723_v21, %v4741_v38  ;;  %v4744_v14 = vld [vmem:[#allocation13_spill] sm:$0xff]  ;;  %v4746_v26 = vld [vmem:[#allocation15_spill] sm:$0xff]  ;;  %v3674_v38 = vadd.f32 %v3620_v55, %v3468_v53  ;;  %v3678_v19 = vadd.f32 %v3620_v55, %v3471_v18 }
 0x282   :  { %4738 = vst [vmem:[#allocation21_spill] sm:$0xff] %v3642_v62  ;;  %v3662_v17 = vadd.f32 %v3620_v55, %v4744_v14  ;;  %v4745_v62 = vld [vmem:[#allocation14_spill] sm:$0xff]  ;;  %v3670_v21 = vadd.f32 %v3620_v55, %v4746_v26  ;;  %v3682_v14 = vadd.f32 %v3620_v55, %v3474_v49  ;;  %v3690_v26 = vadd.f32 %v3620_v55, %v3480_v24 }
 0x283   :  { %v3666_v34 = vadd.f32 %v3620_v55, %v4745_v62  ;;  %v3686_v62 = vadd.f32 %v3620_v55, %v3477_v13  ;;  %v3694_v53 = vadd.f32 %v3620_v55, %v3483_v0  ;;  %v3698_v18 = vadd.f32 %v3620_v55, %v3486_v29 }
 0x284   :  { %v3702_v49 = vadd.f32 %v3620_v55, %v3489_v22  ;;  %v3706_v13 = vadd.f32 %v3620_v55, %v3492_v42  ;;  %v3710_v24 = vadd.f32 %v3620_v55, %v3495_v63  ;;  %v3714_v0 = vadd.f32 %v3620_v55, %v3498_v7 }
 0x285   :  { %v3718_v29 = vadd.f32 %v3620_v55, %v3501_v9  ;;  %v3722_v22 = vadd.f32 %v3620_v55, %v3504_v4  ;;  %v3726_v42 = vadd.f32 %v3620_v55, %v3507_v51  ;;  %v3730_v63 = vadd.f32 %v3620_v55, %v3510_v54 }
 0x286   :  { %v3734_v7 = vadd.f32 %v3620_v55, %v3513_v60  ;;  %v3738_v9 = vadd.f32 %v3620_v55, %v3516_v31  ;;  %v3742_v4 = vadd.f32 %v3620_v55, %v3519_v44  ;;  %v3746_v51 = vadd.f32 %v3620_v55, %v3522_v11  ;;  %v4754_v47 = vld [vmem:[#allocation16_spill] sm:$0xff] }
 0x287   :  { %v3750_v54 = vadd.f32 %v3620_v55, %v3525_v52  ;;  %v3754_v60 = vadd.f32 %v3620_v55, %v3528_v20  ;;  %v3758_v31 = vadd.f32 %v3620_v55, %v3531_v3  ;;  %v3762_v44 = vadd.f32 %v3620_v55, %v3534_v8 }
 0x288   :  { %v3766_v11 = vadd.f32 %v3620_v55, %v3537_v10  ;;  %v3770_v52 = vadd.f32 %v3620_v55, %v3540_v25  ;;  %v3774_v20 = vadd.f32 %v3620_v55, %v3543_v5  ;;  %v3778_v3 = vadd.f32 %v3620_v55, %v3546_v1 }
 0x289   :  { %v3782_v8 = vadd.f32 %v3620_v55, %v3549_v61  ;;  %v3786_v10 = vadd.f32 %v3620_v55, %v3552_v6  ;;  %v3790_v25 = vadd.f32 %v3620_v55, %v3555_v50  ;;  %v3794_v5 = vadd.f32 %v3620_v55, %v3558_v40 }
 0x28a   :  { %v3798_v1 = vadd.f32 %v3620_v55, %v3561_v32  ;;  %v3802_v61 = vadd.f32 %v3620_v55, %v3564_v58  ;;  %v3806_v6 = vadd.f32 %v3620_v55, %v3567_v59  ;;  %v3810_v50 = vadd.f32 %v3620_v55, %v3570_v12 }
 0x28b   :  { %v3814_v40 = vadd.f32 %v3620_v55, %v3573_v23  ;;  %v3818_v32 = vadd.f32 %v3620_v55, %v3576_v33  ;;  %v3822_v58 = vadd.f32 %v3620_v55, %v3579_v36  ;;  %v3826_v59 = vadd.f32 %v3620_v55, %v3582_v28 }
 0x28c   :  { %v3830_v12 = vadd.f32 %v3620_v55, %v3585_v16  ;;  %v3834_v23 = vadd.f32 %v3620_v55, %v3588_v45  ;;  %v3838_v33 = vadd.f32 %v3620_v55, %v3591_v39  ;;  %v3842_v36 = vadd.f32 %v3620_v55, %v3594_v30 }
 0x28d   :  { %v3846_v28 = vadd.f32 %v3620_v55, %v3597_v2  ;;  %v3850_v16 = vadd.f32 %v3620_v55, %v3600_v43  ;;  %v3854_v45 = vadd.f32 %v3620_v55, %v3603_v56  ;;  %v3858_v39 = vadd.f32 %v3620_v55, %v3606_v48 }
 0x28e   :  { %4747 = vst [vmem:[#allocation24_spill] sm:$0xff] %v3830_v12  ;;  %4748 = vst [vmem:[#allocation25_spill] sm:$0xff] %v3834_v23  ;;  %v3862_v30 = vadd.f32 %v3620_v55, %v3609_v46  ;;  %v3866_v2 = vadd.f32 %v3620_v55, %v4754_v47  ;;  %v3874_v56 = vadd.f32 %v3620_v55, %v3623_v35  ;;  %vm1926_vm0 = vcmp.ge.f32.partialorder %v3654_v37, 0.0 }
 0x28f   :  { %4749 = vst [vmem:[#allocation26_spill] sm:$0xff] %v3846_v28  ;;  %4750 = vst [vmem:[#allocation27_spill] sm:$0xff] %v3850_v16  ;;  %v4756_v28 = vld [vmem:[#allocation17_spill] sm:$0xff]  ;;  %v3882_v46 = vadd.f32 %v3620_v55, %v3629_v15  ;;  %vm1927_vm1 = vcmp.ge.f32.partialorder %v3658_v57, 0.0  ;;  %vm1928_vm2 = vcmp.ge.f32.partialorder %v3662_v17, 0.0  ;;  %vm1929_vm3 = vcmp.ge.f32.partialorder %v3666_v34, 0.0 }
 0x290   :  { %4751 = vst [vmem:[#allocation28_spill] sm:$0xff] %v3854_v45  ;;  %4752 = vst [vmem:[#allocation23_spill] sm:$0xff] %v3858_v39  ;;  %v3870_v43 = vadd.f32 %v3620_v55, %v4756_v28  ;;  %v4759_v45 = vld [vmem:[#allocation18_spill] sm:$0xff]  ;;  %v3890_v28 = vadd.f32 %v3620_v55, %v3635_v27  ;;  %vm1930_vm4 = vcmp.ge.f32.partialorder %v3670_v21, 0.0  ;;  %vm1931_vm5 = vcmp.ge.f32.partialorder %v3674_v38, 0.0 }
 0x291   :  { %4753 = vst [vmem:[#allocation29_spill] sm:$0xff] %v3862_v30  ;;  %4755 = vst [vmem:[#allocation9_spill] sm:$0xff] %v3866_v2  ;;  %v3878_v48 = vadd.f32 %v3620_v55, %v4759_v45  ;;  %v4762_v30 = vld [vmem:[#allocation19_spill] sm:$0xff]  ;;  %vm1932_vm6 = vcmp.ge.f32.partialorder %v3678_v19, 0.0  ;;  %vm1933_vm7 = vcmp.ge.f32.partialorder %v3682_v14, 0.0  ;;  %vm1934_vm8 = vcmp.ge.f32.partialorder %v3686_v62, 0.0 }
 0x292   :  { %4757 = vst [vmem:[#allocation10_spill] sm:$0xff] %v3870_v43  ;;  %4758 = vst [vmem:[#allocation11_spill] sm:$0xff] %v3874_v56  ;;  %v3886_v47 = vadd.f32 %v3620_v55, %v4762_v30  ;;  %v4765_v43 = vld [vmem:[#allocation20_spill] sm:$0xff]  ;;  %v4767_v56 = vld [vmem:[#allocation21_spill] sm:$0xff]  ;;  %vm1935_vm9 = vcmp.ge.f32.partialorder %v3690_v26, 0.0  ;;  %vm1936_vm10 = vcmp.ge.f32.partialorder %v3694_v53, 0.0 }
 0x293   :  { %4760 = vst [vmem:[#allocation31_spill] sm:$0xff] %v3878_v48  ;;  %4761 = vst [vmem:[#allocation32_spill] sm:$0xff] %v3882_v46  ;;  %v3894_v35 = vadd.f32 %v3620_v55, %v4765_v43  ;;  %v3898_v45 = vadd.f32 %v3620_v55, %v4767_v56  ;;  %v4769_v15 = vld [vmem:[#allocation22_spill] sm:$0xff]  ;;  %v1990_v30 = vmul.f32 0.2, %v3654_v37  ;;  %vm1937_vm11 = vcmp.ge.f32.partialorder %v3698_v18, 0.0 }
 0x294   :  { %4763 = vst [vmem:[#allocation33_spill] sm:$0xff] %v3886_v47  ;;  %4764 = vst [vmem:[#allocation30_spill] sm:$0xff] %v3890_v28  ;;  %v3911_v27 = vadd.f32 %v3620_v55, %v4769_v15  ;;  %v1991_v43 = vmul.f32 0.2, %v3658_v57  ;;  %v1992_v56 = vmul.f32 0.2, %v3662_v17 }
 0x295   :  { %4766 = vst [vmem:[#allocation12_spill] sm:$0xff] %v3894_v35  ;;  %4768 = vst [vmem:[#allocation13_spill] sm:$0xff] %v3898_v45  ;;  %v3919_v45 = vadd.f32 %v3620_v55, %v3650_v41  ;;  %v1993_v35 = vmul.f32 0.2, %v3666_v34  ;;  %v1994_v28 = vmul.f32 0.2, %v3670_v21  ;;  %v2054_v55 = vsel %vm1926_vm0, %v3654_v37, %v1990_v30 }
 0x296   :  { %4770 = vst [vmem:[#allocation14_spill] sm:$0xff] %v3911_v27  ;;  %v1995_v15 = vmul.f32 0.2, %v3674_v38  ;;  %v1996_v27 = vmul.f32 0.2, %v3678_v19  ;;  %vm1938_vm12 = vcmp.ge.f32.partialorder %v3702_v49, 0.0  ;;  %v2055_v2 = vsel %vm1927_vm1, %v3658_v57, %v1991_v43  ;;  %2118 = vst [vmem:[%s4587_s5] sm:$0xff] %v2054_v55 }
 0x297   :  { %4771 = vst [vmem:[#allocation15_spill] sm:$0xff] %v3919_v45  ;;  %v1997_v47 = vmul.f32 0.2, %v3682_v14  ;;  %v1998_v46 = vmul.f32 0.2, %v3686_v62  ;;  %vm1939_vm13 = vcmp.ge.f32.partialorder %v3706_v13, 0.0  ;;  %v2056_v16 = vsel %vm1928_vm2, %v3662_v17, %v1992_v56 }
 0x298   :  { %v1999_v41 = vmul.f32 0.2, %v3690_v26  ;;  %v3935_v45 = vmul.f32 0.2, %v3694_v53  ;;  %v3938_v48 = vmul.f32 0.2, %v3698_v18 }
 0x299   :  { %v3948_v37 = vmul.f32 0.2, %v3702_v49  ;;  %v3951_v30 = vmul.f32 0.2, %v3706_v13  ;;  %v3954_v39 = vmul.f32 0.2, %v3710_v24 }
 0x29a   :  { %2119 = vst [vmem:[%s4587_s5 + $0x8] sm:$0xff] %v2055_v2  ;;  %vm1940_vm14 = vcmp.ge.f32.partialorder %v3710_v24, 0.0  ;;  %v3964_v57 = vmul.f32 0.2, %v3714_v0  ;;  %v3967_v43 = vmul.f32 0.2, %v3718_v29 }
 0x29b   :  { %4772 = vst [vmem:[#allocation16_spill] sm:$0xff] %v3954_v39  ;;  %v3970_v55 = vmul.f32 0.2, %v3722_v22  ;;  %v2057_v39 = vsel %vm1929_vm3, %v3666_v34, %v1993_v35  ;;  %2120 = vst [vmem:[%s4587_s5 + $0x10] sm:$0xff] %v2056_v16  ;;  %vm1941_vm15 = vcmp.ge.f32.partialorder %v3714_v0, 0.0  ;;  %vm1942_vm0 = vcmp.ge.f32.partialorder %v3718_v29, 0.0 }
 0x29c   :  { %v3980_v17 = vmul.f32 0.2, %v3726_v42  ;;  %v3983_v2 = vmul.f32 0.2, %v3730_v63  ;;  %v3986_v56 = vmul.f32 0.2, %v3734_v7 }
 0x29d   :  { %4773 = vst [vmem:[#allocation17_spill] sm:$0xff] %v3970_v55  ;;  %v2058_v55 = vsel %vm1930_vm4, %v3670_v21, %v1994_v28  ;;  %2121 = vst [vmem:[%s4587_s5 + $0x18] sm:$0xff] %v2057_v39  ;;  %v3996_v34 = vmul.f32 0.2, %v3738_v9  ;;  %v3999_v16 = vmul.f32 0.2, %v3742_v4 }
 0x29e   :  { %4774 = vst [vmem:[#allocation18_spill] sm:$0xff] %v3986_v56  ;;  %v4002_v35 = vmul.f32 0.2, %v3746_v51  ;;  %v2059_v56 = vsel %vm1931_vm5, %v3674_v38, %v1995_v15  ;;  %2122 = vst [vmem:[%s4587_s5 + $0x20] sm:$0xff] %v2058_v55  ;;  %vm1943_vm1 = vcmp.ge.f32.partialorder %v3722_v22, 0.0  ;;  %vm1944_vm2 = vcmp.ge.f32.partialorder %v3726_v42, 0.0 }
 0x29f   :  { %v4012_v21 = vmul.f32 0.2, %v3750_v54  ;;  %v4015_v39 = vmul.f32 0.2, %v3754_v60  ;;  %v4018_v28 = vmul.f32 0.2, %v3758_v31 }
 0x2a0   :  { %4775 = vst [vmem:[#allocation19_spill] sm:$0xff] %v4002_v35  ;;  %v2060_v35 = vsel %vm1932_vm6, %v3678_v19, %v1996_v27  ;;  %2123 = vst [vmem:[%s4587_s5 + $0x28] sm:$0xff] %v2059_v56  ;;  %v4028_v38 = vmul.f32 0.2, %v3762_v44  ;;  %v4031_v15 = vmul.f32 0.2, %v3766_v11 }
 0x2a1   :  { %4776 = vst [vmem:[#allocation20_spill] sm:$0xff] %v4018_v28  ;;  %v4034_v55 = vmul.f32 0.2, %v3770_v52  ;;  %v2061_v28 = vsel %vm1933_vm7, %v3682_v14, %v1997_v47  ;;  %2124 = vst [vmem:[%s4587_s5 + $0x30] sm:$0xff] %v2060_v35  ;;  %vm1945_vm3 = vcmp.ge.f32.partialorder %v3730_v63, 0.0  ;;  %v2062_v14 = vsel %vm1934_vm8, %v3686_v62, %v1998_v46 }
 0x2a2   :  { %v4046_v19 = vmul.f32 0.2, %v3774_v20  ;;  %v4049_v27 = vmul.f32 0.2, %v3778_v3  ;;  %v4052_v56 = vmul.f32 0.2, %v3782_v8  ;;  %v2063_v46 = vsel %vm1935_vm9, %v3690_v26, %v1999_v41 }
 0x2a3   :  { %2125 = vst [vmem:[%s4587_s5 + $0x38] sm:$0xff] %v2061_v28  ;;  %vm1948_vm6 = vcmp.ge.f32.partialorder %v3742_v4, 0.0  ;;  %v4065_v47 = vmul.f32 0.2, %v3786_v10  ;;  %v4068_v35 = vmul.f32 0.2, %v3790_v25  ;;  %v2064_v41 = vsel %vm1936_vm10, %v3694_v53, %v3935_v45 }
 0x2a4   :  { %v4071_v62 = vmul.f32 0.2, %v3794_v5  ;;  %2126 = vst [vmem:[%s4587_s5 + $0x40] sm:$0xff] %v2062_v14  ;;  %vm1952_vm8 = vcmp.ge.f32.partialorder %v3758_v31, 0.0  ;;  %v4084_v28 = vmul.f32 0.2, %v3798_v1  ;;  %v2065_v45 = vsel %vm1937_vm11, %v3698_v18, %v3938_v48 }
 0x2a5   :  { %v4090_v26 = vmul.f32 0.2, %v3806_v6  ;;  %2127 = vst [vmem:[%s4587_s5 + $0x48] sm:$0xff] %v2063_v46  ;;  %vm1956_vm9 = vcmp.ge.f32.partialorder %v3774_v20, 0.0  ;;  %v4104_v14 = vmul.f32 0.2, %v3810_v50  ;;  %v2066_v48 = vsel %vm1938_vm12, %v3702_v49, %v3948_v37 }
 0x2a6   :  { %4777 = vst [vmem:[#allocation21_spill] sm:$0xff] %v4071_v62  ;;  %v4087_v62 = vmul.f32 0.2, %v3802_v61  ;;  %v4110_v53 = vmul.f32 0.2, %v3818_v32  ;;  %2128 = vst [vmem:[%s4587_s5 + $0x50] sm:$0xff] %v2064_v41  ;;  %v2067_v37 = vsel %vm1939_vm13, %v3706_v13, %v3951_v30 }
 0x2a7   :  { %4778 = vst [vmem:[#allocation22_spill] sm:$0xff] %v4090_v26  ;;  %v4107_v26 = vmul.f32 0.2, %v3814_v40  ;;  %vm1960_vm10 = vcmp.ge.f32.partialorder %v3790_v25, 0.0  ;;  %v4124_v46 = vmul.f32 0.2, %v3822_v58 }
 0x2a8   :  { %4779 = vst [vmem:[#allocation34_spill] sm:$0xff] %v4110_v53  ;;  %v4127_v53 = vmul.f32 0.2, %v3826_v59  ;;  %v4130_v18 = vmul.f32 0.2, %v3830_v12  ;;  %2129 = vst [vmem:[%s4587_s5 + $0x58] sm:$0xff] %v2065_v45 }
 0x2a9   :  { %vm1964_vm11 = vcmp.ge.f32.partialorder %v3806_v6, 0.0  ;;  %v4144_v41 = vmul.f32 0.2, %v3834_v23  ;;  %v4150_v49 = vmul.f32 0.2, %v3842_v36  ;;  %2130 = vst [vmem:[%s4587_s5 + $0x60] sm:$0xff] %v2066_v48 }
 0x2aa   :  { %4780 = vst [vmem:[#allocation35_spill] sm:$0xff] %v4127_v53  ;;  %4781 = vst [vmem:[#allocation36_spill] sm:$0xff] %v4130_v18  ;;  %v4147_v18 = vmul.f32 0.2, %v3838_v33  ;;  %vm1968_vm12 = vcmp.ge.f32.partialorder %v3822_v58, 0.0  ;;  %v4785_v45 = vld [vmem:[#allocation26_spill] sm:$0xff] }
 0x2ab   :  { %4782 = vst [vmem:[#allocation37_spill] sm:$0xff] %v4144_v41  ;;  %4784 = vst [vmem:[#allocation39_spill] sm:$0xff] %v4150_v49  ;;  %v4787_v49 = vld [vmem:[#allocation27_spill] sm:$0xff]  ;;  %v4789_v53 = vld [vmem:[#allocation28_spill] sm:$0xff]  ;;  %vm1972_vm13 = vcmp.ge.f32.partialorder %v3838_v33, 0.0  ;;  %vm4818_vm5 = vcmp.ge.f32.partialorder %v3738_v9, 0.0 }
 0x2ac   :  { %4783 = vst [vmem:[#allocation38_spill] sm:$0xff] %v4147_v18  ;;  %v4164_v18 = vmul.f32 0.2, %v4785_v45  ;;  %v4167_v41 = vmul.f32 0.2, %v4787_v49  ;;  %v4791_v30 = vld [vmem:[#allocation16_spill] sm:$0xff] }
 0x2ad   :  { %v4170_v13 = vmul.f32 0.2, %v4789_v53  ;;  %v2068_v48 = vsel %vm1940_vm14, %v3710_v24, %v4791_v30  ;;  %2131 = vst [vmem:[%s4587_s5 + $0x68] sm:$0xff] %v2067_v37  ;;  %v4796_v12 = vld [vmem:[#allocation9_spill] sm:$0xff]  ;;  %v2069_v37 = vsel %vm1941_vm15, %v3714_v0, %v3964_v57  ;;  %vm1976_vm14 = vcmp.ge.f32.partialorder %v4789_v53, 0.0  ;;  %v4798_v30 = vld [vmem:[#allocation10_spill] sm:$0xff] }
 0x2ae   :  { %4786 = vst [vmem:[#allocation26_spill] sm:$0xff] %v4164_v18  ;;  %4788 = vst [vmem:[#allocation40_spill] sm:$0xff] %v4167_v41  ;;  %v4792_v41 = vld [vmem:[#allocation23_spill] sm:$0xff]  ;;  %v4190_v24 = vmul.f32 0.2, %v4796_v12  ;;  %v2070_v57 = vsel %vm1942_vm0, %v3718_v29, %v3967_v43  ;;  %vm1980_vm15 = vcmp.ge.f32.partialorder %v4798_v30, 0.0 }
 0x2af   :  { %4790 = vst [vmem:[#allocation28_spill] sm:$0xff] %v4170_v13  ;;  %v4184_v18 = vmul.f32 0.2, %v4792_v41  ;;  %v4794_v13 = vld [vmem:[#allocation29_spill] sm:$0xff]  ;;  %2132 = vst [vmem:[%s4587_s5 + $0x70] sm:$0xff] %v2068_v48  ;;  %v4802_v49 = vld [vmem:[#allocation31_spill] sm:$0xff] }
 0x2b0   :  { %v4187_v23 = vmul.f32 0.2, %v4794_v13  ;;  %4797 = vst [vmem:[#allocation29_spill] sm:$0xff] %v4190_v24  ;;  %v4800_v24 = vld [vmem:[#allocation11_spill] sm:$0xff]  ;;  %v4210_v0 = vmul.f32 0.2, %v4802_v49 }
 0x2b1   :  { %4793 = vst [vmem:[#allocation16_spill] sm:$0xff] %v4184_v18  ;;  %v4207_v18 = vmul.f32 0.2, %v4800_v24  ;;  %2133 = vst [vmem:[%s4587_s5 + $0x78] sm:$0xff] %v2069_v37  ;;  %v4804_v48 = vld [vmem:[#allocation32_spill] sm:$0xff]  ;;  %v4808_v12 = vld [vmem:[#allocation30_spill] sm:$0xff] }
 0x2b2   :  { %4795 = vst [vmem:[#allocation23_spill] sm:$0xff] %v4187_v23  ;;  %v4204_v23 = vmul.f32 0.2, %v4798_v30  ;;  %4803 = vst [vmem:[#allocation41_spill] sm:$0xff] %v4210_v0  ;;  %v4806_v0 = vld [vmem:[#allocation33_spill] sm:$0xff]  ;;  %vm1985_vm4 = vcmp.ge.f32.partialorder %v4808_v12, 0.0 }
 0x2b3   :  { %4801 = vst [vmem:[#allocation11_spill] sm:$0xff] %v4207_v18  ;;  %v4224_v18 = vmul.f32 0.2, %v4804_v48  ;;  %v4230_v29 = vmul.f32 0.2, %v4808_v12  ;;  %v4810_v43 = vld [vmem:[#allocation17_spill] sm:$0xff] }
 0x2b4   :  { %4799 = vst [vmem:[#allocation10_spill] sm:$0xff] %v4204_v23  ;;  %v4227_v23 = vmul.f32 0.2, %v4806_v0  ;;  %v2071_v37 = vsel %vm1943_vm1, %v3722_v22, %v4810_v43  ;;  %2134 = vst [vmem:[%s4587_s5 + $0x80] sm:$0xff] %v2070_v57  ;;  %vm1984_vm0 = vcmp.ge.f32.partialorder %v4806_v0, 0.0  ;;  %v4811_v48 = vld [vmem:[#allocation12_spill] sm:$0xff]  ;;  %v2072_v57 = vsel %vm1944_vm2, %v3726_v42, %v3980_v17 }
 0x2b5   :  { %4805 = vst [vmem:[#allocation42_spill] sm:$0xff] %v4224_v18  ;;  %4809 = vst [vmem:[#allocation30_spill] sm:$0xff] %v4230_v29  ;;  %v4812_v18 = vld [vmem:[#allocation13_spill] sm:$0xff]  ;;  %v4813_v49 = vld [vmem:[#allocation14_spill] sm:$0xff]  ;;  %vm4817_vm2 = vcmp.ge.f32.partialorder %v3734_v7, 0.0  ;;  %v2075_v17 = vsel %vm4818_vm5, %v3738_v9, %v3996_v34  ;;  %vm4822_vm5 = vcmp.ge.f32.partialorder %v3754_v60, 0.0 }
 0x2b6   :  { %4807 = vst [vmem:[#allocation33_spill] sm:$0xff] %v4227_v23  ;;  %v4244_v23 = vmul.f32 0.2, %v4811_v48  ;;  %v4247_v29 = vmul.f32 0.2, %v4812_v18  ;;  %2135 = vst [vmem:[%s4587_s5 + $0x88] sm:$0xff] %v2071_v37  ;;  %v2076_v37 = vsel %vm1948_vm6, %v3742_v4, %v3999_v16  ;;  %v2079_v9 = vsel %vm4822_vm5, %v3754_v60, %v4015_v39 }
 0x2b7   :  { %v4250_v22 = vmul.f32 0.2, %v4813_v49  ;;  %vm1988_vm1 = vcmp.ge.f32.partialorder %v4813_v49, 0.0  ;;  %v4815_v43 = vld [vmem:[#allocation15_spill] sm:$0xff]  ;;  %v4816_v18 = vld [vmem:[#allocation18_spill] sm:$0xff]  ;;  %2136 = vst [vmem:[%s4587_s5 + $0x90] sm:$0xff] %v2072_v57 }
 0x2b8   :  { %vm1989_vm7 = vcmp.ge.f32.partialorder %v4815_v43, 0.0  ;;  %v4262_v48 = vmul.f32 0.2, %v4815_v43  ;;  %v2074_v42 = vsel %vm4817_vm2, %v3734_v7, %v4816_v18  ;;  %vm4821_vm2 = vcmp.ge.f32.partialorder %v3750_v54, 0.0  ;;  %2139 = vst [vmem:[%s4587_s5 + $0xa8] sm:$0xff] %v2075_v17  ;;  %v4823_v4 = vld [vmem:[#allocation20_spill] sm:$0xff] }
 0x2b9   :  { %4814 = vst [vmem:[#allocation17_spill] sm:$0xff] %v4250_v22  ;;  %v2073_v22 = vsel %vm1945_vm3, %v3730_v63, %v3983_v2  ;;  %v4819_v63 = vld [vmem:[#allocation19_spill] sm:$0xff]  ;;  %vm4820_vm3 = vcmp.ge.f32.partialorder %v3746_v51, 0.0  ;;  %v2078_v7 = vsel %vm4821_vm2, %v3750_v54, %v4012_v21  ;;  %2138 = vst [vmem:[%s4587_s5 + $0xa0] sm:$0xff] %v2074_v42  ;;  %vm4824_vm6 = vcmp.ge.f32.partialorder %v3762_v44, 0.0  ;;  %v4837_v21 = vld [vmem:[#allocation34_spill] sm:$0xff] }
 0x2ba   :  { %v2077_v2 = vsel %vm4820_vm3, %v3746_v51, %v4819_v63  ;;  %2137 = vst [vmem:[%s4587_s5 + $0x98] sm:$0xff] %v2073_v22  ;;  %v2080_v51 = vsel %vm1952_vm8, %v3758_v31, %v4823_v4  ;;  %v2081_v54 = vsel %vm4824_vm6, %v3762_v44, %v4028_v38  ;;  %vm4825_vm3 = vcmp.ge.f32.partialorder %v3766_v11, 0.0  ;;  %2140 = vst [vmem:[%s4587_s5 + $0xb0] sm:$0xff] %v2076_v37  ;;  %v4842_v38 = vld [vmem:[#allocation24_spill] sm:$0xff]  ;;  %v4860_v57 = vld [vmem:[#allocation29_spill] sm:$0xff] }
 0x2bb   :  { %v2082_v60 = vsel %vm4825_vm3, %v3766_v11, %v4031_v15  ;;  %vm4826_vm2 = vcmp.ge.f32.partialorder %v3770_v52, 0.0  ;;  %2141 = vst [vmem:[%s4587_s5 + $0xb8] sm:$0xff] %v2077_v2  ;;  %2142 = vst [vmem:[%s4587_s5 + $0xc0] sm:$0xff] %v2078_v7  ;;  %v2084_v31 = vsel %vm1956_vm9, %v3774_v20, %v4046_v19  ;;  %vm4827_vm8 = vcmp.ge.f32.partialorder %v3778_v3, 0.0  ;;  %v4845_v19 = vld [vmem:[#allocation25_spill] sm:$0xff]  ;;  %v4867_v2 = vld [vmem:[#allocation31_spill] sm:$0xff] }
 0x2bc   :  { %v2083_v34 = vsel %vm4826_vm2, %v3770_v52, %v4034_v55  ;;  %2143 = vst [vmem:[%s4587_s5 + $0xc8] sm:$0xff] %v2079_v9  ;;  %v2085_v44 = vsel %vm4827_vm8, %v3778_v3, %v4049_v27  ;;  %vm4828_vm5 = vcmp.ge.f32.partialorder %v3782_v8, 0.0  ;;  %vm4829_vm6 = vcmp.ge.f32.partialorder %v3786_v10, 0.0  ;;  %2144 = vst [vmem:[%s4587_s5 + $0xd0] sm:$0xff] %v2080_v51  ;;  %v4830_v3 = vld [vmem:[#allocation21_spill] sm:$0xff]  ;;  %v4869_v9 = vld [vmem:[#allocation42_spill] sm:$0xff] }
 0x2bd   :  { %v2086_v11 = vsel %vm4828_vm5, %v3782_v8, %v4052_v56  ;;  %v2087_v52 = vsel %vm4829_vm6, %v3786_v10, %v4065_v47  ;;  %2145 = vst [vmem:[%s4587_s5 + $0xd8] sm:$0xff] %v2081_v54  ;;  %2146 = vst [vmem:[%s4587_s5 + $0xe0] sm:$0xff] %v2082_v60  ;;  %v2088_v20 = vsel %vm1960_vm10, %v3790_v25, %v4068_v35  ;;  %vm4831_vm9 = vcmp.ge.f32.partialorder %v3794_v5, 0.0  ;;  %v4834_v25 = vld [vmem:[#allocation22_spill] sm:$0xff]  ;;  %v4844_v55 = vld [vmem:[#allocation37_spill] sm:$0xff] }
 0x2be   :  { %2147 = vst [vmem:[%s4587_s5 + $0xe8] sm:$0xff] %v2083_v34  ;;  %v2089_v8 = vsel %vm4831_vm9, %v3794_v5, %v4830_v3  ;;  %vm4832_vm3 = vcmp.ge.f32.partialorder %v3798_v1, 0.0  ;;  %vm4833_vm2 = vcmp.ge.f32.partialorder %v3802_v61, 0.0  ;;  %2148 = vst [vmem:[%s4587_s5 + $0xf0] sm:$0xff] %v2084_v31  ;;  %v2092_v5 = vsel %vm1964_vm11, %v3806_v6, %v4834_v25  ;;  %v4848_v56 = vld [vmem:[#allocation39_spill] sm:$0xff]  ;;  %v4850_v35 = vld [vmem:[#allocation26_spill] sm:$0xff] }
 0x2bf   :  { %v2090_v10 = vsel %vm4832_vm3, %v3798_v1, %v4084_v28  ;;  %v2091_v16 = vsel %vm4833_vm2, %v3802_v61, %v4087_v62  ;;  %2149 = vst [vmem:[%s4587_s5 + $0xf8] sm:$0xff] %v2085_v44  ;;  %2150 = vst [vmem:[%s4587_s5 + $0x100] sm:$0xff] %v2086_v11  ;;  %vm4835_vm10 = vcmp.ge.f32.partialorder %v3810_v50, 0.0  ;;  %vm4836_vm8 = vcmp.ge.f32.partialorder %v3814_v40, 0.0  ;;  %v4852_v28 = vld [vmem:[#allocation40_spill] sm:$0xff]  ;;  %v4861_v42 = vld [vmem:[#allocation9_spill] sm:$0xff] }
 0x2c0   :  { %2151 = vst [vmem:[%s4587_s5 + $0x108] sm:$0xff] %v2087_v52  ;;  %v2093_v1 = vsel %vm4835_vm10, %v3810_v50, %v4104_v14  ;;  %v2094_v61 = vsel %vm4836_vm8, %v3814_v40, %v4107_v26  ;;  %vm4838_vm5 = vcmp.ge.f32.partialorder %v3818_v32, 0.0  ;;  %2152 = vst [vmem:[%s4587_s5 + $0x110] sm:$0xff] %v2088_v20  ;;  %v2096_v6 = vsel %vm1968_vm12, %v3822_v58, %v4124_v46  ;;  %v4839_v50 = vld [vmem:[#allocation35_spill] sm:$0xff]  ;;  %v4847_v58 = vld [vmem:[#allocation38_spill] sm:$0xff] }
 0x2c1   :  { %v2095_v39 = vsel %vm4838_vm5, %v3818_v32, %v4837_v21  ;;  %2153 = vst [vmem:[%s4587_s5 + $0x118] sm:$0xff] %v2089_v8  ;;  %2154 = vst [vmem:[%s4587_s5 + $0x120] sm:$0xff] %v2090_v10  ;;  %vm4840_vm11 = vcmp.ge.f32.partialorder %v3826_v59, 0.0  ;;  %v4841_v32 = vld [vmem:[#allocation36_spill] sm:$0xff]  ;;  %vm4843_vm6 = vcmp.ge.f32.partialorder %v4842_v38, 0.0  ;;  %vm4846_vm9 = vcmp.ge.f32.partialorder %v4845_v19, 0.0 }
 0x2c2   :  { %2155 = vst [vmem:[%s4587_s5 + $0x128] sm:$0xff] %v2091_v16  ;;  %v2097_v40 = vsel %vm4840_vm11, %v3826_v59, %v4839_v50  ;;  %v2098_v15 = vsel %vm4843_vm6, %v4842_v38, %v4841_v32  ;;  %v2099_v27 = vsel %vm4846_vm9, %v4845_v19, %v4844_v55  ;;  %2156 = vst [vmem:[%s4587_s5 + $0x130] sm:$0xff] %v2092_v5  ;;  %vm4849_vm12 = vcmp.ge.f32.partialorder %v3842_v36, 0.0  ;;  %v4853_v26 = vld [vmem:[#allocation27_spill] sm:$0xff]  ;;  %v4856_v46 = vld [vmem:[#allocation16_spill] sm:$0xff] }
 0x2c3   :  { %2157 = vst [vmem:[%s4587_s5 + $0x138] sm:$0xff] %v2093_v1  ;;  %2158 = vst [vmem:[%s4587_s5 + $0x140] sm:$0xff] %v2094_v61  ;;  %v2100_v59 = vsel %vm1972_vm13, %v3838_v33, %v4847_v58  ;;  %v2101_v47 = vsel %vm4849_vm12, %v3842_v36, %v4848_v56  ;;  %vm4851_vm3 = vcmp.ge.f32.partialorder %v4785_v45, 0.0  ;;  %vm4854_vm2 = vcmp.ge.f32.partialorder %v4853_v26, 0.0  ;;  %v4855_v33 = vld [vmem:[#allocation28_spill] sm:$0xff]  ;;  %v4866_v63 = vld [vmem:[#allocation41_spill] sm:$0xff] }
 0x2c4   :  { %2159 = vst [vmem:[%s4587_s5 + $0x148] sm:$0xff] %v2095_v39  ;;  %v2102_v62 = vsel %vm4851_vm3, %v4785_v45, %v4850_v35  ;;  %v2103_v14 = vsel %vm4854_vm2, %v4853_v26, %v4852_v28  ;;  %2160 = vst [vmem:[%s4587_s5 + $0x150] sm:$0xff] %v2096_v6  ;;  %v2104_v36 = vsel %vm1976_vm14, %v4789_v53, %v4855_v33  ;;  %vm4857_vm13 = vcmp.ge.f32.partialorder %v4792_v41, 0.0  ;;  %v4858_v45 = vld [vmem:[#allocation23_spill] sm:$0xff]  ;;  %v4863_v53 = vld [vmem:[#allocation10_spill] sm:$0xff] }
 0x2c5   :  { %2161 = vst [vmem:[%s4587_s5 + $0x158] sm:$0xff] %v2097_v40  ;;  %2162 = vst [vmem:[%s4587_s5 + $0x160] sm:$0xff] %v2098_v15  ;;  %v2105_v18 = vsel %vm4857_vm13, %v4792_v41, %v4856_v46  ;;  %vm4859_vm10 = vcmp.ge.f32.partialorder %v4794_v13, 0.0  ;;  %vm4862_vm8 = vcmp.ge.f32.partialorder %v4861_v42, 0.0  ;;  %v2108_v41 = vsel %vm1980_vm15, %v4798_v30, %v4863_v53  ;;  %v4870_v4 = vld [vmem:[#allocation32_spill] sm:$0xff]  ;;  %v4873_v54 = vld [vmem:[#allocation30_spill] sm:$0xff] }
 0x2c6   :  { %2163 = vst [vmem:[%s4587_s5 + $0x168] sm:$0xff] %v2099_v27  ;;  %v2106_v22 = vsel %vm4859_vm10, %v4794_v13, %v4858_v45  ;;  %v2107_v17 = vsel %vm4862_vm8, %v4861_v42, %v4860_v57  ;;  %2164 = vst [vmem:[%s4587_s5 + $0x170] sm:$0xff] %v2100_v59  ;;  %v4864_v13 = vld [vmem:[#allocation11_spill] sm:$0xff]  ;;  %vm4865_vm14 = vcmp.ge.f32.partialorder %v4800_v24, 0.0  ;;  %vm4868_vm5 = vcmp.ge.f32.partialorder %v4867_v2, 0.0  ;;  %v4874_v34 = vld [vmem:[#allocation12_spill] sm:$0xff] }
 0x2c7   :  { %2165 = vst [vmem:[%s4587_s5 + $0x178] sm:$0xff] %v2101_v47  ;;  %2166 = vst [vmem:[%s4587_s5 + $0x180] sm:$0xff] %v2102_v62  ;;  %v2109_v37 = vsel %vm4865_vm14, %v4800_v24, %v4864_v13  ;;  %v2110_v7 = vsel %vm4868_vm5, %v4867_v2, %v4866_v63  ;;  %vm4871_vm11 = vcmp.ge.f32.partialorder %v4870_v4, 0.0  ;;  %v4872_v24 = vld [vmem:[#allocation33_spill] sm:$0xff]  ;;  %v2113_v60 = vsel %vm1985_vm4, %v4808_v12, %v4873_v54 }
 0x2c8   :  { %2167 = vst [vmem:[%s4587_s5 + $0x188] sm:$0xff] %v2103_v14  ;;  %v2111_v51 = vsel %vm4871_vm11, %v4870_v4, %v4869_v9  ;;  %2168 = vst [vmem:[%s4587_s5 + $0x190] sm:$0xff] %v2104_v36  ;;  %v2112_v30 = vsel %vm1984_vm0, %v4806_v0, %v4872_v24  ;;  %vm4875_vm15 = vcmp.ge.f32.partialorder %v4874_v34, 0.0  ;;  %v4876_v44 = vld [vmem:[#allocation13_spill] sm:$0xff]  ;;  %v2117_v0 = vsel %vm1989_vm7, %v4815_v43, %v4262_v48 }
 0x2c9   :  { %2169 = vst [vmem:[%s4587_s5 + $0x198] sm:$0xff] %v2105_v18  ;;  %2170 = vst [vmem:[%s4587_s5 + $0x1a0] sm:$0xff] %v2106_v22  ;;  %v2114_v31 = vsel %vm4875_vm15, %v4874_v34, %v4244_v23  ;;  %vm4877_vm6 = vcmp.ge.f32.partialorder %v4876_v44, 0.0  ;;  %v4878_v12 = vld [vmem:[#allocation17_spill] sm:$0xff] }
 0x2ca   :  { %2171 = vst [vmem:[%s4587_s5 + $0x1a8] sm:$0xff] %v2107_v17  ;;  %v2115_v11 = vsel %vm4877_vm6, %v4876_v44, %v4247_v29  ;;  %2172 = vst [vmem:[%s4587_s5 + $0x1b0] sm:$0xff] %v2108_v41  ;;  %v2116_v23 = vsel %vm1988_vm1, %v4813_v49, %v4878_v12 }
 0x2cb   :  { %2173 = vst [vmem:[%s4587_s5 + $0x1b8] sm:$0xff] %v2109_v37  ;;  %2174 = vst [vmem:[%s4587_s5 + $0x1c0] sm:$0xff] %v2110_v7 }
 0x2cc   :  { %2175 = vst [vmem:[%s4587_s5 + $0x1c8] sm:$0xff] %v2111_v51  ;;  %2176 = vst [vmem:[%s4587_s5 + $0x1d0] sm:$0xff] %v2112_v30 }
 0x2cd   :  { %2177 = vst [vmem:[%s4587_s5 + $0x1d8] sm:$0xff] %v2113_v60  ;;  %2178 = vst [vmem:[%s4587_s5 + $0x1e0] sm:$0xff] %v2114_v31 }
 0x2ce   :  { %2179 = vst [vmem:[%s4587_s5 + $0x1e8] sm:$0xff] %v2115_v11  ;;  %2180 = vst [vmem:[%s4587_s5 + $0x1f0] sm:$0xff] %v2116_v23 }
 0x2cf   :  { %2181 = vst [vmem:[%s4587_s5 + $0x1f8] sm:$0xff] %v2117_v0 }
 0x2d0   :  { %2186 = vsyncpa [#allocation3], 1 }
 0x2d1   :  { %2187 = vsyncpa [#allocation5], 1 }

// kernel: encoder_conv_orig_forward.7
= control target key start
LH: loop header
LB: loop body
LE: loop exit
PB: predicated region body
PF: predicated region fallthrough
CT: control target
= control target key end

     0   :  { %10 = vsyncpa [#allocation4], 0  ;;  %s2736_s0 = inlined_call_operand.vmem [shape: bf16[128,1024], index: 0, kind: input, shape index: {}]   ;;  %s2737_s1 = inlined_call_operand.hbm [shape: bf16[1024,128], index: 1, kind: input, shape index: {}]   ;;  %s2738_s2 = inlined_call_operand.hbm [shape: f32[1,128], index: 2, kind: input, shape index: {}]   ;;  %s2739_s3 = inlined_call_operand.vmem [shape: f32[1,128], index: 3, kind: input, shape index: {}]   ;;  %s2740_s4 = inlined_call_operand.vmem [shape: f32[1,128], index: 4, kind: input, shape index: {}]   ;;  %s2741_s5 = inlined_call_operand.vmem [shape: f32[128,128], index: 5, kind: output, shape index: {}]  }
   0x1   :  { %12 = vsyncpa [#allocation4 + $0x1], 0 }
   0x2   :  { %13 = vsyncpa [#allocation6], 0  ;;  %s2102_s18 = smov 0   ;;  %s2104_s19 = smov 0  }
   0x3   :  { %s2106_s20 = smov 0   ;;  %s2108_s21 = smov 0  }
   0x4   :  { %s2110_s22 = smov 0   ;;  %s2112_s23 = smov 0  }
   0x5 LB: > { %s1591_s24 = sadd.s32 4294967295, %s2065_s23   ;;  %s28_s25 = sadd.s32 1, %s2061_s22  ;;  %s2065_s23 = sphi %s2112_s23, %s19_s23   ;;  %s2061_s22 = sphi %s2110_s22, %s2761_s22   ;;  %s2057_s21 = sphi %s2108_s21, %s2760_s21   ;;  %s2053_s20 = sphi %s2106_s20, %s2759_s20   ;;  %s2049_s19 = sphi %s2104_s19, %s2758_s19   ;;  %s2045_s18 = sphi %s2102_s18, %s2757_s18  }
   0x6   : > { %p29_p0 = scmp.ge.s32.totalorder %s28_s25, 2  ;;  %s38_s26 = sadd.s32 1, %s2053_s20 }
   0x7   : > { %p45_p1 = scmp.ne.s32.totalorder %s2053_s20, %s2049_s19  ;;  %p46_p2 = scmp.eq.s32.totalorder %s2065_s23, 0 }
   0x8   : > { %s2763_s25 = smov (%p29_p0, %s28_s25), 0  ;;  %p79_p4 = scmp.ne.s32.totalorder %s2049_s19, %s2045_s18 }
   0x9   : > { %p2138_p3 = por %p46_p2, %p45_p1  ;;  %s35_s28 = ssub.s32 %s2061_s22, %s2763_s25 }
   0xa   : > { %p2145_p5 = scmp.eq.s32.totalorder %s1591_s24, 0  ;;  %p36_p6 = scmp.eq.s32.totalorder %s35_s28, 0 }
   0xb   : > { %s2747_s27 = scalar_select %p2138_p3, 1, 0 }
   0xc   : > { %s2748_s29 = scalar_select %p2145_p5, 1, 0 }
   0xd   : > { %p1592_p7 = scmp.ge.s32.totalorder %s2065_s23, 1  ;;  %p2152_p8 = por %p2145_p5, %p79_p4 }
   0xe   : > { %p194_p9 = scmp.lt.s32.totalorder %s2065_s23, 3  ;;  %s2067_s8 = smov [#allocation5]  }
   0xf   : > { %s2749_s30 = scalar_select %p2152_p8, 1, 0 }
  0x10   : > { %s2158_s6 = scalar_select %p36_p6, %s2053_s20, %s38_s26  }
  0x11   : > { %p2160_p10 = pnand %p1592_p7, %p194_p9  ;;  %s209_s9 = sshll.u32 %s2067_s8, 4  ;;  %s210_s9 = int_to_ptr.vmem [resolvable:$true] %s209_s9 }
  0x12   : > { %s1955_s13 = scalar_lea.hbm %s2738_s2, 16 }
  0x13   : > { %s2750_s7 = scalar_select %p2160_p10, 1, 0 }
  0x14   : > { %p1815_p11 = pneg %p2160_p10  ;;  %p1956_p13 = scmp.ne.s32.totalorder %s2738_s2, %s1955_s13 }
  0x15   : > { %p1962_p4 = scmp.lt.u32.totalorder %s1955_s13, %s2738_s2 }
  0x16   : > { %p2168_p12 = pnand %p1815_p11, %p2145_p5 }
  0x18   : > { %p1957_p0 = pneg %p2168_p12 }
  0x1a   : > { %p1958_p1 = pnand %p1957_p0, %p1956_p13 }
  0x1c   : > { %p1959_p2 = pneg %p1958_p1 }
  0x1e   : > { %p1964_p6 = pnand %p1962_p4, %p1959_p2 }
  0x20   : > { %1967 = shalt.err (!%p1964_p6)
}
  0x21   : > { %s1968_s18 = scalar_lea.vmem %s210_s9, 16  ;;  %s1975_s24 = scalar_lea.vmem %s210_s9, 32 }
  0x22   : > { %p1969_p7 = scmp.ne.s32.totalorder %s210_s9, %s1968_s18  ;;  %p1976_p5 = scmp.lt.s32.totalorder %s210_s9, %s210_s9 }
  0x23   : > { %p1977_p8 = scmp.lt.s32.totalorder %s1975_s24, %s1968_s18 }
  0x24   : > { %p1971_p9 = pnand %p1969_p7, %p1957_p0 }
  0x25   : > { %p1978_p10 = por %p1977_p8, %p1976_p5 }
  0x26   : > { %p1972_p11 = pneg %p1971_p9 }
  0x28   : > { %p1979_p3 = pnand %p1978_p10, %p1972_p11 }
  0x2a   : > { %1982 = shalt.err (!%p1979_p3)
}
  0x2b   : > { %1818 = dma.hbm_to_vmem [thread:$0]  (!%p2168_p12), %s2738_s2, 16, %s210_s9, [#allocation6]  }
  0x2c   : > { %p1596_p13 = scmp.ge.s32.totalorder %s2065_s23, 2 }
  0x2d   : > { %p2752_p1 = scmp.ne.s32.totalorder (!%p1596_p13), %s2747_s27, 0 }
  0x2e   : > { %228 = sbr.rel (%p1596_p13) target bundleno = 100 (0x64), region = 28 }
  0x35   : > { %231 = sbr.rel (!%p2752_p1) target bundleno = 73 (0x49), region = 32  ;;  %s233_s8 = sand.u32 (%p2752_p1), 1, %s2053_s20  }
  0x36   : > { %s1679_s11 = sshll.u32 (%p2752_p1), %s2061_s22, 4  ;;  %s1597_s12 = sshll.u32 (%p2752_p1), %s233_s8, 8 }
  0x37   : > { %s2196_s15 = scalar_lea.vmem (%p2752_p1), %s2736_s0, %s1679_s11  ;;  %s2201_s9 = scalar_lea.vmem (%p2752_p1), [#allocation2], %s1597_s12 }
  0x38   : > { %v251_v0 = vld [vmem:[%s2196_s15] sm:$0xff] (%p2752_p1)  ;;  %v253_v1 = vld [vmem:[%s2196_s15 + $0x8] sm:$0xff] (%p2752_p1) }
  0x39   : > { %v255_v2 = vld [vmem:[%s2196_s15 + $0x20] sm:$0xff] (%p2752_p1)  ;;  %252 = vst [vmem:[%s2201_s9] sm:$0xff] (%p2752_p1), %v251_v0  ;;  %254 = vst [vmem:[%s2201_s9 + $0x8] sm:$0xff] (%p2752_p1), %v253_v1  ;;  %v257_v3 = vld [vmem:[%s2196_s15 + $0x28] sm:$0xff] (%p2752_p1) }
  0x3a   : > { %256 = vst [vmem:[%s2201_s9 + $0x10] sm:$0xff] (%p2752_p1), %v255_v2  ;;  %v259_v4 = vld [vmem:[%s2196_s15 + $0x40] sm:$0xff] (%p2752_p1)  ;;  %v261_v5 = vld [vmem:[%s2196_s15 + $0x48] sm:$0xff] (%p2752_p1)  ;;  %258 = vst [vmem:[%s2201_s9 + $0x18] sm:$0xff] (%p2752_p1), %v257_v3 }
  0x3b   : > { %260 = vst [vmem:[%s2201_s9 + $0x20] sm:$0xff] (%p2752_p1), %v259_v4  ;;  %262 = vst [vmem:[%s2201_s9 + $0x28] sm:$0xff] (%p2752_p1), %v261_v5  ;;  %v263_v6 = vld [vmem:[%s2196_s15 + $0x60] sm:$0xff] (%p2752_p1)  ;;  %v265_v7 = vld [vmem:[%s2196_s15 + $0x68] sm:$0xff] (%p2752_p1) }
  0x3c   : > { %v267_v8 = vld [vmem:[%s2196_s15 + $0x80] sm:$0xff]  ;;  %264 = vst [vmem:[%s2201_s9 + $0x30] sm:$0xff] %v263_v6  ;;  %266 = vst [vmem:[%s2201_s9 + $0x38] sm:$0xff] %v265_v7  ;;  %v269_v9 = vld [vmem:[%s2196_s15 + $0x88] sm:$0xff] }
  0x3d   : > { %268 = vst [vmem:[%s2201_s9 + $0x40] sm:$0xff] %v267_v8  ;;  %v271_v10 = vld [vmem:[%s2196_s15 + $0xa0] sm:$0xff]  ;;  %v273_v11 = vld [vmem:[%s2196_s15 + $0xa8] sm:$0xff]  ;;  %270 = vst [vmem:[%s2201_s9 + $0x48] sm:$0xff] %v269_v9 }
  0x3e   : > { %272 = vst [vmem:[%s2201_s9 + $0x50] sm:$0xff] %v271_v10  ;;  %274 = vst [vmem:[%s2201_s9 + $0x58] sm:$0xff] %v273_v11  ;;  %v275_v12 = vld [vmem:[%s2196_s15 + $0xc0] sm:$0xff]  ;;  %v277_v13 = vld [vmem:[%s2196_s15 + $0xc8] sm:$0xff] }
  0x3f   : > { %v279_v14 = vld [vmem:[%s2196_s15 + $0xe0] sm:$0xff]  ;;  %276 = vst [vmem:[%s2201_s9 + $0x60] sm:$0xff] %v275_v12  ;;  %278 = vst [vmem:[%s2201_s9 + $0x68] sm:$0xff] %v277_v13  ;;  %v281_v15 = vld [vmem:[%s2196_s15 + $0xe8] sm:$0xff] }
  0x40   : > { %280 = vst [vmem:[%s2201_s9 + $0x70] sm:$0xff] %v279_v14  ;;  %v283_v16 = vld [vmem:[%s2196_s15 + $0x100] sm:$0xff]  ;;  %v285_v17 = vld [vmem:[%s2196_s15 + $0x108] sm:$0xff]  ;;  %282 = vst [vmem:[%s2201_s9 + $0x78] sm:$0xff] %v281_v15 }
  0x41   : > { %284 = vst [vmem:[%s2201_s9 + $0x80] sm:$0xff] %v283_v16  ;;  %286 = vst [vmem:[%s2201_s9 + $0x88] sm:$0xff] %v285_v17  ;;  %v287_v18 = vld [vmem:[%s2196_s15 + $0x120] sm:$0xff]  ;;  %v289_v19 = vld [vmem:[%s2196_s15 + $0x128] sm:$0xff] }
  0x42   : > { %v291_v20 = vld [vmem:[%s2196_s15 + $0x140] sm:$0xff]  ;;  %288 = vst [vmem:[%s2201_s9 + $0x90] sm:$0xff] %v287_v18  ;;  %290 = vst [vmem:[%s2201_s9 + $0x98] sm:$0xff] %v289_v19  ;;  %v293_v21 = vld [vmem:[%s2196_s15 + $0x148] sm:$0xff] }
  0x43   : > { %292 = vst [vmem:[%s2201_s9 + $0xa0] sm:$0xff] %v291_v20  ;;  %v295_v22 = vld [vmem:[%s2196_s15 + $0x160] sm:$0xff]  ;;  %v297_v23 = vld [vmem:[%s2196_s15 + $0x168] sm:$0xff]  ;;  %294 = vst [vmem:[%s2201_s9 + $0xa8] sm:$0xff] %v293_v21 }
  0x44   : > { %296 = vst [vmem:[%s2201_s9 + $0xb0] sm:$0xff] %v295_v22  ;;  %298 = vst [vmem:[%s2201_s9 + $0xb8] sm:$0xff] %v297_v23  ;;  %v299_v24 = vld [vmem:[%s2196_s15 + $0x180] sm:$0xff]  ;;  %v301_v25 = vld [vmem:[%s2196_s15 + $0x188] sm:$0xff] }
  0x45   : > { %v303_v26 = vld [vmem:[%s2196_s15 + $0x1a0] sm:$0xff]  ;;  %300 = vst [vmem:[%s2201_s9 + $0xc0] sm:$0xff] %v299_v24  ;;  %302 = vst [vmem:[%s2201_s9 + $0xc8] sm:$0xff] %v301_v25  ;;  %v305_v27 = vld [vmem:[%s2196_s15 + $0x1a8] sm:$0xff] }
  0x46   : > { %304 = vst [vmem:[%s2201_s9 + $0xd0] sm:$0xff] %v303_v26  ;;  %v307_v28 = vld [vmem:[%s2196_s15 + $0x1c0] sm:$0xff]  ;;  %v309_v29 = vld [vmem:[%s2196_s15 + $0x1c8] sm:$0xff]  ;;  %306 = vst [vmem:[%s2201_s9 + $0xd8] sm:$0xff] %v305_v27 }
  0x47   : > { %308 = vst [vmem:[%s2201_s9 + $0xe0] sm:$0xff] %v307_v28  ;;  %310 = vst [vmem:[%s2201_s9 + $0xe8] sm:$0xff] %v309_v29  ;;  %v311_v30 = vld [vmem:[%s2196_s15 + $0x1e0] sm:$0xff]  ;;  %v313_v31 = vld [vmem:[%s2196_s15 + $0x1e8] sm:$0xff] }
  0x48   : > { %312 = vst [vmem:[%s2201_s9 + $0xf0] sm:$0xff] %v311_v30  ;;  %314 = vst [vmem:[%s2201_s9 + $0xf8] sm:$0xff] %v313_v31 }
  0x49 PF: > { %s321_s10 = sand.u32 1, %s2053_s20   ;;  %s1680_s16 = sshll.u32 %s2061_s22, 12 }
  0x4a   : > { %s1600_s17 = sshll.u32 %s321_s10, 8  ;;  %s2269_s26 = scalar_lea.hbm %s2737_s1, %s1680_s16 }
  0x4b   : > { %s325_s28 = scalar_lea.vmem [#allocation3], %s1600_s17  ;;  %s2273_s11 = scalar_lea.sflag [#allocation4], %s321_s10 }
  0x4c   : > { %s333_s8 = sshll.u32 %s325_s28, 4  ;;  %s1983_s12 = scalar_lea.hbm %s2269_s26, 4096  ;;  %s2271_s8 = int_to_ptr.vmem [resolvable:$true] %s333_s8 }
  0x4d   : > { %p1984_p3 = scmp.ne.s32.totalorder %s2269_s26, %s1983_s12  ;;  %p2753_p5 = scmp.ne.s32.totalorder %s2747_s27, 0 }
  0x4e   : > { %s1987_s15 = scalar_lea.hbm %s2737_s1, 8192  ;;  %p1988_p12 = scmp.lt.u32.totalorder %s2269_s26, %s2737_s1 }
  0x4f   : > { %p1985_p8 = pnand %p1984_p3, %p2753_p5  ;;  %p1989_p0 = scmp.lt.u32.totalorder %s1987_s15, %s1983_s12 }
  0x50   : > { %p1991_p4 = scmp.lt.u32.totalorder %s1983_s12, %s2269_s26 }
  0x51   : > { %p1986_p10 = pneg %p1985_p8  ;;  %p1990_p2 = por %p1989_p0, %p1988_p12 }
  0x53   : > { %p1992_p6 = por %p1991_p4, %p1990_p2 }
  0x55   : > { %p1993_p7 = pnand %p1992_p6, %p1986_p10 }
  0x57   : > { %1996 = shalt.err (!%p1993_p7)
}
  0x58   : > { %s1997_s10 = scalar_lea.vmem %s2271_s8, 4096  ;;  %s2068_s17 = smov [#allocation3]  }
  0x59   : > { %p1998_p9 = scmp.ne.s32.totalorder %s2271_s8, %s1997_s10  ;;  %s2001_s18 = sshll.u32 %s2068_s17, 4  ;;  %s2002_s18 = int_to_ptr.vmem [resolvable:$false] %s2001_s18 }
  0x5a   : > { %s2003_s24 = scalar_lea.vmem %s2002_s18, 8192  ;;  %p2004_p1 = scmp.lt.s32.totalorder %s2271_s8, %s2002_s18 }
  0x5b   : > { %p1999_p11 = pnand %p1998_p9, %p2753_p5  ;;  %p2005_p3 = scmp.lt.s32.totalorder %s2003_s24, %s1997_s10 }
  0x5d   : > { %p2000_p13 = pneg %p1999_p11  ;;  %p2006_p8 = por %p2005_p3, %p2004_p1 }
  0x5f   : > { %p2007_p12 = pnand %p2006_p8, %p2000_p13 }
  0x61   : > { %2010 = shalt.err (!%p2007_p12)
}
  0x62   : > { %s2069_s28 = smov 64   ;;  %s2070_s12 = smov 4  }
  0x63   : > { %1811 = dma.hbm_to_vmem [thread:$0]  (%p2753_p5), %s2269_s26, 4096, %s2271_s8, %s2273_s11, %s2069_s28, %s2069_s28, %s2070_s12  }
  0x64 PF: > { %p2754_p10 = scmp.ne.s32.totalorder %s2750_s7, 0 }
  0x65   : > { %s348_s13 = sand.u32 (!%p2754_p10), 1, %s2049_s19   ;;  %p2755_p0 = scmp.ne.s32.totalorder (!%p2754_p10), %s2749_s30, 0 }
  0x66   : > { %345 = sbr.rel (%p2754_p10) target bundleno = 551 (0x227), region = 59  ;;  %s1604_s14 = sshll.u32 (!%p2754_p10), %s348_s13, 8 }
  0x67   : > { %s2300_s15 = scalar_lea.vmem (!%p2754_p10), [#allocation2], %s1604_s14  ;;  %s355_s9 = scalar_lea.sflag (!%p2754_p10), [#allocation4], %s348_s13 }
  0x68   : > { %s2302_s16 = scalar_lea.vmem (!%p2754_p10), [#allocation3], %s1604_s14 }
  0x6d   : > { %2036 = dma.done.wait (%p2755_p0), %s355_s9, 4096  }
  0x6e   : > { %2038 = vsyncadd (%p2755_p0), %s355_s9, 4294963200  ;;  %p2756_p5 = scmp.ne.s32.totalorder %s2748_s29, 0 }
  0x70   : > { %2040 = dma.done.wait (%p2756_p5), [#allocation6], 16  }
  0x71   : > { %2042 = vsyncadd (%p2756_p5), [#allocation6], 4294967280  ;;  %p1607_p2 = scmp.ne.s32.totalorder %s2057_s21, 0 }
  0x72   : > { %v2071_v32 = vmov (!%p1607_p2), 0.0  }
  0x73   : > { %414 = sbr.rel (%p1607_p2) target bundleno = 123 (0x7b), region = 75  ;;  %415 = vst [vmem:[%s2741_s5] sm:$0xff] (!%p1607_p2), %v2071_v32  ;;  %416 = vst [vmem:[%s2741_s5 + $0x8] sm:$0xff] (!%p1607_p2), %v2071_v32 }
  0x74   : > { %417 = vst [vmem:[%s2741_s5 + $0x10] sm:$0xff] (!%p1607_p2), %v2071_v32  ;;  %418 = vst [vmem:[%s2741_s5 + $0x18] sm:$0xff] (!%p1607_p2), %v2071_v32 }
  0x75   : > { %419 = vst [vmem:[%s2741_s5 + $0x20] sm:$0xff] (!%p1607_p2), %v2071_v32  ;;  %420 = vst [vmem:[%s2741_s5 + $0x28] sm:$0xff] (!%p1607_p2), %v2071_v32 }
  0x76   : > { %421 = vst [vmem:[%s2741_s5 + $0x30] sm:$0xff] (!%p1607_p2), %v2071_v32  ;;  %422 = vst [vmem:[%s2741_s5 + $0x38] sm:$0xff] (!%p1607_p2), %v2071_v32 }
  0x77   : > { %423 = vst [vmem:[%s2741_s5 + $0x40] sm:$0xff] (!%p1607_p2), %v2071_v32  ;;  %424 = vst [vmem:[%s2741_s5 + $0x48] sm:$0xff] (!%p1607_p2), %v2071_v32 }
  0x78   : > { %425 = vst [vmem:[%s2741_s5 + $0x50] sm:$0xff] (!%p1607_p2), %v2071_v32  ;;  %426 = vst [vmem:[%s2741_s5 + $0x58] sm:$0xff] (!%p1607_p2), %v2071_v32 }
  0x79   : > { %427 = vst [vmem:[%s2741_s5 + $0x60] sm:$0xff] (!%p1607_p2), %v2071_v32  ;;  %428 = vst [vmem:[%s2741_s5 + $0x68] sm:$0xff] (!%p1607_p2), %v2071_v32 }
  0x7a   : > { %429 = vst [vmem:[%s2741_s5 + $0x70] sm:$0xff] %v2071_v32  ;;  %430 = vst [vmem:[%s2741_s5 + $0x78] sm:$0xff] %v2071_v32 }
  0x7b PF: > { %v1873_v33 = vld [vmem:[%s2302_s16 + $0x40] sm:$0xff]   ;;  %v1877_v37 = vld [vmem:[%s2302_s16 + $0x48] sm:$0xff]   ;;  %v1881_v41 = vld [vmem:[%s2302_s16 + $0x50] sm:$0xff]   ;;  %p1672_p4 = scmp.ne.s32.totalorder %s2057_s21, 1 }
  0x7c   : > { %v1874_v34 = vld [vmem:[%s2302_s16 + $0xc0] sm:$0xff]   ;;  %1681 = vmatprep.subr.bf16.mxu0 %v1873_v33  ;;  %v1878_v38 = vld [vmem:[%s2302_s16 + $0xc8] sm:$0xff]   ;;  %v1882_v42 = vld [vmem:[%s2302_s16 + $0xd0] sm:$0xff]  }
  0x7d   : > { %v1875_v35 = vld [vmem:[%s2302_s16] sm:$0xff]   ;;  %1745 = vmatprep.subr.bf16.mxu1 %v1874_v34  ;;  %v1879_v39 = vld [vmem:[%s2302_s16 + $0x8] sm:$0xff]   ;;  %v1883_v43 = vld [vmem:[%s2302_s16 + $0x10] sm:$0xff]  }
  0x7e   : > { %v1876_v36 = vld [vmem:[%s2302_s16 + $0x80] sm:$0xff]   ;;  %1682 = vmatpush3.bf16.msra.mxu0 %v1875_v35  ;;  %v1880_v40 = vld [vmem:[%s2302_s16 + $0x88] sm:$0xff]   ;;  %v1884_v44 = vld [vmem:[%s2302_s16 + $0x90] sm:$0xff]  }
  0x7f   : > { %1746 = vmatpush3.bf16.msra.mxu1 %v1876_v36  ;;  %1683 = vmatprep.subr.bf16.mxu0 %v1877_v37  ;;  %v1885_v45 = vld [vmem:[%s2302_s16 + $0x58] sm:$0xff]   ;;  %v1889_v49 = vld [vmem:[%s2302_s16 + $0x60] sm:$0xff]   ;;  %v1893_v53 = vld [vmem:[%s2302_s16 + $0x68] sm:$0xff]  }
  0x80   : > { %1747 = vmatprep.subr.bf16.mxu1 %v1878_v38  ;;  %v1886_v46 = vld [vmem:[%s2302_s16 + $0xd8] sm:$0xff]   ;;  %v1890_v50 = vld [vmem:[%s2302_s16 + $0xe0] sm:$0xff]   ;;  %v1894_v54 = vld [vmem:[%s2302_s16 + $0xe8] sm:$0xff]  }
  0x81   : > { %v1887_v47 = vld [vmem:[%s2302_s16 + $0x18] sm:$0xff]   ;;  %v1891_v51 = vld [vmem:[%s2302_s16 + $0x20] sm:$0xff]   ;;  %v1895_v55 = vld [vmem:[%s2302_s16 + $0x28] sm:$0xff]  }
  0x82   : > { %1684 = vmatpush3.bf16.msra.mxu0 %v1879_v39  ;;  %v1888_v48 = vld [vmem:[%s2302_s16 + $0x98] sm:$0xff]   ;;  %v1892_v52 = vld [vmem:[%s2302_s16 + $0xa0] sm:$0xff]   ;;  %v1896_v56 = vld [vmem:[%s2302_s16 + $0xa8] sm:$0xff]  }
  0x83   : > { %1748 = vmatpush3.bf16.msra.mxu1 %v1880_v40  ;;  %1685 = vmatprep.subr.bf16.mxu0 %v1881_v41  ;;  %v1897_v57 = vld [vmem:[%s2302_s16 + $0x70] sm:$0xff]   ;;  %v1901_v61 = vld [vmem:[%s2302_s16 + $0x78] sm:$0xff]  }
  0x84   : > { %1749 = vmatprep.subr.bf16.mxu1 %v1882_v42  ;;  %v1898_v58 = vld [vmem:[%s2302_s16 + $0xf0] sm:$0xff]   ;;  %v1902_v62 = vld [vmem:[%s2302_s16 + $0xf8] sm:$0xff]   ;;  %v431_v42 = vld [vmem:[%s2741_s5] sm:$0xff] }
  0x85   : > { %v1899_v59 = vld [vmem:[%s2302_s16 + $0x30] sm:$0xff]   ;;  %v1903_v63 = vld [vmem:[%s2302_s16 + $0x38] sm:$0xff]  }
  0x86   : > { %1686 = vmatpush3.bf16.msra.mxu0 %v1883_v43  ;;  %v1900_v60 = vld [vmem:[%s2302_s16 + $0xb0] sm:$0xff]   ;;  %v1904_v0 = vld [vmem:[%s2302_s16 + $0xb8] sm:$0xff]  }
  0x87   : > { %1750 = vmatpush3.bf16.msra.mxu1 %v1884_v44  ;;  %1687 = vmatprep.subr.bf16.mxu0 %v1885_v45  ;;  %v1905_v1 = vld [vmem:[%s2300_s15] ss:$16 sps:$4 sm:$0xff]   ;;  %v1907_v2 = vld [vmem:[%s2300_s15 + $0x4] ss:$16 sps:$4 sm:$0xff]   ;;  %v1908_v3 = vld [vmem:[%s2300_s15 + $0x8] ss:$16 sps:$4 sm:$0xff]  }
  0x88   : > { %1751 = vmatprep.subr.bf16.mxu1 %v1886_v46  ;;  %v1910_v4 = vld [vmem:[%s2300_s15 + $0xc] ss:$16 sps:$4 sm:$0xff]   ;;  %927 = vmatprep.mubr.bf16.mxu0 %v1907_v2  ;;  %v1911_v5 = vld [vmem:[%s2300_s15 + $0x24] ss:$16 sps:$4 sm:$0xff]   ;;  %v1915_v7 = vld [vmem:[%s2300_s15 + $0x20] ss:$16 sps:$4 sm:$0xff]  }
  0x89   : > { %1024 = vmatprep.mubr.bf16.mxu1 %v1910_v4  ;;  %v1913_v6 = vld [vmem:[%s2300_s15 + $0x2c] ss:$16 sps:$4 sm:$0xff]   ;;  %v1916_v8 = vld [vmem:[%s2300_s15 + $0x28] ss:$16 sps:$4 sm:$0xff]   ;;  %v1917_v9 = vld [vmem:[%s2300_s15 + $0x44] ss:$16 sps:$4 sm:$0xff]  }
  0x8a   : > { %1688 = vmatpush3.bf16.msra.mxu0 %v1887_v47  ;;  %v1919_v10 = vld [vmem:[%s2300_s15 + $0x4c] ss:$16 sps:$4 sm:$0xff]   ;;  %v1921_v11 = vld [vmem:[%s2300_s15 + $0x40] ss:$16 sps:$4 sm:$0xff]   ;;  %v1922_v12 = vld [vmem:[%s2300_s15 + $0x48] ss:$16 sps:$4 sm:$0xff]  }
  0x8b   : > { %1752 = vmatpush3.bf16.msra.mxu1 %v1888_v48  ;;  %1689 = vmatprep.subr.bf16.mxu0 %v1889_v49  ;;  %v1923_v13 = vld [vmem:[%s2300_s15 + $0x64] ss:$16 sps:$4 sm:$0xff]   ;;  %v1925_v14 = vld [vmem:[%s2300_s15 + $0x6c] ss:$16 sps:$4 sm:$0xff]   ;;  %v1927_v15 = vld [vmem:[%s2300_s15 + $0x60] ss:$16 sps:$4 sm:$0xff]  }
  0x8c   : > { %1753 = vmatprep.subr.bf16.mxu1 %v1890_v50  ;;  %v1928_v16 = vld [vmem:[%s2300_s15 + $0x68] ss:$16 sps:$4 sm:$0xff]   ;;  %v1929_v17 = vld [vmem:[%s2300_s15 + $0x84] ss:$16 sps:$4 sm:$0xff]   ;;  %v1931_v18 = vld [vmem:[%s2300_s15 + $0x8c] ss:$16 sps:$4 sm:$0xff]  }
  0x8d   : > { %v1933_v19 = vld [vmem:[%s2300_s15 + $0x80] ss:$16 sps:$4 sm:$0xff]   ;;  %v1934_v20 = vld [vmem:[%s2300_s15 + $0x88] ss:$16 sps:$4 sm:$0xff]   ;;  %v1935_v21 = vld [vmem:[%s2300_s15 + $0xa4] ss:$16 sps:$4 sm:$0xff]  }
  0x8e   : > { %1690 = vmatpush3.bf16.msra.mxu0 %v1891_v51  ;;  %v1937_v22 = vld [vmem:[%s2300_s15 + $0xac] ss:$16 sps:$4 sm:$0xff]   ;;  %v1939_v23 = vld [vmem:[%s2300_s15 + $0xa0] ss:$16 sps:$4 sm:$0xff]   ;;  %v1940_v24 = vld [vmem:[%s2300_s15 + $0xa8] ss:$16 sps:$4 sm:$0xff]  }
  0x8f   : > { %1754 = vmatpush3.bf16.msra.mxu1 %v1892_v52  ;;  %1691 = vmatprep.subr.bf16.mxu0 %v1893_v53  ;;  %v1941_v25 = vld [vmem:[%s2300_s15 + $0xc4] ss:$16 sps:$4 sm:$0xff]   ;;  %v1943_v26 = vld [vmem:[%s2300_s15 + $0xcc] ss:$16 sps:$4 sm:$0xff]   ;;  %v1945_v27 = vld [vmem:[%s2300_s15 + $0xc0] ss:$16 sps:$4 sm:$0xff]  }
  0x90   : > { %1755 = vmatprep.subr.bf16.mxu1 %v1894_v54  ;;  %v1946_v28 = vld [vmem:[%s2300_s15 + $0xc8] ss:$16 sps:$4 sm:$0xff]   ;;  %v1947_v29 = vld [vmem:[%s2300_s15 + $0xe4] ss:$16 sps:$4 sm:$0xff]   ;;  %v1949_v30 = vld [vmem:[%s2300_s15 + $0xec] ss:$16 sps:$4 sm:$0xff]  }
  0x91   : > { %v1951_v31 = vld [vmem:[%s2300_s15 + $0xe0] ss:$16 sps:$4 sm:$0xff]   ;;  %v1952_v32 = vld [vmem:[%s2300_s15 + $0xe8] ss:$16 sps:$4 sm:$0xff]  }
  0x92   : > { %1692 = vmatpush3.bf16.msra.mxu0 %v1895_v55  ;;  %v432_v47 = vld [vmem:[%s2741_s5 + $0x8] sm:$0xff] }
  0x93   : > { %1756 = vmatpush3.bf16.msra.mxu1 %v1896_v56  ;;  %1693 = vmatprep.subr.bf16.mxu0 %v1897_v57 }
  0x94   : > { %1757 = vmatprep.subr.bf16.mxu1 %v1898_v58 }
  0x96   : > { %1694 = vmatpush3.bf16.msra.mxu0 %v1899_v59 }
  0x97   : > { %1758 = vmatpush3.bf16.msra.mxu1 %v1900_v60  ;;  %1695 = vmatprep.subr.bf16.mxu0 %v1901_v61  ;;  %v433_v60 = vld [vmem:[%s2741_s5 + $0x10] sm:$0xff] }
  0x98   : > { %1759 = vmatprep.subr.bf16.mxu1 %v1902_v62 }
  0x9a   : > { %1696 = vmatpush3.bf16.msra.mxu0 %v1903_v63 }
  0x9b   : > { %1760 = vmatpush3.bf16.msra.mxu1 %v1904_v0 }
  0x9d   : > { %928 = vmatmul.mubr.bf16.vlgmr.msra.gmra.mrb[0].mxu0 %v1905_v1  ;;  %v434_v1 = vld [vmem:[%s2741_s5 + $0x18] sm:$0xff] }
  0x9e   : > { %1025 = vmatmul.mubr.bf16.vlgmr.msra.gmra.mrb[0].mxu1 %v1908_v3  ;;  %935 = vmatprep.mubr.bf16.mxu0 %v1911_v5 }
  0x9f   : > { %1032 = vmatprep.mubr.bf16.mxu1 %v1913_v6 }
  0xa5   : > { %936 = vmatmul.mubr.bf16.gmra.mrb[4].mxu0 %v1915_v7 }
  0xa6   : > { %1033 = vmatmul.mubr.bf16.gmra.mrb[4].mxu1 %v1916_v8  ;;  %943 = vmatprep.mubr.bf16.mxu0 %v1917_v9 }
  0xa7   : > { %1040 = vmatprep.mubr.bf16.mxu1 %v1919_v10 }
  0xad   : > { %944 = vmatmul.mubr.bf16.gmra.mrb[8].mxu0 %v1921_v11 }
  0xae   : > { %1041 = vmatmul.mubr.bf16.gmra.mrb[8].mxu1 %v1922_v12  ;;  %951 = vmatprep.mubr.bf16.mxu0 %v1923_v13 }
  0xaf   : > { %1048 = vmatprep.mubr.bf16.mxu1 %v1925_v14  ;;  %v435_v14 = vld [vmem:[%s2741_s5 + $0x20] sm:$0xff] }
  0xb5   : > { %952 = vmatmul.mubr.bf16.gmra.mrb[12].mxu0 %v1927_v15 }
  0xb6   : > { %1049 = vmatmul.mubr.bf16.gmra.mrb[12].mxu1 %v1928_v16  ;;  %959 = vmatprep.mubr.bf16.mxu0 %v1929_v17 }
  0xb7   : > { %1056 = vmatprep.mubr.bf16.mxu1 %v1931_v18 }
  0xbd   : > { %960 = vmatmul.mubr.bf16.gmra.mrb[16].mxu0 %v1933_v19  ;;  %v436_v19 = vld [vmem:[%s2741_s5 + $0x28] sm:$0xff] }
  0xbe   : > { %1057 = vmatmul.mubr.bf16.gmra.mrb[16].mxu1 %v1934_v20  ;;  %967 = vmatprep.mubr.bf16.mxu0 %v1935_v21 }
  0xbf   : > { %1064 = vmatprep.mubr.bf16.mxu1 %v1937_v22 }
  0xc5   : > { %968 = vmatmul.mubr.bf16.gmra.mrb[20].mxu0 %v1939_v23 }
  0xc6   : > { %1065 = vmatmul.mubr.bf16.gmra.mrb[20].mxu1 %v1940_v24  ;;  %975 = vmatprep.mubr.bf16.mxu0 %v1941_v25 }
  0xc7   : > { %1072 = vmatprep.mubr.bf16.mxu1 %v1943_v26 }
  0xcd   : > { %976 = vmatmul.mubr.bf16.gmra.mrb[24].mxu0 %v1945_v27 }
  0xce   : > { %1073 = vmatmul.mubr.bf16.gmra.mrb[24].mxu1 %v1946_v28  ;;  %983 = vmatprep.mubr.bf16.mxu0 %v1947_v29 }
  0xcf   : > { %1080 = vmatprep.mubr.bf16.mxu1 %v1949_v30 }
  0xd5   : > { %984 = vmatmul.mubr.bf16.gmra.mrb[28].mxu0 %v1951_v31 }
  0xd6   : > { %1081 = vmatmul.mubr.bf16.gmra.mrb[28].mxu1 %v1952_v32  ;;  %v437_v32 = vld [vmem:[%s2741_s5 + $0x30] sm:$0xff] }
 0x170   : > { %v1697_v33 = vpop.f32.mrb[0].mxu0 }
 0x171   : > { %v1761_v34 = vpop.f32.mrb[0].mxu1  ;;  %v1698_v35 = vpop.f32.mrb[1].mxu0 }
 0x172   : > { %v1699_v36 = vadd.f32 %v1698_v35, %v1697_v33  ;;  %v1762_v37 = vpop.f32.mrb[1].mxu1  ;;  %v1700_v38 = vpop.f32.mrb[2].mxu0 }
 0x173   : > { %v1763_v39 = vadd.f32 %v1762_v37, %v1761_v34  ;;  %v1764_v40 = vpop.f32.mrb[2].mxu1  ;;  %v1701_v41 = vpop.f32.mrb[3].mxu0  ;;  %v438_v37 = vld [vmem:[%s2741_s5 + $0x38] sm:$0xff] }
 0x174   : > { %v1702_v43 = vadd.f32 %v1701_v41, %v1700_v38  ;;  %v1765_v44 = vpop.f32.mrb[3].mxu1 }
 0x175   : > { %v1027_v45 = vadd.f32 %v1763_v39, %v1699_v36  ;;  %v1766_v46 = vadd.f32 %v1765_v44, %v1764_v40 }
 0x177   : > { %v1089_v48 = vadd.f32 %v1027_v45, %v431_v42  ;;  %v1030_v49 = vadd.f32 %v1766_v46, %v1702_v43 }
 0x178   : > { %v1703_v50 = vpop.f32.mrb[4].mxu0 }
 0x179   : > { %1105 = vst [vmem:[%s2741_s5] sm:$0xff] %v1089_v48  ;;  %v1090_v51 = vadd.f32 %v1030_v49, %v432_v47  ;;  %v1767_v52 = vpop.f32.mrb[4].mxu1  ;;  %v1704_v53 = vpop.f32.mrb[5].mxu0 }
 0x17a   : > { %v1705_v54 = vadd.f32 %v1704_v53, %v1703_v50  ;;  %v1768_v55 = vpop.f32.mrb[5].mxu1  ;;  %v1706_v56 = vpop.f32.mrb[6].mxu0  ;;  %v439_v50 = vld [vmem:[%s2741_s5 + $0x40] sm:$0xff] }
 0x17b   : > { %1106 = vst [vmem:[%s2741_s5 + $0x8] sm:$0xff] %v1090_v51  ;;  %v1769_v57 = vadd.f32 %v1768_v55, %v1767_v52  ;;  %v1770_v58 = vpop.f32.mrb[6].mxu1  ;;  %v1707_v59 = vpop.f32.mrb[7].mxu0  ;;  %v440_v55 = vld [vmem:[%s2741_s5 + $0x48] sm:$0xff] }
 0x17c   : > { %v1708_v61 = vadd.f32 %v1707_v59, %v1706_v56  ;;  %v1771_v62 = vpop.f32.mrb[7].mxu1 }
 0x17d   : > { %v1035_v63 = vadd.f32 %v1769_v57, %v1705_v54  ;;  %v1772_v0 = vadd.f32 %v1771_v62, %v1770_v58 }
 0x17f   : > { %v1091_v2 = vadd.f32 %v1035_v63, %v433_v60  ;;  %v1038_v3 = vadd.f32 %v1772_v0, %v1708_v61 }
 0x180   : > { %v1709_v4 = vpop.f32.mrb[8].mxu0 }
 0x181   : > { %1107 = vst [vmem:[%s2741_s5 + $0x10] sm:$0xff] %v1091_v2  ;;  %v1092_v5 = vadd.f32 %v1038_v3, %v434_v1  ;;  %v1773_v6 = vpop.f32.mrb[8].mxu1  ;;  %v1710_v7 = vpop.f32.mrb[9].mxu0 }
 0x182   : > { %v1711_v8 = vadd.f32 %v1710_v7, %v1709_v4  ;;  %v1774_v9 = vpop.f32.mrb[9].mxu1  ;;  %v1712_v10 = vpop.f32.mrb[10].mxu0  ;;  %v441_v4 = vld [vmem:[%s2741_s5 + $0x50] sm:$0xff] }
 0x183   : > { %1108 = vst [vmem:[%s2741_s5 + $0x18] sm:$0xff] %v1092_v5  ;;  %v1775_v11 = vadd.f32 %v1774_v9, %v1773_v6  ;;  %v1776_v12 = vpop.f32.mrb[10].mxu1  ;;  %v1713_v13 = vpop.f32.mrb[11].mxu0  ;;  %v442_v9 = vld [vmem:[%s2741_s5 + $0x58] sm:$0xff] }
 0x184   : > { %v1714_v15 = vadd.f32 %v1713_v13, %v1712_v10  ;;  %v1777_v16 = vpop.f32.mrb[11].mxu1 }
 0x185   : > { %v1043_v17 = vadd.f32 %v1775_v11, %v1711_v8  ;;  %v1778_v18 = vadd.f32 %v1777_v16, %v1776_v12 }
 0x187   : > { %v1093_v20 = vadd.f32 %v1043_v17, %v435_v14  ;;  %v1046_v21 = vadd.f32 %v1778_v18, %v1714_v15 }
 0x188   : > { %v1715_v22 = vpop.f32.mrb[12].mxu0 }
 0x189   : > { %1109 = vst [vmem:[%s2741_s5 + $0x20] sm:$0xff] %v1093_v20  ;;  %v1094_v23 = vadd.f32 %v1046_v21, %v436_v19  ;;  %v1779_v24 = vpop.f32.mrb[12].mxu1  ;;  %v1716_v25 = vpop.f32.mrb[13].mxu0 }
 0x18a   : > { %v1717_v26 = vadd.f32 %v1716_v25, %v1715_v22  ;;  %v1780_v27 = vpop.f32.mrb[13].mxu1  ;;  %v1718_v28 = vpop.f32.mrb[14].mxu0  ;;  %v443_v22 = vld [vmem:[%s2741_s5 + $0x60] sm:$0xff] }
 0x18b   : > { %1110 = vst [vmem:[%s2741_s5 + $0x28] sm:$0xff] %v1094_v23  ;;  %v1781_v29 = vadd.f32 %v1780_v27, %v1779_v24  ;;  %v1782_v30 = vpop.f32.mrb[14].mxu1  ;;  %v1719_v31 = vpop.f32.mrb[15].mxu0  ;;  %v444_v27 = vld [vmem:[%s2741_s5 + $0x68] sm:$0xff] }
 0x18c   : > { %v1720_v33 = vadd.f32 %v1719_v31, %v1718_v28  ;;  %v1783_v34 = vpop.f32.mrb[15].mxu1 }
 0x18d   : > { %v1051_v35 = vadd.f32 %v1781_v29, %v1717_v26  ;;  %v1784_v36 = vadd.f32 %v1783_v34, %v1782_v30 }
 0x18f   : > { %v1095_v38 = vadd.f32 %v1051_v35, %v437_v32  ;;  %v1054_v39 = vadd.f32 %v1784_v36, %v1720_v33 }
 0x190   : > { %v1721_v40 = vpop.f32.mrb[16].mxu0 }
 0x191   : > { %1111 = vst [vmem:[%s2741_s5 + $0x30] sm:$0xff] %v1095_v38  ;;  %v1096_v41 = vadd.f32 %v1054_v39, %v438_v37  ;;  %v1785_v42 = vpop.f32.mrb[16].mxu1  ;;  %v1722_v43 = vpop.f32.mrb[17].mxu0 }
 0x192   : > { %v1723_v44 = vadd.f32 %v1722_v43, %v1721_v40  ;;  %v1786_v45 = vpop.f32.mrb[17].mxu1  ;;  %v1724_v46 = vpop.f32.mrb[18].mxu0  ;;  %v445_v40 = vld [vmem:[%s2741_s5 + $0x70] sm:$0xff] }
 0x193   : > { %1112 = vst [vmem:[%s2741_s5 + $0x38] sm:$0xff] %v1096_v41  ;;  %v1787_v47 = vadd.f32 %v1786_v45, %v1785_v42  ;;  %v1788_v48 = vpop.f32.mrb[18].mxu1  ;;  %v1725_v49 = vpop.f32.mrb[19].mxu0  ;;  %v446_v45 = vld [vmem:[%s2741_s5 + $0x78] sm:$0xff] }
 0x194   : > { %v1726_v51 = vadd.f32 %v1725_v49, %v1724_v46  ;;  %v1789_v52 = vpop.f32.mrb[19].mxu1  ;;  %v1125_v49 = vld [vmem:[%s2741_s5] sm:$0xff] (!%p1672_p4) }
 0x195   : > { %v1059_v53 = vadd.f32 %v1787_v47, %v1723_v44  ;;  %v1790_v54 = vadd.f32 %v1789_v52, %v1788_v48  ;;  %v1673_v52 = vld [vmem:[#allocation5] ss:$0 sm:$0xff] (!%p1672_p4) }
 0x197   : > { %v1097_v56 = vadd.f32 %v1059_v53, %v439_v50  ;;  %v1062_v57 = vadd.f32 %v1790_v54, %v1726_v51  ;;  %v1126_v50 = vld [vmem:[%s2741_s5 + $0x8] sm:$0xff] (!%p1672_p4)  ;;  %v1127_v51 = vld [vmem:[%s2741_s5 + $0x10] sm:$0xff] (!%p1672_p4)  ;;  %v1148_v53 = vadd.f32 (!%p1672_p4), %v1673_v52, %v1125_v49 }
 0x198   : > { %v1727_v58 = vpop.f32.mrb[20].mxu0  ;;  %v1149_v54 = vadd.f32 (!%p1672_p4), %v1673_v52, %v1126_v50 }
 0x199   : > { %1113 = vst [vmem:[%s2741_s5 + $0x40] sm:$0xff] %v1097_v56  ;;  %v1098_v59 = vadd.f32 %v1062_v57, %v440_v55  ;;  %v1791_v60 = vpop.f32.mrb[20].mxu1  ;;  %v1728_v61 = vpop.f32.mrb[21].mxu0  ;;  %v1128_v55 = vld [vmem:[%s2741_s5 + $0x18] sm:$0xff] (!%p1672_p4)  ;;  %v1150_v56 = vadd.f32 (!%p1672_p4), %v1673_v52, %v1127_v51  ;;  %v1129_v57 = vld [vmem:[%s2741_s5 + $0x20] sm:$0xff] (!%p1672_p4) }
 0x19a   : > { %v1729_v62 = vadd.f32 %v1728_v61, %v1727_v58  ;;  %v1792_v63 = vpop.f32.mrb[21].mxu1  ;;  %v1730_v0 = vpop.f32.mrb[22].mxu0  ;;  %v1151_v58 = vadd.f32 (!%p1672_p4), %v1673_v52, %v1128_v55  ;;  %v1152_v61 = vadd.f32 (!%p1672_p4), %v1673_v52, %v1129_v57 }
 0x19b   : > { %1114 = vst [vmem:[%s2741_s5 + $0x48] sm:$0xff] %v1098_v59  ;;  %v1793_v1 = vadd.f32 %v1792_v63, %v1791_v60  ;;  %v1794_v2 = vpop.f32.mrb[22].mxu1  ;;  %v1731_v3 = vpop.f32.mrb[23].mxu0  ;;  %v1245_v59 = vadd.f32 (!%p1672_p4), %v1149_v54, %v1148_v53  ;;  %v1130_v60 = vld [vmem:[%s2741_s5 + $0x28] sm:$0xff] (!%p1672_p4)  ;;  %v1131_v63 = vld [vmem:[%s2741_s5 + $0x30] sm:$0xff] (!%p1672_p4) }
 0x19c   : > { %v1732_v5 = vadd.f32 %v1731_v3, %v1730_v0  ;;  %v1795_v6 = vpop.f32.mrb[23].mxu1  ;;  %v1153_v0 = vadd.f32 (!%p1672_p4), %v1673_v52, %v1130_v60  ;;  %v1154_v3 = vadd.f32 (!%p1672_p4), %v1673_v52, %v1131_v63 }
 0x19d   : > { %v1067_v7 = vadd.f32 %v1793_v1, %v1729_v62  ;;  %v1796_v8 = vadd.f32 %v1795_v6, %v1794_v2  ;;  %v1246_v62 = vadd.f32 (!%p1672_p4), %v1245_v59, %v1150_v56  ;;  %v1132_v2 = vld [vmem:[%s2741_s5 + $0x38] sm:$0xff] (!%p1672_p4) }
 0x19e   : > { %v1155_v6 = vadd.f32 (!%p1672_p4), %v1673_v52, %v1132_v2 }
 0x19f   : > { %v1099_v10 = vadd.f32 %v1067_v7, %v441_v4  ;;  %v1070_v11 = vadd.f32 %v1796_v8, %v1732_v5  ;;  %v1247_v1 = vadd.f32 (!%p1672_p4), %v1246_v62, %v1151_v58 }
 0x1a0   : > { %v1733_v12 = vpop.f32.mrb[24].mxu0  ;;  %v1133_v5 = vld [vmem:[%s2741_s5 + $0x40] sm:$0xff] (!%p1672_p4) }
 0x1a1   : > { %1115 = vst [vmem:[%s2741_s5 + $0x50] sm:$0xff] %v1099_v10  ;;  %v1100_v13 = vadd.f32 %v1070_v11, %v442_v9  ;;  %v1797_v14 = vpop.f32.mrb[24].mxu1  ;;  %v1734_v15 = vpop.f32.mrb[25].mxu0  ;;  %v1248_v4 = vadd.f32 (!%p1672_p4), %v1247_v1, %v1152_v61  ;;  %v1156_v9 = vadd.f32 (!%p1672_p4), %v1673_v52, %v1133_v5 }
 0x1a2   : > { %v1735_v16 = vadd.f32 %v1734_v15, %v1733_v12  ;;  %v1798_v17 = vpop.f32.mrb[25].mxu1  ;;  %v1736_v18 = vpop.f32.mrb[26].mxu0  ;;  %v1134_v8 = vld [vmem:[%s2741_s5 + $0x48] sm:$0xff] (!%p1672_p4) }
 0x1a3   : > { %1116 = vst [vmem:[%s2741_s5 + $0x58] sm:$0xff] %v1100_v13  ;;  %v1799_v19 = vadd.f32 %v1798_v17, %v1797_v14  ;;  %v1800_v20 = vpop.f32.mrb[26].mxu1  ;;  %v1737_v21 = vpop.f32.mrb[27].mxu0  ;;  %v1249_v7 = vadd.f32 (!%p1672_p4), %v1248_v4, %v1153_v0  ;;  %v1157_v12 = vadd.f32 (!%p1672_p4), %v1673_v52, %v1134_v8 }
 0x1a4   : > { %v1738_v23 = vadd.f32 %v1737_v21, %v1736_v18  ;;  %v1801_v24 = vpop.f32.mrb[27].mxu1 }
 0x1a5   : > { %v1075_v25 = vadd.f32 %v1799_v19, %v1735_v16  ;;  %v1802_v26 = vadd.f32 %v1801_v24, %v1800_v20  ;;  %v1250_v10 = vadd.f32 (!%p1672_p4), %v1249_v7, %v1154_v3 }
 0x1a7   : > { %v1101_v28 = vadd.f32 %v1075_v25, %v443_v22  ;;  %v1078_v29 = vadd.f32 %v1802_v26, %v1738_v23  ;;  %v1251_v13 = vadd.f32 (!%p1672_p4), %v1250_v10, %v1155_v6 }
 0x1a8   : > { %v1739_v30 = vpop.f32.mrb[28].mxu0  ;;  %v1135_v11 = vld [vmem:[%s2741_s5 + $0x50] sm:$0xff] (!%p1672_p4) }
 0x1a9   : > { %1117 = vst [vmem:[%s2741_s5 + $0x60] sm:$0xff] %v1101_v28  ;;  %v1102_v31 = vadd.f32 %v1078_v29, %v444_v27  ;;  %v1803_v32 = vpop.f32.mrb[28].mxu1  ;;  %v1740_v33 = vpop.f32.mrb[29].mxu0  ;;  %v1158_v15 = vadd.f32 (!%p1672_p4), %v1673_v52, %v1135_v11  ;;  %v1252_v16 = vadd.f32 (!%p1672_p4), %v1251_v13, %v1156_v9 }
 0x1aa   : > { %v1741_v34 = vadd.f32 %v1740_v33, %v1739_v30  ;;  %v1804_v35 = vpop.f32.mrb[29].mxu1  ;;  %v1742_v36 = vpop.f32.mrb[30].mxu0  ;;  %v1136_v14 = vld [vmem:[%s2741_s5 + $0x58] sm:$0xff] (!%p1672_p4) }
 0x1ab   : > { %1118 = vst [vmem:[%s2741_s5 + $0x68] sm:$0xff] %v1102_v31  ;;  %v1805_v37 = vadd.f32 %v1804_v35, %v1803_v32  ;;  %v1806_v38 = vpop.f32.mrb[30].mxu1  ;;  %v1743_v39 = vpop.f32.mrb[31].mxu0  ;;  %v1159_v18 = vadd.f32 (!%p1672_p4), %v1673_v52, %v1136_v14  ;;  %v1253_v19 = vadd.f32 (!%p1672_p4), %v1252_v16, %v1157_v12 }
 0x1ac   : > { %v1744_v41 = vadd.f32 %v1743_v39, %v1742_v36  ;;  %v1807_v42 = vpop.f32.mrb[31].mxu1 }
 0x1ad   : > { %v1083_v43 = vadd.f32 %v1805_v37, %v1741_v34  ;;  %v1808_v44 = vadd.f32 %v1807_v42, %v1806_v38  ;;  %1124 = sbr.rel (%p1672_p4) target bundleno = 551 (0x227), region = 79  ;;  %v1254_v22 = vadd.f32 (!%p1672_p4), %v1253_v19, %v1158_v15 }
 0x1af   : > { %v1103_v46 = vadd.f32 %v1083_v43, %v445_v40  ;;  %v1086_v47 = vadd.f32 %v1808_v44, %v1744_v41  ;;  %v1255_v25 = vadd.f32 (!%p1672_p4), %v1254_v22, %v1159_v18 }
 0x1b0   : > { %v1137_v17 = vld [vmem:[%s2741_s5 + $0x60] sm:$0xff] (!%p1672_p4) }
 0x1b1   : > { %1119 = vst [vmem:[%s2741_s5 + $0x70] sm:$0xff] %v1103_v46  ;;  %v1104_v48 = vadd.f32 %v1086_v47, %v446_v45  ;;  %v1160_v21 = vadd.f32 (!%p1672_p4), %v1673_v52, %v1137_v17 }
 0x1b2   : > { %v1138_v20 = vld [vmem:[%s2741_s5 + $0x68] sm:$0xff] (!%p1672_p4) }
 0x1b3   : > { %1120 = vst [vmem:[%s2741_s5 + $0x78] sm:$0xff] %v1104_v48  ;;  %v1161_v24 = vadd.f32 (!%p1672_p4), %v1673_v52, %v1138_v20  ;;  %v1256_v28 = vadd.f32 (!%p1672_p4), %v1255_v25, %v1160_v21 }
 0x1b5   : > { %v1257_v30 = vadd.f32 %v1256_v28, %v1161_v24 }
 0x1b8   : > { %v1139_v23 = vld [vmem:[%s2741_s5 + $0x70] sm:$0xff] }
 0x1b9   : > { %v1162_v27 = vadd.f32 %v1673_v52, %v1139_v23 }
 0x1ba   : > { %v1140_v26 = vld [vmem:[%s2741_s5 + $0x78] sm:$0xff] }
 0x1bb   : > { %v1163_v29 = vadd.f32 %v1673_v52, %v1140_v26  ;;  %v1258_v31 = vadd.f32 %v1257_v30, %v1162_v27 }
 0x1bd   : > { %v1259_v32 = vadd.f32 %v1258_v31, %v1163_v29 }
 0x1bf   : > { %v1260_v33 = vrot.slane %v1259_v32, 4 }
 0x1c1   : > { %v1261_v34 = vadd.f32 %v1260_v33, %v1259_v32  ;;  %v2607_v32 = vld [vmem:[%s2739_s3] ss:$0 sm:$0xff] }
 0x1c3   : > { %v1262_v35 = vrot.slane %v1261_v34, 2 }
 0x1c5   : > { %v1263_v36 = vadd.f32 %v1262_v35, %v1261_v34 }
 0x1c7   : > { %v1264_v37 = vrot.slane %v1263_v36, 1 }
 0x1c9   : > { %v1265_v38 = vadd.f32 %v1264_v37, %v1263_v36  ;;  %v2616_v37 = vld [vmem:[%s2740_s4] ss:$0 sm:$0xff] }
 0x1cb   : > { %v1266_v39 = vmul.f32 0.0078125, %v1265_v38 }
 0x1cd   : > { %v1267_v40 = vsub.f32 %v1148_v53, %v1266_v39  ;;  %v1268_v41 = vsub.f32 %v1149_v54, %v1266_v39  ;;  %v1269_v42 = vsub.f32 %v1150_v56, %v1266_v39  ;;  %v1270_v43 = vsub.f32 %v1151_v58, %v1266_v39 }
 0x1ce   : > { %v1271_v46 = vsub.f32 %v1152_v61, %v1266_v39  ;;  %v1272_v48 = vsub.f32 %v1153_v0, %v1266_v39  ;;  %v1273_v51 = vsub.f32 %v1154_v3, %v1266_v39  ;;  %v1274_v57 = vsub.f32 %v1155_v6, %v1266_v39 }
 0x1cf   : > { %v1299_v44 = vmul.f32 %v1267_v40, %v1267_v40  ;;  %v1300_v45 = vmul.f32 %v1268_v41, %v1268_v41  ;;  %v1301_v47 = vmul.f32 %v1269_v42, %v1269_v42  ;;  %v1302_v49 = vmul.f32 %v1270_v43, %v1270_v43 }
 0x1d0   : > { %v1303_v52 = vmul.f32 %v1271_v46, %v1271_v46  ;;  %v1304_v59 = vmul.f32 %v1272_v48, %v1272_v48  ;;  %v2570_v62 = vsub.f32 %v1156_v9, %v1266_v39  ;;  %v1305_v63 = vmul.f32 %v1273_v51, %v1273_v51 }
 0x1d1   : > { %v1315_v50 = vadd.f32 %v1300_v45, %v1299_v44  ;;  %v2572_v54 = vsub.f32 %v1157_v12, %v1266_v39  ;;  %v1306_v56 = vmul.f32 %v1274_v57, %v1274_v57  ;;  %v2574_v1 = vsub.f32 %v1158_v15, %v1266_v39 }
 0x1d2   : > { %v1307_v61 = vmul.f32 %v2570_v62, %v2570_v62  ;;  %v2578_v2 = vsub.f32 %v1159_v18, %v1266_v39  ;;  %v2582_v5 = vsub.f32 %v1160_v21, %v1266_v39  ;;  %v2586_v8 = vsub.f32 %v1161_v24, %v1266_v39 }
 0x1d3   : > { %v1316_v55 = vadd.f32 %v1315_v50, %v1301_v47  ;;  %v1308_v3 = vmul.f32 %v2572_v54, %v2572_v54  ;;  %v1309_v6 = vmul.f32 %v2574_v1, %v2574_v1  ;;  %v2590_v11 = vsub.f32 %v1162_v27, %v1266_v39 }
 0x1d4   : > { %v1310_v9 = vmul.f32 %v2578_v2, %v2578_v2  ;;  %v1311_v12 = vmul.f32 %v2582_v5, %v2582_v5  ;;  %v2594_v14 = vsub.f32 %v1163_v29, %v1266_v39  ;;  %v1312_v15 = vmul.f32 %v2586_v8, %v2586_v8 }
 0x1d5   : > { %v1317_v60 = vadd.f32 %v1316_v55, %v1302_v49  ;;  %v1313_v17 = vmul.f32 %v2590_v11, %v2590_v11 }
 0x1d6   : > { %v1314_v19 = vmul.f32 %v2594_v14, %v2594_v14 }
 0x1d7   : > { %v1318_v53 = vadd.f32 %v1317_v60, %v1303_v52 }
 0x1d9   : > { %v1319_v58 = vadd.f32 %v1318_v53, %v1304_v59 }
 0x1db   : > { %v1320_v0 = vadd.f32 %v1319_v58, %v1305_v63 }
 0x1dd   : > { %v1321_v4 = vadd.f32 %v1320_v0, %v1306_v56 }
 0x1df   : > { %v1322_v7 = vadd.f32 %v1321_v4, %v1307_v61 }
 0x1e1   : > { %v1323_v10 = vadd.f32 %v1322_v7, %v1308_v3 }
 0x1e3   : > { %v1324_v13 = vadd.f32 %v1323_v10, %v1309_v6 }
 0x1e5   : > { %v1325_v16 = vadd.f32 %v1324_v13, %v1310_v9 }
 0x1e7   : > { %v1326_v18 = vadd.f32 %v1325_v16, %v1311_v12 }
 0x1e9   : > { %v1327_v20 = vadd.f32 %v1326_v18, %v1312_v15 }
 0x1eb   : > { %v1328_v21 = vadd.f32 %v1327_v20, %v1313_v17 }
 0x1ed   : > { %v1329_v22 = vadd.f32 %v1328_v21, %v1314_v19 }
 0x1ef   : > { %v1330_v23 = vrot.slane %v1329_v22, 4 }
 0x1f1   : > { %v1331_v24 = vadd.f32 %v1330_v23, %v1329_v22 }
 0x1f3   : > { %v1332_v25 = vrot.slane %v1331_v24, 2 }
 0x1f5   : > { %v1333_v26 = vadd.f32 %v1332_v25, %v1331_v24 }
 0x1f7   : > { %v1334_v27 = vrot.slane %v1333_v26, 1 }
 0x1f9   : > { %v1335_v28 = vadd.f32 %v1334_v27, %v1333_v26 }
 0x1fb   : > { %v1336_v29 = vmul.f32 0.0078125, %v1335_v28 }
 0x1fd   : > { %v1337_v30 = vadd.f32 1e-05, %v1336_v29 }
 0x1ff   : > { %1953 = vrsqrt.f32 %v1337_v30 }
 0x209   : > { %v2602_v31 = vpop.eup %1953 }
 0x20a   : > { %v1339_v33 = vmul.f32 %v2602_v31, %v1267_v40  ;;  %v1340_v34 = vmul.f32 %v2602_v31, %v1268_v41  ;;  %v1341_v35 = vmul.f32 %v2602_v31, %v1269_v42  ;;  %v1342_v36 = vmul.f32 %v2602_v31, %v1270_v43 }
 0x20b   : > { %v1343_v38 = vmul.f32 %v2602_v31, %v1271_v46  ;;  %v1344_v39 = vmul.f32 %v2602_v31, %v1272_v48  ;;  %v1345_v44 = vmul.f32 %v2602_v31, %v1273_v51  ;;  %v1346_v45 = vmul.f32 %v2602_v31, %v1274_v57 }
 0x20c   : > { %v1362_v40 = vmul.f32 %v2607_v32, %v1339_v33  ;;  %v1363_v41 = vmul.f32 %v2607_v32, %v1340_v34  ;;  %v1364_v42 = vmul.f32 %v2607_v32, %v1341_v35  ;;  %v1365_v43 = vmul.f32 %v2607_v32, %v1342_v36 }
 0x20d   : > { %v1366_v47 = vmul.f32 %v2607_v32, %v1343_v38  ;;  %v1367_v49 = vmul.f32 %v2607_v32, %v1344_v39  ;;  %v1368_v46 = vmul.f32 %v2607_v32, %v1345_v44  ;;  %v1369_v48 = vmul.f32 %v2607_v32, %v1346_v45 }
 0x20e   : > { %v1385_v50 = vadd.f32 %v2616_v37, %v1362_v40  ;;  %v1386_v51 = vadd.f32 %v2616_v37, %v1363_v41  ;;  %v1387_v52 = vadd.f32 %v2616_v37, %v1364_v42  ;;  %v1388_v55 = vadd.f32 %v2616_v37, %v1365_v43 }
 0x20f   : > { %v1389_v57 = vadd.f32 %v2616_v37, %v1366_v47  ;;  %v1390_v59 = vadd.f32 %v2616_v37, %v1367_v49  ;;  %v1391_v60 = vadd.f32 %v2616_v37, %v1368_v46  ;;  %v1392_v63 = vadd.f32 %v2616_v37, %v1369_v48 }
 0x210   : > { %vm1401_vm0 = vcmp.ge.f32.partialorder %v1385_v50, 0.0  ;;  %v1417_v53 = vmul.f32 0.2, %v1385_v50  ;;  %vm1402_vm1 = vcmp.ge.f32.partialorder %v1386_v51, 0.0  ;;  %v1418_v56 = vmul.f32 0.2, %v1386_v51 }
 0x211   : > { %vm1403_vm2 = vcmp.ge.f32.partialorder %v1387_v52, 0.0  ;;  %v1419_v58 = vmul.f32 0.2, %v1387_v52  ;;  %vm1404_vm3 = vcmp.ge.f32.partialorder %v1388_v55, 0.0  ;;  %v1420_v61 = vmul.f32 0.2, %v1388_v55 }
 0x212   : > { %v1433_v0 = vsel %vm1401_vm0, %v1385_v50, %v1417_v53  ;;  %v1434_v3 = vsel %vm1402_vm1, %v1386_v51, %v1418_v56  ;;  %vm1405_vm4 = vcmp.ge.f32.partialorder %v1389_v57, 0.0  ;;  %v1421_v4 = vmul.f32 0.2, %v1389_v57 }
 0x213   : > { %1449 = vst [vmem:[%s2741_s5] sm:$0xff] %v1433_v0  ;;  %1450 = vst [vmem:[%s2741_s5 + $0x8] sm:$0xff] %v1434_v3  ;;  %v1435_v6 = vsel %vm1403_vm2, %v1387_v52, %v1419_v58  ;;  %v1436_v7 = vsel %vm1404_vm3, %v1388_v55, %v1420_v61  ;;  %vm1406_vm5 = vcmp.ge.f32.partialorder %v1390_v59, 0.0  ;;  %v1422_v9 = vmul.f32 0.2, %v1390_v59 }
 0x214   : > { %1451 = vst [vmem:[%s2741_s5 + $0x10] sm:$0xff] %v1435_v6  ;;  %1452 = vst [vmem:[%s2741_s5 + $0x18] sm:$0xff] %v1436_v7  ;;  %v1437_v10 = vsel %vm1405_vm4, %v1389_v57, %v1421_v4  ;;  %vm1407_vm6 = vcmp.ge.f32.partialorder %v1391_v60, 0.0  ;;  %v1423_v12 = vmul.f32 0.2, %v1391_v60  ;;  %vm1408_vm7 = vcmp.ge.f32.partialorder %v1392_v63, 0.0 }
 0x215   : > { %1453 = vst [vmem:[%s2741_s5 + $0x20] sm:$0xff] %v1437_v10  ;;  %v1438_v13 = vsel %vm1406_vm5, %v1390_v59, %v1422_v9  ;;  %v1424_v15 = vmul.f32 0.2, %v1392_v63  ;;  %v1347_v16 = vmul.f32 %v2602_v31, %v2570_v62  ;;  %v1348_v17 = vmul.f32 %v2602_v31, %v2572_v54 }
 0x216   : > { %1454 = vst [vmem:[%s2741_s5 + $0x28] sm:$0xff] %v1438_v13  ;;  %v1439_v18 = vsel %vm1407_vm6, %v1391_v60, %v1423_v12  ;;  %v1349_v19 = vmul.f32 %v2602_v31, %v2574_v1  ;;  %v1350_v20 = vmul.f32 %v2602_v31, %v2578_v2  ;;  %v1351_v21 = vmul.f32 %v2602_v31, %v2582_v5 }
 0x217   : > { %1455 = vst [vmem:[%s2741_s5 + $0x30] sm:$0xff] %v1439_v18  ;;  %v1440_v62 = vsel %vm1408_vm7, %v1392_v63, %v1424_v15  ;;  %v1370_v54 = vmul.f32 %v2607_v32, %v1347_v16  ;;  %v1371_v22 = vmul.f32 %v2607_v32, %v1348_v17  ;;  %v1352_v23 = vmul.f32 %v2602_v31, %v2586_v8 }
 0x218   : > { %1456 = vst [vmem:[%s2741_s5 + $0x38] sm:$0xff] %v1440_v62  ;;  %v1372_v1 = vmul.f32 %v2607_v32, %v1349_v19  ;;  %v1373_v2 = vmul.f32 %v2607_v32, %v1350_v20  ;;  %v1374_v5 = vmul.f32 %v2607_v32, %v1351_v21  ;;  %v1353_v24 = vmul.f32 %v2602_v31, %v2590_v11 }
 0x219   : > { %v1393_v25 = vadd.f32 %v2616_v37, %v1370_v54  ;;  %v1394_v26 = vadd.f32 %v2616_v37, %v1371_v22  ;;  %v1375_v27 = vmul.f32 %v2607_v32, %v1352_v23  ;;  %v1354_v8 = vmul.f32 %v2602_v31, %v2594_v14 }
 0x21a   : > { %v1395_v28 = vadd.f32 %v2616_v37, %v1372_v1  ;;  %v1396_v29 = vadd.f32 %v2616_v37, %v1373_v2  ;;  %v1397_v30 = vadd.f32 %v2616_v37, %v1374_v5  ;;  %v1376_v33 = vmul.f32 %v2607_v32, %v1353_v24 }
 0x21b   : > { %vm1409_vm8 = vcmp.ge.f32.partialorder %v1393_v25, 0.0  ;;  %v1425_v34 = vmul.f32 0.2, %v1393_v25  ;;  %vm1410_vm9 = vcmp.ge.f32.partialorder %v1394_v26, 0.0  ;;  %v1426_v11 = vmul.f32 0.2, %v1394_v26 }
 0x21c   : > { %vm1411_vm10 = vcmp.ge.f32.partialorder %v1395_v28, 0.0  ;;  %v1427_v35 = vmul.f32 0.2, %v1395_v28  ;;  %vm1412_vm11 = vcmp.ge.f32.partialorder %v1396_v29, 0.0  ;;  %v1428_v36 = vmul.f32 0.2, %v1396_v29 }
 0x21d   : > { %v1441_v38 = vsel %vm1409_vm8, %v1393_v25, %v1425_v34  ;;  %v1442_v39 = vsel %vm1410_vm9, %v1394_v26, %v1426_v11  ;;  %vm1413_vm12 = vcmp.ge.f32.partialorder %v1397_v30, 0.0  ;;  %v1429_v14 = vmul.f32 0.2, %v1397_v30 }
 0x21e   : > { %1457 = vst [vmem:[%s2741_s5 + $0x40] sm:$0xff] %v1441_v38  ;;  %1458 = vst [vmem:[%s2741_s5 + $0x48] sm:$0xff] %v1442_v39  ;;  %v1443_v31 = vsel %vm1411_vm10, %v1395_v28, %v1427_v35  ;;  %v1444_v44 = vsel %vm1412_vm11, %v1396_v29, %v1428_v36  ;;  %v1398_v45 = vadd.f32 %v2616_v37, %v1375_v27 }
 0x21f   : > { %v1399_v40 = vadd.f32 %v2616_v37, %v1376_v33  ;;  %1459 = vst [vmem:[%s2741_s5 + $0x50] sm:$0xff] %v1443_v31  ;;  %1460 = vst [vmem:[%s2741_s5 + $0x58] sm:$0xff] %v1444_v44  ;;  %v1445_v41 = vsel %vm1413_vm12, %v1397_v30, %v1429_v14  ;;  %v1377_v42 = vmul.f32 %v2607_v32, %v1354_v8 }
 0x220   : > { %1461 = vst [vmem:[%s2741_s5 + $0x60] sm:$0xff] %v1445_v41  ;;  %vm1414_vm13 = vcmp.ge.f32.partialorder %v1398_v45, 0.0  ;;  %v1430_v43 = vmul.f32 0.2, %v1398_v45 }
 0x221   : > { %vm1415_vm14 = vcmp.ge.f32.partialorder %v1399_v40, 0.0  ;;  %v1431_v47 = vmul.f32 0.2, %v1399_v40  ;;  %v1400_v49 = vadd.f32 %v2616_v37, %v1377_v42 }
 0x222   : > { %v1446_v46 = vsel %vm1414_vm13, %v1398_v45, %v1430_v43 }
 0x223   : > { %v1447_v48 = vsel %vm1415_vm14, %v1399_v40, %v1431_v47  ;;  %1462 = vst [vmem:[%s2741_s5 + $0x68] sm:$0xff] %v1446_v46  ;;  %vm1416_vm15 = vcmp.ge.f32.partialorder %v1400_v49, 0.0  ;;  %v1432_v32 = vmul.f32 0.2, %v1400_v49 }
 0x224   : > { %1463 = vst [vmem:[%s2741_s5 + $0x70] sm:$0xff] %v1447_v48 }
 0x225   : > { %v1448_v50 = vsel %vm1416_vm15, %v1400_v49, %v1432_v32 }
 0x226   : > { %1464 = vst [vmem:[%s2741_s5 + $0x78] sm:$0xff] %v1448_v50 }
 0x227 PF: > { %s19_s23 = sadd.s32 1, %s2065_s23   ;;  %s2757_s18 = smov %s2049_s19 }
 0x228   : > { %p16_p6 = scmp.ge.s32.totalorder %s19_s23, 4   ;;  %s2758_s19 = smov %s2053_s20 }
 0x229   : > { %s2759_s20 = smov %s2158_s6  ;;  %s2760_s21 = smov %s2061_s22 }
 0x22a   : > { %s2761_s22 = smov %s2763_s25  ;;  %18 = sbr.rel (!%p16_p6) target bundleno = 5 (0x5), region = 130 }
 0x231   :  { %1484 = vsyncpa [#allocation4], 1 }
 0x232   :  { %1486 = vsyncpa [#allocation4 + $0x1], 1 }
 0x233   :  { %1487 = vsyncpa [#allocation6], 1 }

// kernel: encoder_conv_orig_forward.8
= control target key start
LH: loop header
LB: loop body
LE: loop exit
PB: predicated region body
PF: predicated region fallthrough
CT: control target
= control target key end

     0   :  { %10 = vsyncpa [#allocation4], 0  ;;  %s1648_s18 = smov 0   ;;  %s1650_s19 = smov 0   ;;  %s1972_s0 = inlined_call_operand.vmem [shape: bf16[32,2048], index: 0, kind: input, shape index: {}]   ;;  %s1973_s1 = inlined_call_operand.vmem [shape: bf16[2048,256], index: 1, kind: input, shape index: {}]   ;;  %s1974_s2 = inlined_call_operand.hbm [shape: f32[1,256], index: 2, kind: input, shape index: {}]   ;;  %s1975_s3 = inlined_call_operand.vmem [shape: f32[1,256], index: 3, kind: input, shape index: {}]   ;;  %s1976_s4 = inlined_call_operand.vmem [shape: f32[1,256], index: 4, kind: input, shape index: {}]   ;;  %s1977_s5 = inlined_call_operand.vmem [shape: f32[32,256], index: 5, kind: output, shape index: {}]  }
   0x1   :  { %s1652_s20 = smov 0   ;;  %s1654_s21 = smov 0  }
   0x2   :  { %s1656_s22 = smov 0  }
   0x3 LB: > { %s1277_s23 = sadd.s32 4294967295, %s1614_s22   ;;  %s25_s24 = sadd.s32 1, %s1610_s21  ;;  %s1614_s22 = sphi %s1656_s22, %s16_s22   ;;  %s1610_s21 = sphi %s1654_s21, %s1991_s21   ;;  %s1606_s20 = sphi %s1652_s20, %s1990_s20   ;;  %s1602_s19 = sphi %s1650_s19, %s1989_s19   ;;  %s1598_s18 = sphi %s1648_s18, %s1988_s18  }
   0x4   : > { %p26_p0 = scmp.ge.s32.totalorder %s25_s24, 4  ;;  %s35_s25 = sadd.s32 1, %s1602_s19 }
   0x5   : > { %p42_p1 = scmp.ne.s32.totalorder %s1602_s19, %s1598_s18  ;;  %p43_p2 = scmp.eq.s32.totalorder %s1614_s22, 0 }
   0x6   : > { %s1993_s24 = smov (%p26_p0, %s25_s24), 0  ;;  %p1278_p4 = scmp.ge.s32.totalorder %s1614_s22, 1 }
   0x7   : > { %p1681_p3 = por %p43_p2, %p42_p1  ;;  %s32_s27 = ssub.s32 %s1610_s21, %s1993_s24 }
   0x8   : > { %p191_p5 = scmp.lt.s32.totalorder %s1614_s22, 5  ;;  %p33_p6 = scmp.eq.s32.totalorder %s32_s27, 0 }
   0x9   : > { %s1981_s26 = scalar_select %p1681_p3, 1, 0 }
   0xa   : > { %p1689_p7 = pnand %p1278_p4, %p191_p5  ;;  %p1693_p8 = scmp.eq.s32.totalorder %s1277_s23, 0 }
   0xb   : > { %s1698_s30 = scalar_select %p33_p6, %s1602_s19, %s35_s25  }
   0xc   : > { %s1982_s28 = scalar_select %p1689_p7, 1, 0 }
   0xd   : > { %s1983_s29 = scalar_select %p1693_p8, 1, 0 }
   0xe   : > { %p1384_p9 = pneg %p1689_p7  ;;  %s1616_s6 = smov [#allocation3]  }
   0xf   : > { %s207_s7 = sshll.u32 %s1616_s6, 4  ;;  %s1544_s11 = scalar_lea.hbm %s1974_s2, 32  ;;  %s208_s7 = int_to_ptr.vmem [resolvable:$true] %s207_s7 }
  0x10   : > { %p1704_p10 = pnand %p1693_p8, %p1384_p9  ;;  %p1545_p11 = scmp.ne.s32.totalorder %s1974_s2, %s1544_s11 }
  0x11   : > { %p1551_p1 = scmp.lt.u32.totalorder %s1544_s11, %s1974_s2 }
  0x12   : > { %p1546_p12 = pneg %p1704_p10 }
  0x14   : > { %p1547_p13 = pnand %p1546_p12, %p1545_p11 }
  0x16   : > { %p1548_p0 = pneg %p1547_p13 }
  0x18   : > { %p1553_p2 = pnand %p1551_p1, %p1548_p0 }
  0x1a   : > { %1556 = shalt.err (!%p1553_p2)
}
  0x1b   : > { %s1557_s16 = scalar_lea.vmem %s208_s7, 32  ;;  %p1565_p9 = scmp.lt.s32.totalorder %s208_s7, %s208_s7 }
  0x1c   : > { %p1558_p4 = scmp.ne.s32.totalorder %s208_s7, %s1557_s16  ;;  %p1566_p8 = scmp.lt.s32.totalorder %s1557_s16, %s1557_s16 }
  0x1e   : > { %p1560_p5 = pnand %p1558_p4, %p1546_p12  ;;  %p1567_p7 = por %p1566_p8, %p1565_p9 }
  0x20   : > { %p1561_p6 = pneg %p1560_p5 }
  0x22   : > { %p1568_p3 = pnand %p1567_p7, %p1561_p6 }
  0x24   : > { %1571 = shalt.err (!%p1568_p3)
}
  0x25   : > { %1387 = dma.hbm_to_vmem [thread:$0]  (!%p1704_p10), %s1974_s2, 32, %s208_s7, [#allocation4]  }
  0x26   : > { %p1282_p11 = scmp.ge.s32.totalorder %s1614_s22, 4 }
  0x27   : > { %p1985_p13 = scmp.ne.s32.totalorder (!%p1282_p11), %s1981_s26, 0 }
  0x28   : > { %230 = sbr.rel (%p1282_p11) target bundleno = 55 (0x37), region = 28 }
  0x2f   : > { %233 = sbr.rel (!%p1985_p13) target bundleno = 55 (0x37), region = 32  ;;  %s235_s25 = sand.u32 (%p1985_p13), 1, %s1602_s19  }
  0x30   : > { %s1370_s27 = sshll.u32 (%p1985_p13), %s1610_s21, 4  ;;  %s1283_s6 = sshll.u32 (%p1985_p13), %s235_s25, 6 }
  0x31   : > { %s240_s11 = scalar_lea.vmem (%p1985_p13), %s1972_s0, %s1370_s27  ;;  %s237_s8 = scalar_lea.vmem (%p1985_p13), [#allocation2], %s1283_s6 }
  0x32   : > { %v253_v0 = vld [vmem:[%s240_s11] sm:$0xff] (%p1985_p13)  ;;  %v255_v1 = vld [vmem:[%s240_s11 + $0x8] sm:$0xff] (%p1985_p13) }
  0x33   : > { %v257_v2 = vld [vmem:[%s240_s11 + $0x40] sm:$0xff] (%p1985_p13)  ;;  %254 = vst [vmem:[%s237_s8] sm:$0xff] (%p1985_p13), %v253_v0  ;;  %256 = vst [vmem:[%s237_s8 + $0x8] sm:$0xff] (%p1985_p13), %v255_v1  ;;  %v259_v3 = vld [vmem:[%s240_s11 + $0x48] sm:$0xff] (%p1985_p13) }
  0x34   : > { %258 = vst [vmem:[%s237_s8 + $0x10] sm:$0xff] (%p1985_p13), %v257_v2  ;;  %v261_v4 = vld [vmem:[%s240_s11 + $0x80] sm:$0xff] (%p1985_p13)  ;;  %v263_v5 = vld [vmem:[%s240_s11 + $0x88] sm:$0xff] (%p1985_p13)  ;;  %260 = vst [vmem:[%s237_s8 + $0x18] sm:$0xff] (%p1985_p13), %v259_v3 }
  0x35   : > { %262 = vst [vmem:[%s237_s8 + $0x20] sm:$0xff] (%p1985_p13), %v261_v4  ;;  %264 = vst [vmem:[%s237_s8 + $0x28] sm:$0xff] (%p1985_p13), %v263_v5  ;;  %v265_v6 = vld [vmem:[%s240_s11 + $0xc0] sm:$0xff] (%p1985_p13)  ;;  %v267_v7 = vld [vmem:[%s240_s11 + $0xc8] sm:$0xff] (%p1985_p13) }
  0x36   : > { %266 = vst [vmem:[%s237_s8 + $0x30] sm:$0xff] %v265_v6  ;;  %268 = vst [vmem:[%s237_s8 + $0x38] sm:$0xff] %v267_v7 }
  0x37 PF: > { %p1986_p3 = scmp.ne.s32.totalorder %s1982_s28, 0 }
  0x38   : > { %s295_s26 = sand.u32 (!%p1986_p3), 1, %s1598_s18   ;;  %p1987_p7 = scmp.ne.s32.totalorder (!%p1986_p3), %s1983_s29, 0 }
  0x39   : > { %292 = sbr.rel (%p1986_p3) target bundleno = 444 (0x1bc), region = 59  ;;  %s1287_s7 = sshll.u32 (!%p1986_p3), %s295_s26, 6 }
  0x3a   : > { %s1735_s12 = scalar_lea.vmem (!%p1986_p3), [#allocation2], %s1287_s7 }
  0x40   : > { %1593 = dma.done.wait (%p1987_p7), [#allocation4], 32  }
  0x41   : > { %1595 = vsyncadd (%p1987_p7), [#allocation4], 4294967264  ;;  %s1289_s13 = sshll.u32 %s1606_s20, 6  ;;  %p1292_p10 = scmp.ne.s32.totalorder %s1606_s20, 0 }
  0x42   : > { %p347_p8 = scmp.lt.s32.totalorder %s1289_s13, 255  ;;  %v1617_v8 = vmov (!%p1292_p10), 0.0  }
  0x43   : > { %377 = sbr.rel (%p1292_p10) target bundleno = 74 (0x4a), region = 71  ;;  %378 = vst [vmem:[%s1977_s5] sm:$0xff] (!%p1292_p10), %v1617_v8  ;;  %379 = vst [vmem:[%s1977_s5 + $0x8] sm:$0xff] (!%p1292_p10), %v1617_v8 }
  0x44   : > { %s1995_s13 = smov (!%p347_p8, %s1289_s13), 255  ;;  %380 = vst [vmem:[%s1977_s5 + $0x10] sm:$0xff] (!%p1292_p10), %v1617_v8  ;;  %381 = vst [vmem:[%s1977_s5 + $0x18] sm:$0xff] (!%p1292_p10), %v1617_v8 }
  0x45   : > { %s1371_s14 = sshll.u32 %s1995_s13, 3  ;;  %382 = vst [vmem:[%s1977_s5 + $0x20] sm:$0xff] (!%p1292_p10), %v1617_v8  ;;  %383 = vst [vmem:[%s1977_s5 + $0x28] sm:$0xff] (!%p1292_p10), %v1617_v8 }
  0x46   : > { %s1745_s28 = scalar_lea.vmem %s1973_s1, %s1371_s14  ;;  %384 = vst [vmem:[%s1977_s5 + $0x30] sm:$0xff] (!%p1292_p10), %v1617_v8  ;;  %385 = vst [vmem:[%s1977_s5 + $0x38] sm:$0xff] (!%p1292_p10), %v1617_v8 }
  0x4a PF: > { %v1432_v9 = vld [vmem:[%s1745_s28 + $0x4] ss:$8 sps:$4 sm:$0xff]   ;;  %v1436_v11 = vld [vmem:[%s1745_s28] ss:$8 sps:$4 sm:$0xff]   ;;  %v1438_v13 = vld [vmem:[%s1745_s28 + $0x14] ss:$8 sps:$4 sm:$0xff]  }
  0x4b   : > { %v1434_v10 = vld [vmem:[%s1745_s28 + $0x104] ss:$8 sps:$4 sm:$0xff]   ;;  %826 = vmatprep.subr.bf16.mxu1 %v1432_v9  ;;  %v1437_v12 = vld [vmem:[%s1745_s28 + $0x100] ss:$8 sps:$4 sm:$0xff]   ;;  %v1440_v14 = vld [vmem:[%s1745_s28 + $0x114] ss:$8 sps:$4 sm:$0xff]  }
  0x4c   : > { %879 = vmatprep.subr.bf16.mxu0 %v1434_v10  ;;  %827 = vmatpush1.bf16.msra.mxu1 %v1436_v11  ;;  %v1442_v15 = vld [vmem:[%s1745_s28 + $0x10] ss:$8 sps:$4 sm:$0xff]   ;;  %v1444_v17 = vld [vmem:[%s1745_s28 + $0x24] ss:$8 sps:$4 sm:$0xff]   ;;  %v1448_v19 = vld [vmem:[%s1745_s28 + $0x20] ss:$8 sps:$4 sm:$0xff]  }
  0x4d   : > { %880 = vmatpush1.bf16.msra.mxu0 %v1437_v12  ;;  %828 = vmatprep.subr.bf16.mxu1 %v1438_v13  ;;  %v1443_v16 = vld [vmem:[%s1745_s28 + $0x110] ss:$8 sps:$4 sm:$0xff]   ;;  %v1446_v18 = vld [vmem:[%s1745_s28 + $0x124] ss:$8 sps:$4 sm:$0xff]   ;;  %v1449_v20 = vld [vmem:[%s1745_s28 + $0x120] ss:$8 sps:$4 sm:$0xff]  }
  0x4e   : > { %881 = vmatprep.subr.bf16.mxu0 %v1440_v14  ;;  %v1450_v21 = vld [vmem:[%s1745_s28 + $0x34] ss:$8 sps:$4 sm:$0xff]   ;;  %v1454_v23 = vld [vmem:[%s1745_s28 + $0x30] ss:$8 sps:$4 sm:$0xff]   ;;  %v1456_v25 = vld [vmem:[%s1745_s28 + $0x44] ss:$8 sps:$4 sm:$0xff]  }
  0x4f   : > { %v1452_v22 = vld [vmem:[%s1745_s28 + $0x134] ss:$8 sps:$4 sm:$0xff]   ;;  %v1455_v24 = vld [vmem:[%s1745_s28 + $0x130] ss:$8 sps:$4 sm:$0xff]   ;;  %v1458_v26 = vld [vmem:[%s1745_s28 + $0x144] ss:$8 sps:$4 sm:$0xff]  }
  0x50   : > { %829 = vmatpush1.bf16.msra.mxu1 %v1442_v15  ;;  %v1460_v27 = vld [vmem:[%s1745_s28 + $0x40] ss:$8 sps:$4 sm:$0xff]   ;;  %v1462_v29 = vld [vmem:[%s1745_s28 + $0x54] ss:$8 sps:$4 sm:$0xff]   ;;  %v1466_v31 = vld [vmem:[%s1745_s28 + $0x50] ss:$8 sps:$4 sm:$0xff]  }
  0x51   : > { %882 = vmatpush1.bf16.msra.mxu0 %v1443_v16  ;;  %830 = vmatprep.subr.bf16.mxu1 %v1444_v17  ;;  %v1461_v28 = vld [vmem:[%s1745_s28 + $0x140] ss:$8 sps:$4 sm:$0xff]   ;;  %v1464_v30 = vld [vmem:[%s1745_s28 + $0x154] ss:$8 sps:$4 sm:$0xff]   ;;  %v1467_v32 = vld [vmem:[%s1745_s28 + $0x150] ss:$8 sps:$4 sm:$0xff]  }
  0x52   : > { %883 = vmatprep.subr.bf16.mxu0 %v1446_v18  ;;  %v1468_v33 = vld [vmem:[%s1745_s28 + $0x64] ss:$8 sps:$4 sm:$0xff]   ;;  %v1472_v35 = vld [vmem:[%s1745_s28 + $0x60] ss:$8 sps:$4 sm:$0xff]   ;;  %v1474_v37 = vld [vmem:[%s1745_s28 + $0x74] ss:$8 sps:$4 sm:$0xff]  }
  0x53   : > { %v1470_v34 = vld [vmem:[%s1745_s28 + $0x164] ss:$8 sps:$4 sm:$0xff]   ;;  %v1473_v36 = vld [vmem:[%s1745_s28 + $0x160] ss:$8 sps:$4 sm:$0xff]   ;;  %v1476_v38 = vld [vmem:[%s1745_s28 + $0x174] ss:$8 sps:$4 sm:$0xff]  }
  0x54   : > { %831 = vmatpush1.bf16.msra.mxu1 %v1448_v19  ;;  %v1478_v39 = vld [vmem:[%s1745_s28 + $0x70] ss:$8 sps:$4 sm:$0xff]   ;;  %v1480_v41 = vld [vmem:[%s1745_s28 + $0x84] ss:$8 sps:$4 sm:$0xff]   ;;  %v1484_v43 = vld [vmem:[%s1745_s28 + $0x80] ss:$8 sps:$4 sm:$0xff]  }
  0x55   : > { %884 = vmatpush1.bf16.msra.mxu0 %v1449_v20  ;;  %832 = vmatprep.subr.bf16.mxu1 %v1450_v21  ;;  %v1479_v40 = vld [vmem:[%s1745_s28 + $0x170] ss:$8 sps:$4 sm:$0xff]   ;;  %v1482_v42 = vld [vmem:[%s1745_s28 + $0x184] ss:$8 sps:$4 sm:$0xff]   ;;  %v1485_v44 = vld [vmem:[%s1745_s28 + $0x180] ss:$8 sps:$4 sm:$0xff]  }
  0x56   : > { %885 = vmatprep.subr.bf16.mxu0 %v1452_v22  ;;  %v1486_v45 = vld [vmem:[%s1745_s28 + $0x94] ss:$8 sps:$4 sm:$0xff]   ;;  %v1490_v47 = vld [vmem:[%s1745_s28 + $0x90] ss:$8 sps:$4 sm:$0xff]   ;;  %v1492_v49 = vld [vmem:[%s1745_s28 + $0xa4] ss:$8 sps:$4 sm:$0xff]  }
  0x57   : > { %v1488_v46 = vld [vmem:[%s1745_s28 + $0x194] ss:$8 sps:$4 sm:$0xff]   ;;  %v1491_v48 = vld [vmem:[%s1745_s28 + $0x190] ss:$8 sps:$4 sm:$0xff]   ;;  %v1494_v50 = vld [vmem:[%s1745_s28 + $0x1a4] ss:$8 sps:$4 sm:$0xff]  }
  0x58   : > { %833 = vmatpush1.bf16.msra.mxu1 %v1454_v23  ;;  %v1496_v51 = vld [vmem:[%s1745_s28 + $0xa0] ss:$8 sps:$4 sm:$0xff]   ;;  %v1498_v53 = vld [vmem:[%s1745_s28 + $0xb4] ss:$8 sps:$4 sm:$0xff]   ;;  %v1502_v55 = vld [vmem:[%s1745_s28 + $0xb0] ss:$8 sps:$4 sm:$0xff]  }
  0x59   : > { %886 = vmatpush1.bf16.msra.mxu0 %v1455_v24  ;;  %834 = vmatprep.subr.bf16.mxu1 %v1456_v25  ;;  %v1497_v52 = vld [vmem:[%s1745_s28 + $0x1a0] ss:$8 sps:$4 sm:$0xff]   ;;  %v1500_v54 = vld [vmem:[%s1745_s28 + $0x1b4] ss:$8 sps:$4 sm:$0xff]   ;;  %v1503_v56 = vld [vmem:[%s1745_s28 + $0x1b0] ss:$8 sps:$4 sm:$0xff]  }
  0x5a   : > { %887 = vmatprep.subr.bf16.mxu0 %v1458_v26  ;;  %v1504_v57 = vld [vmem:[%s1745_s28 + $0xc4] ss:$8 sps:$4 sm:$0xff]   ;;  %v1508_v61 = vld [vmem:[%s1745_s28 + $0xc0] ss:$8 sps:$4 sm:$0xff]   ;;  %v1510_v63 = vld [vmem:[%s1745_s28 + $0xd4] ss:$8 sps:$4 sm:$0xff]  }
  0x5b   : > { %v1530_v58 = vld [vmem:[%s1735_s12 + $0x4] ss:$16 sps:$4 sm:$0xff]   ;;  %v1533_v60 = vld [vmem:[%s1735_s12 + $0xc] ss:$16 sps:$4 sm:$0xff]   ;;  %v1509_v62 = vld [vmem:[%s1745_s28 + $0x1c0] ss:$8 sps:$4 sm:$0xff]  }
  0x5c   : > { %835 = vmatpush1.bf16.msra.mxu1 %v1460_v27  ;;  %v1506_v59 = vld [vmem:[%s1745_s28 + $0x1c4] ss:$8 sps:$4 sm:$0xff]   ;;  %858 = vmatprep.mubr.bf16.mxu1 %v1530_v58  ;;  %v1512_v0 = vld [vmem:[%s1745_s28 + $0x1d4] ss:$8 sps:$4 sm:$0xff]   ;;  %v1514_v1 = vld [vmem:[%s1745_s28 + $0xd0] ss:$8 sps:$4 sm:$0xff]  }
  0x5d   : > { %888 = vmatpush1.bf16.msra.mxu0 %v1461_v28  ;;  %836 = vmatprep.subr.bf16.mxu1 %v1462_v29  ;;  %v1515_v2 = vld [vmem:[%s1745_s28 + $0x1d0] ss:$8 sps:$4 sm:$0xff]   ;;  %v1516_v3 = vld [vmem:[%s1745_s28 + $0xe4] ss:$8 sps:$4 sm:$0xff]   ;;  %v1520_v5 = vld [vmem:[%s1745_s28 + $0xe0] ss:$8 sps:$4 sm:$0xff]  }
  0x5e   : > { %889 = vmatprep.subr.bf16.mxu0 %v1464_v30  ;;  %911 = vmatprep.mubr.bf16.mxu0 %v1533_v60  ;;  %v1518_v4 = vld [vmem:[%s1745_s28 + $0x1e4] ss:$8 sps:$4 sm:$0xff]   ;;  %v1521_v6 = vld [vmem:[%s1745_s28 + $0x1e0] ss:$8 sps:$4 sm:$0xff]   ;;  %v1522_v7 = vld [vmem:[%s1745_s28 + $0xf4] ss:$8 sps:$4 sm:$0xff]  }
  0x5f   : > { %v1524_v8 = vld [vmem:[%s1745_s28 + $0x1f4] ss:$8 sps:$4 sm:$0xff]   ;;  %v1526_v9 = vld [vmem:[%s1745_s28 + $0xf0] ss:$8 sps:$4 sm:$0xff]   ;;  %v386_v18 = vld [vmem:[%s1977_s5] sm:$0xff]  ;;  %p1365_p12 = scmp.ne.s32.totalorder %s1606_s20, 3 }
  0x60   : > { %837 = vmatpush1.bf16.msra.mxu1 %v1466_v31  ;;  %v1527_v10 = vld [vmem:[%s1745_s28 + $0x1f0] ss:$8 sps:$4 sm:$0xff]   ;;  %v1534_v13 = vld [vmem:[%s1735_s12 + $0x24] ss:$16 sps:$4 sm:$0xff]   ;;  %v1536_v14 = vld [vmem:[%s1735_s12 + $0x2c] ss:$16 sps:$4 sm:$0xff]  }
  0x61   : > { %890 = vmatpush1.bf16.msra.mxu0 %v1467_v32  ;;  %838 = vmatprep.subr.bf16.mxu1 %v1468_v33  ;;  %v1528_v11 = vld [vmem:[%s1735_s12] ss:$16 sps:$4 sm:$0xff]   ;;  %v1531_v12 = vld [vmem:[%s1735_s12 + $0x8] ss:$16 sps:$4 sm:$0xff]  }
  0x62   : > { %891 = vmatprep.subr.bf16.mxu0 %v1470_v34  ;;  %v1538_v15 = vld [vmem:[%s1735_s12 + $0x20] ss:$16 sps:$4 sm:$0xff]   ;;  %v1539_v16 = vld [vmem:[%s1735_s12 + $0x28] ss:$16 sps:$4 sm:$0xff]  }
  0x63   : > { %v387_v22 = vld [vmem:[%s1977_s5 + $0x8] sm:$0xff]  ;;  %v388_v26 = vld [vmem:[%s1977_s5 + $0x10] sm:$0xff]  ;;  %v389_v31 = vld [vmem:[%s1977_s5 + $0x18] sm:$0xff] }
  0x64   : > { %839 = vmatpush1.bf16.msra.mxu1 %v1472_v35 }
  0x65   : > { %892 = vmatpush1.bf16.msra.mxu0 %v1473_v36  ;;  %840 = vmatprep.subr.bf16.mxu1 %v1474_v37 }
  0x66   : > { %893 = vmatprep.subr.bf16.mxu0 %v1476_v38  ;;  %v390_v38 = vld [vmem:[%s1977_s5 + $0x20] sm:$0xff] }
  0x68   : > { %841 = vmatpush1.bf16.msra.mxu1 %v1478_v39 }
  0x69   : > { %894 = vmatpush1.bf16.msra.mxu0 %v1479_v40  ;;  %842 = vmatprep.subr.bf16.mxu1 %v1480_v41 }
  0x6a   : > { %895 = vmatprep.subr.bf16.mxu0 %v1482_v42  ;;  %v391_v42 = vld [vmem:[%s1977_s5 + $0x28] sm:$0xff] }
  0x6c   : > { %843 = vmatpush1.bf16.msra.mxu1 %v1484_v43 }
  0x6d   : > { %896 = vmatpush1.bf16.msra.mxu0 %v1485_v44  ;;  %844 = vmatprep.subr.bf16.mxu1 %v1486_v45 }
  0x6e   : > { %897 = vmatprep.subr.bf16.mxu0 %v1488_v46  ;;  %v392_v46 = vld [vmem:[%s1977_s5 + $0x30] sm:$0xff] }
  0x70   : > { %845 = vmatpush1.bf16.msra.mxu1 %v1490_v47 }
  0x71   : > { %898 = vmatpush1.bf16.msra.mxu0 %v1491_v48  ;;  %846 = vmatprep.subr.bf16.mxu1 %v1492_v49 }
  0x72   : > { %899 = vmatprep.subr.bf16.mxu0 %v1494_v50 }
  0x74   : > { %847 = vmatpush1.bf16.msra.mxu1 %v1496_v51  ;;  %v393_v51 = vld [vmem:[%s1977_s5 + $0x38] sm:$0xff] }
  0x75   : > { %900 = vmatpush1.bf16.msra.mxu0 %v1497_v52  ;;  %848 = vmatprep.subr.bf16.mxu1 %v1498_v53 }
  0x76   : > { %901 = vmatprep.subr.bf16.mxu0 %v1500_v54 }
  0x78   : > { %849 = vmatpush1.bf16.msra.mxu1 %v1502_v55 }
  0x79   : > { %902 = vmatpush1.bf16.msra.mxu0 %v1503_v56  ;;  %850 = vmatprep.subr.bf16.mxu1 %v1504_v57  ;;  %v962_v57 = vlaneseq (!%p1365_p12) }
  0x7a   : > { %903 = vmatprep.subr.bf16.mxu0 %v1506_v59  ;;  %v960_v59 = vld [vmem:[#allocation3] sm:$0x3] (!%p1365_p12) }
  0x7b   : > { %v963_v58 = vshrl.u32 (!%p1365_p12), %v962_v57, 7 }
  0x7c   : > { %851 = vmatpush1.bf16.msra.mxu1 %v1508_v61 }
  0x7d   : > { %904 = vmatpush1.bf16.msra.mxu0 %v1509_v62  ;;  %852 = vmatprep.subr.bf16.mxu1 %v1510_v63  ;;  %v1893_v60 = vsub.s32 (!%p1365_p12), 0, %v963_v58  ;;  %v1895_v61 = vsub.s32 (!%p1365_p12), 1, %v963_v58 }
  0x7e   : > { %905 = vmatprep.subr.bf16.mxu0 %v1512_v0 }
  0x80   : > { %853 = vmatpush1.bf16.msra.mxu1 %v1514_v1  ;;  %v965_v1 = vrot.slane (!%p1365_p12), %v960_v59, %v1893_v60 }
  0x81   : > { %906 = vmatpush1.bf16.msra.mxu0 %v1515_v2  ;;  %854 = vmatprep.subr.bf16.mxu1 %v1516_v3 }
  0x82   : > { %907 = vmatprep.subr.bf16.mxu0 %v1518_v4 }
  0x84   : > { %855 = vmatpush1.bf16.msra.mxu1 %v1520_v5  ;;  %v969_v5 = vrot.slane (!%p1365_p12), %v960_v59, %v1895_v61 }
  0x85   : > { %908 = vmatpush1.bf16.msra.mxu0 %v1521_v6  ;;  %856 = vmatprep.subr.bf16.mxu1 %v1522_v7 }
  0x86   : > { %909 = vmatprep.subr.bf16.mxu0 %v1524_v8 }
  0x88   : > { %857 = vmatpush1.bf16.msra.mxu1 %v1526_v9 }
  0x89   : > { %910 = vmatpush1.bf16.msra.mxu0 %v1527_v10 }
  0x8b   : > { %859 = vmatmul.mubr.bf16.vlgmr.msra.gmra.mrb[0].mxu1 %v1528_v11 }
  0x8c   : > { %912 = vmatmul.mubr.bf16.vlgmr.msra.gmra.mrb[0].mxu0 %v1531_v12  ;;  %868 = vmatprep.mubr.bf16.mxu1 %v1534_v13 }
  0x8d   : > { %921 = vmatprep.mubr.bf16.mxu0 %v1536_v14 }
  0x93   : > { %869 = vmatmul.mubr.bf16.gmra.mrb[4].mxu1 %v1538_v15 }
  0x94   : > { %922 = vmatmul.mubr.bf16.gmra.mrb[4].mxu0 %v1539_v16 }
 0x15e   : > { %v860_v17 = vpop.f32.mrb[0].mxu1 }
 0x15f   : > { %v913_v19 = vpop.f32.mrb[0].mxu0  ;;  %v862_v21 = vpop.f32.mrb[1].mxu1 }
 0x160   : > { %v914_v20 = vadd.f32 %v913_v19, %v860_v17  ;;  %v915_v23 = vpop.f32.mrb[1].mxu0  ;;  %v864_v25 = vpop.f32.mrb[2].mxu1 }
 0x161   : > { %v916_v24 = vadd.f32 %v915_v23, %v862_v21  ;;  %v917_v27 = vpop.f32.mrb[2].mxu0  ;;  %v866_v30 = vpop.f32.mrb[3].mxu1 }
 0x162   : > { %v932_v28 = vadd.f32 %v914_v20, %v386_v18  ;;  %v918_v29 = vadd.f32 %v917_v27, %v864_v25  ;;  %v919_v32 = vpop.f32.mrb[3].mxu0 }
 0x163   : > { %v933_v33 = vadd.f32 %v916_v24, %v387_v22  ;;  %v920_v34 = vadd.f32 %v919_v32, %v866_v30 }
 0x164   : > { %940 = vst [vmem:[%s1977_s5] sm:$0xff] %v932_v28  ;;  %v934_v35 = vadd.f32 %v918_v29, %v388_v26 }
 0x165   : > { %941 = vst [vmem:[%s1977_s5 + $0x8] sm:$0xff] %v933_v33  ;;  %v935_v36 = vadd.f32 %v920_v34, %v389_v31 }
 0x166   : > { %942 = vst [vmem:[%s1977_s5 + $0x10] sm:$0xff] %v934_v35  ;;  %v870_v37 = vpop.f32.mrb[4].mxu1 }
 0x167   : > { %943 = vst [vmem:[%s1977_s5 + $0x18] sm:$0xff] %v935_v36  ;;  %v923_v39 = vpop.f32.mrb[4].mxu0  ;;  %v872_v41 = vpop.f32.mrb[5].mxu1 }
 0x168   : > { %v924_v40 = vadd.f32 %v923_v39, %v870_v37  ;;  %v925_v43 = vpop.f32.mrb[5].mxu0  ;;  %v874_v45 = vpop.f32.mrb[6].mxu1 }
 0x169   : > { %v926_v44 = vadd.f32 %v925_v43, %v872_v41  ;;  %v927_v47 = vpop.f32.mrb[6].mxu0  ;;  %v876_v50 = vpop.f32.mrb[7].mxu1  ;;  %951 = sbr.rel (%p1365_p12) target bundleno = 444 (0x1bc), region = 75 }
 0x16a   : > { %v936_v48 = vadd.f32 %v924_v40, %v390_v38  ;;  %v928_v49 = vadd.f32 %v927_v47, %v874_v45  ;;  %v929_v52 = vpop.f32.mrb[7].mxu0 }
 0x16b   : > { %v937_v53 = vadd.f32 %v926_v44, %v391_v42  ;;  %v930_v54 = vadd.f32 %v929_v52, %v876_v50  ;;  %v952_v62 = vld [vmem:[%s1977_s5] sm:$0xff] (!%p1365_p12) }
 0x16c   : > { %944 = vst [vmem:[%s1977_s5 + $0x20] sm:$0xff] %v936_v48  ;;  %v938_v55 = vadd.f32 %v928_v49, %v392_v46  ;;  %v953_v2 = vld [vmem:[%s1977_s5 + $0x8] sm:$0xff] (!%p1365_p12)  ;;  %v972_v7 = vadd.f32 (!%p1365_p12), %v965_v1, %v952_v62 }
 0x16d   : > { %945 = vst [vmem:[%s1977_s5 + $0x28] sm:$0xff] %v937_v53  ;;  %v939_v56 = vadd.f32 %v930_v54, %v393_v51  ;;  %v954_v63 = vld [vmem:[%s1977_s5 + $0x10] sm:$0xff] (!%p1365_p12)  ;;  %v973_v11 = vadd.f32 (!%p1365_p12), %v969_v5, %v953_v2 }
 0x16e   : > { %946 = vst [vmem:[%s1977_s5 + $0x30] sm:$0xff] %v938_v55  ;;  %v955_v3 = vld [vmem:[%s1977_s5 + $0x18] sm:$0xff] (!%p1365_p12)  ;;  %v974_v8 = vadd.f32 (!%p1365_p12), %v965_v1, %v954_v63 }
 0x16f   : > { %947 = vst [vmem:[%s1977_s5 + $0x38] sm:$0xff] %v939_v56  ;;  %v975_v12 = vadd.f32 (!%p1365_p12), %v969_v5, %v955_v3 }
 0x170   : > { %v1005_v15 = vadd.f32 %v974_v8, %v972_v7 }
 0x171   : > { %v1014_v17 = vadd.f32 %v975_v12, %v973_v11 }
 0x173   : > { %v956_v0 = vld [vmem:[%s1977_s5 + $0x20] sm:$0xff] }
 0x174   : > { %v957_v4 = vld [vmem:[%s1977_s5 + $0x28] sm:$0xff]  ;;  %v976_v9 = vadd.f32 %v965_v1, %v956_v0 }
 0x175   : > { %v958_v6 = vld [vmem:[%s1977_s5 + $0x30] sm:$0xff]  ;;  %v977_v13 = vadd.f32 %v969_v5, %v957_v4 }
 0x176   : > { %v959_v10 = vld [vmem:[%s1977_s5 + $0x38] sm:$0xff]  ;;  %v978_v14 = vadd.f32 %v965_v1, %v958_v6  ;;  %v1006_v18 = vadd.f32 %v1005_v15, %v976_v9 }
 0x177   : > { %v979_v16 = vadd.f32 %v969_v5, %v959_v10  ;;  %v1015_v19 = vadd.f32 %v1014_v17, %v977_v13 }
 0x178   : > { %v1007_v20 = vadd.f32 %v1006_v18, %v978_v14 }
 0x179   : > { %v1016_v21 = vadd.f32 %v1015_v19, %v979_v16 }
 0x17a   : > { %v1008_v22 = vrot.slane %v1007_v20, 4 }
 0x17b   : > { %v1017_v23 = vrot.slane %v1016_v21, 4 }
 0x17c   : > { %v1009_v24 = vadd.f32 %v1008_v22, %v1007_v20 }
 0x17d   : > { %v1018_v25 = vadd.f32 %v1017_v23, %v1016_v21 }
 0x17e   : > { %v1010_v26 = vrot.slane %v1009_v24, 2 }
 0x17f   : > { %v1019_v27 = vrot.slane %v1018_v25, 2 }
 0x180   : > { %v1011_v28 = vadd.f32 %v1010_v26, %v1009_v24 }
 0x181   : > { %v1020_v29 = vadd.f32 %v1019_v27, %v1018_v25 }
 0x182   : > { %v1012_v30 = vrot.slane %v1011_v28, 1 }
 0x183   : > { %v1021_v31 = vrot.slane %v1020_v29, 1 }
 0x184   : > { %v1013_v32 = vadd.f32 %v1012_v30, %v1011_v28 }
 0x185   : > { %v1022_v33 = vadd.f32 %v1021_v31, %v1020_v29 }
 0x186   : > { %v1023_v34 = vmul.f32 0.03125, %v1013_v32 }
 0x187   : > { %v1024_v35 = vmul.f32 0.03125, %v1022_v33 }
 0x188   : > { %v1025_v36 = vsub.f32 %v972_v7, %v1023_v34  ;;  %v1027_v37 = vsub.f32 %v974_v8, %v1023_v34  ;;  %v1029_v38 = vsub.f32 %v976_v9, %v1023_v34  ;;  %v1031_v39 = vsub.f32 %v978_v14, %v1023_v34 }
 0x189   : > { %v1026_v40 = vsub.f32 %v973_v11, %v1024_v35  ;;  %v1028_v41 = vsub.f32 %v975_v12, %v1024_v35  ;;  %v1030_v42 = vsub.f32 %v977_v13, %v1024_v35  ;;  %v1032_v43 = vsub.f32 %v979_v16, %v1024_v35  ;;  %v1081_v12 = vld [vmem:[%s1975_s3] sm:$0x3] }
 0x18a   : > { %v1041_v44 = vmul.f32 %v1025_v36, %v1025_v36  ;;  %v1043_v45 = vmul.f32 %v1027_v37, %v1027_v37  ;;  %v1045_v46 = vmul.f32 %v1029_v38, %v1029_v38  ;;  %v1047_v50 = vmul.f32 %v1031_v39, %v1031_v39  ;;  %v1101_v13 = vld [vmem:[%s1976_s4] sm:$0x3] }
 0x18b   : > { %v1042_v47 = vmul.f32 %v1026_v40, %v1026_v40  ;;  %v1044_v48 = vmul.f32 %v1028_v41, %v1028_v41  ;;  %v1046_v49 = vmul.f32 %v1030_v42, %v1030_v42  ;;  %v1048_v52 = vmul.f32 %v1032_v43, %v1032_v43 }
 0x18c   : > { %v1049_v51 = vadd.f32 %v1043_v45, %v1041_v44  ;;  %v1086_v14 = vrot.slane %v1081_v12, %v1893_v60  ;;  %v1106_v16 = vrot.slane %v1101_v13, %v1893_v60  ;;  %v1090_v17 = vrot.slane %v1081_v12, %v1895_v61 }
 0x18d   : > { %v1058_v53 = vadd.f32 %v1044_v48, %v1042_v47  ;;  %v1110_v18 = vrot.slane %v1101_v13, %v1895_v61 }
 0x18e   : > { %v1050_v54 = vadd.f32 %v1049_v51, %v1045_v46 }
 0x18f   : > { %v1059_v55 = vadd.f32 %v1058_v53, %v1046_v49 }
 0x190   : > { %v1051_v56 = vadd.f32 %v1050_v54, %v1047_v50 }
 0x191   : > { %v1060_v57 = vadd.f32 %v1059_v55, %v1048_v52 }
 0x192   : > { %v1052_v58 = vrot.slane %v1051_v56, 4 }
 0x193   : > { %v1061_v59 = vrot.slane %v1060_v57, 4 }
 0x194   : > { %v1053_v62 = vadd.f32 %v1052_v58, %v1051_v56 }
 0x195   : > { %v1062_v63 = vadd.f32 %v1061_v59, %v1060_v57 }
 0x196   : > { %v1054_v0 = vrot.slane %v1053_v62, 2 }
 0x197   : > { %v1063_v1 = vrot.slane %v1062_v63, 2 }
 0x198   : > { %v1055_v2 = vadd.f32 %v1054_v0, %v1053_v62 }
 0x199   : > { %v1064_v3 = vadd.f32 %v1063_v1, %v1062_v63 }
 0x19a   : > { %v1056_v4 = vrot.slane %v1055_v2, 1 }
 0x19b   : > { %v1065_v5 = vrot.slane %v1064_v3, 1 }
 0x19c   : > { %v1057_v6 = vadd.f32 %v1056_v4, %v1055_v2 }
 0x19d   : > { %v1066_v7 = vadd.f32 %v1065_v5, %v1064_v3 }
 0x19e   : > { %v1067_v8 = vmul.f32 0.03125, %v1057_v6 }
 0x19f   : > { %v1068_v9 = vmul.f32 0.03125, %v1066_v7 }
 0x1a0   : > { %v1069_v10 = vadd.f32 1e-05, %v1067_v8 }
 0x1a1   : > { %v1070_v11 = vadd.f32 1e-05, %v1068_v9 }
 0x1a2   : > { %1540 = vrsqrt.f32 %v1069_v10 }
 0x1a3   : > { %1542 = vrsqrt.f32 %v1070_v11 }
 0x1ac   : > { %v1541_v15 = vpop.eup %1540 }
 0x1ad   : > { %v1543_v19 = vpop.eup %1542  ;;  %v1073_v20 = vmul.f32 %v1541_v15, %v1025_v36  ;;  %v1075_v21 = vmul.f32 %v1541_v15, %v1027_v37  ;;  %v1077_v22 = vmul.f32 %v1541_v15, %v1029_v38  ;;  %v1079_v23 = vmul.f32 %v1541_v15, %v1031_v39 }
 0x1ae   : > { %v1074_v24 = vmul.f32 %v1543_v19, %v1026_v40  ;;  %v1076_v25 = vmul.f32 %v1543_v19, %v1028_v41  ;;  %v1078_v26 = vmul.f32 %v1543_v19, %v1030_v42  ;;  %v1080_v27 = vmul.f32 %v1543_v19, %v1032_v43 }
 0x1af   : > { %v1093_v28 = vmul.f32 %v1086_v14, %v1073_v20  ;;  %v1095_v29 = vmul.f32 %v1086_v14, %v1075_v21  ;;  %v1097_v30 = vmul.f32 %v1086_v14, %v1077_v22  ;;  %v1099_v31 = vmul.f32 %v1086_v14, %v1079_v23 }
 0x1b0   : > { %v1094_v32 = vmul.f32 %v1090_v17, %v1074_v24  ;;  %v1096_v33 = vmul.f32 %v1090_v17, %v1076_v25  ;;  %v1098_v60 = vmul.f32 %v1090_v17, %v1078_v26  ;;  %v1100_v34 = vmul.f32 %v1090_v17, %v1080_v27 }
 0x1b1   : > { %v1113_v35 = vadd.f32 %v1106_v16, %v1093_v28  ;;  %v1115_v44 = vadd.f32 %v1106_v16, %v1095_v29  ;;  %v1117_v61 = vadd.f32 %v1106_v16, %v1097_v30  ;;  %v1119_v45 = vadd.f32 %v1106_v16, %v1099_v31 }
 0x1b2   : > { %v1114_v36 = vadd.f32 %v1110_v18, %v1094_v32  ;;  %v1116_v37 = vadd.f32 %v1110_v18, %v1096_v33  ;;  %v1118_v38 = vadd.f32 %v1110_v18, %v1098_v60  ;;  %v1120_v39 = vadd.f32 %v1110_v18, %v1100_v34 }
 0x1b3   : > { %vm1121_vm0 = vcmp.ge.f32.partialorder %v1113_v35, 0.0  ;;  %v1129_v40 = vmul.f32 0.2, %v1113_v35  ;;  %vm1123_vm1 = vcmp.ge.f32.partialorder %v1115_v44, 0.0  ;;  %v1131_v41 = vmul.f32 0.2, %v1115_v44 }
 0x1b4   : > { %vm1122_vm2 = vcmp.ge.f32.partialorder %v1114_v36, 0.0  ;;  %v1130_v42 = vmul.f32 0.2, %v1114_v36  ;;  %vm1124_vm3 = vcmp.ge.f32.partialorder %v1116_v37, 0.0  ;;  %v1132_v43 = vmul.f32 0.2, %v1116_v37 }
 0x1b5   : > { %v1137_v46 = vsel %vm1121_vm0, %v1113_v35, %v1129_v40  ;;  %v1139_v47 = vsel %vm1123_vm1, %v1115_v44, %v1131_v41  ;;  %vm1125_vm4 = vcmp.ge.f32.partialorder %v1117_v61, 0.0  ;;  %v1133_v48 = vmul.f32 0.2, %v1117_v61 }
 0x1b6   : > { %1145 = vst [vmem:[%s1977_s5] sm:$0xff] %v1137_v46  ;;  %v1138_v49 = vsel %vm1122_vm2, %v1114_v36, %v1130_v42  ;;  %1147 = vst [vmem:[%s1977_s5 + $0x10] sm:$0xff] %v1139_v47  ;;  %v1140_v50 = vsel %vm1124_vm3, %v1116_v37, %v1132_v43  ;;  %vm1126_vm5 = vcmp.ge.f32.partialorder %v1118_v38, 0.0  ;;  %v1134_v51 = vmul.f32 0.2, %v1118_v38 }
 0x1b7   : > { %1146 = vst [vmem:[%s1977_s5 + $0x8] sm:$0xff] %v1138_v49  ;;  %1148 = vst [vmem:[%s1977_s5 + $0x18] sm:$0xff] %v1140_v50  ;;  %v1141_v52 = vsel %vm1125_vm4, %v1117_v61, %v1133_v48  ;;  %vm1127_vm6 = vcmp.ge.f32.partialorder %v1119_v45, 0.0  ;;  %v1135_v53 = vmul.f32 0.2, %v1119_v45  ;;  %vm1128_vm7 = vcmp.ge.f32.partialorder %v1120_v39, 0.0 }
 0x1b8   : > { %1149 = vst [vmem:[%s1977_s5 + $0x20] sm:$0xff] %v1141_v52  ;;  %v1142_v54 = vsel %vm1126_vm5, %v1118_v38, %v1134_v51  ;;  %v1136_v55 = vmul.f32 0.2, %v1120_v39 }
 0x1b9   : > { %1150 = vst [vmem:[%s1977_s5 + $0x28] sm:$0xff] %v1142_v54  ;;  %v1143_v56 = vsel %vm1127_vm6, %v1119_v45, %v1135_v53 }
 0x1ba   : > { %1151 = vst [vmem:[%s1977_s5 + $0x30] sm:$0xff] %v1143_v56  ;;  %v1144_v57 = vsel %vm1128_vm7, %v1120_v39, %v1136_v55 }
 0x1bb   : > { %1152 = vst [vmem:[%s1977_s5 + $0x38] sm:$0xff] %v1144_v57 }
 0x1bc PF: > { %s16_s22 = sadd.s32 1, %s1614_s22   ;;  %s1988_s18 = smov %s1602_s19 }
 0x1bd   : > { %p13_p0 = scmp.ge.s32.totalorder %s16_s22, 6   ;;  %s1989_s19 = smov %s1698_s30 }
 0x1be   : > { %s1990_s20 = smov %s1610_s21  ;;  %s1991_s21 = smov %s1993_s24 }
 0x1bf   :  { %15 = sbr.rel (!%p13_p0) target bundleno = 3 (0x3), region = 121 }
 0x1c6   :  { %1175 = vsyncpa [#allocation4], 1 }
 0x1c7   :  { %1177 = vsyncpa [#allocation4 + $0x1], 1 }

// kernel: encoder_conv_orig_forward.9
= control target key start
LH: loop header
LB: loop body
LE: loop exit
PB: predicated region body
PF: predicated region fallthrough
CT: control target
= control target key end

     0   :  { %s2275_s0 = inlined_call_operand.vmem [shape: bf16[16,4096], index: 0, kind: input, shape index: {}]   ;;  %s2276_s1 = inlined_call_operand.vmem [shape: bf16[4096,512], index: 1, kind: input, shape index: {}]   ;;  %s2277_s2 = inlined_call_operand.vmem [shape: f32[1,512], index: 2, kind: input, shape index: {}]   ;;  %s2278_s3 = inlined_call_operand.vmem [shape: f32[1,512], index: 3, kind: input, shape index: {}]   ;;  %s2279_s4 = inlined_call_operand.vmem [shape: f32[1,512], index: 4, kind: input, shape index: {}]   ;;  %s2280_s5 = inlined_call_operand.vmem [shape: f32[16,512], index: 5, kind: output, shape index: {}]  }
   0x1   :  { %2283 = sst [smem:[#allocation8_spill]] %s2275_s0 }
   0x2   :  { %2284 = sst [smem:[#allocation9_spill]] %s2276_s1 }
   0x3   :  { %s1845_s18 = smov 0   ;;  %s1847_s19 = smov 0  }
   0x4   :  { %s1849_s20 = smov 0   ;;  %s1851_s21 = smov 0  }
   0x5   :  { %s1853_s22 = smov 0   ;;  %s1855_s23 = smov 0  }
   0x6   :  { %s1857_s24 = smov 0   ;;  %s1859_s25 = smov 0  }
   0x7   :  { %s1861_s26 = smov 0   ;;  %s1863_s27 = smov 0  }
   0x8   :  { %s1865_s28 = smov 0  }
   0x9 LB: > { %s1430_s29 = sadd.s32 4294967295, %s1812_s28   ;;  %s24_s30 = sadd.s32 1, %s1804_s26  ;;  %s1812_s28 = sphi %s1865_s28, %s15_s28   ;;  %s1808_s27 = sphi %s1863_s27, %s2305_s27   ;;  %s1804_s26 = sphi %s1861_s26, %s2304_s26   ;;  %s1800_s25 = sphi %s1859_s25, %s2303_s25   ;;  %s1796_s24 = sphi %s1857_s24, %s2302_s24   ;;  %s1792_s23 = sphi %s1855_s23, %s2301_s23   ;;  %s1788_s22 = sphi %s1853_s22, %s2300_s22   ;;  %s1784_s21 = sphi %s1851_s21, %s2299_s21   ;;  %s1780_s20 = sphi %s1849_s20, %s2298_s20   ;;  %s1776_s19 = sphi %s1847_s19, %s2297_s19   ;;  %s1772_s18 = sphi %s1845_s18, %s2296_s18  }
   0xa   : > { %p25_p0 = scmp.ge.s32.totalorder %s24_s30, 8  ;;  %s27_s6 = sadd.s32 1, %s1808_s27 }
   0xb   : > { %s34_s7 = sadd.s32 1, %s1792_s23  ;;  %p41_p1 = scmp.ne.s32.totalorder %s1792_s23, %s1788_s22 }
   0xc   : > { %s2307_s30 = smov (%p25_p0, %s24_s30), 0  ;;  %s2309_s6 = smov (!%p25_p0, %s27_s6), %s1808_s27 }
   0xd   : > { %2285 = sst [smem:[#allocation5_spill]] %s2307_s30  ;;  %s31_s8 = ssub.s32 %s1804_s26, %s2307_s30 }
   0xe   : > { %p42_p2 = scmp.eq.s32.totalorder %s1812_s28, 0  ;;  %p29_p3 = scmp.ge.s32.totalorder %s2309_s6, 2 }
   0xf   : > { %p32_p4 = scmp.eq.s32.totalorder %s31_s8, 0  ;;  %s62_s10 = sadd.s32 1, %s1784_s21 }
  0x10   : > { %p1912_p5 = por %p42_p2, %p41_p1  ;;  %s2311_s6 = smov (%p29_p3, %s2309_s6), 0 }
  0x11   : > { %2287 = sst [smem:[#allocation6_spill]] %s2311_s6  ;;  %s58_s12 = ssub.s32 %s1808_s27, %s2311_s6 }
  0x12   : > { %s1920_s11 = scalar_select %p32_p4, %s1792_s23, %s34_s7  }
  0x13   : > { %p69_p6 = scmp.ne.s32.totalorder %s1784_s21, %s1780_s20  ;;  %s59_s13 = sor.u32 %s58_s12, %s31_s8 }
  0x14   : > { %2288 = sst [smem:[#allocation7_spill]] %s1920_s11  ;;  %p164_p7 = scmp.eq.s32.totalorder %s58_s12, 0 }
  0x15   : > { %p60_p8 = scmp.eq.s32.totalorder %s59_s13, 0  ;;  %p1926_p9 = por %p69_p6, %p42_p2 }
  0x16   : > { %s166_s15 = sadd.s32 1, %s1776_s19  ;;  %p176_p10 = scmp.ne.s32.totalorder %s1776_s19, %s1772_s18 }
  0x17   : > { %s1934_s16 = scalar_select %p60_p8, %s1784_s21, %s62_s10  }
  0x18   : > { %s1937_s17 = scalar_select %p164_p7, %s1776_s19, %s166_s15  }
  0x19   : > { %p177_p11 = scmp.eq.s32.totalorder %s1430_s29, 15  ;;  %p1433_p13 = scmp.ge.s32.totalorder %s1812_s28, 16 }
  0x1b   : > { %p1939_p12 = por %p177_p11, %p176_p10  ;;  %199 = sbr.rel (%p1433_p13) target bundleno = 88 (0x58), region = 16 }
  0x22   : > { %202 = sbr.rel (!%p1912_p5) target bundleno = 46 (0x2e), region = 20  ;;  %s204_s7 = sand.u32 (%p1912_p5), 1, %s1792_s23  }
  0x23   : > { %s1524_s8 = sshll.u32 (%p1912_p5), %s1804_s26, 4  ;;  %s1434_s12 = sshll.u32 (%p1912_p5), %s204_s7, 5 }
  0x24   : > { %s2291_s0 = sld [smem:[#allocation8_spill]] (%p1912_p5)  ;;  %s206_s29 = scalar_lea.vmem (%p1912_p5), [#allocation2], %s1434_s12 }
  0x2a   : > { %s209_s15 = scalar_lea.vmem %s2291_s0, %s1524_s8 }
  0x2b   : > { %v222_v0 = vld [vmem:[%s209_s15] sm:$0xff]  ;;  %v224_v1 = vld [vmem:[%s209_s15 + $0x8] sm:$0xff] }
  0x2c   : > { %v226_v2 = vld [vmem:[%s209_s15 + $0x80] sm:$0xff]  ;;  %223 = vst [vmem:[%s206_s29] sm:$0xff] %v222_v0  ;;  %225 = vst [vmem:[%s206_s29 + $0x8] sm:$0xff] %v224_v1  ;;  %v228_v3 = vld [vmem:[%s209_s15 + $0x88] sm:$0xff] }
  0x2d   : > { %227 = vst [vmem:[%s206_s29 + $0x10] sm:$0xff] %v226_v2  ;;  %229 = vst [vmem:[%s206_s29 + $0x18] sm:$0xff] %v228_v3 }
  0x2e PF: > { %235 = sbr.rel (!%p1926_p9) target bundleno = 88 (0x58), region = 43  ;;  %s237_s9 = sand.u32 (%p1926_p9), 1, %s1784_s21  }
  0x2f   : > { %s1439_s7 = sshll.u32 (%p1926_p9), %s1808_s27, 1  ;;  %s1437_s10 = sshll.u32 (%p1926_p9), %s237_s9, 9 }
  0x30   : > { %s1525_s8 = sshll.u32 (%p1926_p9), %s1804_s26, 8  ;;  %s2292_s1 = sld [smem:[#allocation9_spill]] (%p1926_p9) }
  0x31   : > { %s243_s13 = sadd.s32 (%p1926_p9), %s1525_s8, %s1439_s7  ;;  %s1964_s14 = scalar_lea.vmem (%p1926_p9), [#allocation3], %s1437_s10 }
  0x32   : > { %s1441_s0 = sshll.u32 (%p1926_p9), %s243_s13, 2 }
  0x36   : > { %s1959_s11 = scalar_lea.vmem %s2292_s1, %s1441_s0 }
  0x37   : > { %v399_v4 = vld [vmem:[%s1959_s11] sm:$0xff]  ;;  %v401_v5 = vld [vmem:[%s1959_s11 + $0x10] sm:$0xff] }
  0x38   : > { %v403_v6 = vld [vmem:[%s1959_s11 + $0x20] sm:$0xff]  ;;  %400 = vst [vmem:[%s1964_s14] sm:$0xff] %v399_v4  ;;  %402 = vst [vmem:[%s1964_s14 + $0x8] sm:$0xff] %v401_v5  ;;  %v405_v7 = vld [vmem:[%s1959_s11 + $0x30] sm:$0xff] }
  0x39   : > { %404 = vst [vmem:[%s1964_s14 + $0x10] sm:$0xff] %v403_v6  ;;  %v407_v8 = vld [vmem:[%s1959_s11 + $0x40] sm:$0xff]  ;;  %v409_v9 = vld [vmem:[%s1959_s11 + $0x50] sm:$0xff]  ;;  %406 = vst [vmem:[%s1964_s14 + $0x18] sm:$0xff] %v405_v7 }
  0x3a   : > { %408 = vst [vmem:[%s1964_s14 + $0x20] sm:$0xff] %v407_v8  ;;  %410 = vst [vmem:[%s1964_s14 + $0x28] sm:$0xff] %v409_v9  ;;  %v411_v10 = vld [vmem:[%s1959_s11 + $0x60] sm:$0xff]  ;;  %v413_v11 = vld [vmem:[%s1959_s11 + $0x70] sm:$0xff] }
  0x3b   : > { %v415_v12 = vld [vmem:[%s1959_s11 + $0x80] sm:$0xff]  ;;  %412 = vst [vmem:[%s1964_s14 + $0x30] sm:$0xff] %v411_v10  ;;  %414 = vst [vmem:[%s1964_s14 + $0x38] sm:$0xff] %v413_v11  ;;  %v417_v13 = vld [vmem:[%s1959_s11 + $0x90] sm:$0xff] }
  0x3c   : > { %416 = vst [vmem:[%s1964_s14 + $0x40] sm:$0xff] %v415_v12  ;;  %v419_v14 = vld [vmem:[%s1959_s11 + $0xa0] sm:$0xff]  ;;  %v421_v15 = vld [vmem:[%s1959_s11 + $0xb0] sm:$0xff]  ;;  %418 = vst [vmem:[%s1964_s14 + $0x48] sm:$0xff] %v417_v13 }
  0x3d   : > { %420 = vst [vmem:[%s1964_s14 + $0x50] sm:$0xff] %v419_v14  ;;  %422 = vst [vmem:[%s1964_s14 + $0x58] sm:$0xff] %v421_v15  ;;  %v423_v16 = vld [vmem:[%s1959_s11 + $0xc0] sm:$0xff]  ;;  %v425_v17 = vld [vmem:[%s1959_s11 + $0xd0] sm:$0xff] }
  0x3e   : > { %v427_v18 = vld [vmem:[%s1959_s11 + $0xe0] sm:$0xff]  ;;  %424 = vst [vmem:[%s1964_s14 + $0x60] sm:$0xff] %v423_v16  ;;  %426 = vst [vmem:[%s1964_s14 + $0x68] sm:$0xff] %v425_v17  ;;  %v429_v19 = vld [vmem:[%s1959_s11 + $0xf0] sm:$0xff] }
  0x3f   : > { %428 = vst [vmem:[%s1964_s14 + $0x70] sm:$0xff] %v427_v18  ;;  %v431_v20 = vld [vmem:[%s1959_s11 + $0x100] sm:$0xff]  ;;  %v433_v21 = vld [vmem:[%s1959_s11 + $0x110] sm:$0xff]  ;;  %430 = vst [vmem:[%s1964_s14 + $0x78] sm:$0xff] %v429_v19 }
  0x40   : > { %432 = vst [vmem:[%s1964_s14 + $0x80] sm:$0xff] %v431_v20  ;;  %434 = vst [vmem:[%s1964_s14 + $0x88] sm:$0xff] %v433_v21  ;;  %v435_v22 = vld [vmem:[%s1959_s11 + $0x120] sm:$0xff]  ;;  %v437_v23 = vld [vmem:[%s1959_s11 + $0x130] sm:$0xff] }
  0x41   : > { %v439_v24 = vld [vmem:[%s1959_s11 + $0x140] sm:$0xff]  ;;  %436 = vst [vmem:[%s1964_s14 + $0x90] sm:$0xff] %v435_v22  ;;  %438 = vst [vmem:[%s1964_s14 + $0x98] sm:$0xff] %v437_v23  ;;  %v441_v25 = vld [vmem:[%s1959_s11 + $0x150] sm:$0xff] }
  0x42   : > { %440 = vst [vmem:[%s1964_s14 + $0xa0] sm:$0xff] %v439_v24  ;;  %v443_v26 = vld [vmem:[%s1959_s11 + $0x160] sm:$0xff]  ;;  %v445_v27 = vld [vmem:[%s1959_s11 + $0x170] sm:$0xff]  ;;  %442 = vst [vmem:[%s1964_s14 + $0xa8] sm:$0xff] %v441_v25 }
  0x43   : > { %444 = vst [vmem:[%s1964_s14 + $0xb0] sm:$0xff] %v443_v26  ;;  %446 = vst [vmem:[%s1964_s14 + $0xb8] sm:$0xff] %v445_v27  ;;  %v447_v28 = vld [vmem:[%s1959_s11 + $0x180] sm:$0xff]  ;;  %v449_v29 = vld [vmem:[%s1959_s11 + $0x190] sm:$0xff] }
  0x44   : > { %v451_v30 = vld [vmem:[%s1959_s11 + $0x1a0] sm:$0xff]  ;;  %448 = vst [vmem:[%s1964_s14 + $0xc0] sm:$0xff] %v447_v28  ;;  %450 = vst [vmem:[%s1964_s14 + $0xc8] sm:$0xff] %v449_v29  ;;  %v453_v31 = vld [vmem:[%s1959_s11 + $0x1b0] sm:$0xff] }
  0x45   : > { %452 = vst [vmem:[%s1964_s14 + $0xd0] sm:$0xff] %v451_v30  ;;  %v455_v32 = vld [vmem:[%s1959_s11 + $0x1c0] sm:$0xff]  ;;  %v457_v33 = vld [vmem:[%s1959_s11 + $0x1d0] sm:$0xff]  ;;  %454 = vst [vmem:[%s1964_s14 + $0xd8] sm:$0xff] %v453_v31 }
  0x46   : > { %456 = vst [vmem:[%s1964_s14 + $0xe0] sm:$0xff] %v455_v32  ;;  %458 = vst [vmem:[%s1964_s14 + $0xe8] sm:$0xff] %v457_v33  ;;  %v459_v34 = vld [vmem:[%s1959_s11 + $0x1e0] sm:$0xff]  ;;  %v461_v35 = vld [vmem:[%s1959_s11 + $0x1f0] sm:$0xff] }
  0x47   : > { %v463_v36 = vld [vmem:[%s1959_s11 + $0x200] sm:$0xff]  ;;  %460 = vst [vmem:[%s1964_s14 + $0xf0] sm:$0xff] %v459_v34  ;;  %462 = vst [vmem:[%s1964_s14 + $0xf8] sm:$0xff] %v461_v35  ;;  %v465_v37 = vld [vmem:[%s1959_s11 + $0x210] sm:$0xff] }
  0x48   : > { %464 = vst [vmem:[%s1964_s14 + $0x100] sm:$0xff] %v463_v36  ;;  %v467_v38 = vld [vmem:[%s1959_s11 + $0x220] sm:$0xff]  ;;  %v469_v39 = vld [vmem:[%s1959_s11 + $0x230] sm:$0xff]  ;;  %466 = vst [vmem:[%s1964_s14 + $0x108] sm:$0xff] %v465_v37 }
  0x49   : > { %468 = vst [vmem:[%s1964_s14 + $0x110] sm:$0xff] %v467_v38  ;;  %470 = vst [vmem:[%s1964_s14 + $0x118] sm:$0xff] %v469_v39  ;;  %v471_v40 = vld [vmem:[%s1959_s11 + $0x240] sm:$0xff]  ;;  %v473_v41 = vld [vmem:[%s1959_s11 + $0x250] sm:$0xff] }
  0x4a   : > { %v475_v42 = vld [vmem:[%s1959_s11 + $0x260] sm:$0xff]  ;;  %472 = vst [vmem:[%s1964_s14 + $0x120] sm:$0xff] %v471_v40  ;;  %474 = vst [vmem:[%s1964_s14 + $0x128] sm:$0xff] %v473_v41  ;;  %v477_v43 = vld [vmem:[%s1959_s11 + $0x270] sm:$0xff] }
  0x4b   : > { %476 = vst [vmem:[%s1964_s14 + $0x130] sm:$0xff] %v475_v42  ;;  %v479_v44 = vld [vmem:[%s1959_s11 + $0x280] sm:$0xff]  ;;  %v481_v45 = vld [vmem:[%s1959_s11 + $0x290] sm:$0xff]  ;;  %478 = vst [vmem:[%s1964_s14 + $0x138] sm:$0xff] %v477_v43 }
  0x4c   : > { %480 = vst [vmem:[%s1964_s14 + $0x140] sm:$0xff] %v479_v44  ;;  %482 = vst [vmem:[%s1964_s14 + $0x148] sm:$0xff] %v481_v45  ;;  %v483_v46 = vld [vmem:[%s1959_s11 + $0x2a0] sm:$0xff]  ;;  %v485_v47 = vld [vmem:[%s1959_s11 + $0x2b0] sm:$0xff] }
  0x4d   : > { %v487_v48 = vld [vmem:[%s1959_s11 + $0x2c0] sm:$0xff]  ;;  %484 = vst [vmem:[%s1964_s14 + $0x150] sm:$0xff] %v483_v46  ;;  %486 = vst [vmem:[%s1964_s14 + $0x158] sm:$0xff] %v485_v47  ;;  %v489_v49 = vld [vmem:[%s1959_s11 + $0x2d0] sm:$0xff] }
  0x4e   : > { %488 = vst [vmem:[%s1964_s14 + $0x160] sm:$0xff] %v487_v48  ;;  %v491_v50 = vld [vmem:[%s1959_s11 + $0x2e0] sm:$0xff]  ;;  %v493_v51 = vld [vmem:[%s1959_s11 + $0x2f0] sm:$0xff]  ;;  %490 = vst [vmem:[%s1964_s14 + $0x168] sm:$0xff] %v489_v49 }
  0x4f   : > { %492 = vst [vmem:[%s1964_s14 + $0x170] sm:$0xff] %v491_v50  ;;  %494 = vst [vmem:[%s1964_s14 + $0x178] sm:$0xff] %v493_v51  ;;  %v495_v52 = vld [vmem:[%s1959_s11 + $0x300] sm:$0xff]  ;;  %v497_v53 = vld [vmem:[%s1959_s11 + $0x310] sm:$0xff] }
  0x50   : > { %v499_v54 = vld [vmem:[%s1959_s11 + $0x320] sm:$0xff]  ;;  %496 = vst [vmem:[%s1964_s14 + $0x180] sm:$0xff] %v495_v52  ;;  %498 = vst [vmem:[%s1964_s14 + $0x188] sm:$0xff] %v497_v53  ;;  %v501_v55 = vld [vmem:[%s1959_s11 + $0x330] sm:$0xff] }
  0x51   : > { %500 = vst [vmem:[%s1964_s14 + $0x190] sm:$0xff] %v499_v54  ;;  %v503_v56 = vld [vmem:[%s1959_s11 + $0x340] sm:$0xff]  ;;  %v505_v57 = vld [vmem:[%s1959_s11 + $0x350] sm:$0xff]  ;;  %502 = vst [vmem:[%s1964_s14 + $0x198] sm:$0xff] %v501_v55 }
  0x52   : > { %504 = vst [vmem:[%s1964_s14 + $0x1a0] sm:$0xff] %v503_v56  ;;  %506 = vst [vmem:[%s1964_s14 + $0x1a8] sm:$0xff] %v505_v57  ;;  %v507_v58 = vld [vmem:[%s1959_s11 + $0x360] sm:$0xff]  ;;  %v509_v59 = vld [vmem:[%s1959_s11 + $0x370] sm:$0xff] }
  0x53   : > { %v511_v60 = vld [vmem:[%s1959_s11 + $0x380] sm:$0xff]  ;;  %508 = vst [vmem:[%s1964_s14 + $0x1b0] sm:$0xff] %v507_v58  ;;  %510 = vst [vmem:[%s1964_s14 + $0x1b8] sm:$0xff] %v509_v59  ;;  %v513_v61 = vld [vmem:[%s1959_s11 + $0x390] sm:$0xff] }
  0x54   : > { %512 = vst [vmem:[%s1964_s14 + $0x1c0] sm:$0xff] %v511_v60  ;;  %v515_v62 = vld [vmem:[%s1959_s11 + $0x3a0] sm:$0xff]  ;;  %v517_v63 = vld [vmem:[%s1959_s11 + $0x3b0] sm:$0xff]  ;;  %514 = vst [vmem:[%s1964_s14 + $0x1c8] sm:$0xff] %v513_v61 }
  0x55   : > { %516 = vst [vmem:[%s1964_s14 + $0x1d0] sm:$0xff] %v515_v62  ;;  %518 = vst [vmem:[%s1964_s14 + $0x1d8] sm:$0xff] %v517_v63  ;;  %v519_v0 = vld [vmem:[%s1959_s11 + $0x3c0] sm:$0xff]  ;;  %v521_v1 = vld [vmem:[%s1959_s11 + $0x3d0] sm:$0xff] }
  0x56   : > { %v523_v2 = vld [vmem:[%s1959_s11 + $0x3e0] sm:$0xff]  ;;  %520 = vst [vmem:[%s1964_s14 + $0x1e0] sm:$0xff] %v519_v0  ;;  %522 = vst [vmem:[%s1964_s14 + $0x1e8] sm:$0xff] %v521_v1  ;;  %v525_v3 = vld [vmem:[%s1959_s11 + $0x3f0] sm:$0xff] }
  0x57   : > { %524 = vst [vmem:[%s1964_s14 + $0x1f0] sm:$0xff] %v523_v2  ;;  %526 = vst [vmem:[%s1964_s14 + $0x1f8] sm:$0xff] %v525_v3 }
  0x58 PF: > { %p1442_p0 = scmp.ge.s32.totalorder %s1812_s28, 1  ;;  %p555_p1 = scmp.lt.s32.totalorder %s1812_s28, 17 }
  0x5a   : > { %p556_p2 = pnand %p1442_p0, %p555_p1 }
  0x5b   : > { %s562_s0 = sand.u32 (!%p556_p2), 1, %s1788_s22   ;;  %s569_s6 = sand.u32 (!%p556_p2), 1, %s1780_s20  }
  0x5c   : > { %559 = sbr.rel (%p556_p2) target bundleno = 472 (0x1d8), region = 93  ;;  %s1443_s15 = sshll.u32 (!%p556_p2), %s562_s0, 5 }
  0x5d   : > { %s1444_s29 = sshll.u32 (!%p556_p2), %s569_s6, 9  ;;  %s608_s9 = sand.u32 (!%p556_p2), 1, %s1772_s18  }
  0x5e   : > { %s1446_s7 = sshll.u32 (!%p556_p2), %s1800_s25, 1  ;;  %s1445_s11 = sshll.u32 (!%p556_p2), %s608_s9, 5 }
  0x5f   : > { %p615_p3 = scmp.lt.s32.totalorder (!%p556_p2), %s1446_s7, 3  ;;  %s2111_s6 = scalar_lea.vmem (!%p556_p2), [#allocation2], %s1443_s15 }
  0x60   : > { %s2113_s9 = scalar_lea.vmem (!%p556_p2), [#allocation3], %s1444_s29  ;;  %s2115_s1 = scalar_lea.vmem (!%p556_p2), [#allocation4], %s1445_s11 }
  0x61   : > { %p1449_p4 = scmp.ne.s32.totalorder (!%p556_p2), %s1796_s24, 0 }
  0x63   : > { %s2313_s7 = smov (!%p615_p3, %s1446_s7), 3  ;;  %633 = sbr.rel (%p1449_p4) target bundleno = 106 (0x6a), region = 105 }
  0x64   : > { %s617_s13 = scalar_lea.vmem %s2277_s2, %s2313_s7  ;;  %s622_s22 = scalar_lea.vmem %s2278_s3, %s2313_s7  ;;  %v1814_v4 = vmov (!%p1449_p4), 0.0  }
  0x65   : > { %s627_s18 = scalar_lea.vmem %s2279_s4, %s2313_s7  ;;  %634 = vst [vmem:[%s2115_s1] sm:$0xff] (!%p1449_p4), %v1814_v4  ;;  %635 = vst [vmem:[%s2115_s1 + $0x8] sm:$0xff] (!%p1449_p4), %v1814_v4 }
  0x66   : > { %636 = vst [vmem:[%s2115_s1 + $0x10] sm:$0xff] (!%p1449_p4), %v1814_v4  ;;  %637 = vst [vmem:[%s2115_s1 + $0x18] sm:$0xff] (!%p1449_p4), %v1814_v4 }
  0x6a PF: > { %v1620_v5 = vld [vmem:[%s2113_s9 + $0x4] ss:$8 sps:$4 sm:$0xff]   ;;  %v1624_v7 = vld [vmem:[%s2113_s9] ss:$8 sps:$4 sm:$0xff]   ;;  %v1626_v9 = vld [vmem:[%s2113_s9 + $0x14] ss:$8 sps:$4 sm:$0xff]  }
  0x6b   : > { %v1622_v6 = vld [vmem:[%s2113_s9 + $0x104] ss:$8 sps:$4 sm:$0xff]   ;;  %1050 = vmatprep.subr.bf16.mxu1 %v1620_v5  ;;  %v1625_v8 = vld [vmem:[%s2113_s9 + $0x100] ss:$8 sps:$4 sm:$0xff]   ;;  %v1628_v10 = vld [vmem:[%s2113_s9 + $0x114] ss:$8 sps:$4 sm:$0xff]  }
  0x6c   : > { %1093 = vmatprep.subr.bf16.mxu0 %v1622_v6  ;;  %1051 = vmatpush1.bf16.msra.mxu1 %v1624_v7  ;;  %v1630_v11 = vld [vmem:[%s2113_s9 + $0x10] ss:$8 sps:$4 sm:$0xff]   ;;  %v1632_v13 = vld [vmem:[%s2113_s9 + $0x24] ss:$8 sps:$4 sm:$0xff]   ;;  %v1636_v15 = vld [vmem:[%s2113_s9 + $0x20] ss:$8 sps:$4 sm:$0xff]  }
  0x6d   : > { %1094 = vmatpush1.bf16.msra.mxu0 %v1625_v8  ;;  %1052 = vmatprep.subr.bf16.mxu1 %v1626_v9  ;;  %v1631_v12 = vld [vmem:[%s2113_s9 + $0x110] ss:$8 sps:$4 sm:$0xff]   ;;  %v1634_v14 = vld [vmem:[%s2113_s9 + $0x124] ss:$8 sps:$4 sm:$0xff]   ;;  %v1637_v16 = vld [vmem:[%s2113_s9 + $0x120] ss:$8 sps:$4 sm:$0xff]  }
  0x6e   : > { %1095 = vmatprep.subr.bf16.mxu0 %v1628_v10  ;;  %v1638_v17 = vld [vmem:[%s2113_s9 + $0x34] ss:$8 sps:$4 sm:$0xff]   ;;  %v1642_v19 = vld [vmem:[%s2113_s9 + $0x30] ss:$8 sps:$4 sm:$0xff]   ;;  %v1644_v21 = vld [vmem:[%s2113_s9 + $0x44] ss:$8 sps:$4 sm:$0xff]  }
  0x6f   : > { %v1640_v18 = vld [vmem:[%s2113_s9 + $0x134] ss:$8 sps:$4 sm:$0xff]   ;;  %v1643_v20 = vld [vmem:[%s2113_s9 + $0x130] ss:$8 sps:$4 sm:$0xff]   ;;  %v1646_v22 = vld [vmem:[%s2113_s9 + $0x144] ss:$8 sps:$4 sm:$0xff]  }
  0x70   : > { %1053 = vmatpush1.bf16.msra.mxu1 %v1630_v11  ;;  %v1648_v23 = vld [vmem:[%s2113_s9 + $0x40] ss:$8 sps:$4 sm:$0xff]   ;;  %v1650_v25 = vld [vmem:[%s2113_s9 + $0x54] ss:$8 sps:$4 sm:$0xff]   ;;  %v1654_v27 = vld [vmem:[%s2113_s9 + $0x50] ss:$8 sps:$4 sm:$0xff]  }
  0x71   : > { %1096 = vmatpush1.bf16.msra.mxu0 %v1631_v12  ;;  %1054 = vmatprep.subr.bf16.mxu1 %v1632_v13  ;;  %v1649_v24 = vld [vmem:[%s2113_s9 + $0x140] ss:$8 sps:$4 sm:$0xff]   ;;  %v1652_v26 = vld [vmem:[%s2113_s9 + $0x154] ss:$8 sps:$4 sm:$0xff]   ;;  %v1655_v28 = vld [vmem:[%s2113_s9 + $0x150] ss:$8 sps:$4 sm:$0xff]  }
  0x72   : > { %1097 = vmatprep.subr.bf16.mxu0 %v1634_v14  ;;  %v1656_v29 = vld [vmem:[%s2113_s9 + $0x64] ss:$8 sps:$4 sm:$0xff]   ;;  %v1660_v31 = vld [vmem:[%s2113_s9 + $0x60] ss:$8 sps:$4 sm:$0xff]   ;;  %v1662_v33 = vld [vmem:[%s2113_s9 + $0x74] ss:$8 sps:$4 sm:$0xff]  }
  0x73   : > { %v1658_v30 = vld [vmem:[%s2113_s9 + $0x164] ss:$8 sps:$4 sm:$0xff]   ;;  %v1661_v32 = vld [vmem:[%s2113_s9 + $0x160] ss:$8 sps:$4 sm:$0xff]   ;;  %v1664_v34 = vld [vmem:[%s2113_s9 + $0x174] ss:$8 sps:$4 sm:$0xff]  }
  0x74   : > { %1055 = vmatpush1.bf16.msra.mxu1 %v1636_v15  ;;  %v1666_v35 = vld [vmem:[%s2113_s9 + $0x70] ss:$8 sps:$4 sm:$0xff]   ;;  %v1668_v37 = vld [vmem:[%s2113_s9 + $0x84] ss:$8 sps:$4 sm:$0xff]   ;;  %v1672_v39 = vld [vmem:[%s2113_s9 + $0x80] ss:$8 sps:$4 sm:$0xff]  }
  0x75   : > { %1098 = vmatpush1.bf16.msra.mxu0 %v1637_v16  ;;  %1056 = vmatprep.subr.bf16.mxu1 %v1638_v17  ;;  %v1667_v36 = vld [vmem:[%s2113_s9 + $0x170] ss:$8 sps:$4 sm:$0xff]   ;;  %v1670_v38 = vld [vmem:[%s2113_s9 + $0x184] ss:$8 sps:$4 sm:$0xff]   ;;  %v1673_v40 = vld [vmem:[%s2113_s9 + $0x180] ss:$8 sps:$4 sm:$0xff]  }
  0x76   : > { %1099 = vmatprep.subr.bf16.mxu0 %v1640_v18  ;;  %v1674_v41 = vld [vmem:[%s2113_s9 + $0x94] ss:$8 sps:$4 sm:$0xff]   ;;  %v1678_v43 = vld [vmem:[%s2113_s9 + $0x90] ss:$8 sps:$4 sm:$0xff]   ;;  %v1680_v45 = vld [vmem:[%s2113_s9 + $0xa4] ss:$8 sps:$4 sm:$0xff]  }
  0x77   : > { %v1676_v42 = vld [vmem:[%s2113_s9 + $0x194] ss:$8 sps:$4 sm:$0xff]   ;;  %v1679_v44 = vld [vmem:[%s2113_s9 + $0x190] ss:$8 sps:$4 sm:$0xff]   ;;  %v1682_v46 = vld [vmem:[%s2113_s9 + $0x1a4] ss:$8 sps:$4 sm:$0xff]  }
  0x78   : > { %1057 = vmatpush1.bf16.msra.mxu1 %v1642_v19  ;;  %v1684_v47 = vld [vmem:[%s2113_s9 + $0xa0] ss:$8 sps:$4 sm:$0xff]   ;;  %v1686_v49 = vld [vmem:[%s2113_s9 + $0xb4] ss:$8 sps:$4 sm:$0xff]   ;;  %v1690_v51 = vld [vmem:[%s2113_s9 + $0xb0] ss:$8 sps:$4 sm:$0xff]  }
  0x79   : > { %1100 = vmatpush1.bf16.msra.mxu0 %v1643_v20  ;;  %1058 = vmatprep.subr.bf16.mxu1 %v1644_v21  ;;  %v1685_v48 = vld [vmem:[%s2113_s9 + $0x1a0] ss:$8 sps:$4 sm:$0xff]   ;;  %v1688_v50 = vld [vmem:[%s2113_s9 + $0x1b4] ss:$8 sps:$4 sm:$0xff]   ;;  %v1691_v53 = vld [vmem:[%s2113_s9 + $0x1b0] ss:$8 sps:$4 sm:$0xff]  }
  0x7a   : > { %1101 = vmatprep.subr.bf16.mxu0 %v1646_v22  ;;  %v1718_v52 = vld [vmem:[%s2111_s6 + $0x4] ss:$16 sps:$4 sm:$0xff]   ;;  %v1721_v56 = vld [vmem:[%s2111_s6 + $0xc] ss:$16 sps:$4 sm:$0xff]   ;;  %v1696_v57 = vld [vmem:[%s2113_s9 + $0xc0] ss:$8 sps:$4 sm:$0xff]  }
  0x7b   : > { %v1692_v54 = vld [vmem:[%s2113_s9 + $0xc4] ss:$8 sps:$4 sm:$0xff]   ;;  %1082 = vmatprep.mubr.bf16.mxu1 %v1718_v52  ;;  %1125 = vmatprep.mubr.bf16.mxu0 %v1721_v56  ;;  %v1697_v58 = vld [vmem:[%s2113_s9 + $0x1c0] ss:$8 sps:$4 sm:$0xff]   ;;  %v1698_v59 = vld [vmem:[%s2113_s9 + $0xd4] ss:$8 sps:$4 sm:$0xff]  }
  0x7c   : > { %1059 = vmatpush1.bf16.msra.mxu1 %v1648_v23  ;;  %v1694_v55 = vld [vmem:[%s2113_s9 + $0x1c4] ss:$8 sps:$4 sm:$0xff]   ;;  %v1700_v60 = vld [vmem:[%s2113_s9 + $0x1d4] ss:$8 sps:$4 sm:$0xff]   ;;  %v1702_v61 = vld [vmem:[%s2113_s9 + $0xd0] ss:$8 sps:$4 sm:$0xff]  }
  0x7d   : > { %1102 = vmatpush1.bf16.msra.mxu0 %v1649_v24  ;;  %1060 = vmatprep.subr.bf16.mxu1 %v1650_v25  ;;  %v1703_v62 = vld [vmem:[%s2113_s9 + $0x1d0] ss:$8 sps:$4 sm:$0xff]   ;;  %v1704_v63 = vld [vmem:[%s2113_s9 + $0xe4] ss:$8 sps:$4 sm:$0xff]   ;;  %v1708_v1 = vld [vmem:[%s2113_s9 + $0xe0] ss:$8 sps:$4 sm:$0xff]  }
  0x7e   : > { %1103 = vmatprep.subr.bf16.mxu0 %v1652_v26  ;;  %v1706_v0 = vld [vmem:[%s2113_s9 + $0x1e4] ss:$8 sps:$4 sm:$0xff]   ;;  %v1709_v2 = vld [vmem:[%s2113_s9 + $0x1e0] ss:$8 sps:$4 sm:$0xff]   ;;  %v1710_v3 = vld [vmem:[%s2113_s9 + $0xf4] ss:$8 sps:$4 sm:$0xff]  }
  0x7f   : > { %v1712_v4 = vld [vmem:[%s2113_s9 + $0x1f4] ss:$8 sps:$4 sm:$0xff]   ;;  %v1714_v5 = vld [vmem:[%s2113_s9 + $0xf0] ss:$8 sps:$4 sm:$0xff]   ;;  %v638_v10 = vld [vmem:[%s2115_s1] sm:$0xff]  ;;  %p1518_p5 = scmp.ne.s32.totalorder %s1796_s24, 7 }
  0x80   : > { %1061 = vmatpush1.bf16.msra.mxu1 %v1654_v27  ;;  %v1715_v6 = vld [vmem:[%s2113_s9 + $0x1f0] ss:$8 sps:$4 sm:$0xff]   ;;  %v639_v14 = vld [vmem:[%s2115_s1 + $0x8] sm:$0xff] }
  0x81   : > { %1104 = vmatpush1.bf16.msra.mxu0 %v1655_v28  ;;  %1062 = vmatprep.subr.bf16.mxu1 %v1656_v29  ;;  %v1716_v7 = vld [vmem:[%s2111_s6] ss:$16 sps:$4 sm:$0xff]   ;;  %v1719_v8 = vld [vmem:[%s2111_s6 + $0x8] ss:$16 sps:$4 sm:$0xff]   ;;  %v1154_v29 = vlaneseq (!%p1518_p5) }
  0x82   : > { %1105 = vmatprep.subr.bf16.mxu0 %v1658_v30  ;;  %v640_v18 = vld [vmem:[%s2115_s1 + $0x10] sm:$0xff]  ;;  %v641_v23 = vld [vmem:[%s2115_s1 + $0x18] sm:$0xff] }
  0x83   : > { %v1155_v30 = vshrl.u32 (!%p1518_p5), %v1154_v29, 7 }
  0x84   : > { %1063 = vmatpush1.bf16.msra.mxu1 %v1660_v31  ;;  %v1152_v31 = vld [vmem:[%s617_s13] sm:$0x3] (!%p1518_p5) }
  0x85   : > { %1106 = vmatpush1.bf16.msra.mxu0 %v1661_v32  ;;  %1064 = vmatprep.subr.bf16.mxu1 %v1662_v33  ;;  %v2205_v33 = vsub.s32 (!%p1518_p5), 0, %v1155_v30 }
  0x86   : > { %1107 = vmatprep.subr.bf16.mxu0 %v1664_v34  ;;  %v2207_v34 = vsub.s32 (!%p1518_p5), 1, %v1155_v30 }
  0x88   : > { %1065 = vmatpush1.bf16.msra.mxu1 %v1666_v35 }
  0x89   : > { %1108 = vmatpush1.bf16.msra.mxu0 %v1667_v36  ;;  %1066 = vmatprep.subr.bf16.mxu1 %v1668_v37 }
  0x8a   : > { %1109 = vmatprep.subr.bf16.mxu0 %v1670_v38  ;;  %v1157_v38 = vrot.slane (!%p1518_p5), %v1152_v31, %v2205_v33 }
  0x8c   : > { %1067 = vmatpush1.bf16.msra.mxu1 %v1672_v39  ;;  %v1161_v39 = vrot.slane (!%p1518_p5), %v1152_v31, %v2207_v34 }
  0x8d   : > { %1110 = vmatpush1.bf16.msra.mxu0 %v1673_v40  ;;  %1068 = vmatprep.subr.bf16.mxu1 %v1674_v41 }
  0x8e   : > { %1111 = vmatprep.subr.bf16.mxu0 %v1676_v42 }
  0x90   : > { %1069 = vmatpush1.bf16.msra.mxu1 %v1678_v43 }
  0x91   : > { %1112 = vmatpush1.bf16.msra.mxu0 %v1679_v44  ;;  %1070 = vmatprep.subr.bf16.mxu1 %v1680_v45 }
  0x92   : > { %1113 = vmatprep.subr.bf16.mxu0 %v1682_v46 }
  0x94   : > { %1071 = vmatpush1.bf16.msra.mxu1 %v1684_v47 }
  0x95   : > { %1114 = vmatpush1.bf16.msra.mxu0 %v1685_v48  ;;  %1072 = vmatprep.subr.bf16.mxu1 %v1686_v49 }
  0x96   : > { %1115 = vmatprep.subr.bf16.mxu0 %v1688_v50 }
  0x98   : > { %1073 = vmatpush1.bf16.msra.mxu1 %v1690_v51 }
  0x99   : > { %1116 = vmatpush1.bf16.msra.mxu0 %v1691_v53  ;;  %1074 = vmatprep.subr.bf16.mxu1 %v1692_v54 }
  0x9a   : > { %1117 = vmatprep.subr.bf16.mxu0 %v1694_v55 }
  0x9c   : > { %1075 = vmatpush1.bf16.msra.mxu1 %v1696_v57 }
  0x9d   : > { %1118 = vmatpush1.bf16.msra.mxu0 %v1697_v58  ;;  %1076 = vmatprep.subr.bf16.mxu1 %v1698_v59 }
  0x9e   : > { %1119 = vmatprep.subr.bf16.mxu0 %v1700_v60 }
  0xa0   : > { %1077 = vmatpush1.bf16.msra.mxu1 %v1702_v61 }
  0xa1   : > { %1120 = vmatpush1.bf16.msra.mxu0 %v1703_v62  ;;  %1078 = vmatprep.subr.bf16.mxu1 %v1704_v63 }
  0xa2   : > { %1121 = vmatprep.subr.bf16.mxu0 %v1706_v0 }
  0xa4   : > { %1079 = vmatpush1.bf16.msra.mxu1 %v1708_v1 }
  0xa5   : > { %1122 = vmatpush1.bf16.msra.mxu0 %v1709_v2  ;;  %1080 = vmatprep.subr.bf16.mxu1 %v1710_v3 }
  0xa6   : > { %1123 = vmatprep.subr.bf16.mxu0 %v1712_v4 }
  0xa8   : > { %1081 = vmatpush1.bf16.msra.mxu1 %v1714_v5 }
  0xa9   : > { %1124 = vmatpush1.bf16.msra.mxu0 %v1715_v6 }
  0xab   : > { %1083 = vmatmul.mubr.bf16.vlgmr.msra.gmra.mrb[0].mxu1 %v1716_v7 }
  0xac   : > { %1126 = vmatmul.mubr.bf16.vlgmr.msra.gmra.mrb[0].mxu0 %v1719_v8 }
 0x17e   : > { %v1084_v9 = vpop.f32.mrb[0].mxu1 }
 0x17f   : > { %v1127_v11 = vpop.f32.mrb[0].mxu0  ;;  %v1086_v13 = vpop.f32.mrb[1].mxu1 }
 0x180   : > { %v1128_v12 = vadd.f32 %v1127_v11, %v1084_v9  ;;  %v1129_v15 = vpop.f32.mrb[1].mxu0  ;;  %v1088_v17 = vpop.f32.mrb[2].mxu1 }
 0x181   : > { %v1130_v16 = vadd.f32 %v1129_v15, %v1086_v13  ;;  %v1131_v19 = vpop.f32.mrb[2].mxu0  ;;  %v1090_v22 = vpop.f32.mrb[3].mxu1  ;;  %1147 = sbr.rel (%p1518_p5) target bundleno = 464 (0x1d0), region = 109 }
 0x182   : > { %v1136_v20 = vadd.f32 %v1128_v12, %v638_v10  ;;  %v1132_v21 = vadd.f32 %v1131_v19, %v1088_v17  ;;  %v1133_v24 = vpop.f32.mrb[3].mxu0 }
 0x183   : > { %v1137_v25 = vadd.f32 %v1130_v16, %v639_v14  ;;  %v1134_v26 = vadd.f32 %v1133_v24, %v1090_v22 }
 0x184   : > { %1140 = vst [vmem:[%s2115_s1] sm:$0xff] %v1136_v20  ;;  %v1138_v27 = vadd.f32 %v1132_v21, %v640_v18 }
 0x185   : > { %1141 = vst [vmem:[%s2115_s1 + $0x8] sm:$0xff] %v1137_v25  ;;  %v1139_v28 = vadd.f32 %v1134_v26, %v641_v23  ;;  %v1233_v26 = vld [vmem:[%s622_s22] sm:$0x3] (!%p1518_p5) }
 0x186   : > { %1142 = vst [vmem:[%s2115_s1 + $0x10] sm:$0xff] %v1138_v27  ;;  %v1249_v27 = vld [vmem:[%s627_s18] sm:$0x3] (!%p1518_p5)  ;;  %v1242_v30 = vrot.slane (!%p1518_p5), %v1233_v26, %v2207_v34 }
 0x187   : > { %1143 = vst [vmem:[%s2115_s1 + $0x18] sm:$0xff] %v1139_v28  ;;  %v1238_v28 = vrot.slane (!%p1518_p5), %v1233_v26, %v2205_v33 }
 0x18b   : > { %v1148_v32 = vld [vmem:[%s2115_s1] sm:$0xff] }
 0x18c   : > { %v1149_v36 = vld [vmem:[%s2115_s1 + $0x8] sm:$0xff]  ;;  %v1164_v40 = vadd.f32 %v1157_v38, %v1148_v32 }
 0x18d   : > { %v1150_v35 = vld [vmem:[%s2115_s1 + $0x10] sm:$0xff]  ;;  %v1165_v42 = vadd.f32 %v1161_v39, %v1149_v36 }
 0x18e   : > { %v1151_v37 = vld [vmem:[%s2115_s1 + $0x18] sm:$0xff]  ;;  %v1166_v41 = vadd.f32 %v1157_v38, %v1150_v35  ;;  %v1254_v35 = vrot.slane %v1249_v27, %v2205_v33  ;;  %v1258_v38 = vrot.slane %v1249_v27, %v2207_v34 }
 0x18f   : > { %v1167_v43 = vadd.f32 %v1161_v39, %v1151_v37 }
 0x190   : > { %v1179_v44 = vmul.f32 0.0, %v1166_v41 }
 0x191   : > { %v1180_v45 = vmul.f32 0.0, %v1167_v43 }
 0x192   : > { %v1181_v46 = vadd.f32 %v1179_v44, %v1164_v40 }
 0x193   : > { %v1188_v47 = vadd.f32 %v1180_v45, %v1165_v42 }
 0x194   : > { %v1182_v48 = vrot.slane %v1181_v46, 4 }
 0x195   : > { %v1189_v49 = vrot.slane %v1188_v47, 4 }
 0x196   : > { %v1183_v50 = vadd.f32 %v1182_v48, %v1181_v46 }
 0x197   : > { %v1190_v51 = vadd.f32 %v1189_v49, %v1188_v47 }
 0x198   : > { %v1184_v52 = vrot.slane %v1183_v50, 2 }
 0x199   : > { %v1191_v53 = vrot.slane %v1190_v51, 2 }
 0x19a   : > { %v1185_v54 = vadd.f32 %v1184_v52, %v1183_v50 }
 0x19b   : > { %v1192_v55 = vadd.f32 %v1191_v53, %v1190_v51 }
 0x19c   : > { %v1186_v56 = vrot.slane %v1185_v54, 1 }
 0x19d   : > { %v1193_v57 = vrot.slane %v1192_v55, 1 }
 0x19e   : > { %v1187_v58 = vadd.f32 %v1186_v56, %v1185_v54 }
 0x19f   : > { %v1194_v59 = vadd.f32 %v1193_v57, %v1192_v55 }
 0x1a0   : > { %v1195_v60 = vmul.f32 0.125, %v1187_v58 }
 0x1a1   : > { %v1196_v61 = vmul.f32 0.125, %v1194_v59 }
 0x1a2   : > { %v1197_v62 = vsub.f32 %v1164_v40, %v1195_v60  ;;  %v1199_v63 = vsub.f32 %v1166_v41, %v1195_v60 }
 0x1a3   : > { %v1198_v0 = vsub.f32 %v1165_v42, %v1196_v61  ;;  %v1200_v1 = vsub.f32 %v1167_v43, %v1196_v61 }
 0x1a4   : > { %v1203_v2 = vmul.f32 0.0, %v1199_v63  ;;  %v1205_v3 = vmul.f32 %v1197_v62, %v1197_v62 }
 0x1a5   : > { %v1204_v4 = vmul.f32 0.0, %v1200_v1  ;;  %v1206_v5 = vmul.f32 %v1198_v0, %v1198_v0 }
 0x1a6   : > { %v1207_v6 = vmul.f32 %v1203_v2, %v1203_v2 }
 0x1a7   : > { %v1208_v7 = vmul.f32 %v1204_v4, %v1204_v4 }
 0x1a8   : > { %v1209_v8 = vadd.f32 %v1207_v6, %v1205_v3 }
 0x1a9   : > { %v1216_v9 = vadd.f32 %v1208_v7, %v1206_v5 }
 0x1aa   : > { %v1210_v10 = vrot.slane %v1209_v8, 4 }
 0x1ab   : > { %v1217_v11 = vrot.slane %v1216_v9, 4 }
 0x1ac   : > { %v1211_v12 = vadd.f32 %v1210_v10, %v1209_v8 }
 0x1ad   : > { %v1218_v13 = vadd.f32 %v1217_v11, %v1216_v9 }
 0x1ae   : > { %v1212_v14 = vrot.slane %v1211_v12, 2 }
 0x1af   : > { %v1219_v15 = vrot.slane %v1218_v13, 2 }
 0x1b0   : > { %v1213_v16 = vadd.f32 %v1212_v14, %v1211_v12 }
 0x1b1   : > { %v1220_v17 = vadd.f32 %v1219_v15, %v1218_v13 }
 0x1b2   : > { %v1214_v18 = vrot.slane %v1213_v16, 1 }
 0x1b3   : > { %v1221_v19 = vrot.slane %v1220_v17, 1 }
 0x1b4   : > { %v1215_v20 = vadd.f32 %v1214_v18, %v1213_v16 }
 0x1b5   : > { %v1222_v21 = vadd.f32 %v1221_v19, %v1220_v17 }
 0x1b6   : > { %v1223_v22 = vmul.f32 0.125, %v1215_v20 }
 0x1b7   : > { %v1224_v23 = vmul.f32 0.125, %v1222_v21 }
 0x1b8   : > { %v1225_v24 = vadd.f32 1e-05, %v1223_v22 }
 0x1b9   : > { %v1226_v25 = vadd.f32 1e-05, %v1224_v23 }
 0x1ba   : > { %1722 = vrsqrt.f32 %v1225_v24 }
 0x1bb   : > { %1724 = vrsqrt.f32 %v1226_v25 }
 0x1c4   : > { %v1723_v29 = vpop.eup %1722 }
 0x1c5   : > { %v1725_v31 = vpop.eup %1724  ;;  %v1229_v32 = vmul.f32 %v1723_v29, %v1197_v62  ;;  %v1231_v36 = vmul.f32 %v1723_v29, %v1199_v63 }
 0x1c6   : > { %v1230_v37 = vmul.f32 %v1725_v31, %v1198_v0  ;;  %v1232_v39 = vmul.f32 %v1725_v31, %v1200_v1 }
 0x1c7   : > { %v1245_v40 = vmul.f32 %v1238_v28, %v1229_v32  ;;  %v1247_v41 = vmul.f32 %v1238_v28, %v1231_v36 }
 0x1c8   : > { %v1246_v42 = vmul.f32 %v1242_v30, %v1230_v37  ;;  %v1248_v43 = vmul.f32 %v1242_v30, %v1232_v39 }
 0x1c9   : > { %v1261_v44 = vadd.f32 %v1254_v35, %v1245_v40  ;;  %v1263_v45 = vadd.f32 %v1254_v35, %v1247_v41 }
 0x1ca   : > { %v1262_v46 = vadd.f32 %v1258_v38, %v1246_v42  ;;  %v1264_v47 = vadd.f32 %v1258_v38, %v1248_v43 }
 0x1cb   : > { %vm1265_vm0 = vcmp.ge.f32.partialorder %v1261_v44, 0.0  ;;  %v1269_v48 = vmul.f32 0.2, %v1261_v44  ;;  %vm1267_vm1 = vcmp.ge.f32.partialorder %v1263_v45, 0.0  ;;  %v1271_v33 = vmul.f32 0.2, %v1263_v45 }
 0x1cc   : > { %vm1266_vm2 = vcmp.ge.f32.partialorder %v1262_v46, 0.0  ;;  %v1270_v49 = vmul.f32 0.2, %v1262_v46  ;;  %vm1268_vm3 = vcmp.ge.f32.partialorder %v1264_v47, 0.0  ;;  %v1272_v34 = vmul.f32 0.2, %v1264_v47 }
 0x1cd   : > { %v1273_v50 = vsel %vm1265_vm0, %v1261_v44, %v1269_v48  ;;  %v1275_v51 = vsel %vm1267_vm1, %v1263_v45, %v1271_v33 }
 0x1ce   : > { %1277 = vst [vmem:[%s2115_s1] sm:$0xff] %v1273_v50  ;;  %v1274_v52 = vsel %vm1266_vm2, %v1262_v46, %v1270_v49  ;;  %1279 = vst [vmem:[%s2115_s1 + $0x10] sm:$0xff] %v1275_v51  ;;  %v1276_v53 = vsel %vm1268_vm3, %v1264_v47, %v1272_v34 }
 0x1cf   : > { %1278 = vst [vmem:[%s2115_s1 + $0x8] sm:$0xff] %v1274_v52  ;;  %1280 = vst [vmem:[%s2115_s1 + $0x18] sm:$0xff] %v1276_v53 }
 0x1d0 PF: > { %1287 = sbr.rel (!%p1939_p12) target bundleno = 472 (0x1d8), region = 113  ;;  %s1526_s7 = sshll.u32 (%p1939_p12), %s1800_s25, 4 }
 0x1d1   : > { %s1290_s14 = scalar_lea.vmem (%p1939_p12), %s2280_s5, %s1526_s7 }
 0x1d5   : > { %v1303_v54 = vld [vmem:[%s2115_s1] sm:$0xff] (%p1939_p12)  ;;  %v1307_v56 = vld [vmem:[%s2115_s1 + $0x10] sm:$0xff] (%p1939_p12) }
 0x1d6   : > { %v1305_v55 = vld [vmem:[%s2115_s1 + $0x8] sm:$0xff] (%p1939_p12)  ;;  %v1309_v57 = vld [vmem:[%s2115_s1 + $0x18] sm:$0xff] (%p1939_p12)  ;;  %1304 = vst [vmem:[%s1290_s14] sm:$0xff] (%p1939_p12), %v1303_v54  ;;  %1308 = vst [vmem:[%s1290_s14 + $0x20] sm:$0xff] (%p1939_p12), %v1307_v56 }
 0x1d7   : > { %1306 = vst [vmem:[%s1290_s14 + $0x8] sm:$0xff] %v1305_v55  ;;  %1310 = vst [vmem:[%s1290_s14 + $0x28] sm:$0xff] %v1309_v57 }
 0x1d8 PF: > { %s15_s28 = sadd.s32 1, %s1812_s28   ;;  %s2293_s25 = sld [smem:[#allocation7_spill]] }
 0x1d9   : > { %p12_p6 = scmp.ge.s32.totalorder %s15_s28, 18   ;;  %s2294_s30 = sld [smem:[#allocation5_spill]] }
 0x1da   : > { %s2295_s0 = sld [smem:[#allocation6_spill]]  ;;  %s2296_s18 = smov %s1776_s19 }
 0x1db   : > { %s2297_s19 = smov %s1937_s17  ;;  %s2298_s20 = smov %s1784_s21 }
 0x1dc   : > { %s2299_s21 = smov %s1934_s16  ;;  %s2300_s22 = smov %s1792_s23 }
 0x1dd   : > { %s2302_s24 = smov %s1804_s26  ;;  %14 = sbr.rel (!%p12_p6) target bundleno = 9 (0x9), region = 184 }
 0x1de   : > { %s2301_s23 = smov %s2293_s25  ;;  %s2303_s25 = smov %s1808_s27 }
 0x1df   : > { %s2304_s26 = smov %s2294_s30 }
 0x1e0   : > { %s2305_s27 = smov %s2295_s0 }

// kernel: encoder_conv_orig_forward.10
= control target key start
LH: loop header
LB: loop body
LE: loop exit
PB: predicated region body
PF: predicated region fallthrough
CT: control target
= control target key end

     0   :  { %s2278_s0 = inlined_call_operand.vmem [shape: bf16[16,8192], index: 0, kind: input, shape index: {}]   ;;  %s2279_s1 = inlined_call_operand.vmem [shape: bf16[8192,1024], index: 1, kind: input, shape index: {}]   ;;  %s2280_s2 = inlined_call_operand.vmem [shape: f32[1,1024], index: 2, kind: input, shape index: {}]   ;;  %s2281_s3 = inlined_call_operand.vmem [shape: f32[1,1024], index: 3, kind: input, shape index: {}]   ;;  %s2282_s4 = inlined_call_operand.vmem [shape: f32[1,1024], index: 4, kind: input, shape index: {}]   ;;  %s2283_s5 = inlined_call_operand.vmem [shape: f32[16,1024], index: 5, kind: output, shape index: {}]  }
   0x1   :  { %2286 = sst [smem:[#allocation8_spill]] %s2278_s0 }
   0x2   :  { %2287 = sst [smem:[#allocation9_spill]] %s2279_s1 }
   0x3   :  { %s1848_s18 = smov 0   ;;  %s1850_s19 = smov 0  }
   0x4   :  { %s1852_s20 = smov 0   ;;  %s1854_s21 = smov 0  }
   0x5   :  { %s1856_s22 = smov 0   ;;  %s1858_s23 = smov 0  }
   0x6   :  { %s1860_s24 = smov 0   ;;  %s1862_s25 = smov 0  }
   0x7   :  { %s1864_s26 = smov 0   ;;  %s1866_s27 = smov 0  }
   0x8   :  { %s1868_s28 = smov 0  }
   0x9 LB: > { %s1430_s29 = sadd.s32 4294967295, %s1814_s28   ;;  %s24_s30 = sadd.s32 1, %s1806_s26  ;;  %s1814_s28 = sphi %s1868_s28, %s15_s28   ;;  %s1810_s27 = sphi %s1866_s27, %s2308_s27   ;;  %s1806_s26 = sphi %s1864_s26, %s2307_s26   ;;  %s1802_s25 = sphi %s1862_s25, %s2306_s25   ;;  %s1798_s24 = sphi %s1860_s24, %s2305_s24   ;;  %s1794_s23 = sphi %s1858_s23, %s2304_s23   ;;  %s1790_s22 = sphi %s1856_s22, %s2303_s22   ;;  %s1786_s21 = sphi %s1854_s21, %s2302_s21   ;;  %s1782_s20 = sphi %s1852_s20, %s2301_s20   ;;  %s1778_s19 = sphi %s1850_s19, %s2300_s19   ;;  %s1774_s18 = sphi %s1848_s18, %s2299_s18  }
   0xa   : > { %p25_p0 = scmp.ge.s32.totalorder %s24_s30, 16  ;;  %s27_s6 = sadd.s32 1, %s1810_s27 }
   0xb   : > { %s34_s7 = sadd.s32 1, %s1794_s23  ;;  %p41_p1 = scmp.ne.s32.totalorder %s1794_s23, %s1790_s22 }
   0xc   : > { %s2310_s30 = smov (%p25_p0, %s24_s30), 0  ;;  %s2312_s6 = smov (!%p25_p0, %s27_s6), %s1810_s27 }
   0xd   : > { %2288 = sst [smem:[#allocation5_spill]] %s2310_s30  ;;  %s31_s8 = ssub.s32 %s1806_s26, %s2310_s30 }
   0xe   : > { %p42_p2 = scmp.eq.s32.totalorder %s1814_s28, 0  ;;  %p29_p3 = scmp.ge.s32.totalorder %s2312_s6, 4 }
   0xf   : > { %p32_p4 = scmp.eq.s32.totalorder %s31_s8, 0  ;;  %s62_s10 = sadd.s32 1, %s1786_s21 }
  0x10   : > { %p1915_p5 = por %p42_p2, %p41_p1  ;;  %s2314_s6 = smov (%p29_p3, %s2312_s6), 0 }
  0x11   : > { %2290 = sst [smem:[#allocation6_spill]] %s2314_s6  ;;  %s58_s12 = ssub.s32 %s1810_s27, %s2314_s6 }
  0x12   : > { %s1923_s11 = scalar_select %p32_p4, %s1794_s23, %s34_s7  }
  0x13   : > { %p69_p6 = scmp.ne.s32.totalorder %s1786_s21, %s1782_s20  ;;  %s59_s13 = sor.u32 %s58_s12, %s31_s8 }
  0x14   : > { %2291 = sst [smem:[#allocation7_spill]] %s1923_s11  ;;  %p164_p7 = scmp.eq.s32.totalorder %s58_s12, 0 }
  0x15   : > { %p60_p8 = scmp.eq.s32.totalorder %s59_s13, 0  ;;  %p1929_p9 = por %p69_p6, %p42_p2 }
  0x16   : > { %s166_s15 = sadd.s32 1, %s1778_s19  ;;  %p176_p10 = scmp.ne.s32.totalorder %s1778_s19, %s1774_s18 }
  0x17   : > { %s1937_s16 = scalar_select %p60_p8, %s1786_s21, %s62_s10  }
  0x18   : > { %s1940_s17 = scalar_select %p164_p7, %s1778_s19, %s166_s15  }
  0x19   : > { %p177_p11 = scmp.eq.s32.totalorder %s1430_s29, 63  ;;  %p1433_p13 = scmp.ge.s32.totalorder %s1814_s28, 64 }
  0x1b   : > { %p1942_p12 = por %p177_p11, %p176_p10  ;;  %199 = sbr.rel (%p1433_p13) target bundleno = 120 (0x78), region = 16 }
  0x22   : > { %202 = sbr.rel (!%p1915_p5) target bundleno = 46 (0x2e), region = 20  ;;  %s204_s7 = sand.u32 (%p1915_p5), 1, %s1794_s23  }
  0x23   : > { %s1525_s8 = sshll.u32 (%p1915_p5), %s1806_s26, 4  ;;  %s1434_s12 = sshll.u32 (%p1915_p5), %s204_s7, 5 }
  0x24   : > { %s2294_s0 = sld [smem:[#allocation8_spill]] (%p1915_p5)  ;;  %s206_s29 = scalar_lea.vmem (%p1915_p5), [#allocation2], %s1434_s12 }
  0x2a   : > { %s209_s15 = scalar_lea.vmem %s2294_s0, %s1525_s8 }
  0x2b   : > { %v222_v0 = vld [vmem:[%s209_s15] sm:$0xff]  ;;  %v224_v1 = vld [vmem:[%s209_s15 + $0x8] sm:$0xff] }
  0x2c   : > { %v226_v2 = vld [vmem:[%s209_s15 + $0x100] sm:$0xff]  ;;  %223 = vst [vmem:[%s206_s29] sm:$0xff] %v222_v0  ;;  %225 = vst [vmem:[%s206_s29 + $0x8] sm:$0xff] %v224_v1  ;;  %v228_v3 = vld [vmem:[%s209_s15 + $0x108] sm:$0xff] }
  0x2d   : > { %227 = vst [vmem:[%s206_s29 + $0x10] sm:$0xff] %v226_v2  ;;  %229 = vst [vmem:[%s206_s29 + $0x18] sm:$0xff] %v228_v3 }
  0x2e PF: > { %235 = sbr.rel (!%p1929_p9) target bundleno = 120 (0x78), region = 43  ;;  %s237_s9 = sand.u32 (%p1929_p9), 1, %s1786_s21  }
  0x2f   : > { %s1439_s7 = sshll.u32 (%p1929_p9), %s1810_s27, 1  ;;  %s1437_s10 = sshll.u32 (%p1929_p9), %s237_s9, 9 }
  0x30   : > { %s1526_s8 = sshll.u32 (%p1929_p9), %s1806_s26, 9  ;;  %s2295_s1 = sld [smem:[#allocation9_spill]] (%p1929_p9) }
  0x31   : > { %s243_s13 = sadd.s32 (%p1929_p9), %s1526_s8, %s1439_s7  ;;  %s1967_s14 = scalar_lea.vmem (%p1929_p9), [#allocation3], %s1437_s10 }
  0x32   : > { %s1441_s0 = sshll.u32 (%p1929_p9), %s243_s13, 2 }
  0x36   : > { %s1962_s11 = scalar_lea.vmem %s2295_s1, %s1441_s0 }
  0x37   : > { %v399_v4 = vld [vmem:[%s1962_s11] sm:$0xff] }
  0x38   : > { %v401_v5 = vld [vmem:[%s1962_s11 + $0x20] sm:$0xff]  ;;  %400 = vst [vmem:[%s1967_s14] sm:$0xff] %v399_v4 }
  0x39   : > { %v403_v6 = vld [vmem:[%s1962_s11 + $0x40] sm:$0xff]  ;;  %402 = vst [vmem:[%s1967_s14 + $0x8] sm:$0xff] %v401_v5 }
  0x3a   : > { %404 = vst [vmem:[%s1967_s14 + $0x10] sm:$0xff] %v403_v6  ;;  %v405_v7 = vld [vmem:[%s1962_s11 + $0x60] sm:$0xff] }
  0x3b   : > { %v407_v8 = vld [vmem:[%s1962_s11 + $0x80] sm:$0xff]  ;;  %406 = vst [vmem:[%s1967_s14 + $0x18] sm:$0xff] %v405_v7 }
  0x3c   : > { %v409_v9 = vld [vmem:[%s1962_s11 + $0xa0] sm:$0xff]  ;;  %408 = vst [vmem:[%s1967_s14 + $0x20] sm:$0xff] %v407_v8 }
  0x3d   : > { %410 = vst [vmem:[%s1967_s14 + $0x28] sm:$0xff] %v409_v9  ;;  %v411_v10 = vld [vmem:[%s1962_s11 + $0xc0] sm:$0xff] }
  0x3e   : > { %v413_v11 = vld [vmem:[%s1962_s11 + $0xe0] sm:$0xff]  ;;  %412 = vst [vmem:[%s1967_s14 + $0x30] sm:$0xff] %v411_v10 }
  0x3f   : > { %v415_v12 = vld [vmem:[%s1962_s11 + $0x100] sm:$0xff]  ;;  %414 = vst [vmem:[%s1967_s14 + $0x38] sm:$0xff] %v413_v11 }
  0x40   : > { %416 = vst [vmem:[%s1967_s14 + $0x40] sm:$0xff] %v415_v12  ;;  %v417_v13 = vld [vmem:[%s1962_s11 + $0x120] sm:$0xff] }
  0x41   : > { %v419_v14 = vld [vmem:[%s1962_s11 + $0x140] sm:$0xff]  ;;  %418 = vst [vmem:[%s1967_s14 + $0x48] sm:$0xff] %v417_v13 }
  0x42   : > { %v421_v15 = vld [vmem:[%s1962_s11 + $0x160] sm:$0xff]  ;;  %420 = vst [vmem:[%s1967_s14 + $0x50] sm:$0xff] %v419_v14 }
  0x43   : > { %422 = vst [vmem:[%s1967_s14 + $0x58] sm:$0xff] %v421_v15  ;;  %v423_v16 = vld [vmem:[%s1962_s11 + $0x180] sm:$0xff] }
  0x44   : > { %v425_v17 = vld [vmem:[%s1962_s11 + $0x1a0] sm:$0xff]  ;;  %424 = vst [vmem:[%s1967_s14 + $0x60] sm:$0xff] %v423_v16 }
  0x45   : > { %v427_v18 = vld [vmem:[%s1962_s11 + $0x1c0] sm:$0xff]  ;;  %426 = vst [vmem:[%s1967_s14 + $0x68] sm:$0xff] %v425_v17 }
  0x46   : > { %428 = vst [vmem:[%s1967_s14 + $0x70] sm:$0xff] %v427_v18  ;;  %v429_v19 = vld [vmem:[%s1962_s11 + $0x1e0] sm:$0xff] }
  0x47   : > { %v431_v20 = vld [vmem:[%s1962_s11 + $0x200] sm:$0xff]  ;;  %430 = vst [vmem:[%s1967_s14 + $0x78] sm:$0xff] %v429_v19 }
  0x48   : > { %v433_v21 = vld [vmem:[%s1962_s11 + $0x220] sm:$0xff]  ;;  %432 = vst [vmem:[%s1967_s14 + $0x80] sm:$0xff] %v431_v20 }
  0x49   : > { %434 = vst [vmem:[%s1967_s14 + $0x88] sm:$0xff] %v433_v21  ;;  %v435_v22 = vld [vmem:[%s1962_s11 + $0x240] sm:$0xff] }
  0x4a   : > { %v437_v23 = vld [vmem:[%s1962_s11 + $0x260] sm:$0xff]  ;;  %436 = vst [vmem:[%s1967_s14 + $0x90] sm:$0xff] %v435_v22 }
  0x4b   : > { %v439_v24 = vld [vmem:[%s1962_s11 + $0x280] sm:$0xff]  ;;  %438 = vst [vmem:[%s1967_s14 + $0x98] sm:$0xff] %v437_v23 }
  0x4c   : > { %440 = vst [vmem:[%s1967_s14 + $0xa0] sm:$0xff] %v439_v24  ;;  %v441_v25 = vld [vmem:[%s1962_s11 + $0x2a0] sm:$0xff] }
  0x4d   : > { %v443_v26 = vld [vmem:[%s1962_s11 + $0x2c0] sm:$0xff]  ;;  %442 = vst [vmem:[%s1967_s14 + $0xa8] sm:$0xff] %v441_v25 }
  0x4e   : > { %v445_v27 = vld [vmem:[%s1962_s11 + $0x2e0] sm:$0xff]  ;;  %444 = vst [vmem:[%s1967_s14 + $0xb0] sm:$0xff] %v443_v26 }
  0x4f   : > { %446 = vst [vmem:[%s1967_s14 + $0xb8] sm:$0xff] %v445_v27  ;;  %v447_v28 = vld [vmem:[%s1962_s11 + $0x300] sm:$0xff] }
  0x50   : > { %v449_v29 = vld [vmem:[%s1962_s11 + $0x320] sm:$0xff]  ;;  %448 = vst [vmem:[%s1967_s14 + $0xc0] sm:$0xff] %v447_v28 }
  0x51   : > { %v451_v30 = vld [vmem:[%s1962_s11 + $0x340] sm:$0xff]  ;;  %450 = vst [vmem:[%s1967_s14 + $0xc8] sm:$0xff] %v449_v29 }
  0x52   : > { %452 = vst [vmem:[%s1967_s14 + $0xd0] sm:$0xff] %v451_v30  ;;  %v453_v31 = vld [vmem:[%s1962_s11 + $0x360] sm:$0xff] }
  0x53   : > { %v455_v32 = vld [vmem:[%s1962_s11 + $0x380] sm:$0xff]  ;;  %454 = vst [vmem:[%s1967_s14 + $0xd8] sm:$0xff] %v453_v31 }
  0x54   : > { %v457_v33 = vld [vmem:[%s1962_s11 + $0x3a0] sm:$0xff]  ;;  %456 = vst [vmem:[%s1967_s14 + $0xe0] sm:$0xff] %v455_v32 }
  0x55   : > { %458 = vst [vmem:[%s1967_s14 + $0xe8] sm:$0xff] %v457_v33  ;;  %v459_v34 = vld [vmem:[%s1962_s11 + $0x3c0] sm:$0xff] }
  0x56   : > { %v461_v35 = vld [vmem:[%s1962_s11 + $0x3e0] sm:$0xff]  ;;  %460 = vst [vmem:[%s1967_s14 + $0xf0] sm:$0xff] %v459_v34 }
  0x57   : > { %v463_v36 = vld [vmem:[%s1962_s11 + $0x400] sm:$0xff]  ;;  %462 = vst [vmem:[%s1967_s14 + $0xf8] sm:$0xff] %v461_v35 }
  0x58   : > { %464 = vst [vmem:[%s1967_s14 + $0x100] sm:$0xff] %v463_v36  ;;  %v465_v37 = vld [vmem:[%s1962_s11 + $0x420] sm:$0xff] }
  0x59   : > { %v467_v38 = vld [vmem:[%s1962_s11 + $0x440] sm:$0xff]  ;;  %466 = vst [vmem:[%s1967_s14 + $0x108] sm:$0xff] %v465_v37 }
  0x5a   : > { %v469_v39 = vld [vmem:[%s1962_s11 + $0x460] sm:$0xff]  ;;  %468 = vst [vmem:[%s1967_s14 + $0x110] sm:$0xff] %v467_v38 }
  0x5b   : > { %470 = vst [vmem:[%s1967_s14 + $0x118] sm:$0xff] %v469_v39  ;;  %v471_v40 = vld [vmem:[%s1962_s11 + $0x480] sm:$0xff] }
  0x5c   : > { %v473_v41 = vld [vmem:[%s1962_s11 + $0x4a0] sm:$0xff]  ;;  %472 = vst [vmem:[%s1967_s14 + $0x120] sm:$0xff] %v471_v40 }
  0x5d   : > { %v475_v42 = vld [vmem:[%s1962_s11 + $0x4c0] sm:$0xff]  ;;  %474 = vst [vmem:[%s1967_s14 + $0x128] sm:$0xff] %v473_v41 }
  0x5e   : > { %476 = vst [vmem:[%s1967_s14 + $0x130] sm:$0xff] %v475_v42  ;;  %v477_v43 = vld [vmem:[%s1962_s11 + $0x4e0] sm:$0xff] }
  0x5f   : > { %v479_v44 = vld [vmem:[%s1962_s11 + $0x500] sm:$0xff]  ;;  %478 = vst [vmem:[%s1967_s14 + $0x138] sm:$0xff] %v477_v43 }
  0x60   : > { %v481_v45 = vld [vmem:[%s1962_s11 + $0x520] sm:$0xff]  ;;  %480 = vst [vmem:[%s1967_s14 + $0x140] sm:$0xff] %v479_v44 }
  0x61   : > { %482 = vst [vmem:[%s1967_s14 + $0x148] sm:$0xff] %v481_v45  ;;  %v483_v46 = vld [vmem:[%s1962_s11 + $0x540] sm:$0xff] }
  0x62   : > { %v485_v47 = vld [vmem:[%s1962_s11 + $0x560] sm:$0xff]  ;;  %484 = vst [vmem:[%s1967_s14 + $0x150] sm:$0xff] %v483_v46 }
  0x63   : > { %v487_v48 = vld [vmem:[%s1962_s11 + $0x580] sm:$0xff]  ;;  %486 = vst [vmem:[%s1967_s14 + $0x158] sm:$0xff] %v485_v47 }
  0x64   : > { %488 = vst [vmem:[%s1967_s14 + $0x160] sm:$0xff] %v487_v48  ;;  %v489_v49 = vld [vmem:[%s1962_s11 + $0x5a0] sm:$0xff] }
  0x65   : > { %v491_v50 = vld [vmem:[%s1962_s11 + $0x5c0] sm:$0xff]  ;;  %490 = vst [vmem:[%s1967_s14 + $0x168] sm:$0xff] %v489_v49 }
  0x66   : > { %v493_v51 = vld [vmem:[%s1962_s11 + $0x5e0] sm:$0xff]  ;;  %492 = vst [vmem:[%s1967_s14 + $0x170] sm:$0xff] %v491_v50 }
  0x67   : > { %494 = vst [vmem:[%s1967_s14 + $0x178] sm:$0xff] %v493_v51  ;;  %v495_v52 = vld [vmem:[%s1962_s11 + $0x600] sm:$0xff] }
  0x68   : > { %v497_v53 = vld [vmem:[%s1962_s11 + $0x620] sm:$0xff]  ;;  %496 = vst [vmem:[%s1967_s14 + $0x180] sm:$0xff] %v495_v52 }
  0x69   : > { %v499_v54 = vld [vmem:[%s1962_s11 + $0x640] sm:$0xff]  ;;  %498 = vst [vmem:[%s1967_s14 + $0x188] sm:$0xff] %v497_v53 }
  0x6a   : > { %500 = vst [vmem:[%s1967_s14 + $0x190] sm:$0xff] %v499_v54  ;;  %v501_v55 = vld [vmem:[%s1962_s11 + $0x660] sm:$0xff] }
  0x6b   : > { %v503_v56 = vld [vmem:[%s1962_s11 + $0x680] sm:$0xff]  ;;  %502 = vst [vmem:[%s1967_s14 + $0x198] sm:$0xff] %v501_v55 }
  0x6c   : > { %v505_v57 = vld [vmem:[%s1962_s11 + $0x6a0] sm:$0xff]  ;;  %504 = vst [vmem:[%s1967_s14 + $0x1a0] sm:$0xff] %v503_v56 }
  0x6d   : > { %506 = vst [vmem:[%s1967_s14 + $0x1a8] sm:$0xff] %v505_v57  ;;  %v507_v58 = vld [vmem:[%s1962_s11 + $0x6c0] sm:$0xff] }
  0x6e   : > { %v509_v59 = vld [vmem:[%s1962_s11 + $0x6e0] sm:$0xff]  ;;  %508 = vst [vmem:[%s1967_s14 + $0x1b0] sm:$0xff] %v507_v58 }
  0x6f   : > { %v511_v60 = vld [vmem:[%s1962_s11 + $0x700] sm:$0xff]  ;;  %510 = vst [vmem:[%s1967_s14 + $0x1b8] sm:$0xff] %v509_v59 }
  0x70   : > { %512 = vst [vmem:[%s1967_s14 + $0x1c0] sm:$0xff] %v511_v60  ;;  %v513_v61 = vld [vmem:[%s1962_s11 + $0x720] sm:$0xff] }
  0x71   : > { %v515_v62 = vld [vmem:[%s1962_s11 + $0x740] sm:$0xff]  ;;  %514 = vst [vmem:[%s1967_s14 + $0x1c8] sm:$0xff] %v513_v61 }
  0x72   : > { %v517_v63 = vld [vmem:[%s1962_s11 + $0x760] sm:$0xff]  ;;  %516 = vst [vmem:[%s1967_s14 + $0x1d0] sm:$0xff] %v515_v62 }
  0x73   : > { %518 = vst [vmem:[%s1967_s14 + $0x1d8] sm:$0xff] %v517_v63  ;;  %v519_v0 = vld [vmem:[%s1962_s11 + $0x780] sm:$0xff] }
  0x74   : > { %v521_v1 = vld [vmem:[%s1962_s11 + $0x7a0] sm:$0xff]  ;;  %520 = vst [vmem:[%s1967_s14 + $0x1e0] sm:$0xff] %v519_v0 }
  0x75   : > { %v523_v2 = vld [vmem:[%s1962_s11 + $0x7c0] sm:$0xff]  ;;  %522 = vst [vmem:[%s1967_s14 + $0x1e8] sm:$0xff] %v521_v1 }
  0x76   : > { %524 = vst [vmem:[%s1967_s14 + $0x1f0] sm:$0xff] %v523_v2  ;;  %v525_v3 = vld [vmem:[%s1962_s11 + $0x7e0] sm:$0xff] }
  0x77   : > { %526 = vst [vmem:[%s1967_s14 + $0x1f8] sm:$0xff] %v525_v3 }
  0x78 PF: > { %p1442_p0 = scmp.ge.s32.totalorder %s1814_s28, 1  ;;  %p555_p1 = scmp.lt.s32.totalorder %s1814_s28, 65 }
  0x7a   : > { %p556_p2 = pnand %p1442_p0, %p555_p1 }
  0x7b   : > { %s562_s0 = sand.u32 (!%p556_p2), 1, %s1790_s22   ;;  %s569_s6 = sand.u32 (!%p556_p2), 1, %s1782_s20  }
  0x7c   : > { %559 = sbr.rel (%p556_p2) target bundleno = 504 (0x1f8), region = 93  ;;  %s1443_s15 = sshll.u32 (!%p556_p2), %s562_s0, 5 }
  0x7d   : > { %s1444_s29 = sshll.u32 (!%p556_p2), %s569_s6, 9  ;;  %s608_s9 = sand.u32 (!%p556_p2), 1, %s1774_s18  }
  0x7e   : > { %s1446_s7 = sshll.u32 (!%p556_p2), %s1802_s25, 1  ;;  %s1445_s11 = sshll.u32 (!%p556_p2), %s608_s9, 5 }
  0x7f   : > { %p615_p3 = scmp.lt.s32.totalorder (!%p556_p2), %s1446_s7, 7  ;;  %s2114_s6 = scalar_lea.vmem (!%p556_p2), [#allocation2], %s1443_s15 }
  0x80   : > { %s2116_s9 = scalar_lea.vmem (!%p556_p2), [#allocation3], %s1444_s29  ;;  %s2118_s1 = scalar_lea.vmem (!%p556_p2), [#allocation4], %s1445_s11 }
  0x81   : > { %p1449_p4 = scmp.ne.s32.totalorder (!%p556_p2), %s1798_s24, 0 }
  0x83   : > { %s2316_s7 = smov (!%p615_p3, %s1446_s7), 7  ;;  %633 = sbr.rel (%p1449_p4) target bundleno = 138 (0x8a), region = 105 }
  0x84   : > { %s617_s13 = scalar_lea.vmem %s2280_s2, %s2316_s7  ;;  %s622_s22 = scalar_lea.vmem %s2281_s3, %s2316_s7  ;;  %v1816_v4 = vmov (!%p1449_p4), 0.0  }
  0x85   : > { %s627_s18 = scalar_lea.vmem %s2282_s4, %s2316_s7  ;;  %634 = vst [vmem:[%s2118_s1] sm:$0xff] (!%p1449_p4), %v1816_v4  ;;  %635 = vst [vmem:[%s2118_s1 + $0x8] sm:$0xff] (!%p1449_p4), %v1816_v4 }
  0x86   : > { %636 = vst [vmem:[%s2118_s1 + $0x10] sm:$0xff] (!%p1449_p4), %v1816_v4  ;;  %637 = vst [vmem:[%s2118_s1 + $0x18] sm:$0xff] (!%p1449_p4), %v1816_v4 }
  0x8a PF: > { %v1622_v5 = vld [vmem:[%s2116_s9 + $0x4] ss:$8 sps:$4 sm:$0xff]   ;;  %v1626_v7 = vld [vmem:[%s2116_s9] ss:$8 sps:$4 sm:$0xff]   ;;  %v1628_v9 = vld [vmem:[%s2116_s9 + $0x14] ss:$8 sps:$4 sm:$0xff]  }
  0x8b   : > { %v1624_v6 = vld [vmem:[%s2116_s9 + $0x104] ss:$8 sps:$4 sm:$0xff]   ;;  %1050 = vmatprep.subr.bf16.mxu1 %v1622_v5  ;;  %v1627_v8 = vld [vmem:[%s2116_s9 + $0x100] ss:$8 sps:$4 sm:$0xff]   ;;  %v1630_v10 = vld [vmem:[%s2116_s9 + $0x114] ss:$8 sps:$4 sm:$0xff]  }
  0x8c   : > { %1093 = vmatprep.subr.bf16.mxu0 %v1624_v6  ;;  %1051 = vmatpush1.bf16.msra.mxu1 %v1626_v7  ;;  %v1632_v11 = vld [vmem:[%s2116_s9 + $0x10] ss:$8 sps:$4 sm:$0xff]   ;;  %v1634_v13 = vld [vmem:[%s2116_s9 + $0x24] ss:$8 sps:$4 sm:$0xff]   ;;  %v1638_v15 = vld [vmem:[%s2116_s9 + $0x20] ss:$8 sps:$4 sm:$0xff]  }
  0x8d   : > { %1094 = vmatpush1.bf16.msra.mxu0 %v1627_v8  ;;  %1052 = vmatprep.subr.bf16.mxu1 %v1628_v9  ;;  %v1633_v12 = vld [vmem:[%s2116_s9 + $0x110] ss:$8 sps:$4 sm:$0xff]   ;;  %v1636_v14 = vld [vmem:[%s2116_s9 + $0x124] ss:$8 sps:$4 sm:$0xff]   ;;  %v1639_v16 = vld [vmem:[%s2116_s9 + $0x120] ss:$8 sps:$4 sm:$0xff]  }
  0x8e   : > { %1095 = vmatprep.subr.bf16.mxu0 %v1630_v10  ;;  %v1640_v17 = vld [vmem:[%s2116_s9 + $0x34] ss:$8 sps:$4 sm:$0xff]   ;;  %v1644_v19 = vld [vmem:[%s2116_s9 + $0x30] ss:$8 sps:$4 sm:$0xff]   ;;  %v1646_v21 = vld [vmem:[%s2116_s9 + $0x44] ss:$8 sps:$4 sm:$0xff]  }
  0x8f   : > { %v1642_v18 = vld [vmem:[%s2116_s9 + $0x134] ss:$8 sps:$4 sm:$0xff]   ;;  %v1645_v20 = vld [vmem:[%s2116_s9 + $0x130] ss:$8 sps:$4 sm:$0xff]   ;;  %v1648_v22 = vld [vmem:[%s2116_s9 + $0x144] ss:$8 sps:$4 sm:$0xff]  }
  0x90   : > { %1053 = vmatpush1.bf16.msra.mxu1 %v1632_v11  ;;  %v1650_v23 = vld [vmem:[%s2116_s9 + $0x40] ss:$8 sps:$4 sm:$0xff]   ;;  %v1652_v25 = vld [vmem:[%s2116_s9 + $0x54] ss:$8 sps:$4 sm:$0xff]   ;;  %v1656_v27 = vld [vmem:[%s2116_s9 + $0x50] ss:$8 sps:$4 sm:$0xff]  }
  0x91   : > { %1096 = vmatpush1.bf16.msra.mxu0 %v1633_v12  ;;  %1054 = vmatprep.subr.bf16.mxu1 %v1634_v13  ;;  %v1651_v24 = vld [vmem:[%s2116_s9 + $0x140] ss:$8 sps:$4 sm:$0xff]   ;;  %v1654_v26 = vld [vmem:[%s2116_s9 + $0x154] ss:$8 sps:$4 sm:$0xff]   ;;  %v1657_v28 = vld [vmem:[%s2116_s9 + $0x150] ss:$8 sps:$4 sm:$0xff]  }
  0x92   : > { %1097 = vmatprep.subr.bf16.mxu0 %v1636_v14  ;;  %v1658_v29 = vld [vmem:[%s2116_s9 + $0x64] ss:$8 sps:$4 sm:$0xff]   ;;  %v1662_v31 = vld [vmem:[%s2116_s9 + $0x60] ss:$8 sps:$4 sm:$0xff]   ;;  %v1664_v33 = vld [vmem:[%s2116_s9 + $0x74] ss:$8 sps:$4 sm:$0xff]  }
  0x93   : > { %v1660_v30 = vld [vmem:[%s2116_s9 + $0x164] ss:$8 sps:$4 sm:$0xff]   ;;  %v1663_v32 = vld [vmem:[%s2116_s9 + $0x160] ss:$8 sps:$4 sm:$0xff]   ;;  %v1666_v34 = vld [vmem:[%s2116_s9 + $0x174] ss:$8 sps:$4 sm:$0xff]  }
  0x94   : > { %1055 = vmatpush1.bf16.msra.mxu1 %v1638_v15  ;;  %v1668_v35 = vld [vmem:[%s2116_s9 + $0x70] ss:$8 sps:$4 sm:$0xff]   ;;  %v1670_v37 = vld [vmem:[%s2116_s9 + $0x84] ss:$8 sps:$4 sm:$0xff]   ;;  %v1674_v39 = vld [vmem:[%s2116_s9 + $0x80] ss:$8 sps:$4 sm:$0xff]  }
  0x95   : > { %1098 = vmatpush1.bf16.msra.mxu0 %v1639_v16  ;;  %1056 = vmatprep.subr.bf16.mxu1 %v1640_v17  ;;  %v1669_v36 = vld [vmem:[%s2116_s9 + $0x170] ss:$8 sps:$4 sm:$0xff]   ;;  %v1672_v38 = vld [vmem:[%s2116_s9 + $0x184] ss:$8 sps:$4 sm:$0xff]   ;;  %v1675_v40 = vld [vmem:[%s2116_s9 + $0x180] ss:$8 sps:$4 sm:$0xff]  }
  0x96   : > { %1099 = vmatprep.subr.bf16.mxu0 %v1642_v18  ;;  %v1676_v41 = vld [vmem:[%s2116_s9 + $0x94] ss:$8 sps:$4 sm:$0xff]   ;;  %v1680_v43 = vld [vmem:[%s2116_s9 + $0x90] ss:$8 sps:$4 sm:$0xff]   ;;  %v1682_v45 = vld [vmem:[%s2116_s9 + $0xa4] ss:$8 sps:$4 sm:$0xff]  }
  0x97   : > { %v1678_v42 = vld [vmem:[%s2116_s9 + $0x194] ss:$8 sps:$4 sm:$0xff]   ;;  %v1681_v44 = vld [vmem:[%s2116_s9 + $0x190] ss:$8 sps:$4 sm:$0xff]   ;;  %v1684_v46 = vld [vmem:[%s2116_s9 + $0x1a4] ss:$8 sps:$4 sm:$0xff]  }
  0x98   : > { %1057 = vmatpush1.bf16.msra.mxu1 %v1644_v19  ;;  %v1686_v47 = vld [vmem:[%s2116_s9 + $0xa0] ss:$8 sps:$4 sm:$0xff]   ;;  %v1688_v49 = vld [vmem:[%s2116_s9 + $0xb4] ss:$8 sps:$4 sm:$0xff]   ;;  %v1692_v51 = vld [vmem:[%s2116_s9 + $0xb0] ss:$8 sps:$4 sm:$0xff]  }
  0x99   : > { %1100 = vmatpush1.bf16.msra.mxu0 %v1645_v20  ;;  %1058 = vmatprep.subr.bf16.mxu1 %v1646_v21  ;;  %v1687_v48 = vld [vmem:[%s2116_s9 + $0x1a0] ss:$8 sps:$4 sm:$0xff]   ;;  %v1690_v50 = vld [vmem:[%s2116_s9 + $0x1b4] ss:$8 sps:$4 sm:$0xff]   ;;  %v1693_v53 = vld [vmem:[%s2116_s9 + $0x1b0] ss:$8 sps:$4 sm:$0xff]  }
  0x9a   : > { %1101 = vmatprep.subr.bf16.mxu0 %v1648_v22  ;;  %v1720_v52 = vld [vmem:[%s2114_s6 + $0x4] ss:$16 sps:$4 sm:$0xff]   ;;  %v1723_v56 = vld [vmem:[%s2114_s6 + $0xc] ss:$16 sps:$4 sm:$0xff]   ;;  %v1698_v57 = vld [vmem:[%s2116_s9 + $0xc0] ss:$8 sps:$4 sm:$0xff]  }
  0x9b   : > { %v1694_v54 = vld [vmem:[%s2116_s9 + $0xc4] ss:$8 sps:$4 sm:$0xff]   ;;  %1082 = vmatprep.mubr.bf16.mxu1 %v1720_v52  ;;  %1125 = vmatprep.mubr.bf16.mxu0 %v1723_v56  ;;  %v1699_v58 = vld [vmem:[%s2116_s9 + $0x1c0] ss:$8 sps:$4 sm:$0xff]   ;;  %v1700_v59 = vld [vmem:[%s2116_s9 + $0xd4] ss:$8 sps:$4 sm:$0xff]  }
  0x9c   : > { %1059 = vmatpush1.bf16.msra.mxu1 %v1650_v23  ;;  %v1696_v55 = vld [vmem:[%s2116_s9 + $0x1c4] ss:$8 sps:$4 sm:$0xff]   ;;  %v1702_v60 = vld [vmem:[%s2116_s9 + $0x1d4] ss:$8 sps:$4 sm:$0xff]   ;;  %v1704_v61 = vld [vmem:[%s2116_s9 + $0xd0] ss:$8 sps:$4 sm:$0xff]  }
  0x9d   : > { %1102 = vmatpush1.bf16.msra.mxu0 %v1651_v24  ;;  %1060 = vmatprep.subr.bf16.mxu1 %v1652_v25  ;;  %v1705_v62 = vld [vmem:[%s2116_s9 + $0x1d0] ss:$8 sps:$4 sm:$0xff]   ;;  %v1706_v63 = vld [vmem:[%s2116_s9 + $0xe4] ss:$8 sps:$4 sm:$0xff]   ;;  %v1710_v1 = vld [vmem:[%s2116_s9 + $0xe0] ss:$8 sps:$4 sm:$0xff]  }
  0x9e   : > { %1103 = vmatprep.subr.bf16.mxu0 %v1654_v26  ;;  %v1708_v0 = vld [vmem:[%s2116_s9 + $0x1e4] ss:$8 sps:$4 sm:$0xff]   ;;  %v1711_v2 = vld [vmem:[%s2116_s9 + $0x1e0] ss:$8 sps:$4 sm:$0xff]   ;;  %v1712_v3 = vld [vmem:[%s2116_s9 + $0xf4] ss:$8 sps:$4 sm:$0xff]  }
  0x9f   : > { %v1714_v4 = vld [vmem:[%s2116_s9 + $0x1f4] ss:$8 sps:$4 sm:$0xff]   ;;  %v1716_v5 = vld [vmem:[%s2116_s9 + $0xf0] ss:$8 sps:$4 sm:$0xff]   ;;  %v638_v10 = vld [vmem:[%s2118_s1] sm:$0xff]  ;;  %p1518_p5 = scmp.ne.s32.totalorder %s1798_s24, 15 }
  0xa0   : > { %1061 = vmatpush1.bf16.msra.mxu1 %v1656_v27  ;;  %v1717_v6 = vld [vmem:[%s2116_s9 + $0x1f0] ss:$8 sps:$4 sm:$0xff]   ;;  %v639_v14 = vld [vmem:[%s2118_s1 + $0x8] sm:$0xff] }
  0xa1   : > { %1104 = vmatpush1.bf16.msra.mxu0 %v1657_v28  ;;  %1062 = vmatprep.subr.bf16.mxu1 %v1658_v29  ;;  %v1718_v7 = vld [vmem:[%s2114_s6] ss:$16 sps:$4 sm:$0xff]   ;;  %v1721_v8 = vld [vmem:[%s2114_s6 + $0x8] ss:$16 sps:$4 sm:$0xff]   ;;  %v1154_v29 = vlaneseq (!%p1518_p5) }
  0xa2   : > { %1105 = vmatprep.subr.bf16.mxu0 %v1660_v30  ;;  %v640_v18 = vld [vmem:[%s2118_s1 + $0x10] sm:$0xff]  ;;  %v641_v23 = vld [vmem:[%s2118_s1 + $0x18] sm:$0xff] }
  0xa3   : > { %v1155_v30 = vshrl.u32 (!%p1518_p5), %v1154_v29, 7 }
  0xa4   : > { %1063 = vmatpush1.bf16.msra.mxu1 %v1662_v31  ;;  %v1152_v31 = vld [vmem:[%s617_s13] sm:$0x3] (!%p1518_p5) }
  0xa5   : > { %1106 = vmatpush1.bf16.msra.mxu0 %v1663_v32  ;;  %1064 = vmatprep.subr.bf16.mxu1 %v1664_v33  ;;  %v2208_v33 = vsub.s32 (!%p1518_p5), 0, %v1155_v30  ;;  %vm1171_vm0 = vcmp.lt.s32.totalorder (!%p1518_p5), %v1155_v30, 2 }
  0xa6   : > { %1107 = vmatprep.subr.bf16.mxu0 %v1666_v34  ;;  %v2210_v34 = vsub.s32 (!%p1518_p5), 1, %v1155_v30 }
  0xa8   : > { %1065 = vmatpush1.bf16.msra.mxu1 %v1668_v35 }
  0xa9   : > { %1108 = vmatpush1.bf16.msra.mxu0 %v1669_v36  ;;  %1066 = vmatprep.subr.bf16.mxu1 %v1670_v37 }
  0xaa   : > { %1109 = vmatprep.subr.bf16.mxu0 %v1672_v38  ;;  %v1157_v38 = vrot.slane (!%p1518_p5), %v1152_v31, %v2208_v33 }
  0xac   : > { %1067 = vmatpush1.bf16.msra.mxu1 %v1674_v39  ;;  %v1161_v39 = vrot.slane (!%p1518_p5), %v1152_v31, %v2210_v34 }
  0xad   : > { %1110 = vmatpush1.bf16.msra.mxu0 %v1675_v40  ;;  %1068 = vmatprep.subr.bf16.mxu1 %v1676_v41  ;;  %v1817_v40 = vmov (!%p1518_p5), 0.0  }
  0xae   : > { %1111 = vmatprep.subr.bf16.mxu0 %v1678_v42  ;;  %v1519_v41 = vsel (!%p1518_p5), %vm1171_vm0, 1.0, %v1817_v40 }
  0xb0   : > { %1069 = vmatpush1.bf16.msra.mxu1 %v1680_v43 }
  0xb1   : > { %1112 = vmatpush1.bf16.msra.mxu0 %v1681_v44  ;;  %1070 = vmatprep.subr.bf16.mxu1 %v1682_v45 }
  0xb2   : > { %1113 = vmatprep.subr.bf16.mxu0 %v1684_v46 }
  0xb4   : > { %1071 = vmatpush1.bf16.msra.mxu1 %v1686_v47 }
  0xb5   : > { %1114 = vmatpush1.bf16.msra.mxu0 %v1687_v48  ;;  %1072 = vmatprep.subr.bf16.mxu1 %v1688_v49 }
  0xb6   : > { %1115 = vmatprep.subr.bf16.mxu0 %v1690_v50 }
  0xb8   : > { %1073 = vmatpush1.bf16.msra.mxu1 %v1692_v51 }
  0xb9   : > { %1116 = vmatpush1.bf16.msra.mxu0 %v1693_v53  ;;  %1074 = vmatprep.subr.bf16.mxu1 %v1694_v54 }
  0xba   : > { %1117 = vmatprep.subr.bf16.mxu0 %v1696_v55 }
  0xbc   : > { %1075 = vmatpush1.bf16.msra.mxu1 %v1698_v57 }
  0xbd   : > { %1118 = vmatpush1.bf16.msra.mxu0 %v1699_v58  ;;  %1076 = vmatprep.subr.bf16.mxu1 %v1700_v59 }
  0xbe   : > { %1119 = vmatprep.subr.bf16.mxu0 %v1702_v60 }
  0xc0   : > { %1077 = vmatpush1.bf16.msra.mxu1 %v1704_v61 }
  0xc1   : > { %1120 = vmatpush1.bf16.msra.mxu0 %v1705_v62  ;;  %1078 = vmatprep.subr.bf16.mxu1 %v1706_v63 }
  0xc2   : > { %1121 = vmatprep.subr.bf16.mxu0 %v1708_v0 }
  0xc4   : > { %1079 = vmatpush1.bf16.msra.mxu1 %v1710_v1 }
  0xc5   : > { %1122 = vmatpush1.bf16.msra.mxu0 %v1711_v2  ;;  %1080 = vmatprep.subr.bf16.mxu1 %v1712_v3 }
  0xc6   : > { %1123 = vmatprep.subr.bf16.mxu0 %v1714_v4 }
  0xc8   : > { %1081 = vmatpush1.bf16.msra.mxu1 %v1716_v5 }
  0xc9   : > { %1124 = vmatpush1.bf16.msra.mxu0 %v1717_v6 }
  0xcb   : > { %1083 = vmatmul.mubr.bf16.vlgmr.msra.gmra.mrb[0].mxu1 %v1718_v7 }
  0xcc   : > { %1126 = vmatmul.mubr.bf16.vlgmr.msra.gmra.mrb[0].mxu0 %v1721_v8 }
 0x19e   : > { %v1084_v9 = vpop.f32.mrb[0].mxu1 }
 0x19f   : > { %v1127_v11 = vpop.f32.mrb[0].mxu0  ;;  %v1086_v13 = vpop.f32.mrb[1].mxu1 }
 0x1a0   : > { %v1128_v12 = vadd.f32 %v1127_v11, %v1084_v9  ;;  %v1129_v15 = vpop.f32.mrb[1].mxu0  ;;  %v1088_v17 = vpop.f32.mrb[2].mxu1 }
 0x1a1   : > { %v1130_v16 = vadd.f32 %v1129_v15, %v1086_v13  ;;  %v1131_v19 = vpop.f32.mrb[2].mxu0  ;;  %v1090_v22 = vpop.f32.mrb[3].mxu1  ;;  %1147 = sbr.rel (%p1518_p5) target bundleno = 496 (0x1f0), region = 109 }
 0x1a2   : > { %v1136_v20 = vadd.f32 %v1128_v12, %v638_v10  ;;  %v1132_v21 = vadd.f32 %v1131_v19, %v1088_v17  ;;  %v1133_v24 = vpop.f32.mrb[3].mxu0 }
 0x1a3   : > { %v1137_v25 = vadd.f32 %v1130_v16, %v639_v14  ;;  %v1134_v26 = vadd.f32 %v1133_v24, %v1090_v22 }
 0x1a4   : > { %1140 = vst [vmem:[%s2118_s1] sm:$0xff] %v1136_v20  ;;  %v1138_v27 = vadd.f32 %v1132_v21, %v640_v18 }
 0x1a5   : > { %1141 = vst [vmem:[%s2118_s1 + $0x8] sm:$0xff] %v1137_v25  ;;  %v1139_v28 = vadd.f32 %v1134_v26, %v641_v23 }
 0x1a6   : > { %1142 = vst [vmem:[%s2118_s1 + $0x10] sm:$0xff] %v1138_v27 }
 0x1a7   : > { %1143 = vst [vmem:[%s2118_s1 + $0x18] sm:$0xff] %v1139_v28 }
 0x1ab   : > { %v1148_v32 = vld [vmem:[%s2118_s1] sm:$0xff] }
 0x1ac   : > { %v1149_v36 = vld [vmem:[%s2118_s1 + $0x8] sm:$0xff]  ;;  %v1164_v42 = vadd.f32 %v1157_v38, %v1148_v32  ;;  %v1233_v32 = vld [vmem:[%s622_s22] sm:$0x3] }
 0x1ad   : > { %v1150_v35 = vld [vmem:[%s2118_s1 + $0x10] sm:$0xff]  ;;  %v1165_v44 = vadd.f32 %v1161_v39, %v1149_v36  ;;  %v1238_v36 = vrot.slane %v1233_v32, %v2208_v33 }
 0x1ae   : > { %v1151_v37 = vld [vmem:[%s2118_s1 + $0x18] sm:$0xff]  ;;  %v1166_v43 = vadd.f32 %v1157_v38, %v1150_v35  ;;  %v1177_v46 = vmul.f32 %v1519_v41, %v1164_v42  ;;  %v1249_v35 = vld [vmem:[%s627_s18] sm:$0x3]  ;;  %v1242_v38 = vrot.slane %v1233_v32, %v2210_v34 }
 0x1af   : > { %v1167_v45 = vadd.f32 %v1161_v39, %v1151_v37  ;;  %v1178_v48 = vmul.f32 %v1519_v41, %v1165_v44 }
 0x1b0   : > { %v1179_v47 = vmul.f32 0.0, %v1166_v43 }
 0x1b1   : > { %v1180_v49 = vmul.f32 0.0, %v1167_v45 }
 0x1b2   : > { %v1181_v50 = vadd.f32 %v1179_v47, %v1177_v46 }
 0x1b3   : > { %v1188_v51 = vadd.f32 %v1180_v49, %v1178_v48 }
 0x1b4   : > { %v1182_v52 = vrot.slane %v1181_v50, 4 }
 0x1b5   : > { %v1189_v53 = vrot.slane %v1188_v51, 4 }
 0x1b6   : > { %v1183_v54 = vadd.f32 %v1182_v52, %v1181_v50 }
 0x1b7   : > { %v1190_v55 = vadd.f32 %v1189_v53, %v1188_v51 }
 0x1b8   : > { %v1184_v56 = vrot.slane %v1183_v54, 2 }
 0x1b9   : > { %v1191_v57 = vrot.slane %v1190_v55, 2 }
 0x1ba   : > { %v1185_v58 = vadd.f32 %v1184_v56, %v1183_v54 }
 0x1bb   : > { %v1192_v59 = vadd.f32 %v1191_v57, %v1190_v55 }
 0x1bc   : > { %v1186_v60 = vrot.slane %v1185_v58, 1 }
 0x1bd   : > { %v1193_v61 = vrot.slane %v1192_v59, 1 }
 0x1be   : > { %v1187_v62 = vadd.f32 %v1186_v60, %v1185_v58 }
 0x1bf   : > { %v1194_v63 = vadd.f32 %v1193_v61, %v1192_v59 }
 0x1c0   : > { %v1195_v0 = vmul.f32 0.5, %v1187_v62 }
 0x1c1   : > { %v1196_v1 = vmul.f32 0.5, %v1194_v63 }
 0x1c2   : > { %v1197_v2 = vsub.f32 %v1164_v42, %v1195_v0  ;;  %v1199_v3 = vsub.f32 %v1166_v43, %v1195_v0 }
 0x1c3   : > { %v1198_v4 = vsub.f32 %v1165_v44, %v1196_v1  ;;  %v1200_v5 = vsub.f32 %v1167_v45, %v1196_v1  ;;  %v1258_v44 = vrot.slane %v1249_v35, %v2210_v34 }
 0x1c4   : > { %v1201_v6 = vmul.f32 %v1519_v41, %v1197_v2  ;;  %v1203_v7 = vmul.f32 0.0, %v1199_v3 }
 0x1c5   : > { %v1202_v8 = vmul.f32 %v1519_v41, %v1198_v4  ;;  %v1204_v9 = vmul.f32 0.0, %v1200_v5  ;;  %v1254_v41 = vrot.slane %v1249_v35, %v2208_v33 }
 0x1c6   : > { %v1205_v10 = vmul.f32 %v1201_v6, %v1201_v6  ;;  %v1207_v11 = vmul.f32 %v1203_v7, %v1203_v7 }
 0x1c7   : > { %v1206_v12 = vmul.f32 %v1202_v8, %v1202_v8  ;;  %v1208_v13 = vmul.f32 %v1204_v9, %v1204_v9 }
 0x1c8   : > { %v1209_v14 = vadd.f32 %v1207_v11, %v1205_v10 }
 0x1c9   : > { %v1216_v15 = vadd.f32 %v1208_v13, %v1206_v12 }
 0x1ca   : > { %v1210_v16 = vrot.slane %v1209_v14, 4 }
 0x1cb   : > { %v1217_v17 = vrot.slane %v1216_v15, 4 }
 0x1cc   : > { %v1211_v18 = vadd.f32 %v1210_v16, %v1209_v14 }
 0x1cd   : > { %v1218_v19 = vadd.f32 %v1217_v17, %v1216_v15 }
 0x1ce   : > { %v1212_v20 = vrot.slane %v1211_v18, 2 }
 0x1cf   : > { %v1219_v21 = vrot.slane %v1218_v19, 2 }
 0x1d0   : > { %v1213_v22 = vadd.f32 %v1212_v20, %v1211_v18 }
 0x1d1   : > { %v1220_v23 = vadd.f32 %v1219_v21, %v1218_v19 }
 0x1d2   : > { %v1214_v24 = vrot.slane %v1213_v22, 1 }
 0x1d3   : > { %v1221_v25 = vrot.slane %v1220_v23, 1 }
 0x1d4   : > { %v1215_v26 = vadd.f32 %v1214_v24, %v1213_v22 }
 0x1d5   : > { %v1222_v27 = vadd.f32 %v1221_v25, %v1220_v23 }
 0x1d6   : > { %v1223_v28 = vmul.f32 0.5, %v1215_v26 }
 0x1d7   : > { %v1224_v29 = vmul.f32 0.5, %v1222_v27 }
 0x1d8   : > { %v1225_v30 = vadd.f32 1e-05, %v1223_v28 }
 0x1d9   : > { %v1226_v31 = vadd.f32 1e-05, %v1224_v29 }
 0x1da   : > { %1724 = vrsqrt.f32 %v1225_v30 }
 0x1db   : > { %1726 = vrsqrt.f32 %v1226_v31 }
 0x1e4   : > { %v1725_v37 = vpop.eup %1724 }
 0x1e5   : > { %v1727_v39 = vpop.eup %1726  ;;  %v1229_v40 = vmul.f32 %v1725_v37, %v1197_v2  ;;  %v1231_v42 = vmul.f32 %v1725_v37, %v1199_v3 }
 0x1e6   : > { %v1230_v43 = vmul.f32 %v1727_v39, %v1198_v4  ;;  %v1232_v45 = vmul.f32 %v1727_v39, %v1200_v5 }
 0x1e7   : > { %v1245_v46 = vmul.f32 %v1238_v36, %v1229_v40  ;;  %v1247_v47 = vmul.f32 %v1238_v36, %v1231_v42 }
 0x1e8   : > { %v1246_v48 = vmul.f32 %v1242_v38, %v1230_v43  ;;  %v1248_v49 = vmul.f32 %v1242_v38, %v1232_v45 }
 0x1e9   : > { %v1261_v50 = vadd.f32 %v1254_v41, %v1245_v46  ;;  %v1263_v51 = vadd.f32 %v1254_v41, %v1247_v47 }
 0x1ea   : > { %v1262_v52 = vadd.f32 %v1258_v44, %v1246_v48  ;;  %v1264_v53 = vadd.f32 %v1258_v44, %v1248_v49 }
 0x1eb   : > { %vm1265_vm1 = vcmp.ge.f32.partialorder %v1261_v50, 0.0  ;;  %v1269_v54 = vmul.f32 0.2, %v1261_v50  ;;  %vm1267_vm2 = vcmp.ge.f32.partialorder %v1263_v51, 0.0  ;;  %v1271_v33 = vmul.f32 0.2, %v1263_v51 }
 0x1ec   : > { %vm1266_vm3 = vcmp.ge.f32.partialorder %v1262_v52, 0.0  ;;  %v1270_v55 = vmul.f32 0.2, %v1262_v52  ;;  %vm1268_vm4 = vcmp.ge.f32.partialorder %v1264_v53, 0.0  ;;  %v1272_v34 = vmul.f32 0.2, %v1264_v53 }
 0x1ed   : > { %v1273_v56 = vsel %vm1265_vm1, %v1261_v50, %v1269_v54  ;;  %v1275_v57 = vsel %vm1267_vm2, %v1263_v51, %v1271_v33 }
 0x1ee   : > { %1277 = vst [vmem:[%s2118_s1] sm:$0xff] %v1273_v56  ;;  %v1274_v58 = vsel %vm1266_vm3, %v1262_v52, %v1270_v55  ;;  %1279 = vst [vmem:[%s2118_s1 + $0x10] sm:$0xff] %v1275_v57  ;;  %v1276_v59 = vsel %vm1268_vm4, %v1264_v53, %v1272_v34 }
 0x1ef   : > { %1278 = vst [vmem:[%s2118_s1 + $0x8] sm:$0xff] %v1274_v58  ;;  %1280 = vst [vmem:[%s2118_s1 + $0x18] sm:$0xff] %v1276_v59 }
 0x1f0 PF: > { %1287 = sbr.rel (!%p1942_p12) target bundleno = 504 (0x1f8), region = 113  ;;  %s1527_s7 = sshll.u32 (%p1942_p12), %s1802_s25, 4 }
 0x1f1   : > { %s1290_s14 = scalar_lea.vmem (%p1942_p12), %s2283_s5, %s1527_s7 }
 0x1f5   : > { %v1303_v60 = vld [vmem:[%s2118_s1] sm:$0xff] (%p1942_p12)  ;;  %v1307_v62 = vld [vmem:[%s2118_s1 + $0x10] sm:$0xff] (%p1942_p12) }
 0x1f6   : > { %v1305_v61 = vld [vmem:[%s2118_s1 + $0x8] sm:$0xff] (%p1942_p12)  ;;  %v1309_v63 = vld [vmem:[%s2118_s1 + $0x18] sm:$0xff] (%p1942_p12)  ;;  %1304 = vst [vmem:[%s1290_s14] sm:$0xff] (%p1942_p12), %v1303_v60  ;;  %1308 = vst [vmem:[%s1290_s14 + $0x40] sm:$0xff] (%p1942_p12), %v1307_v62 }
 0x1f7   : > { %1306 = vst [vmem:[%s1290_s14 + $0x8] sm:$0xff] %v1305_v61  ;;  %1310 = vst [vmem:[%s1290_s14 + $0x48] sm:$0xff] %v1309_v63 }
 0x1f8 PF: > { %s15_s28 = sadd.s32 1, %s1814_s28   ;;  %s2296_s25 = sld [smem:[#allocation7_spill]] }
 0x1f9   : > { %p12_p6 = scmp.ge.s32.totalorder %s15_s28, 66   ;;  %s2297_s30 = sld [smem:[#allocation5_spill]] }
 0x1fa   : > { %s2298_s0 = sld [smem:[#allocation6_spill]]  ;;  %s2299_s18 = smov %s1778_s19 }
 0x1fb   : > { %s2300_s19 = smov %s1940_s17  ;;  %s2301_s20 = smov %s1786_s21 }
 0x1fc   : > { %s2302_s21 = smov %s1937_s16  ;;  %s2303_s22 = smov %s1794_s23 }
 0x1fd   : > { %s2305_s24 = smov %s1806_s26  ;;  %14 = sbr.rel (!%p12_p6) target bundleno = 9 (0x9), region = 184 }
 0x1fe   : > { %s2304_s23 = smov %s2296_s25  ;;  %s2306_s25 = smov %s1810_s27 }
 0x1ff   : > { %s2307_s26 = smov %s2297_s30 }
 0x200   : > { %s2308_s27 = smov %s2298_s0 }

// kernel: encoder_conv_orig_forward.11
= control target key start
LH: loop header
LB: loop body
LE: loop exit
PB: predicated region body
PF: predicated region fallthrough
CT: control target
= control target key end

     0   :  { %s1095_s18 = smov 0   ;;  %s1097_s19 = smov 0   ;;  %s1235_s0 = inlined_call_operand.vmem [shape: bf16[16,1024], index: 0, kind: input, shape index: {}]   ;;  %s1236_s1 = inlined_call_operand.vmem [shape: bf16[1024,128], index: 1, kind: input, shape index: {}]   ;;  %s1237_s2 = inlined_call_operand.vmem [shape: f32[1,128], index: 2, kind: input, shape index: {}]   ;;  %s1238_s3 = inlined_call_operand.vmem [shape: f32[1,128], index: 3, kind: input, shape index: {}]   ;;  %s1239_s4 = inlined_call_operand.vmem [shape: f32[1,128], index: 4, kind: input, shape index: {}]   ;;  %s1240_s5 = inlined_call_operand.vmem [shape: f32[16,128], index: 5, kind: output, shape index: {}]  }
   0x1   :  { %s1099_s20 = smov 0   ;;  %s1101_s21 = smov 0  }
   0x2   :  { %s1103_s22 = smov 0  }
   0x3 LB: > { %s24_s3 = sadd.s32 1, %s1058_s21  ;;  %p41_p1 = scmp.ne.s32.totalorder %s1050_s19, %s1046_s18  ;;  %s1062_s22 = sphi %s1103_s22, %s15_s22   ;;  %s1058_s21 = sphi %s1101_s21, %s1244_s21   ;;  %s1054_s20 = sphi %s1099_s20, %s1243_s20   ;;  %s1050_s19 = sphi %s1097_s19, %s1242_s19   ;;  %s1046_s18 = sphi %s1095_s18, %s1241_s18  }
   0x4   : > { %p25_p0 = scmp.ge.s32.totalorder %s24_s3, 2  ;;  %p42_p2 = scmp.eq.s32.totalorder %s1062_s22, 0 }
   0x5   : > { %s34_s23 = sadd.s32 1, %s1050_s19  ;;  %p850_p5 = scmp.ge.s32.totalorder %s1062_s22, 2 }
   0x6   : > { %s1246_s3 = smov (%p25_p0, %s24_s3), 0  ;;  %p43_p3 = por %p42_p2, %p41_p1 }
   0x7   : > { %s31_s4 = ssub.s32 %s1058_s21, %s1246_s3  ;;  %217 = sbr.rel (%p850_p5) target bundleno = 21 (0x15), region = 28 }
   0x8   : > { %p32_p4 = scmp.eq.s32.totalorder %s31_s4, 0 }
   0xa   : > { %s1130_s24 = scalar_select %p32_p4, %s1050_s19, %s34_s23  }
   0xe   : > { %220 = sbr.rel (!%p43_p3) target bundleno = 21 (0x15), region = 32  ;;  %s222_s25 = sand.u32 (%p43_p3), 1, %s1050_s19  }
   0xf   : > { %s900_s26 = sshll.u32 (%p43_p3), %s1058_s21, 4  ;;  %s851_s27 = sshll.u32 (%p43_p3), %s222_s25, 5 }
  0x10   : > { %s227_s30 = scalar_lea.vmem (%p43_p3), %s1235_s0, %s900_s26  ;;  %s224_s6 = scalar_lea.vmem (%p43_p3), [#allocation2], %s851_s27 }
  0x11   : > { %v240_v0 = vld [vmem:[%s227_s30] sm:$0xff] (%p43_p3)  ;;  %v242_v1 = vld [vmem:[%s227_s30 + $0x8] sm:$0xff] (%p43_p3) }
  0x12   : > { %v244_v2 = vld [vmem:[%s227_s30 + $0x20] sm:$0xff] (%p43_p3)  ;;  %241 = vst [vmem:[%s224_s6] sm:$0xff] (%p43_p3), %v240_v0  ;;  %243 = vst [vmem:[%s224_s6 + $0x8] sm:$0xff] (%p43_p3), %v242_v1  ;;  %v246_v3 = vld [vmem:[%s227_s30 + $0x28] sm:$0xff] (%p43_p3) }
  0x13   : > { %245 = vst [vmem:[%s224_s6 + $0x10] sm:$0xff] (%p43_p3), %v244_v2  ;;  %247 = vst [vmem:[%s224_s6 + $0x18] sm:$0xff] (%p43_p3), %v246_v3 }
  0x15 PF: > { %p854_p6 = scmp.ge.s32.totalorder %s1062_s22, 1  ;;  %p264_p7 = scmp.lt.s32.totalorder %s1062_s22, 3 }
  0x17   : > { %p265_p8 = pnand %p854_p6, %p264_p7 }
  0x18   : > { %s271_s7 = sand.u32 (!%p265_p8), 1, %s1046_s18   ;;  %s856_s8 = sshll.u32 (!%p265_p8), %s1054_s20, 6 }
  0x19   : > { %268 = sbr.rel (%p265_p8) target bundleno = 306 (0x132), region = 59  ;;  %s855_s9 = sshll.u32 (!%p265_p8), %s271_s7, 5 }
  0x1a   : > { %p316_p9 = scmp.lt.s32.totalorder (!%p265_p8), %s856_s8, 127  ;;  %s1147_s14 = scalar_lea.vmem (!%p265_p8), [#allocation2], %s855_s9 }
  0x1b   : > { %p858_p10 = scmp.ne.s32.totalorder (!%p265_p8), %s1054_s20, 0 }
  0x20   : > { %s1248_s8 = smov (!%p316_p9, %s856_s8), 127  ;;  %341 = sbr.rel (%p858_p10) target bundleno = 39 (0x27), region = 67 }
  0x21   : > { %s857_s10 = sshll.u32 %s1248_s8, 2  ;;  %v1064_v4 = vmov (!%p858_p10), 0.0  }
  0x22   : > { %s1145_s13 = scalar_lea.vmem %s1236_s1, %s857_s10  ;;  %342 = vst [vmem:[%s1240_s5] sm:$0xff] (!%p858_p10), %v1064_v4  ;;  %343 = vst [vmem:[%s1240_s5 + $0x8] sm:$0xff] (!%p858_p10), %v1064_v4 }
  0x27 PF: > { %v986_v5 = vld [vmem:[%s1145_s13 + $0x40] sm:$0xff]   ;;  %v990_v9 = vld [vmem:[%s1145_s13 + $0x48] sm:$0xff]   ;;  %v994_v13 = vld [vmem:[%s1145_s13 + $0x50] sm:$0xff]   ;;  %p895_p11 = scmp.ne.s32.totalorder %s1054_s20, 1 }
  0x28   : > { %v987_v6 = vld [vmem:[%s1145_s13 + $0xc0] sm:$0xff]   ;;  %901 = vmatprep.subr.bf16.mxu0 %v986_v5  ;;  %v991_v10 = vld [vmem:[%s1145_s13 + $0xc8] sm:$0xff]   ;;  %v995_v14 = vld [vmem:[%s1145_s13 + $0xd0] sm:$0xff]  }
  0x29   : > { %v988_v7 = vld [vmem:[%s1145_s13] sm:$0xff]   ;;  %923 = vmatprep.subr.bf16.mxu1 %v987_v6  ;;  %v992_v11 = vld [vmem:[%s1145_s13 + $0x8] sm:$0xff]   ;;  %v996_v15 = vld [vmem:[%s1145_s13 + $0x10] sm:$0xff]  }
  0x2a   : > { %v989_v8 = vld [vmem:[%s1145_s13 + $0x80] sm:$0xff]   ;;  %902 = vmatpush3.bf16.msra.mxu0 %v988_v7  ;;  %v993_v12 = vld [vmem:[%s1145_s13 + $0x88] sm:$0xff]   ;;  %v997_v16 = vld [vmem:[%s1145_s13 + $0x90] sm:$0xff]  }
  0x2b   : > { %924 = vmatpush3.bf16.msra.mxu1 %v989_v8  ;;  %903 = vmatprep.subr.bf16.mxu0 %v990_v9  ;;  %v998_v17 = vld [vmem:[%s1145_s13 + $0x58] sm:$0xff]   ;;  %v1002_v21 = vld [vmem:[%s1145_s13 + $0x60] sm:$0xff]   ;;  %v1006_v25 = vld [vmem:[%s1145_s13 + $0x68] sm:$0xff]  }
  0x2c   : > { %925 = vmatprep.subr.bf16.mxu1 %v991_v10  ;;  %v999_v18 = vld [vmem:[%s1145_s13 + $0xd8] sm:$0xff]   ;;  %v1003_v22 = vld [vmem:[%s1145_s13 + $0xe0] sm:$0xff]   ;;  %v1007_v26 = vld [vmem:[%s1145_s13 + $0xe8] sm:$0xff]  }
  0x2d   : > { %v1000_v19 = vld [vmem:[%s1145_s13 + $0x18] sm:$0xff]   ;;  %v1004_v23 = vld [vmem:[%s1145_s13 + $0x20] sm:$0xff]   ;;  %v1008_v27 = vld [vmem:[%s1145_s13 + $0x28] sm:$0xff]  }
  0x2e   : > { %904 = vmatpush3.bf16.msra.mxu0 %v992_v11  ;;  %v1001_v20 = vld [vmem:[%s1145_s13 + $0x98] sm:$0xff]   ;;  %v1005_v24 = vld [vmem:[%s1145_s13 + $0xa0] sm:$0xff]   ;;  %v1009_v28 = vld [vmem:[%s1145_s13 + $0xa8] sm:$0xff]  }
  0x2f   : > { %926 = vmatpush3.bf16.msra.mxu1 %v993_v12  ;;  %905 = vmatprep.subr.bf16.mxu0 %v994_v13  ;;  %v1010_v29 = vld [vmem:[%s1145_s13 + $0x70] sm:$0xff]   ;;  %v1014_v33 = vld [vmem:[%s1145_s13 + $0x78] sm:$0xff]   ;;  %v344_v50 = vld [vmem:[%s1240_s5] sm:$0xff] }
  0x30   : > { %927 = vmatprep.subr.bf16.mxu1 %v995_v14  ;;  %v1011_v30 = vld [vmem:[%s1145_s13 + $0xf0] sm:$0xff]   ;;  %v1015_v34 = vld [vmem:[%s1145_s13 + $0xf8] sm:$0xff]   ;;  %v345_v55 = vld [vmem:[%s1240_s5 + $0x8] sm:$0xff] }
  0x31   : > { %v1012_v31 = vld [vmem:[%s1145_s13 + $0x30] sm:$0xff]   ;;  %v1016_v35 = vld [vmem:[%s1145_s13 + $0x38] sm:$0xff]   ;;  %v896_v60 = vld [vmem:[%s1237_s2] ss:$0 sm:$0xff] (!%p895_p11) }
  0x32   : > { %906 = vmatpush3.bf16.msra.mxu0 %v996_v15  ;;  %v1013_v32 = vld [vmem:[%s1145_s13 + $0xb0] sm:$0xff]   ;;  %v1017_v36 = vld [vmem:[%s1145_s13 + $0xb8] sm:$0xff]  }
  0x33   : > { %928 = vmatpush3.bf16.msra.mxu1 %v997_v16  ;;  %907 = vmatprep.subr.bf16.mxu0 %v998_v17  ;;  %v1018_v37 = vld [vmem:[%s1147_s14] ss:$16 sps:$4 sm:$0xff]   ;;  %v1020_v38 = vld [vmem:[%s1147_s14 + $0x4] ss:$16 sps:$4 sm:$0xff]   ;;  %v1021_v39 = vld [vmem:[%s1147_s14 + $0x8] ss:$16 sps:$4 sm:$0xff]  }
  0x34   : > { %929 = vmatprep.subr.bf16.mxu1 %v999_v18  ;;  %v1023_v40 = vld [vmem:[%s1147_s14 + $0xc] ss:$16 sps:$4 sm:$0xff]   ;;  %658 = vmatprep.mubr.bf16.mxu0 %v1020_v38 }
  0x35   : > { %699 = vmatprep.mubr.bf16.mxu1 %v1023_v40 }
  0x36   : > { %908 = vmatpush3.bf16.msra.mxu0 %v1000_v19 }
  0x37   : > { %930 = vmatpush3.bf16.msra.mxu1 %v1001_v20  ;;  %909 = vmatprep.subr.bf16.mxu0 %v1002_v21 }
  0x38   : > { %931 = vmatprep.subr.bf16.mxu1 %v1003_v22 }
  0x3a   : > { %910 = vmatpush3.bf16.msra.mxu0 %v1004_v23 }
  0x3b   : > { %932 = vmatpush3.bf16.msra.mxu1 %v1005_v24  ;;  %911 = vmatprep.subr.bf16.mxu0 %v1006_v25 }
  0x3c   : > { %933 = vmatprep.subr.bf16.mxu1 %v1007_v26 }
  0x3e   : > { %912 = vmatpush3.bf16.msra.mxu0 %v1008_v27 }
  0x3f   : > { %934 = vmatpush3.bf16.msra.mxu1 %v1009_v28  ;;  %913 = vmatprep.subr.bf16.mxu0 %v1010_v29 }
  0x40   : > { %935 = vmatprep.subr.bf16.mxu1 %v1011_v30 }
  0x42   : > { %914 = vmatpush3.bf16.msra.mxu0 %v1012_v31 }
  0x43   : > { %936 = vmatpush3.bf16.msra.mxu1 %v1013_v32  ;;  %915 = vmatprep.subr.bf16.mxu0 %v1014_v33 }
  0x44   : > { %937 = vmatprep.subr.bf16.mxu1 %v1015_v34 }
  0x46   : > { %916 = vmatpush3.bf16.msra.mxu0 %v1016_v35 }
  0x47   : > { %938 = vmatpush3.bf16.msra.mxu1 %v1017_v36 }
  0x49   : > { %659 = vmatmul.mubr.bf16.vlgmr.msra.gmra.mrb[0].mxu0 %v1018_v37 }
  0x4a   : > { %700 = vmatmul.mubr.bf16.vlgmr.msra.gmra.mrb[0].mxu1 %v1021_v39 }
 0x11c   : > { %v917_v41 = vpop.f32.mrb[0].mxu0 }
 0x11d   : > { %v939_v42 = vpop.f32.mrb[0].mxu1  ;;  %v918_v43 = vpop.f32.mrb[1].mxu0 }
 0x11e   : > { %v919_v44 = vadd.f32 %v918_v43, %v917_v41  ;;  %v940_v45 = vpop.f32.mrb[1].mxu1  ;;  %v920_v46 = vpop.f32.mrb[2].mxu0 }
 0x11f   : > { %v941_v47 = vadd.f32 %v940_v45, %v939_v42  ;;  %v942_v48 = vpop.f32.mrb[2].mxu1  ;;  %v921_v49 = vpop.f32.mrb[3].mxu0 }
 0x120   : > { %v922_v51 = vadd.f32 %v921_v49, %v920_v46  ;;  %v943_v52 = vpop.f32.mrb[3].mxu1 }
 0x121   : > { %v702_v53 = vadd.f32 %v941_v47, %v919_v44  ;;  %v944_v54 = vadd.f32 %v943_v52, %v942_v48  ;;  %715 = sbr.rel (%p895_p11) target bundleno = 306 (0x132), region = 71 }
 0x123   : > { %v708_v56 = vadd.f32 %v702_v53, %v344_v50  ;;  %v705_v57 = vadd.f32 %v944_v54, %v922_v51 }
 0x125   : > { %710 = vst [vmem:[%s1240_s5] sm:$0xff] %v708_v56  ;;  %v709_v58 = vadd.f32 %v705_v57, %v345_v55 }
 0x127   : > { %711 = vst [vmem:[%s1240_s5 + $0x8] sm:$0xff] %v709_v58 }
 0x12c   : > { %v716_v59 = vld [vmem:[%s1240_s5] sm:$0xff] }
 0x12d   : > { %v725_v62 = vadd.f32 %v896_v60, %v716_v59 }
 0x12e   : > { %v717_v61 = vld [vmem:[%s1240_s5 + $0x8] sm:$0xff] }
 0x12f   : > { %v726_v63 = vadd.f32 %v896_v60, %v717_v61  ;;  %727 = vst [vmem:[%s1240_s5] sm:$0xff] %v725_v62 }
 0x131   : > { %728 = vst [vmem:[%s1240_s5 + $0x8] sm:$0xff] %v726_v63 }
 0x132 PF: > { %s15_s22 = sadd.s32 1, %s1062_s22   ;;  %s1241_s18 = smov %s1050_s19 }
 0x133   : > { %p12_p12 = scmp.ge.s32.totalorder %s15_s22, 4   ;;  %s1242_s19 = smov %s1130_s24 }
 0x134   : > { %s1243_s20 = smov %s1058_s21  ;;  %s1244_s21 = smov %s1246_s3 }
 0x135   :  { %14 = sbr.rel (!%p12_p12) target bundleno = 3 (0x3), region = 118 }

</bundles_post_ra>
